<compile_context>
chip_gen: v5e
topology: v5e:2x2
jax: 0.10.0
libtpu: 0.0.40
codegen_flags: <defaults>
</compile_context>

<pallas_src>
import jax
import jax.numpy as jnp
from jax import lax
from jax.experimental import pallas as pl
from jax.experimental.pallas import tpu as pltpu

EPS = 1e-5
MATMUL_DTYPE = jnp.bfloat16      # MXU operand dtype (accumulation stays f32)
ACT_DTYPE = jnp.bfloat16         # inter-stage activation storage dtype
VMEM_LIMIT = 48 * 1024 * 1024    # safe on v7x (64 MiB physical), generous on v5e/v6e


def _cparams(n_grid_dims):
    return pltpu.CompilerParams(
        dimension_semantics=("parallel",) * n_grid_dims,   # megacore sharding
        vmem_limit_bytes=VMEM_LIMIT,
    )


def _stats(y_f32):
    """(rows, C) f32 -> (2, C): row 0 = sum, row 1 = sum of squares."""
    return jnp.concatenate(
        [jnp.sum(y_f32, axis=0, keepdims=True),
         jnp.sum(y_f32 * y_f32, axis=0, keepdims=True)], axis=0)


def _bn_scale_shift(st, gamma, beta, count):
    """Fold per-tile (sum, sumsq) partials into per-channel BN scale/shift."""
    # TODO(synk): switch to shifted / Welford-style accumulation if N*H*W gets
    # large enough for E[x^2]-E[x]^2 cancellation to matter.
    st2 = st.reshape(-1, 2, st.shape[-1])
    s = jnp.sum(st2[:, 0, :], axis=0)
    ss = jnp.sum(st2[:, 1, :], axis=0)
    mean = s / count
    var = jnp.maximum(ss / count - mean * mean, 0.0)   # biased train-mode var
    scale = gamma / jnp.sqrt(var + EPS)
    shift = beta - mean * scale
    return scale.reshape(1, -1), shift.reshape(1, -1)


# -------- stage A: 1x1 conv Cin -> Cmid straight from NCHW, + BN1 stats ------
def pw1_kernel(x_ref, w1_ref, y1_ref, st_ref):
    # x_ref: (Cin, TCOL) slab of the NCHW input. Contract over Cin (dim 0 of
    # both operands) so no standalone NCHW->NHWC HBM transpose pass is needed.
    y = lax.dot_general(
        x_ref[...].astype(MATMUL_DTYPE), w1_ref[...].astype(MATMUL_DTYPE),
        (((0,), (0,)), ((), ())), preferred_element_type=jnp.float32)
    y1_ref[...] = y.astype(y1_ref.dtype)        # (TCOL, Cmid), bf16 store
    st_ref[...] = _stats(y)                     # f32 partial stats


# -------- stage B: BN1+ReLU + 3x3 conv as register im2col matmul, stats ------
def conv3_kernel(y1m_ref, y1u_ref, y1d_ref, a1_ref, b1_ref, w3_ref, bias_ref,
                 y2_ref, st_ref):
    HT, W, C = y1m_ref.shape
    b = pl.program_id(1)
    last = pl.num_programs(1) - 1
    a1 = a1_ref[0]                               # (C,)
    b1 = b1_ref[0]

    def bn_relu(v):
        return jnp.maximum(v.astype(jnp.float32) * a1 + b1, 0.0)

    zm = bn_relu(y1m_ref[...])                                  # (HT, W, C)
    zu = jnp.where(b == 0, 0.0, bn_relu(y1u_ref[...]))          # (1, W, C) halo
    zd = jnp.where(b == last, 0.0, bn_relu(y1d_ref[...]))       # (1, W, C) halo

    # (HT+2, W+2, C) zero-padded band, built entirely in registers.
    z = jnp.concatenate([zu, zm, zd], axis=0).astype(MATMUL_DTYPE)
    wpad = jnp.zeros((HT + 2, 1, C), MATMUL_DTYPE)
    z = jnp.concatenate([wpad, z, wpad], axis=1)

    # im2col: 9 shifted views concatenated on the lane axis -> one MXU matmul
    # with K = 9*C (tap ordering matches w3 reshaped from HWIO).
    taps = [z[kh:kh + HT, kw:kw + W, :] for kh in range(3) for kw in range(3)]
    patch = jnp.concatenate(taps, axis=-1).reshape(HT * W, 9 * C)

    y2 = jnp.dot(patch, w3_ref[...].astype(MATMUL_DTYPE),
                 preferred_element_type=jnp.float32) + bias_ref[...]
    y2_ref[...] = y2.astype(y2_ref.dtype)        # 2-D (HT*W, C) store, no reshape
    st_ref[...] = _stats(y2)


# -------- stage C: BN2+ReLU + 1x1 conv Cmid -> Cin, + BN3 stats --------------
def pw3_kernel(y2_ref, a2_ref, b2_ref, w2_ref, y3_ref, st_ref):
    z = jnp.maximum(y2_ref[...].astype(jnp.float32) * a2_ref[0] + b2_ref[0], 0.0)
    y = jnp.dot(z.astype(MATMUL_DTYPE), w2_ref[...].astype(MATMUL_DTYPE),
                preferred_element_type=jnp.float32)
    y3_ref[...] = y.astype(y3_ref.dtype)
    st_ref[...] = _stats(y)


# ------------------------------ tile selection --------------------------------
def _largest_divisor(total, align, cap):
    """Largest divisor of `total` that is a multiple of `align` and <= cap."""
    best = None
    d = align
    while d <= min(total, cap):
        if total % d == 0:
            best = d
        d += align
    return best if best is not None else total


def _pick_band(H, W):
    """Largest divisor HT of H with a sublane-aligned band of <= 512 rows."""
    best = None
    for ht in range(1, H + 1):
        if H % ht == 0 and (ht * W) % 8 == 0 and ht * W <= 512:
            best = ht
    return best if best is not None else H


# ------------------------------------------------------------------------------
@jax.jit
def conv_bottleneck(x_nchw, params):
    """x_nchw: (N, Cin, H, W) f32 -> (N, Cin, H, W) f32 (ConvBottleneck fwd)."""
    N, Cin, H, W = x_nchw.shape
    Cmid = params["w1"].shape[1]
    HW = H * W
    R = N * HW
    f32 = jnp.float32

    TCOL = _largest_divisor(HW, 128, 2048)   # stage A column tile (lane aligned)
    TM = _largest_divisor(R, 8, 2048)        # stage C row tile
    HT = _pick_band(H, W)                    # stage B band height
    G1, NB, G3 = HW // TCOL, H // HT, R // TM
    assert HW % TCOL == 0 and H % HT == 0 and R % TM == 0

    x3 = x_nchw.reshape(N, Cin, HW)              # free reshape; NCHW stays put
    w3f = params["w3"].reshape(9 * Cmid, Cmid)   # HWIO -> rows (kh*3+kw)*C + ci
    bias3 = params["bias3"].reshape(1, Cmid)

    # ---------------- stage A ----------------
    y1, st1 = pl.pallas_call(
        pw1_kernel,
        grid=(N, G1),
        in_specs=[pl.BlockSpec((None, Cin, TCOL), lambda n, j: (n, 0, j)),
                  pl.BlockSpec((Cin, Cmid), lambda n, j: (0, 0))],
        out_specs=(pl.BlockSpec((None, TCOL, Cmid), lambda n, j: (n, j, 0)),
                   pl.BlockSpec((None, None, 2, Cmid), lambda n, j: (n, j, 0, 0))),
        out_shape=(jax.ShapeDtypeStruct((N, HW, Cmid), ACT_DTYPE),
                   jax.ShapeDtypeStruct((N, G1, 2, Cmid), f32)),
        compiler_params=_cparams(2),
        cost_estimate=pl.CostEstimate(
            flops=2 * R * Cin * Cmid, transcendentals=0,
            bytes_accessed=4 * R * Cin + 4 * Cin * Cmid + 2 * R * Cmid),
    )(x3, params["w1"])
    a1, b1 = _bn_scale_shift(st1, params["g1"], params["beta1"], R)

    # ---------------- stage B ----------------
    y1_img = y1.reshape(N, H, W, Cmid)           # free reshape of (N, HW, Cmid)
    y2, st2 = pl.pallas_call(
        conv3_kernel,
        grid=(N, NB),
        in_specs=[
            pl.BlockSpec((None, HT, W, Cmid), lambda n, b: (n, b, 0, 0)),
            # 1-row halos above / below the band; clamped at image borders and
            # zeroed in-kernel (so no padded copy of y1 ever hits HBM).
            pl.BlockSpec((None, 1, W, Cmid),
                         lambda n, b: (n, jnp.maximum(b * HT - 1, 0), 0, 0)),
            pl.BlockSpec((None, 1, W, Cmid),
                         lambda n, b: (n, jnp.minimum((b + 1) * HT, H - 1), 0, 0)),
            pl.BlockSpec((1, Cmid), lambda n, b: (0, 0)),       # BN1 scale
            pl.BlockSpec((1, Cmid), lambda n, b: (0, 0)),       # BN1 shift
            pl.BlockSpec((9 * Cmid, Cmid), lambda n, b: (0, 0)),
            pl.BlockSpec((1, Cmid), lambda n, b: (0, 0)),       # conv bias
        ],
        out_specs=(pl.BlockSpec((None, HT * W, Cmid), lambda n, b: (n, b, 0)),
                   pl.BlockSpec((None, None, 2, Cmid), lambda n, b: (n, b, 0, 0))),
        out_shape=(jax.ShapeDtypeStruct((N, HW, Cmid), ACT_DTYPE),
                   jax.ShapeDtypeStruct((N, NB, 2, Cmid), f32)),
        compiler_params=_cparams(2),
        cost_estimate=pl.CostEstimate(
            flops=2 * R * 9 * Cmid * Cmid + 6 * R * Cmid, transcendentals=0,
            bytes_accessed=4 * R * Cmid + 4 * N * NB * 9 * Cmid * Cmid),
    )(y1_img, y1_img, y1_img, a1, b1, w3f, bias3)
    a2, b2 = _bn_scale_shift(st2, params["g2"], params["beta2"], R)

    # ---------------- stage C ----------------
    y3, st3 = pl.pallas_call(
        pw3_kernel,
        grid=(G3,),
        in_specs=[pl.BlockSpec((TM, Cmid), lambda i: (i, 0)),
                  pl.BlockSpec((1, Cmid), lambda i: (0, 0)),
                  pl.BlockSpec((1, Cmid), lambda i: (0, 0)),
                  pl.BlockSpec((Cmid, Cin), lambda i: (0, 0))],
        out_specs=(pl.BlockSpec((TM, Cin), lambda i: (i, 0)),
                   pl.BlockSpec((None, 2, Cin), lambda i: (i, 0, 0))),
        out_shape=(jax.ShapeDtypeStruct((R, Cin), ACT_DTYPE),
                   jax.ShapeDtypeStruct((G3, 2, Cin), f32)),
        compiler_params=_cparams(1),
        cost_estimate=pl.CostEstimate(
            flops=2 * R * Cmid * Cin + 5 * R * Cmid, transcendentals=0,
            bytes_accessed=2 * R * Cmid + 2 * R * Cin + 4 * Cmid * Cin),
    )(y2.reshape(R, Cmid), a2, b2, params["w2"])
    a3, b3 = _bn_scale_shift(st3, params["g3"], params["beta3"], R)

    # -------- epilogue: BN3 + ReLU fused by XLA into the output transpose ----
    out2d = jnp.maximum(y3.astype(f32) * a3 + b3, 0.0)
    return jnp.transpose(out2d.reshape(N, H, W, Cin), (0, 3, 1, 2))


def init_params(key, in_channels, downsample):
    """Deterministic params in kernel-friendly layouts.

    torch -> kernel layout mapping:
      Conv2d (Cmid, Cin, 1, 1)   -> w1    (Cin, Cmid)
      Conv2d (Cmid, Cmid, 3, 3)  -> w3    (3, 3, Cmid_in, Cmid_out)   [HWIO]
      its bias (Cmid,)           -> bias3 (Cmid,)
      Conv2d (Cin, Cmid, 1, 1)   -> w2    (Cmid, Cin)
      BatchNorm gamma/beta       -> g*/beta* (C,)
    NOTE: BatchNorm running-stat momentum updates are stateful bookkeeping and
    do not affect the train-mode forward output, so they are not modeled.
    """
    cmid = in_channels // downsample
    ks = jax.random.split(key, 10)
    w1 = 0.1 * jax.random.normal(ks[0], (in_channels, cmid), jnp.float32)
    w3 = 0.05 * jax.random.normal(ks[1], (3, 3, cmid, cmid), jnp.float32)
    bias3 = 0.05 * jax.random.normal(ks[2], (cmid,), jnp.float32)
    w2 = 0.1 * jax.random.normal(ks[3], (cmid, in_channels), jnp.float32)
    g1 = 1.0 + 0.1 * jax.random.normal(ks[4], (cmid,), jnp.float32)
    g2 = 1.0 + 0.1 * jax.random.normal(ks[5], (cmid,), jnp.float32)
    g3 = 1.0 + 0.1 * jax.random.normal(ks[6], (in_channels,), jnp.float32)
    beta1 = 0.1 * jax.random.normal(ks[7], (cmid,), jnp.float32)
    beta2 = 0.1 * jax.random.normal(ks[8], (cmid,), jnp.float32)
    beta3 = 0.1 * jax.random.normal(ks[9], (in_channels,), jnp.float32)
    return dict(w1=w1, g1=g1, beta1=beta1,
                w3=w3, bias3=bias3, g2=g2, beta2=beta2,
                w2=w2, g3=g3, beta3=beta3)


def ref_forward(x_nchw, p):
    """Pure-XLA f32 reference of the same train-mode forward (HIGHEST prec)."""
    hi = lax.Precision.HIGHEST
    x = jnp.transpose(x_nchw, (0, 2, 3, 1)).astype(jnp.float32)
    N, H, W, Cin = x.shape
    Cmid = p["w1"].shape[1]

    def bn_relu(y2d, gamma, beta):
        m = jnp.mean(y2d, axis=0)
        v = jnp.mean((y2d - m) ** 2, axis=0)
        return jnp.maximum((y2d - m) / jnp.sqrt(v + EPS) * gamma + beta, 0.0)

    y1 = jnp.einsum("nhwc,cd->nhwd", x, p["w1"], precision=hi)
    z1 = bn_relu(y1.reshape(-1, Cmid), p["g1"], p["beta1"]).reshape(N, H, W, Cmid)
    y2 = lax.conv_general_dilated(
        z1, p["w3"], window_strides=(1, 1), padding="SAME",
        dimension_numbers=("NHWC", "HWIO", "NHWC"), precision=hi) + p["bias3"]
    z2 = bn_relu(y2.reshape(-1, Cmid), p["g2"], p["beta2"])
    y3 = jnp.dot(z2, p["w2"], precision=hi)
    z3 = bn_relu(y3, p["g3"], p["beta3"])
    return jnp.transpose(z3.reshape(N, H, W, Cin), (0, 3, 1, 2))


if __name__ == "__main__":
    key = jax.random.PRNGKey(0)
    k_x, k_p = jax.random.split(key)

    # Small, lane-friendly demo: Cin = 128 (dense 128-lane last stage),
    # downsample = 4 -> Cmid = 32; H = W = 32 so stage B runs 2 H-bands per
    # image and exercises the halo path.
    N, H, W = 2, 32, 32
    in_channels, downsample = 128, 4

    x = jax.random.normal(k_x, (N, in_channels, H, W), jnp.float32)
    params = init_params(k_p, in_channels, downsample)

    out = jax.block_until_ready(conv_bottleneck(x, params))

    assert out.shape == (N, in_channels, H, W)
    assert bool(jnp.all(jnp.isfinite(out)))
    assert bool(jnp.all(out >= 0.0))          # trailing ReLU (residual=False)

    ref = jax.block_until_ready(ref_forward(x, params))
    max_err = float(jnp.max(jnp.abs(out - ref)))
    mean_err = float(jnp.mean(jnp.abs(out - ref)))
    # bf16 MXU operands + bf16 inter-stage activations (stats / accumulation in
    # f32): BN renormalization keeps the drift small but not f32 bit-close.
    assert max_err < 1e-1 and mean_err < 1e-2, (
        f"mismatch vs XLA reference: max_err={max_err}, mean_err={mean_err}")

    print("KERNEL_OK")
</pallas_src>

<mosaic_0001>
module attributes {stable_mosaic.version = 11 : i64} {
  func.func @pw1_kernel(%arg0: i32, %arg1: i32, %arg2: memref<1x128x1024xf32, #tpu.memory_space<vmem>>, %arg3: memref<128x32xf32, #tpu.memory_space<vmem>>, %arg4: memref<1x1024x32xbf16, #tpu.memory_space<vmem>>, %arg5: memref<1x1x2x32xf32, #tpu.memory_space<vmem>>) attributes {dimension_semantics = [#tpu.dimension_semantics<parallel>, #tpu.dimension_semantics<parallel>], iteration_bounds = array<i64: 2, 1>, scalar_prefetch = 0 : i64, scratch_operands = 0 : i64, tpu.core_type = #tpu.core_type<tc>, window_params = [{transform_indices = @transform_0, window_bounds = array<i64: 1, 128, 1024>}, {pipeline_mode = #tpu.pipeline_mode<synchronous>, transform_indices = @transform_1, window_bounds = array<i64: 128, 32>}, {transform_indices = @transform_2, window_bounds = array<i64: 1, 1024, 32>}, {transform_indices = @transform_3, window_bounds = array<i64: 1, 1, 2, 32>}]} {
    %c0 = arith.constant 0 : index
    %c0_0 = arith.constant 0 : index
    %c0_1 = arith.constant 0 : index
    %0 = vector.load %arg2[%c0, %c0_0, %c0_1] : memref<1x128x1024xf32, #tpu.memory_space<vmem>>, vector<1x128x1024xf32>
    %1 = vector.shape_cast %0 : vector<1x128x1024xf32> to vector<128x1024xf32>
    %2 = arith.truncf %1 : vector<128x1024xf32> to vector<128x1024xbf16>
    %c0_2 = arith.constant 0 : index
    %c0_3 = arith.constant 0 : index
    %3 = vector.load %arg3[%c0_2, %c0_3] : memref<128x32xf32, #tpu.memory_space<vmem>>, vector<128x32xf32>
    %4 = arith.truncf %3 : vector<128x32xf32> to vector<128x32xbf16>
    %cst = arith.constant dense<0.000000e+00> : vector<1024x32xf32>
    %5 = tpu.matmul %2, %4, %cst {dimension_numbers = #tpu.dot_dimension_numbers<[0], [0], [1], [1], [0, 1, 1, 1], [], []>} : vector<128x1024xbf16>, vector<128x32xbf16>, vector<1024x32xf32> -> vector<1024x32xf32>
    %6 = arith.truncf %5 : vector<1024x32xf32> to vector<1024x32xbf16>
    %c0_4 = arith.constant 0 : index
    %c0_5 = arith.constant 0 : index
    %c0_6 = arith.constant 0 : index
    %7 = vector.load %arg4[%c0_4, %c0_5, %c0_6] : memref<1x1024x32xbf16, #tpu.memory_space<vmem>>, vector<1x1024x32xbf16>
    %8 = vector.shape_cast %7 : vector<1x1024x32xbf16> to vector<1024x32xbf16>
    %9 = vector.shape_cast %6 : vector<1024x32xbf16> to vector<1x1024x32xbf16>
    tpu.vector_store %arg4[%c0_4, %c0_5, %c0_6], %9 {strides = array<i32>} : memref<1x1024x32xbf16, #tpu.memory_space<vmem>>, vector<1x1024x32xbf16>,
    %cst_7 = arith.constant dense<0.000000e+00> : vector<32xf32>
    %10 = vector.multi_reduction <add>, %5, %cst_7 [0] : vector<1024x32xf32> to vector<32xf32>
    %11 = vector.shape_cast %10 : vector<32xf32> to vector<1x32xf32>
    %12 = arith.mulf %5, %5 : vector<1024x32xf32>
    %cst_8 = arith.constant dense<0.000000e+00> : vector<32xf32>
    %13 = vector.multi_reduction <add>, %12, %cst_8 [0] : vector<1024x32xf32> to vector<32xf32>
    %14 = vector.shape_cast %13 : vector<32xf32> to vector<1x32xf32>
    %15 = tpu.concatenate %11, %14 in 0 : vector<1x32xf32>, vector<1x32xf32> -> vector<2x32xf32>
    %c0_9 = arith.constant 0 : index
    %c0_10 = arith.constant 0 : index
    %c0_11 = arith.constant 0 : index
    %c0_12 = arith.constant 0 : index
    %16 = vector.load %arg5[%c0_9, %c0_10, %c0_11, %c0_12] : memref<1x1x2x32xf32, #tpu.memory_space<vmem>>, vector<1x1x2x32xf32>
    %17 = vector.shape_cast %16 : vector<1x1x2x32xf32> to vector<2x32xf32>
    %18 = vector.shape_cast %15 : vector<2x32xf32> to vector<1x1x2x32xf32>
    tpu.vector_store %arg5[%c0_9, %c0_10, %c0_11, %c0_12], %18 {strides = array<i32>} : memref<1x1x2x32xf32, #tpu.memory_space<vmem>>, vector<1x1x2x32xf32>,
    return
  }
  func.func @transform_0(%arg0: i32, %arg1: i32) -> (i32, i32, i32) {
    %c0_i32 = arith.constant 0 : i32
    %c0_i32_0 = arith.constant 0 : i32
    return %arg0, %c0_i32, %arg1 : i32, i32, i32
  }
  func.func @transform_1(%arg0: i32, %arg1: i32) -> (i32, i32) {
    %c0_i32 = arith.constant 0 : i32
    %c0_i32_0 = arith.constant 0 : i32
    %c0_i32_1 = arith.constant 0 : i32
    return %c0_i32, %c0_i32_0 : i32, i32
  }
  func.func @transform_2(%arg0: i32, %arg1: i32) -> (i32, i32, i32) {
    %c0_i32 = arith.constant 0 : i32
    %c0_i32_0 = arith.constant 0 : i32
    return %arg0, %arg1, %c0_i32 : i32, i32, i32
  }
  func.func @transform_3(%arg0: i32, %arg1: i32) -> (i32, i32, i32, i32) {
    %c0_i32 = arith.constant 0 : i32
    %c0_i32_0 = arith.constant 0 : i32
    %c0_i32_1 = arith.constant 0 : i32
    return %arg0, %arg1, %c0_i32, %c0_i32_0 : i32, i32, i32, i32
  }
}

module attributes {stable_mosaic.version = 11 : i64} {
  func.func @conv3_kernel(%arg0: i32, %arg1: i32, %arg2: memref<1x16x32x32xbf16, #tpu.memory_space<vmem>>, %arg3: memref<1x1x32x32xbf16, #tpu.memory_space<vmem>>, %arg4: memref<1x1x32x32xbf16, #tpu.memory_space<vmem>>, %arg5: memref<1x32xf32, #tpu.memory_space<vmem>>, %arg6: memref<1x32xf32, #tpu.memory_space<vmem>>, %arg7: memref<288x32xf32, #tpu.memory_space<vmem>>, %arg8: memref<1x32xf32, #tpu.memory_space<vmem>>, %arg9: memref<1x512x32xbf16, #tpu.memory_space<vmem>>, %arg10: memref<1x1x2x32xf32, #tpu.memory_space<vmem>>) attributes {dimension_semantics = [#tpu.dimension_semantics<parallel>, #tpu.dimension_semantics<parallel>], iteration_bounds = array<i64: 2, 2>, scalar_prefetch = 0 : i64, scratch_operands = 0 : i64, tpu.core_type = #tpu.core_type<tc>, window_params = [{transform_indices = @transform_0, window_bounds = array<i64: 1, 16, 32, 32>}, {transform_indices = @transform_1, window_bounds = array<i64: 1, 1, 32, 32>}, {transform_indices = @transform_2, window_bounds = array<i64: 1, 1, 32, 32>}, {pipeline_mode = #tpu.pipeline_mode<synchronous>, transform_indices = @transform_3, window_bounds = array<i64: 1, 32>}, {pipeline_mode = #tpu.pipeline_mode<synchronous>, transform_indices = @transform_4, window_bounds = array<i64: 1, 32>}, {pipeline_mode = #tpu.pipeline_mode<synchronous>, transform_indices = @transform_5, window_bounds = array<i64: 288, 32>}, {pipeline_mode = #tpu.pipeline_mode<synchronous>, transform_indices = @transform_6, window_bounds = array<i64: 1, 32>}, {transform_indices = @transform_7, window_bounds = array<i64: 1, 512, 32>}, {transform_indices = @transform_8, window_bounds = array<i64: 1, 1, 2, 32>}]} {
    %c0 = arith.constant 0 : index
    %c0_0 = arith.constant 0 : index
    %0 = vector.load %arg5[%c0, %c0_0] : memref<1x32xf32, #tpu.memory_space<vmem>>, vector<1x32xf32>
    %1 = vector.shape_cast %0 : vector<1x32xf32> to vector<32xf32>
    %c0_1 = arith.constant 0 : index
    %c0_2 = arith.constant 0 : index
    %2 = vector.load %arg6[%c0_1, %c0_2] : memref<1x32xf32, #tpu.memory_space<vmem>>, vector<1x32xf32>
    %3 = vector.shape_cast %2 : vector<1x32xf32> to vector<32xf32>
    %c0_3 = arith.constant 0 : index
    %c0_4 = arith.constant 0 : index
    %c0_5 = arith.constant 0 : index
    %c0_6 = arith.constant 0 : index
    %4 = vector.load %arg2[%c0_3, %c0_4, %c0_5, %c0_6] : memref<1x16x32x32xbf16, #tpu.memory_space<vmem>>, vector<1x16x32x32xbf16>
    %5 = vector.shape_cast %4 : vector<1x16x32x32xbf16> to vector<16x32x32xbf16>
    %6 = arith.extf %5 : vector<16x32x32xbf16> to vector<16x32x32xf32>
    %7 = vector.shape_cast %1 : vector<32xf32> to vector<1x1x32xf32>
    %8 = vector.broadcast %7 : vector<1x1x32xf32> to vector<16x32x32xf32>
    %9 = arith.mulf %6, %8 : vector<16x32x32xf32>
    %10 = vector.shape_cast %3 : vector<32xf32> to vector<1x1x32xf32>
    %11 = vector.broadcast %10 : vector<1x1x32xf32> to vector<16x32x32xf32>
    %12 = arith.addf %9, %11 : vector<16x32x32xf32>
    %cst = arith.constant 0.000000e+00 : f32
    %13 = vector.broadcast %cst : f32 to vector<16x32x32xf32>
    %14 = arith.maximumf %12, %13 : vector<16x32x32xf32>
    %c0_i32 = arith.constant 0 : i32
    %15 = arith.cmpi eq, %arg1, %c0_i32 : i32
    %c0_7 = arith.constant 0 : index
    %c0_8 = arith.constant 0 : index
    %c0_9 = arith.constant 0 : index
    %c0_10 = arith.constant 0 : index
    %16 = vector.load %arg3[%c0_7, %c0_8, %c0_9, %c0_10] : memref<1x1x32x32xbf16, #tpu.memory_space<vmem>>, vector<1x1x32x32xbf16>
    %17 = vector.shape_cast %16 : vector<1x1x32x32xbf16> to vector<1x32x32xbf16>
    %18 = arith.extf %17 : vector<1x32x32xbf16> to vector<1x32x32xf32>
    %19 = vector.shape_cast %1 : vector<32xf32> to vector<1x1x32xf32>
    %20 = vector.broadcast %19 : vector<1x1x32xf32> to vector<1x32x32xf32>
    %21 = arith.mulf %18, %20 : vector<1x32x32xf32>
    %22 = vector.shape_cast %3 : vector<32xf32> to vector<1x1x32xf32>
    %23 = vector.broadcast %22 : vector<1x1x32xf32> to vector<1x32x32xf32>
    %24 = arith.addf %21, %23 : vector<1x32x32xf32>
    %cst_11 = arith.constant 0.000000e+00 : f32
    %25 = vector.broadcast %cst_11 : f32 to vector<1x32x32xf32>
    %26 = arith.maximumf %24, %25 : vector<1x32x32xf32>
    %cst_12 = arith.constant 0.000000e+00 : f32
    %27 = vector.broadcast %cst_12 : f32 to vector<1x32x32xf32>
    %28 = arith.select %15, %27, %26 : vector<1x32x32xf32>
    %c1_i32 = arith.constant 1 : i32
    %29 = arith.cmpi eq, %arg1, %c1_i32 : i32
    %c0_13 = arith.constant 0 : index
    %c0_14 = arith.constant 0 : index
    %c0_15 = arith.constant 0 : index
    %c0_16 = arith.constant 0 : index
    %30 = vector.load %arg4[%c0_13, %c0_14, %c0_15, %c0_16] : memref<1x1x32x32xbf16, #tpu.memory_space<vmem>>, vector<1x1x32x32xbf16>
    %31 = vector.shape_cast %30 : vector<1x1x32x32xbf16> to vector<1x32x32xbf16>
    %32 = arith.extf %31 : vector<1x32x32xbf16> to vector<1x32x32xf32>
    %33 = vector.shape_cast %1 : vector<32xf32> to vector<1x1x32xf32>
    %34 = vector.broadcast %33 : vector<1x1x32xf32> to vector<1x32x32xf32>
    %35 = arith.mulf %32, %34 : vector<1x32x32xf32>
    %36 = vector.shape_cast %3 : vector<32xf32> to vector<1x1x32xf32>
    %37 = vector.broadcast %36 : vector<1x1x32xf32> to vector<1x32x32xf32>
    %38 = arith.addf %35, %37 : vector<1x32x32xf32>
    %cst_17 = arith.constant 0.000000e+00 : f32
    %39 = vector.broadcast %cst_17 : f32 to vector<1x32x32xf32>
    %40 = arith.maximumf %38, %39 : vector<1x32x32xf32>
    %cst_18 = arith.constant 0.000000e+00 : f32
    %41 = vector.broadcast %cst_18 : f32 to vector<1x32x32xf32>
    %42 = arith.select %29, %41, %40 : vector<1x32x32xf32>
    %43 = tpu.concatenate %28, %14, %42 in 0 : vector<1x32x32xf32>, vector<16x32x32xf32>, vector<1x32x32xf32> -> vector<18x32x32xf32>
    %44 = arith.truncf %43 : vector<18x32x32xf32> to vector<18x32x32xbf16>
    %cst_19 = arith.constant 0.000000e+00 : bf16
    %45 = vector.broadcast %cst_19 : bf16 to vector<18x1x32xbf16>
    %46 = tpu.concatenate %45, %44, %45 in 1 : vector<18x1x32xbf16>, vector<18x32x32xbf16>, vector<18x1x32xbf16> -> vector<18x34x32xbf16>
    %47 = vector.extract_strided_slice %46 {offsets = [0, 0, 0], sizes = [16, 32, 32], strides = [1, 1, 1]} : vector<18x34x32xbf16> to vector<16x32x32xbf16>
    %48 = vector.extract_strided_slice %46 {offsets = [0, 1, 0], sizes = [16, 32, 32], strides = [1, 1, 1]} : vector<18x34x32xbf16> to vector<16x32x32xbf16>
    %49 = vector.extract_strided_slice %46 {offsets = [0, 2, 0], sizes = [16, 32, 32], strides = [1, 1, 1]} : vector<18x34x32xbf16> to vector<16x32x32xbf16>
    %50 = vector.extract_strided_slice %46 {offsets = [1, 0, 0], sizes = [16, 32, 32], strides = [1, 1, 1]} : vector<18x34x32xbf16> to vector<16x32x32xbf16>
    %51 = vector.extract_strided_slice %46 {offsets = [1, 1, 0], sizes = [16, 32, 32], strides = [1, 1, 1]} : vector<18x34x32xbf16> to vector<16x32x32xbf16>
    %52 = vector.extract_strided_slice %46 {offsets = [1, 2, 0], sizes = [16, 32, 32], strides = [1, 1, 1]} : vector<18x34x32xbf16> to vector<16x32x32xbf16>
    %53 = vector.extract_strided_slice %46 {offsets = [2, 0, 0], sizes = [16, 32, 32], strides = [1, 1, 1]} : vector<18x34x32xbf16> to vector<16x32x32xbf16>
    %54 = vector.extract_strided_slice %46 {offsets = [2, 1, 0], sizes = [16, 32, 32], strides = [1, 1, 1]} : vector<18x34x32xbf16> to vector<16x32x32xbf16>
    %55 = vector.extract_strided_slice %46 {offsets = [2, 2, 0], sizes = [16, 32, 32], strides = [1, 1, 1]} : vector<18x34x32xbf16> to vector<16x32x32xbf16>
    %56 = tpu.concatenate %47, %48, %49, %50, %51, %52, %53, %54, %55 in 2 : vector<16x32x32xbf16>, vector<16x32x32xbf16>, vector<16x32x32xbf16>, vector<16x32x32xbf16>, vector<16x32x32xbf16>, vector<16x32x32xbf16>, vector<16x32x32xbf16>, vector<16x32x32xbf16>, vector<16x32x32xbf16> -> vector<16x32x288xbf16>
    %57 = vector.shape_cast %56 : vector<16x32x288xbf16> to vector<512x288xbf16>
    %c0_20 = arith.constant 0 : index
    %c0_21 = arith.constant 0 : index
    %58 = vector.load %arg7[%c0_20, %c0_21] : memref<288x32xf32, #tpu.memory_space<vmem>>, vector<288x32xf32>
    %59 = arith.truncf %58 : vector<288x32xf32> to vector<288x32xbf16>
    %cst_22 = arith.constant dense<0.000000e+00> : vector<512x32xf32>
    %60 = tpu.matmul %57, %59, %cst_22 {dimension_numbers = #tpu.dot_dimension_numbers<[1], [0], [0], [1], [0, 0, 1, 1], [], []>} : vector<512x288xbf16>, vector<288x32xbf16>, vector<512x32xf32> -> vector<512x32xf32>
    %c0_23 = arith.constant 0 : index
    %c0_24 = arith.constant 0 : index
    %61 = vector.load %arg8[%c0_23, %c0_24] : memref<1x32xf32, #tpu.memory_space<vmem>>, vector<1x32xf32>
    %62 = vector.broadcast %61 : vector<1x32xf32> to vector<512x32xf32>
    %63 = arith.addf %60, %62 : vector<512x32xf32>
    %64 = arith.truncf %63 : vector<512x32xf32> to vector<512x32xbf16>
    %c0_25 = arith.constant 0 : index
    %c0_26 = arith.constant 0 : index
    %c0_27 = arith.constant 0 : index
    %65 = vector.load %arg9[%c0_25, %c0_26, %c0_27] : memref<1x512x32xbf16, #tpu.memory_space<vmem>>, vector<1x512x32xbf16>
    %66 = vector.shape_cast %65 : vector<1x512x32xbf16> to vector<512x32xbf16>
    %67 = vector.shape_cast %64 : vector<512x32xbf16> to vector<1x512x32xbf16>
    tpu.vector_store %arg9[%c0_25, %c0_26, %c0_27], %67 {strides = array<i32>} : memref<1x512x32xbf16, #tpu.memory_space<vmem>>, vector<1x512x32xbf16>,
    %cst_28 = arith.constant dense<0.000000e+00> : vector<32xf32>
    %68 = vector.multi_reduction <add>, %63, %cst_28 [0] : vector<512x32xf32> to vector<32xf32>
    %69 = vector.shape_cast %68 : vector<32xf32> to vector<1x32xf32>
    %70 = arith.mulf %63, %63 : vector<512x32xf32>
    %cst_29 = arith.constant dense<0.000000e+00> : vector<32xf32>
    %71 = vector.multi_reduction <add>, %70, %cst_29 [0] : vector<512x32xf32> to vector<32xf32>
    %72 = vector.shape_cast %71 : vector<32xf32> to vector<1x32xf32>
    %73 = tpu.concatenate %69, %72 in 0 : vector<1x32xf32>, vector<1x32xf32> -> vector<2x32xf32>
    %c0_30 = arith.constant 0 : index
    %c0_31 = arith.constant 0 : index
    %c0_32 = arith.constant 0 : index
    %c0_33 = arith.constant 0 : index
    %74 = vector.load %arg10[%c0_30, %c0_31, %c0_32, %c0_33] : memref<1x1x2x32xf32, #tpu.memory_space<vmem>>, vector<1x1x2x32xf32>
    %75 = vector.shape_cast %74 : vector<1x1x2x32xf32> to vector<2x32xf32>
    %76 = vector.shape_cast %73 : vector<2x32xf32> to vector<1x1x2x32xf32>
    tpu.vector_store %arg10[%c0_30, %c0_31, %c0_32, %c0_33], %76 {strides = array<i32>} : memref<1x1x2x32xf32, #tpu.memory_space<vmem>>, vector<1x1x2x32xf32>,
    return
  }
  func.func @transform_0(%arg0: i32, %arg1: i32) -> (i32, i32, i32, i32) {
    %c0_i32 = arith.constant 0 : i32
    %c0_i32_0 = arith.constant 0 : i32
    %c0_i32_1 = arith.constant 0 : i32
    return %arg0, %arg1, %c0_i32, %c0_i32_0 : i32, i32, i32, i32
  }
  func.func @transform_1(%arg0: i32, %arg1: i32) -> (i32, i32, i32, i32) {
    %c16_i32 = arith.constant 16 : i32
    %0 = arith.muli %arg1, %c16_i32 : i32
    %c1_i32 = arith.constant 1 : i32
    %1 = arith.subi %0, %c1_i32 : i32
    %c0_i32 = arith.constant 0 : i32
    %2 = arith.maxsi %1, %c0_i32 : i32
    %c0_i32_0 = arith.constant 0 : i32
    %c0_i32_1 = arith.constant 0 : i32
    %c0_i32_2 = arith.constant 0 : i32
    return %arg0, %2, %c0_i32_0, %c0_i32_1 : i32, i32, i32, i32
  }
  func.func @transform_2(%arg0: i32, %arg1: i32) -> (i32, i32, i32, i32) {
    %c1_i32 = arith.constant 1 : i32
    %0 = arith.addi %arg1, %c1_i32 : i32
    %c16_i32 = arith.constant 16 : i32
    %1 = arith.muli %0, %c16_i32 : i32
    %c31_i32 = arith.constant 31 : i32
    %2 = arith.minsi %1, %c31_i32 : i32
    %c0_i32 = arith.constant 0 : i32
    %c0_i32_0 = arith.constant 0 : i32
    %c0_i32_1 = arith.constant 0 : i32
    return %arg0, %2, %c0_i32, %c0_i32_0 : i32, i32, i32, i32
  }
  func.func @transform_3(%arg0: i32, %arg1: i32) -> (i32, i32) {
    %c0_i32 = arith.constant 0 : i32
    %c0_i32_0 = arith.constant 0 : i32
    %c0_i32_1 = arith.constant 0 : i32
    return %c0_i32, %c0_i32_0 : i32, i32
  }
  func.func @transform_4(%arg0: i32, %arg1: i32) -> (i32, i32) {
    %c0_i32 = arith.constant 0 : i32
    %c0_i32_0 = arith.constant 0 : i32
    %c0_i32_1 = arith.constant 0 : i32
    return %c0_i32, %c0_i32_0 : i32, i32
  }
  func.func @transform_5(%arg0: i32, %arg1: i32) -> (i32, i32) {
    %c0_i32 = arith.constant 0 : i32
    %c0_i32_0 = arith.constant 0 : i32
    %c0_i32_1 = arith.constant 0 : i32
    return %c0_i32, %c0_i32_0 : i32, i32
  }
  func.func @transform_6(%arg0: i32, %arg1: i32) -> (i32, i32) {
    %c0_i32 = arith.constant 0 : i32
    %c0_i32_0 = arith.constant 0 : i32
    %c0_i32_1 = arith.constant 0 : i32
    return %c0_i32, %c0_i32_0 : i32, i32
  }
  func.func @transform_7(%arg0: i32, %arg1: i32) -> (i32, i32, i32) {
    %c0_i32 = arith.constant 0 : i32
    %c0_i32_0 = arith.constant 0 : i32
    return %arg0, %arg1, %c0_i32 : i32, i32, i32
  }
  func.func @transform_8(%arg0: i32, %arg1: i32) -> (i32, i32, i32, i32) {
    %c0_i32 = arith.constant 0 : i32
    %c0_i32_0 = arith.constant 0 : i32
    %c0_i32_1 = arith.constant 0 : i32
    return %arg0, %arg1, %c0_i32, %c0_i32_0 : i32, i32, i32, i32
  }
}

module attributes {stable_mosaic.version = 11 : i64} {
  func.func @pw3_kernel(%arg0: i32, %arg1: memref<2048x32xbf16, #tpu.memory_space<vmem>>, %arg2: memref<1x32xf32, #tpu.memory_space<vmem>>, %arg3: memref<1x32xf32, #tpu.memory_space<vmem>>, %arg4: memref<32x128xf32, #tpu.memory_space<vmem>>, %arg5: memref<2048x128xbf16, #tpu.memory_space<vmem>>, %arg6: memref<1x2x128xf32, #tpu.memory_space<vmem>>) attributes {dimension_semantics = [#tpu.dimension_semantics<parallel>], iteration_bounds = array<i64: 1>, scalar_prefetch = 0 : i64, scratch_operands = 0 : i64, tpu.core_type = #tpu.core_type<tc>, window_params = [{transform_indices = @transform_0, window_bounds = array<i64: 2048, 32>}, {pipeline_mode = #tpu.pipeline_mode<synchronous>, transform_indices = @transform_1, window_bounds = array<i64: 1, 32>}, {pipeline_mode = #tpu.pipeline_mode<synchronous>, transform_indices = @transform_2, window_bounds = array<i64: 1, 32>}, {pipeline_mode = #tpu.pipeline_mode<synchronous>, transform_indices = @transform_3, window_bounds = array<i64: 32, 128>}, {transform_indices = @transform_4, window_bounds = array<i64: 2048, 128>}, {transform_indices = @transform_5, window_bounds = array<i64: 1, 2, 128>}]} {
    %c0 = arith.constant 0 : index
    %c0_0 = arith.constant 0 : index
    %0 = vector.load %arg1[%c0, %c0_0] : memref<2048x32xbf16, #tpu.memory_space<vmem>>, vector<2048x32xbf16>
    %1 = arith.extf %0 : vector<2048x32xbf16> to vector<2048x32xf32>
    %c0_1 = arith.constant 0 : index
    %c0_2 = arith.constant 0 : index
    %2 = vector.load %arg2[%c0_1, %c0_2] : memref<1x32xf32, #tpu.memory_space<vmem>>, vector<1x32xf32>
    %3 = vector.shape_cast %2 : vector<1x32xf32> to vector<32xf32>
    %4 = vector.shape_cast %3 : vector<32xf32> to vector<1x32xf32>
    %5 = vector.broadcast %4 : vector<1x32xf32> to vector<2048x32xf32>
    %6 = arith.mulf %1, %5 : vector<2048x32xf32>
    %c0_3 = arith.constant 0 : index
    %c0_4 = arith.constant 0 : index
    %7 = vector.load %arg3[%c0_3, %c0_4] : memref<1x32xf32, #tpu.memory_space<vmem>>, vector<1x32xf32>
    %8 = vector.shape_cast %7 : vector<1x32xf32> to vector<32xf32>
    %9 = vector.shape_cast %8 : vector<32xf32> to vector<1x32xf32>
    %10 = vector.broadcast %9 : vector<1x32xf32> to vector<2048x32xf32>
    %11 = arith.addf %6, %10 : vector<2048x32xf32>
    %cst = arith.constant 0.000000e+00 : f32
    %12 = vector.broadcast %cst : f32 to vector<2048x32xf32>
    %13 = arith.maximumf %11, %12 : vector<2048x32xf32>
    %14 = arith.truncf %13 : vector<2048x32xf32> to vector<2048x32xbf16>
    %c0_5 = arith.constant 0 : index
    %c0_6 = arith.constant 0 : index
    %15 = vector.load %arg4[%c0_5, %c0_6] : memref<32x128xf32, #tpu.memory_space<vmem>>, vector<32x128xf32>
    %16 = arith.truncf %15 : vector<32x128xf32> to vector<32x128xbf16>
    %cst_7 = arith.constant dense<0.000000e+00> : vector<2048x128xf32>
    %17 = tpu.matmul %14, %16, %cst_7 {dimension_numbers = #tpu.dot_dimension_numbers<[1], [0], [0], [1], [0, 0, 1, 1], [], []>} : vector<2048x32xbf16>, vector<32x128xbf16>, vector<2048x128xf32> -> vector<2048x128xf32>
    %18 = arith.truncf %17 : vector<2048x128xf32> to vector<2048x128xbf16>
    %c0_8 = arith.constant 0 : index
    %c0_9 = arith.constant 0 : index
    %19 = vector.load %arg5[%c0_8, %c0_9] : memref<2048x128xbf16, #tpu.memory_space<vmem>>, vector<2048x128xbf16>
    tpu.vector_store %arg5[%c0_8, %c0_9], %18 {strides = array<i32>} : memref<2048x128xbf16, #tpu.memory_space<vmem>>, vector<2048x128xbf16>,
    %cst_10 = arith.constant dense<0.000000e+00> : vector<128xf32>
    %20 = vector.multi_reduction <add>, %17, %cst_10 [0] : vector<2048x128xf32> to vector<128xf32>
    %21 = vector.shape_cast %20 : vector<128xf32> to vector<1x128xf32>
    %22 = arith.mulf %17, %17 : vector<2048x128xf32>
    %cst_11 = arith.constant dense<0.000000e+00> : vector<128xf32>
    %23 = vector.multi_reduction <add>, %22, %cst_11 [0] : vector<2048x128xf32> to vector<128xf32>
    %24 = vector.shape_cast %23 : vector<128xf32> to vector<1x128xf32>
    %25 = tpu.concatenate %21, %24 in 0 : vector<1x128xf32>, vector<1x128xf32> -> vector<2x128xf32>
    %c0_12 = arith.constant 0 : index
    %c0_13 = arith.constant 0 : index
    %c0_14 = arith.constant 0 : index
    %26 = vector.load %arg6[%c0_12, %c0_13, %c0_14] : memref<1x2x128xf32, #tpu.memory_space<vmem>>, vector<1x2x128xf32>
    %27 = vector.shape_cast %26 : vector<1x2x128xf32> to vector<2x128xf32>
    %28 = vector.shape_cast %25 : vector<2x128xf32> to vector<1x2x128xf32>
    tpu.vector_store %arg6[%c0_12, %c0_13, %c0_14], %28 {strides = array<i32>} : memref<1x2x128xf32, #tpu.memory_space<vmem>>, vector<1x2x128xf32>,
    return
  }
  func.func @transform_0(%arg0: i32) -> (i32, i32) {
    %c0_i32 = arith.constant 0 : i32
    %c0_i32_0 = arith.constant 0 : i32
    return %arg0, %c0_i32 : i32, i32
  }
  func.func @transform_1(%arg0: i32) -> (i32, i32) {
    %c0_i32 = arith.constant 0 : i32
    %c0_i32_0 = arith.constant 0 : i32
    %c0_i32_1 = arith.constant 0 : i32
    return %c0_i32, %c0_i32_0 : i32, i32
  }
  func.func @transform_2(%arg0: i32) -> (i32, i32) {
    %c0_i32 = arith.constant 0 : i32
    %c0_i32_0 = arith.constant 0 : i32
    %c0_i32_1 = arith.constant 0 : i32
    return %c0_i32, %c0_i32_0 : i32, i32
  }
  func.func @transform_3(%arg0: i32) -> (i32, i32) {
    %c0_i32 = arith.constant 0 : i32
    %c0_i32_0 = arith.constant 0 : i32
    %c0_i32_1 = arith.constant 0 : i32
    return %c0_i32, %c0_i32_0 : i32, i32
  }
  func.func @transform_4(%arg0: i32) -> (i32, i32) {
    %c0_i32 = arith.constant 0 : i32
    %c0_i32_0 = arith.constant 0 : i32
    return %arg0, %c0_i32 : i32, i32
  }
  func.func @transform_5(%arg0: i32) -> (i32, i32, i32) {
    %c0_i32 = arith.constant 0 : i32
    %c0_i32_0 = arith.constant 0 : i32
    %c0_i32_1 = arith.constant 0 : i32
    return %arg0, %c0_i32, %c0_i32_0 : i32, i32, i32
  }
}

</mosaic_0001>

<bundles_post_ra>
// kernel: conv_bottleneck.3
= control target key start
LH: loop header
LB: loop body
LE: loop exit
PB: predicated region body
PF: predicated region fallthrough
CT: control target
= control target key end

     0   :  { %s2016_s12 = smov 0   ;;  %s2018_s13 = smov 0   ;;  %s3556_s0 = inlined_call_operand.vmem [shape: f32[2,128,1024], index: 0, kind: input, shape index: {}]   ;;  %s3557_s1 = inlined_call_operand.vmem [shape: f32[128,32], index: 1, kind: input, shape index: {}]   ;;  %s3558_s2 = inlined_call_operand.vmem [shape: bf16[2,1024,32], index: 2, kind: output, shape index: {0}]   ;;  %s3559_s3 = inlined_call_operand.vmem [shape: f32[2,1,2,32], index: 3, kind: output, shape index: {1}]  }
   0x1   :  { %s2020_s14 = smov 0  }
   0x2 LB: > { %s26_s15 = sadd.s32 1, %s1990_s13  ;;  %p1914_p0 = scmp.ge.s32.totalorder %s1994_s14, 1  ;;  %s1994_s14 = sphi %s2020_s14, %s14_s14   ;;  %s1990_s13 = sphi %s2018_s13, %s3693_s13   ;;  %s1986_s12 = sphi %s2016_s12, %s3692_s12  }
   0x3   : > { %p28_p1 = scmp.ge.s32.totalorder %s26_s15, 2  ;;  %p163_p2 = scmp.lt.s32.totalorder %s1994_s14, 3 }
   0x5   : > { %s3695_s15 = smov (%p28_p1, %s26_s15), 0  ;;  %p164_p3 = pnand %p1914_p0, %p163_p2 }
   0x7   : > { %167 = sbr.rel (%p164_p3) target bundleno = 780 (0x30c), region = 28 }
   0xc   : > { %p203_p4 = scmp.lt.s32.totalorder %s1986_s12, 1  ;;  %vm998_vm0 = vcmask 257024   ;;  %vm1127_vm1 = vcmask 261120   ;;  %vm1778_vm2 = vcmask 1040384   ;;  %vm1780_vm3 = vcmask 254976  }
   0xe   : > { %s3697_s12 = smov (!%p203_p4, %s1986_s12), 1 }
   0xf   : > { %s1922_s16 = sshll.u32 %s3697_s12, 10  ;;  %s1919_s6 = sshll.u32 %s3697_s12, 1 }
  0x10   : > { %s2040_s19 = scalar_lea.vmem %s3556_s0, %s1922_s16  ;;  %s228_s9 = scalar_lea.vmem %s3559_s3, %s1919_s6 }
  0x11   : > { %v231_v0 = vld [vmem:[%s2040_s19 + $0x10] sm:$0xff]  ;;  %v232_v1 = vld [vmem:[%s2040_s19 + $0x18] sm:$0xff]  ;;  %v229_v5 = vld [vmem:[%s2040_s19] sm:$0xff] }
  0x12   : > { %v239_v2 = vld [vmem:[%s2040_s19 + $0x50] sm:$0xff]  ;;  %v240_v3 = vld [vmem:[%s2040_s19 + $0x58] sm:$0xff]  ;;  %v230_v6 = vld [vmem:[%s2040_s19 + $0x8] sm:$0xff] }
  0x13   : > { %v359_v4 = vpack.c.bf16 %v239_v2, %v231_v0  ;;  %v360_v7 = vpack.c.bf16 %v240_v3, %v232_v1  ;;  %v237_v8 = vld [vmem:[%s2040_s19 + $0x40] sm:$0xff]  ;;  %v238_v9 = vld [vmem:[%s2040_s19 + $0x48] sm:$0xff]  ;;  %v247_v18 = vld [vmem:[%s2040_s19 + $0x90] sm:$0xff] }
  0x14   : > { %v233_v10 = vld [vmem:[%s2040_s19 + $0x20] sm:$0xff]  ;;  %v357_v11 = vpack.c.bf16 %v237_v8, %v229_v5  ;;  %v358_v12 = vpack.c.bf16 %v238_v9, %v230_v6  ;;  %v234_v13 = vld [vmem:[%s2040_s19 + $0x28] sm:$0xff]  ;;  %v248_v19 = vld [vmem:[%s2040_s19 + $0x98] sm:$0xff] }
  0x15   : > { %v241_v14 = vld [vmem:[%s2040_s19 + $0x60] sm:$0xff]  ;;  %v242_v15 = vld [vmem:[%s2040_s19 + $0x68] sm:$0xff]  ;;  %469 = vxpose.binary.xlu1.c.b16.start [1/16] %v360_v7, %v359_v4, 128  ;;  %v255_v20 = vld [vmem:[%s2040_s19 + $0xd0] sm:$0xff] }
  0x16   : > { %v361_v16 = vpack.c.bf16 %v241_v14, %v233_v10  ;;  %v362_v17 = vpack.c.bf16 %v242_v15, %v234_v13  ;;  %445 = vxpose.binary.xlu0.c.b16.start [1/16] %v358_v12, %v357_v11, 128  ;;  %v256_v21 = vld [vmem:[%s2040_s19 + $0xd8] sm:$0xff]  ;;  %v245_v22 = vld [vmem:[%s2040_s19 + $0x80] sm:$0xff]  ;;  %v246_v23 = vld [vmem:[%s2040_s19 + $0x88] sm:$0xff]  ;;  %v367_v30 = vpack.c.bf16 %v255_v20, %v247_v18 }
  0x17   : > { %v253_v24 = vld [vmem:[%s2040_s19 + $0xc0] sm:$0xff]  ;;  %v254_v25 = vld [vmem:[%s2040_s19 + $0xc8] sm:$0xff]  ;;  %v368_v31 = vpack.c.bf16 %v256_v21, %v248_v19  ;;  %v263_v36 = vld [vmem:[%s2040_s19 + $0x110] sm:$0xff] }
  0x18   : > { %493 = vxpose.binary.xlu2.c.b16.start [1/16] %v362_v17, %v361_v16, 128  ;;  %v249_v26 = vld [vmem:[%s2040_s19 + $0xa0] sm:$0xff]  ;;  %v250_v27 = vld [vmem:[%s2040_s19 + $0xa8] sm:$0xff]  ;;  %v365_v32 = vpack.c.bf16 %v253_v24, %v245_v22  ;;  %v366_v33 = vpack.c.bf16 %v254_v25, %v246_v23  ;;  %v264_v37 = vld [vmem:[%s2040_s19 + $0x118] sm:$0xff] }
  0x19   : > { %v257_v28 = vld [vmem:[%s2040_s19 + $0xe0] sm:$0xff]  ;;  %v258_v29 = vld [vmem:[%s2040_s19 + $0xe8] sm:$0xff]  ;;  %v271_v38 = vld [vmem:[%s2040_s19 + $0x150] sm:$0xff] }
  0x1a   : > { %v369_v34 = vpack.c.bf16 %v257_v28, %v249_v26  ;;  %v370_v35 = vpack.c.bf16 %v258_v29, %v250_v27  ;;  %v272_v39 = vld [vmem:[%s2040_s19 + $0x158] sm:$0xff]  ;;  %v261_v40 = vld [vmem:[%s2040_s19 + $0x100] sm:$0xff]  ;;  %v262_v41 = vld [vmem:[%s2040_s19 + $0x108] sm:$0xff]  ;;  %v375_v48 = vpack.c.bf16 %v271_v38, %v263_v36 }
  0x1b   : > { %v269_v42 = vld [vmem:[%s2040_s19 + $0x140] sm:$0xff]  ;;  %v270_v43 = vld [vmem:[%s2040_s19 + $0x148] sm:$0xff]  ;;  %v376_v49 = vpack.c.bf16 %v272_v39, %v264_v37  ;;  %v279_v54 = vld [vmem:[%s2040_s19 + $0x190] sm:$0xff] }
  0x1c   : > { %v265_v44 = vld [vmem:[%s2040_s19 + $0x120] sm:$0xff]  ;;  %v266_v45 = vld [vmem:[%s2040_s19 + $0x128] sm:$0xff]  ;;  %v373_v50 = vpack.c.bf16 %v269_v42, %v261_v40  ;;  %v374_v51 = vpack.c.bf16 %v270_v43, %v262_v41  ;;  %v280_v55 = vld [vmem:[%s2040_s19 + $0x198] sm:$0xff] }
  0x1d   : > { %v273_v46 = vld [vmem:[%s2040_s19 + $0x160] sm:$0xff]  ;;  %v274_v47 = vld [vmem:[%s2040_s19 + $0x168] sm:$0xff]  ;;  %v287_v56 = vld [vmem:[%s2040_s19 + $0x1d0] sm:$0xff] }
  0x1e   : > { %v377_v52 = vpack.c.bf16 %v273_v46, %v265_v44  ;;  %v378_v53 = vpack.c.bf16 %v274_v47, %v266_v45  ;;  %v288_v57 = vld [vmem:[%s2040_s19 + $0x1d8] sm:$0xff]  ;;  %v277_v58 = vld [vmem:[%s2040_s19 + $0x180] sm:$0xff]  ;;  %v278_v59 = vld [vmem:[%s2040_s19 + $0x188] sm:$0xff]  ;;  %v383_v2 = vpack.c.bf16 %v287_v56, %v279_v54 }
  0x1f   : > { %v285_v60 = vld [vmem:[%s2040_s19 + $0x1c0] sm:$0xff]  ;;  %v286_v61 = vld [vmem:[%s2040_s19 + $0x1c8] sm:$0xff]  ;;  %v384_v3 = vpack.c.bf16 %v288_v57, %v280_v55  ;;  %v295_v8 = vld [vmem:[%s2040_s19 + $0x210] sm:$0xff] }
  0x20   : > { %v281_v62 = vld [vmem:[%s2040_s19 + $0x1a0] sm:$0xff]  ;;  %v282_v63 = vld [vmem:[%s2040_s19 + $0x1a8] sm:$0xff]  ;;  %v381_v4 = vpack.c.bf16 %v285_v60, %v277_v58  ;;  %v382_v5 = vpack.c.bf16 %v286_v61, %v278_v59  ;;  %v296_v9 = vld [vmem:[%s2040_s19 + $0x218] sm:$0xff] }
  0x21   : > { %v289_v0 = vld [vmem:[%s2040_s19 + $0x1e0] sm:$0xff]  ;;  %v290_v1 = vld [vmem:[%s2040_s19 + $0x1e8] sm:$0xff]  ;;  %v303_v10 = vld [vmem:[%s2040_s19 + $0x250] sm:$0xff] }
  0x22   : > { %v385_v6 = vpack.c.bf16 %v289_v0, %v281_v62  ;;  %v386_v7 = vpack.c.bf16 %v290_v1, %v282_v63  ;;  %v304_v11 = vld [vmem:[%s2040_s19 + $0x258] sm:$0xff]  ;;  %v293_v12 = vld [vmem:[%s2040_s19 + $0x200] sm:$0xff]  ;;  %v294_v13 = vld [vmem:[%s2040_s19 + $0x208] sm:$0xff]  ;;  %v391_v20 = vpack.c.bf16 %v303_v10, %v295_v8 }
  0x23   : > { %v301_v14 = vld [vmem:[%s2040_s19 + $0x240] sm:$0xff]  ;;  %v302_v15 = vld [vmem:[%s2040_s19 + $0x248] sm:$0xff]  ;;  %v392_v21 = vpack.c.bf16 %v304_v11, %v296_v9  ;;  %v311_v26 = vld [vmem:[%s2040_s19 + $0x290] sm:$0xff] }
  0x24   : > { %v297_v16 = vld [vmem:[%s2040_s19 + $0x220] sm:$0xff]  ;;  %v298_v17 = vld [vmem:[%s2040_s19 + $0x228] sm:$0xff]  ;;  %v389_v22 = vpack.c.bf16 %v301_v14, %v293_v12  ;;  %v390_v23 = vpack.c.bf16 %v302_v15, %v294_v13  ;;  %v312_v27 = vld [vmem:[%s2040_s19 + $0x298] sm:$0xff] }
  0x25   : > { %470 = vxpose.binary.xlu1.c.b16.cont [2/16] %v368_v31, %v367_v30, 128  ;;  %v305_v18 = vld [vmem:[%s2040_s19 + $0x260] sm:$0xff]  ;;  %v306_v19 = vld [vmem:[%s2040_s19 + $0x268] sm:$0xff]  ;;  %v319_v28 = vld [vmem:[%s2040_s19 + $0x2d0] sm:$0xff] }
  0x26   : > { %446 = vxpose.binary.xlu0.c.b16.cont [2/16] %v366_v33, %v365_v32, 128  ;;  %v393_v24 = vpack.c.bf16 %v305_v18, %v297_v16  ;;  %v394_v25 = vpack.c.bf16 %v306_v19, %v298_v17  ;;  %v320_v29 = vld [vmem:[%s2040_s19 + $0x2d8] sm:$0xff]  ;;  %v309_v30 = vld [vmem:[%s2040_s19 + $0x280] sm:$0xff]  ;;  %v310_v31 = vld [vmem:[%s2040_s19 + $0x288] sm:$0xff]  ;;  %v399_v38 = vpack.c.bf16 %v319_v28, %v311_v26 }
  0x27   : > { %v317_v32 = vld [vmem:[%s2040_s19 + $0x2c0] sm:$0xff]  ;;  %v318_v33 = vld [vmem:[%s2040_s19 + $0x2c8] sm:$0xff]  ;;  %v400_v39 = vpack.c.bf16 %v320_v29, %v312_v27  ;;  %v327_v44 = vld [vmem:[%s2040_s19 + $0x310] sm:$0xff] }
  0x28   : > { %494 = vxpose.binary.xlu2.c.b16.cont [2/16] %v370_v35, %v369_v34, 128  ;;  %v313_v34 = vld [vmem:[%s2040_s19 + $0x2a0] sm:$0xff]  ;;  %v314_v35 = vld [vmem:[%s2040_s19 + $0x2a8] sm:$0xff]  ;;  %v397_v40 = vpack.c.bf16 %v317_v32, %v309_v30  ;;  %v398_v41 = vpack.c.bf16 %v318_v33, %v310_v31  ;;  %v328_v45 = vld [vmem:[%s2040_s19 + $0x318] sm:$0xff] }
  0x29   : > { %v321_v36 = vld [vmem:[%s2040_s19 + $0x2e0] sm:$0xff]  ;;  %v322_v37 = vld [vmem:[%s2040_s19 + $0x2e8] sm:$0xff]  ;;  %v335_v46 = vld [vmem:[%s2040_s19 + $0x350] sm:$0xff] }
  0x2a   : > { %v401_v42 = vpack.c.bf16 %v321_v36, %v313_v34  ;;  %v402_v43 = vpack.c.bf16 %v322_v37, %v314_v35  ;;  %v336_v47 = vld [vmem:[%s2040_s19 + $0x358] sm:$0xff]  ;;  %v337_v54 = vld [vmem:[%s2040_s19 + $0x360] sm:$0xff]  ;;  %v338_v55 = vld [vmem:[%s2040_s19 + $0x368] sm:$0xff]  ;;  %v407_v56 = vpack.c.bf16 %v335_v46, %v327_v44 }
  0x2b   : > { %v408_v57 = vpack.c.bf16 %v336_v47, %v328_v45  ;;  %v435_v62 = vld [vmem:[%s3557_s1 + $0x70] sm:$0xff]  ;;  %v436_v63 = vld [vmem:[%s3557_s1 + $0x78] sm:$0xff]  ;;  %v433_v0 = vld [vmem:[%s3557_s1 + $0x60] sm:$0xff] }
  0x2c   : > { %v444_v1 = vpack.c.bf16 %v436_v63, %v435_v62  ;;  %v351_v8 = vld [vmem:[%s2040_s19 + $0x3d0] sm:$0xff]  ;;  %v352_v10 = vld [vmem:[%s2040_s19 + $0x3d8] sm:$0xff]  ;;  %v341_v11 = vld [vmem:[%s2040_s19 + $0x380] sm:$0xff] }
  0x2d   : > { %v342_v12 = vld [vmem:[%s2040_s19 + $0x388] sm:$0xff]  ;;  %v349_v13 = vld [vmem:[%s2040_s19 + $0x3c0] sm:$0xff]  ;;  %v427_v27 = vld [vmem:[%s3557_s1 + $0x30] sm:$0xff] }
  0x2e   : > { %1925 = vmatpush.bf16.msra.mxu2 %v444_v1  ;;  %541 = vmatpush.bf16.msra.mxu0 %v444_v1  ;;  %v350_v14 = vld [vmem:[%s2040_s19 + $0x3c8] sm:$0xff]  ;;  %v345_v15 = vld [vmem:[%s2040_s19 + $0x3a0] sm:$0xff]  ;;  %v428_v29 = vld [vmem:[%s3557_s1 + $0x38] sm:$0xff] }
  0x2f   : > { %1924 = vmatpush.bf16.msra.mxu1 %v444_v1  ;;  %1926 = vmatpush.bf16.msra.mxu3 %v444_v1  ;;  %v346_v16 = vld [vmem:[%s2040_s19 + $0x3a8] sm:$0xff]  ;;  %v353_v17 = vld [vmem:[%s2040_s19 + $0x3e0] sm:$0xff]  ;;  %v440_v30 = vpack.c.bf16 %v428_v29, %v427_v27  ;;  %v235_v34 = vld [vmem:[%s2040_s19 + $0x30] sm:$0xff] }
  0x30   : > { %v354_v18 = vld [vmem:[%s2040_s19 + $0x3e8] sm:$0xff]  ;;  %v425_v31 = vld [vmem:[%s3557_s1 + $0x20] sm:$0xff]  ;;  %v423_v35 = vld [vmem:[%s3557_s1 + $0x10] sm:$0xff] }
  0x31   : > { %v430_v26 = vld [vmem:[%s3557_s1 + $0x48] sm:$0xff]  ;;  %v424_v36 = vld [vmem:[%s3557_s1 + $0x18] sm:$0xff]  ;;  %v251_v46 = vld [vmem:[%s2040_s19 + $0xb0] sm:$0xff] }
  0x32   : > { %v426_v32 = vld [vmem:[%s3557_s1 + $0x28] sm:$0xff]  ;;  %v236_v37 = vld [vmem:[%s2040_s19 + $0x38] sm:$0xff] }
  0x33   : > { %v439_v33 = vpack.c.bf16 %v426_v32, %v425_v31  ;;  %v422_v44 = vld [vmem:[%s3557_s1 + $0x8] sm:$0xff]  ;;  %v252_v47 = vld [vmem:[%s2040_s19 + $0xb8] sm:$0xff]  ;;  %v331_v31 = vld [vmem:[%s2040_s19 + $0x330] sm:$0xff] }
  0x34   : > { %v292_v62 = vld [vmem:[%s2040_s19 + $0x1f8] sm:$0xff] }
  0x35   : > { %471 = vxpose.binary.xlu1.c.b16.cont [3/16] %v376_v49, %v375_v48, 128  ;;  %v325_v48 = vld [vmem:[%s2040_s19 + $0x300] sm:$0xff]  ;;  %v326_v49 = vld [vmem:[%s2040_s19 + $0x308] sm:$0xff]  ;;  %v332_v32 = vld [vmem:[%s2040_s19 + $0x338] sm:$0xff] }
  0x36   : > { %447 = vxpose.binary.xlu0.c.b16.cont [3/16] %v374_v51, %v373_v50, 128  ;;  %v333_v50 = vld [vmem:[%s2040_s19 + $0x340] sm:$0xff]  ;;  %v334_v51 = vld [vmem:[%s2040_s19 + $0x348] sm:$0xff] }
  0x37   : > { %v405_v58 = vpack.c.bf16 %v333_v50, %v325_v48  ;;  %v406_v59 = vpack.c.bf16 %v334_v51, %v326_v49  ;;  %v259_v48 = vld [vmem:[%s2040_s19 + $0xf0] sm:$0xff]  ;;  %v260_v49 = vld [vmem:[%s2040_s19 + $0xf8] sm:$0xff] }
  0x38   : > { %495 = vxpose.binary.xlu2.c.b16.cont [3/16] %v378_v53, %v377_v52, 128  ;;  %v329_v52 = vld [vmem:[%s2040_s19 + $0x320] sm:$0xff]  ;;  %v330_v53 = vld [vmem:[%s2040_s19 + $0x328] sm:$0xff]  ;;  %v371_v50 = vpack.c.bf16 %v259_v48, %v251_v46  ;;  %v372_v51 = vpack.c.bf16 %v260_v49, %v252_v47  ;;  %v356_v46 = vld [vmem:[%s2040_s19 + $0x3f8] sm:$0xff] }
  0x39   : > { %v409_v60 = vpack.c.bf16 %v337_v54, %v329_v52  ;;  %v410_v61 = vpack.c.bf16 %v338_v55, %v330_v53  ;;  %v267_v52 = vld [vmem:[%s2040_s19 + $0x130] sm:$0xff]  ;;  %v268_v53 = vld [vmem:[%s2040_s19 + $0x138] sm:$0xff] }
  0x3a   : > { %v275_v54 = vld [vmem:[%s2040_s19 + $0x170] sm:$0xff]  ;;  %v276_v55 = vld [vmem:[%s2040_s19 + $0x178] sm:$0xff] }
  0x45   : > { %472 = vxpose.binary.xlu1.c.b16.cont [4/16] %v384_v3, %v383_v2, 128  ;;  %v434_v2 = vld [vmem:[%s3557_s1 + $0x68] sm:$0xff] }
  0x46   : > { %448 = vxpose.binary.xlu0.c.b16.cont [4/16] %v382_v5, %v381_v4, 128  ;;  %v443_v3 = vpack.c.bf16 %v434_v2, %v433_v0  ;;  %v431_v4 = vld [vmem:[%s3557_s1 + $0x50] sm:$0xff]  ;;  %v432_v5 = vld [vmem:[%s3557_s1 + $0x58] sm:$0xff] }
  0x47   : > { %v442_v9 = vpack.c.bf16 %v432_v5, %v431_v4 }
  0x48   : > { %496 = vxpose.binary.xlu2.c.b16.cont [4/16] %v386_v7, %v385_v6, 128  ;;  %v343_v6 = vld [vmem:[%s2040_s19 + $0x390] sm:$0xff]  ;;  %v344_v7 = vld [vmem:[%s2040_s19 + $0x398] sm:$0xff] }
  0x49   : > { %1928 = vmatpush.bf16.msra.mxu2 %v443_v3  ;;  %542 = vmatpush.bf16.msra.mxu0 %v443_v3  ;;  %v415_v19 = vpack.c.bf16 %v351_v8, %v343_v6  ;;  %v300_v8 = vld [vmem:[%s2040_s19 + $0x238] sm:$0xff] }
  0x4a   : > { %1927 = vmatpush.bf16.msra.mxu1 %v443_v3  ;;  %1929 = vmatpush.bf16.msra.mxu3 %v443_v3 }
  0x4d   : > { %1931 = vmatpush.bf16.msra.mxu2 %v442_v9  ;;  %543 = vmatpush.bf16.msra.mxu0 %v442_v9 }
  0x4e   : > { %1930 = vmatpush.bf16.msra.mxu1 %v442_v9  ;;  %1932 = vmatpush.bf16.msra.mxu3 %v442_v9  ;;  %v307_v9 = vld [vmem:[%s2040_s19 + $0x270] sm:$0xff] }
  0x55   : > { %473 = vxpose.binary.xlu1.c.b16.cont [5/16] %v392_v21, %v391_v20, 128  ;;  %v416_v20 = vpack.c.bf16 %v352_v10, %v344_v7  ;;  %v413_v21 = vpack.c.bf16 %v349_v13, %v341_v11  ;;  %v299_v7 = vld [vmem:[%s2040_s19 + $0x230] sm:$0xff]  ;;  %v308_v10 = vld [vmem:[%s2040_s19 + $0x278] sm:$0xff] }
  0x56   : > { %449 = vxpose.binary.xlu0.c.b16.cont [5/16] %v390_v23, %v389_v22, 128  ;;  %v414_v22 = vpack.c.bf16 %v350_v14, %v342_v12  ;;  %v417_v23 = vpack.c.bf16 %v353_v17, %v345_v15  ;;  %v395_v14 = vpack.c.bf16 %v307_v9, %v299_v7 }
  0x57   : > { %v396_v15 = vpack.c.bf16 %v308_v10, %v300_v8 }
  0x58   : > { %497 = vxpose.binary.xlu2.c.b16.cont [5/16] %v394_v25, %v393_v24, 128  ;;  %v418_v24 = vpack.c.bf16 %v354_v18, %v346_v16  ;;  %v429_v25 = vld [vmem:[%s3557_s1 + $0x40] sm:$0xff] }
  0x59   : > { %v441_v28 = vpack.c.bf16 %v430_v26, %v429_v25 }
  0x5b   : > { %1934 = vmatpush.bf16.msra.mxu2 %v441_v28  ;;  %544 = vmatpush.bf16.msra.mxu0 %v441_v28 }
  0x5c   : > { %1933 = vmatpush.bf16.msra.mxu1 %v441_v28  ;;  %1935 = vmatpush.bf16.msra.mxu3 %v441_v28 }
  0x5f   : > { %1937 = vmatpush.bf16.msra.mxu2 %v440_v30  ;;  %545 = vmatpush.bf16.msra.mxu0 %v440_v30 }
  0x60   : > { %1936 = vmatpush.bf16.msra.mxu1 %v440_v30  ;;  %1938 = vmatpush.bf16.msra.mxu3 %v440_v30 }
  0x63   : > { %1940 = vmatpush.bf16.msra.mxu2 %v439_v33  ;;  %546 = vmatpush.bf16.msra.mxu0 %v439_v33 }
  0x64   : > { %1939 = vmatpush.bf16.msra.mxu1 %v439_v33  ;;  %1941 = vmatpush.bf16.msra.mxu3 %v439_v33  ;;  %v339_v33 = vld [vmem:[%s2040_s19 + $0x370] sm:$0xff] }
  0x65   : > { %474 = vxpose.binary.xlu1.c.b16.cont [6/16] %v400_v39, %v399_v38, 128  ;;  %v243_v38 = vld [vmem:[%s2040_s19 + $0x70] sm:$0xff]  ;;  %v244_v39 = vld [vmem:[%s2040_s19 + $0x78] sm:$0xff] }
  0x66   : > { %450 = vxpose.binary.xlu0.c.b16.cont [6/16] %v398_v41, %v397_v40, 128  ;;  %v438_v40 = vpack.c.bf16 %v424_v36, %v423_v35  ;;  %v363_v41 = vpack.c.bf16 %v243_v38, %v235_v34  ;;  %v340_v34 = vld [vmem:[%s2040_s19 + $0x378] sm:$0xff]  ;;  %v411_v38 = vpack.c.bf16 %v339_v33, %v331_v31 }
  0x68   : > { %498 = vxpose.binary.xlu2.c.b16.cont [6/16] %v402_v43, %v401_v42, 128  ;;  %v364_v42 = vpack.c.bf16 %v244_v39, %v236_v37  ;;  %v421_v43 = vld [vmem:[%s3557_s1] sm:$0xff]  ;;  %v412_v39 = vpack.c.bf16 %v340_v34, %v332_v32 }
  0x69   : > { %1943 = vmatpush.bf16.msra.mxu2 %v438_v40  ;;  %547 = vmatpush.bf16.msra.mxu0 %v438_v40  ;;  %v437_v45 = vpack.c.bf16 %v422_v44, %v421_v43  ;;  %v347_v43 = vld [vmem:[%s2040_s19 + $0x3b0] sm:$0xff]  ;;  %v348_v44 = vld [vmem:[%s2040_s19 + $0x3b8] sm:$0xff] }
  0x6a   : > { %1942 = vmatpush.bf16.msra.mxu1 %v438_v40  ;;  %1944 = vmatpush.bf16.msra.mxu3 %v438_v40 }
  0x6d   : > { %1946 = vmatpush.bf16.msra.mxu2 %v437_v45  ;;  %548 = vmatpush.bf16.msra.mxu0 %v437_v45 }
  0x6e   : > { %1945 = vmatpush.bf16.msra.mxu1 %v437_v45  ;;  %1947 = vmatpush.bf16.msra.mxu3 %v437_v45  ;;  %v355_v45 = vld [vmem:[%s2040_s19 + $0x3f0] sm:$0xff] }
  0x75   : > { %475 = vxpose.binary.xlu1.c.b16.cont [7/16] %v408_v57, %v407_v56, 128  ;;  %v379_v56 = vpack.c.bf16 %v275_v54, %v267_v52  ;;  %v380_v57 = vpack.c.bf16 %v276_v55, %v268_v53 }
  0x76   : > { %451 = vxpose.binary.xlu0.c.b16.cont [7/16] %v406_v59, %v405_v58, 128  ;;  %v283_v59 = vld [vmem:[%s2040_s19 + $0x1b0] sm:$0xff] }
  0x78   : > { %499 = vxpose.binary.xlu2.c.b16.cont [7/16] %v410_v61, %v409_v60, 128  ;;  %v284_v60 = vld [vmem:[%s2040_s19 + $0x1b8] sm:$0xff]  ;;  %v291_v61 = vld [vmem:[%s2040_s19 + $0x1f0] sm:$0xff] }
  0x79   : > { %v387_v2 = vpack.c.bf16 %v291_v61, %v283_v59  ;;  %v388_v3 = vpack.c.bf16 %v292_v62, %v284_v60 }
  0x85   : > { %476 = vxpose.binary.xlu1.c.b16.end [8/16] %v416_v20, %v415_v19, 128  ;;  %v315_v19 = vld [vmem:[%s2040_s19 + $0x2b0] sm:$0xff]  ;;  %v316_v20 = vld [vmem:[%s2040_s19 + $0x2b8] sm:$0xff] }
  0x86   : > { %452 = vxpose.binary.xlu0.c.b16.end [8/16] %v414_v22, %v413_v21, 128  ;;  %v323_v21 = vld [vmem:[%s2040_s19 + $0x2f0] sm:$0xff]  ;;  %v324_v22 = vld [vmem:[%s2040_s19 + $0x2f8] sm:$0xff]  ;;  %s1923_s19 = sshll.u32 %s3697_s12, 9 }
  0x87   : > { %v403_v26 = vpack.c.bf16 %v323_v21, %v315_v19  ;;  %v404_v27 = vpack.c.bf16 %v324_v22, %v316_v20  ;;  %s2271_s5 = scalar_lea.vmem %s3558_s2, %s1923_s19 }
  0x88   : > { %500 = vxpose.binary.xlu2.c.b16.end [8/16] %v418_v24, %v417_v23, 128 }
  0x96   : > { %517 = vxpose.binary.xlu0.c.b16.start [1/16] %v364_v42, %v363_v41, 128 }
  0xa6   : > { %518 = vxpose.binary.xlu0.c.b16.cont [2/16] %v372_v51, %v371_v50, 128  ;;  %v419_v50 = vpack.c.bf16 %v355_v45, %v347_v43  ;;  %v420_v51 = vpack.c.bf16 %v356_v46, %v348_v44 }
  0xb6   : > { %519 = vxpose.binary.xlu0.c.b16.cont [3/16] %v380_v57, %v379_v56, 128 }
  0xb9   : > { %v501_v58 = vpop.trf.xlu2 }
  0xba   : > { %709 = vmatmul.bf16.vlgmr.msra.gmra.mxu2 %v501_v58 }
  0xc1   : > { %v2202_v63 = vpop.trf.xlu2  ;;  %v477_v0 = vpop.trf.xlu1 }
  0xc2   : > { %v453_v1 = vpop.trf.xlu0  ;;  %629 = vmatmul.bf16.vlgmr.msra.gmra.mxu1 %v477_v0 }
  0xc3   : > { %549 = vmatmul.bf16.vlgmr.msra.gmra.mxu0 %v453_v1 }
  0xc6   : > { %520 = vxpose.binary.xlu0.c.b16.cont [4/16] %v388_v3, %v387_v2, 128 }
  0xc9   : > { %v503_v4 = vpop.trf.xlu2  ;;  %v2204_v5 = vpop.trf.xlu1 }
  0xca   : > { %714 = vmatmul.bf16.gmra.mxu2 %v503_v4  ;;  %v2206_v6 = vpop.trf.xlu0 }
  0xd1   : > { %v2212_v11 = vpop.trf.xlu2  ;;  %v479_v12 = vpop.trf.xlu1 }
  0xd2   : > { %v455_v13 = vpop.trf.xlu0  ;;  %634 = vmatmul.bf16.gmra.mxu1 %v479_v12 }
  0xd3   : > { %554 = vmatmul.bf16.gmra.mxu0 %v455_v13 }
  0xd6   : > { %521 = vxpose.binary.xlu0.c.b16.cont [5/16] %v396_v15, %v395_v14, 128 }
  0xd9   : > { %v505_v16 = vpop.trf.xlu2  ;;  %v2214_v17 = vpop.trf.xlu1 }
  0xda   : > { %719 = vmatmul.bf16.gmra.mxu2 %v505_v16  ;;  %v2216_v18 = vpop.trf.xlu0 }
  0xe1   : > { %v2222_v23 = vpop.trf.xlu2  ;;  %v481_v24 = vpop.trf.xlu1 }
  0xe2   : > { %v457_v25 = vpop.trf.xlu0  ;;  %639 = vmatmul.bf16.gmra.mxu1 %v481_v24 }
  0xe3   : > { %559 = vmatmul.bf16.gmra.mxu0 %v457_v25 }
  0xe6   : > { %522 = vxpose.binary.xlu0.c.b16.cont [6/16] %v404_v27, %v403_v26, 128 }
  0xe9   : > { %v507_v28 = vpop.trf.xlu2  ;;  %v2224_v29 = vpop.trf.xlu1 }
  0xea   : > { %724 = vmatmul.bf16.gmra.mxu2 %v507_v28  ;;  %v2226_v30 = vpop.trf.xlu0 }
  0xf1   : > { %v2232_v35 = vpop.trf.xlu2  ;;  %v483_v36 = vpop.trf.xlu1 }
  0xf2   : > { %v459_v37 = vpop.trf.xlu0  ;;  %644 = vmatmul.bf16.gmra.mxu1 %v483_v36 }
  0xf3   : > { %564 = vmatmul.bf16.gmra.mxu0 %v459_v37 }
  0xf6   : > { %523 = vxpose.binary.xlu0.c.b16.cont [7/16] %v412_v39, %v411_v38, 128 }
  0xf9   : > { %v509_v40 = vpop.trf.xlu2  ;;  %v2234_v41 = vpop.trf.xlu1 }
  0xfa   : > { %729 = vmatmul.bf16.gmra.mxu2 %v509_v40  ;;  %v2236_v42 = vpop.trf.xlu0 }
 0x101   : > { %v2242_v47 = vpop.trf.xlu2  ;;  %v485_v48 = vpop.trf.xlu1 }
 0x102   : > { %v461_v49 = vpop.trf.xlu0  ;;  %649 = vmatmul.bf16.gmra.mxu1 %v485_v48 }
 0x103   : > { %569 = vmatmul.bf16.gmra.mxu0 %v461_v49 }
 0x106   : > { %524 = vxpose.binary.xlu0.c.b16.end [8/16] %v420_v51, %v419_v50, 128 }
 0x109   : > { %v511_v52 = vpop.trf.xlu2  ;;  %v2244_v53 = vpop.trf.xlu1 }
 0x10a   : > { %734 = vmatmul.bf16.gmra.mxu2 %v511_v52  ;;  %v2246_v54 = vpop.trf.xlu0 }
 0x111   : > { %v2248_v55 = vpop.trf.xlu2  ;;  %v487_v56 = vpop.trf.xlu1 }
 0x112   : > { %v463_v57 = vpop.trf.xlu0  ;;  %654 = vmatmul.bf16.gmra.mxu1 %v487_v56 }
 0x113   : > { %574 = vmatmul.bf16.gmra.mxu0 %v463_v57 }
 0x119   : > { %v513_v58 = vpop.trf.xlu2  ;;  %v2250_v59 = vpop.trf.xlu1 }
 0x11a   : > { %739 = vmatmul.bf16.gmra.mxu2 %v513_v58  ;;  %v2252_v60 = vpop.trf.xlu0 }
 0x121   : > { %v2254_v61 = vpop.trf.xlu2  ;;  %v489_v62 = vpop.trf.xlu1 }
 0x122   : > { %v465_v0 = vpop.trf.xlu0  ;;  %659 = vmatmul.bf16.gmra.mxu1 %v489_v62 }
 0x123   : > { %579 = vmatmul.bf16.gmra.mxu0 %v465_v0 }
 0x129   : > { %v515_v1 = vpop.trf.xlu2  ;;  %v2256_v2 = vpop.trf.xlu1 }
 0x12a   : > { %744 = vmatmul.bf16.gmra.mxu2 %v515_v1  ;;  %v2258_v3 = vpop.trf.xlu0 }
 0x131   : > { %v491_v4 = vpop.trf.xlu1 }
 0x132   : > { %v467_v7 = vpop.trf.xlu0  ;;  %664 = vmatmul.bf16.gmra.mxu1 %v491_v4 }
 0x133   : > { %584 = vmatmul.bf16.gmra.mxu0 %v467_v7 }
 0x13a   : > { %749 = vmatmul.bf16.gmra.mxu2 %v2202_v63  ;;  %v2261_v8 = vpop.trf.xlu0 }
 0x13d   : > { %v2264_v9 = vpop.f32.mrf.mxu2 }
 0x13e   : > { %v934_v10 = vpack.c.bf16 %v2264_v9, %v2264_v9 }
 0x13f   : > { %v2273_v12 = vpop.f32.mrf.mxu1 }
 0x140   : > { %1063 = vst.msk [vmem:[%s2271_s5 + $0x100] sm:$0xf] %vm998_vm0, %v934_v10  ;;  %v550_v63 = vpop.f32.mrf.mxu0  ;;  %v902_v13 = vpack.c.bf16 %v2273_v12, %v2273_v12 }
 0x141   : > { %v870_v14 = vpack.c.bf16 %v550_v63, %v550_v63  ;;  %v1389_v20 = vmul.f32 %v550_v63, %v550_v63 }
 0x142   : > { %1031 = vst.msk [vmem:[%s2271_s5 + $0x80] sm:$0xf] %vm998_vm0, %v902_v13  ;;  %v525_v15 = vpop.trf.xlu0  ;;  %669 = vmatmul.bf16.gmra.mxu1 %v2204_v5 }
 0x143   : > { %999 = vst.msk [vmem:[%s2271_s5] sm:$0xf] %vm998_vm0, %v870_v14  ;;  %589 = vmatmul.bf16.gmra.mxu0 %v2206_v6  ;;  %789 = vmatmul.bf16.vlgmr.msra.gmra.mxu3 %v525_v15  ;;  %v1128_v6 = vsel %vm1127_vm1, %v550_v63, 0.0  ;;  %v1517_v31 = vsel %vm1127_vm1, %v1389_v20, 0.0 }
 0x145   : > { %v2285_v16 = vpop.f32.mrf.mxu2 }
 0x146   : > { %v935_v19 = vpack.c.bf16 %v2285_v16, %v2285_v16 }
 0x147   : > { %v2289_v21 = vpop.f32.mrf.mxu1 }
 0x148   : > { %1064 = vst.msk [vmem:[%s2271_s5 + $0x104] sm:$0xf] %vm998_vm0, %v935_v19  ;;  %v552_v22 = vpop.f32.mrf.mxu0  ;;  %v903_v5 = vpack.c.bf16 %v2289_v21, %v2289_v21 }
 0x149   : > { %v871_v24 = vpack.c.bf16 %v552_v22, %v552_v22  ;;  %v1129_v25 = vsel %vm1127_vm1, %v552_v22, 0.0  ;;  %v1390_v26 = vmul.f32 %v552_v22, %v552_v22 }
 0x14a   : > { %754 = vmatmul.bf16.gmra.mxu2 %v2212_v11  ;;  %1032 = vst.msk [vmem:[%s2271_s5 + $0x84] sm:$0xf] %vm998_vm0, %v903_v5  ;;  %v2300_v27 = vpop.trf.xlu0  ;;  %v1130_v28 = vadd.f32 %v1129_v25, %v1128_v6 }
 0x14b   : > { %1000 = vst.msk [vmem:[%s2271_s5 + $0x4] sm:$0xf] %vm998_vm0, %v871_v24  ;;  %v1518_v32 = vsel %vm1127_vm1, %v1390_v26, 0.0 }
 0x14c   : > { %v1519_v33 = vadd.f32 %v1518_v32, %v1517_v31 }
 0x14d   : > { %v2306_v34 = vpop.f32.mrf.mxu2 }
 0x14e   : > { %v936_v36 = vpack.c.bf16 %v2306_v34, %v2306_v34 }
 0x14f   : > { %v2310_v11 = vpop.f32.mrf.mxu1 }
 0x150   : > { %1065 = vst.msk [vmem:[%s2271_s5 + $0x108] sm:$0xf] %vm998_vm0, %v936_v36  ;;  %v555_v37 = vpop.f32.mrf.mxu0  ;;  %v904_v38 = vpack.c.bf16 %v2310_v11, %v2310_v11 }
 0x151   : > { %v872_v39 = vpack.c.bf16 %v555_v37, %v555_v37  ;;  %v1131_v40 = vsel %vm1127_vm1, %v555_v37, 0.0  ;;  %v1391_v43 = vmul.f32 %v555_v37, %v555_v37 }
 0x152   : > { %v1132_v44 = vadd.f32 %v1131_v40, %v1130_v28  ;;  %1033 = vst.msk [vmem:[%s2271_s5 + $0x88] sm:$0xf] %vm998_vm0, %v904_v38  ;;  %v527_v45 = vpop.trf.xlu0  ;;  %674 = vmatmul.bf16.gmra.mxu1 %v2214_v17 }
 0x153   : > { %1001 = vst.msk [vmem:[%s2271_s5 + $0x8] sm:$0xf] %vm998_vm0, %v872_v39  ;;  %v1520_v46 = vsel %vm1127_vm1, %v1391_v43, 0.0  ;;  %594 = vmatmul.bf16.gmra.mxu0 %v2216_v18  ;;  %794 = vmatmul.bf16.gmra.mxu3 %v527_v45 }
 0x154   : > { %v1521_v48 = vadd.f32 %v1520_v46, %v1519_v33 }
 0x155   : > { %v2324_v49 = vpop.f32.mrf.mxu2 }
 0x156   : > { %v937_v50 = vpack.c.bf16 %v2324_v49, %v2324_v49 }
 0x157   : > { %v2328_v51 = vpop.f32.mrf.mxu1 }
 0x158   : > { %1066 = vst.msk [vmem:[%s2271_s5 + $0x10c] sm:$0xf] %vm998_vm0, %v937_v50  ;;  %v557_v17 = vpop.f32.mrf.mxu0  ;;  %v905_v52 = vpack.c.bf16 %v2328_v51, %v2328_v51 }
 0x159   : > { %v873_v56 = vpack.c.bf16 %v557_v17, %v557_v17  ;;  %v1133_v18 = vsel %vm1127_vm1, %v557_v17, 0.0  ;;  %v1392_v57 = vmul.f32 %v557_v17, %v557_v17 }
 0x15a   : > { %759 = vmatmul.bf16.gmra.mxu2 %v2222_v23  ;;  %1034 = vst.msk [vmem:[%s2271_s5 + $0x8c] sm:$0xf] %vm998_vm0, %v905_v52  ;;  %v2338_v58 = vpop.trf.xlu0  ;;  %v1134_v62 = vadd.f32 %v1133_v18, %v1132_v44 }
 0x15b   : > { %1002 = vst.msk [vmem:[%s2271_s5 + $0xc] sm:$0xf] %vm998_vm0, %v873_v56  ;;  %v1522_v0 = vsel %vm1127_vm1, %v1392_v57, 0.0 }
 0x15c   : > { %v1523_v1 = vadd.f32 %v1522_v0, %v1521_v48 }
 0x15d   : > { %v2343_v4 = vpop.f32.mrf.mxu2 }
 0x15e   : > { %v938_v7 = vpack.c.bf16 %v2343_v4, %v2343_v4 }
 0x15f   : > { %v2347_v10 = vpop.f32.mrf.mxu1 }
 0x160   : > { %1067 = vst.msk [vmem:[%s2271_s5 + $0x110] sm:$0xf] %vm998_vm0, %v938_v7  ;;  %v560_v23 = vpop.f32.mrf.mxu0  ;;  %v906_v63 = vpack.c.bf16 %v2347_v10, %v2347_v10 }
 0x161   : > { %v874_v13 = vpack.c.bf16 %v560_v23, %v560_v23  ;;  %v1135_v14 = vsel %vm1127_vm1, %v560_v23, 0.0  ;;  %v1393_v15 = vmul.f32 %v560_v23, %v560_v23 }
 0x162   : > { %v1136_v19 = vadd.f32 %v1135_v14, %v1134_v62  ;;  %1035 = vst.msk [vmem:[%s2271_s5 + $0x90] sm:$0xf] %vm998_vm0, %v906_v63  ;;  %v529_v20 = vpop.trf.xlu0  ;;  %679 = vmatmul.bf16.gmra.mxu1 %v2224_v29 }
 0x163   : > { %1003 = vst.msk [vmem:[%s2271_s5 + $0x10] sm:$0xf] %vm998_vm0, %v874_v13  ;;  %v1524_v22 = vsel %vm1127_vm1, %v1393_v15, 0.0  ;;  %599 = vmatmul.bf16.gmra.mxu0 %v2226_v30  ;;  %799 = vmatmul.bf16.gmra.mxu3 %v529_v20 }
 0x164   : > { %v1525_v5 = vadd.f32 %v1524_v22, %v1523_v1 }
 0x165   : > { %v2361_v6 = vpop.f32.mrf.mxu2 }
 0x166   : > { %v939_v24 = vpack.c.bf16 %v2361_v6, %v2361_v6 }
 0x167   : > { %v2365_v25 = vpop.f32.mrf.mxu1 }
 0x168   : > { %1068 = vst.msk [vmem:[%s2271_s5 + $0x114] sm:$0xf] %vm998_vm0, %v939_v24  ;;  %v562_v29 = vpop.f32.mrf.mxu0  ;;  %v907_v26 = vpack.c.bf16 %v2365_v25, %v2365_v25 }
 0x169   : > { %v875_v28 = vpack.c.bf16 %v562_v29, %v562_v29  ;;  %v1137_v30 = vsel %vm1127_vm1, %v562_v29, 0.0  ;;  %v1394_v31 = vmul.f32 %v562_v29, %v562_v29 }
 0x16a   : > { %764 = vmatmul.bf16.gmra.mxu2 %v2232_v35  ;;  %1036 = vst.msk [vmem:[%s2271_s5 + $0x94] sm:$0xf] %vm998_vm0, %v907_v26  ;;  %v2375_v32 = vpop.trf.xlu0  ;;  %v1138_v33 = vadd.f32 %v1137_v30, %v1136_v19 }
 0x16b   : > { %1004 = vst.msk [vmem:[%s2271_s5 + $0x14] sm:$0xf] %vm998_vm0, %v875_v28  ;;  %v1526_v36 = vsel %vm1127_vm1, %v1394_v31, 0.0 }
 0x16c   : > { %v1527_v37 = vadd.f32 %v1526_v36, %v1525_v5 }
 0x16d   : > { %v2380_v38 = vpop.f32.mrf.mxu2 }
 0x16e   : > { %v940_v39 = vpack.c.bf16 %v2380_v38, %v2380_v38 }
 0x16f   : > { %v2384_v40 = vpop.f32.mrf.mxu1 }
 0x170   : > { %1069 = vst.msk [vmem:[%s2271_s5 + $0x118] sm:$0xf] %vm998_vm0, %v940_v39  ;;  %v565_v35 = vpop.f32.mrf.mxu0  ;;  %v908_v43 = vpack.c.bf16 %v2384_v40, %v2384_v40 }
 0x171   : > { %v876_v44 = vpack.c.bf16 %v565_v35, %v565_v35  ;;  %v1139_v45 = vsel %vm1127_vm1, %v565_v35, 0.0  ;;  %v1395_v46 = vmul.f32 %v565_v35, %v565_v35 }
 0x172   : > { %v1140_v48 = vadd.f32 %v1139_v45, %v1138_v33  ;;  %1037 = vst.msk [vmem:[%s2271_s5 + $0x98] sm:$0xf] %vm998_vm0, %v908_v43  ;;  %v531_v50 = vpop.trf.xlu0  ;;  %684 = vmatmul.bf16.gmra.mxu1 %v2234_v41 }
 0x173   : > { %1005 = vst.msk [vmem:[%s2271_s5 + $0x18] sm:$0xf] %vm998_vm0, %v876_v44  ;;  %v1528_v17 = vsel %vm1127_vm1, %v1395_v46, 0.0  ;;  %604 = vmatmul.bf16.gmra.mxu0 %v2236_v42  ;;  %804 = vmatmul.bf16.gmra.mxu3 %v531_v50 }
 0x174   : > { %v1529_v52 = vadd.f32 %v1528_v17, %v1527_v37 }
 0x175   : > { %v2398_v56 = vpop.f32.mrf.mxu2 }
 0x176   : > { %v941_v18 = vpack.c.bf16 %v2398_v56, %v2398_v56 }
 0x177   : > { %v2402_v57 = vpop.f32.mrf.mxu1 }
 0x178   : > { %1070 = vst.msk [vmem:[%s2271_s5 + $0x11c] sm:$0xf] %vm998_vm0, %v941_v18  ;;  %v567_v41 = vpop.f32.mrf.mxu0  ;;  %v909_v62 = vpack.c.bf16 %v2402_v57, %v2402_v57 }
 0x179   : > { %v877_v0 = vpack.c.bf16 %v567_v41, %v567_v41  ;;  %v1141_v42 = vsel %vm1127_vm1, %v567_v41, 0.0  ;;  %v1396_v1 = vmul.f32 %v567_v41, %v567_v41 }
 0x17a   : > { %769 = vmatmul.bf16.gmra.mxu2 %v2242_v47  ;;  %1038 = vst.msk [vmem:[%s2271_s5 + $0x9c] sm:$0xf] %vm998_vm0, %v909_v62  ;;  %v2412_v7 = vpop.trf.xlu0  ;;  %v1142_v23 = vadd.f32 %v1141_v42, %v1140_v48 }
 0x17b   : > { %1006 = vst.msk [vmem:[%s2271_s5 + $0x1c] sm:$0xf] %vm998_vm0, %v877_v0  ;;  %v1530_v63 = vsel %vm1127_vm1, %v1396_v1, 0.0 }
 0x17c   : > { %v1531_v13 = vadd.f32 %v1530_v63, %v1529_v52 }
 0x17d   : > { %v2417_v14 = vpop.f32.mrf.mxu2 }
 0x17e   : > { %v942_v15 = vpack.c.bf16 %v2417_v14, %v2417_v14 }
 0x17f   : > { %v2421_v19 = vpop.f32.mrf.mxu1 }
 0x180   : > { %1071 = vst.msk [vmem:[%s2271_s5 + $0x120] sm:$0xf] %vm998_vm0, %v942_v15  ;;  %v570_v47 = vpop.f32.mrf.mxu0  ;;  %v910_v20 = vpack.c.bf16 %v2421_v19, %v2421_v19 }
 0x181   : > { %v878_v22 = vpack.c.bf16 %v570_v47, %v570_v47  ;;  %v1143_v5 = vsel %vm1127_vm1, %v570_v47, 0.0  ;;  %v1397_v24 = vmul.f32 %v570_v47, %v570_v47 }
 0x182   : > { %v1144_v29 = vadd.f32 %v1143_v5, %v1142_v23  ;;  %1039 = vst.msk [vmem:[%s2271_s5 + $0xa0] sm:$0xf] %vm998_vm0, %v910_v20  ;;  %v533_v26 = vpop.trf.xlu0  ;;  %689 = vmatmul.bf16.gmra.mxu1 %v2244_v53 }
 0x183   : > { %1007 = vst.msk [vmem:[%s2271_s5 + $0x20] sm:$0xf] %vm998_vm0, %v878_v22  ;;  %v1532_v28 = vsel %vm1127_vm1, %v1397_v24, 0.0  ;;  %609 = vmatmul.bf16.gmra.mxu0 %v2246_v54  ;;  %809 = vmatmul.bf16.gmra.mxu3 %v533_v26 }
 0x184   : > { %v1533_v30 = vadd.f32 %v1532_v28, %v1531_v13 }
 0x185   : > { %v2435_v31 = vpop.f32.mrf.mxu2 }
 0x186   : > { %v943_v33 = vpack.c.bf16 %v2435_v31, %v2435_v31 }
 0x187   : > { %v2439_v36 = vpop.f32.mrf.mxu1 }
 0x188   : > { %1072 = vst.msk [vmem:[%s2271_s5 + $0x124] sm:$0xf] %vm998_vm0, %v943_v33  ;;  %v572_v53 = vpop.f32.mrf.mxu0  ;;  %v911_v37 = vpack.c.bf16 %v2439_v36, %v2439_v36 }
 0x189   : > { %v879_v39 = vpack.c.bf16 %v572_v53, %v572_v53  ;;  %v1145_v54 = vsel %vm1127_vm1, %v572_v53, 0.0  ;;  %v1398_v35 = vmul.f32 %v572_v53, %v572_v53 }
 0x18a   : > { %774 = vmatmul.bf16.gmra.mxu2 %v2248_v55  ;;  %v1146_v43 = vadd.f32 %v1145_v54, %v1144_v29  ;;  %1040 = vst.msk [vmem:[%s2271_s5 + $0xa4] sm:$0xf] %vm998_vm0, %v911_v37  ;;  %v2449_v44 = vpop.trf.xlu0 }
 0x18b   : > { %1008 = vst.msk [vmem:[%s2271_s5 + $0x24] sm:$0xf] %vm998_vm0, %v879_v39  ;;  %v1534_v45 = vsel %vm1127_vm1, %v1398_v35, 0.0 }
 0x18c   : > { %v1535_v46 = vadd.f32 %v1534_v45, %v1533_v30 }
 0x18d   : > { %v2454_v48 = vpop.f32.mrf.mxu2 }
 0x18e   : > { %3626 = vst [vmem:[#allocation2_spill] sm:$0xff] %v2454_v48  ;;  %v944_v50 = vpack.c.bf16 %v2454_v48, %v2454_v48 }
 0x18f   : > { %v2458_v17 = vpop.f32.mrf.mxu1 }
 0x190   : > { %1073 = vst.msk [vmem:[%s2271_s5 + $0x128] sm:$0xf] %vm998_vm0, %v944_v50  ;;  %v575_v55 = vpop.f32.mrf.mxu0  ;;  %v912_v52 = vpack.c.bf16 %v2458_v17, %v2458_v17 }
 0x191   : > { %v880_v18 = vpack.c.bf16 %v575_v55, %v575_v55  ;;  %v1147_v41 = vsel %vm1127_vm1, %v575_v55, 0.0  ;;  %v1399_v62 = vmul.f32 %v575_v55, %v575_v55 }
 0x192   : > { %v1148_v0 = vadd.f32 %v1147_v41, %v1146_v43  ;;  %1041 = vst.msk [vmem:[%s2271_s5 + $0xa8] sm:$0xf] %vm998_vm0, %v912_v52  ;;  %v535_v42 = vpop.trf.xlu0  ;;  %694 = vmatmul.bf16.gmra.mxu1 %v2250_v59 }
 0x193   : > { %1009 = vst.msk [vmem:[%s2271_s5 + $0x28] sm:$0xf] %vm998_vm0, %v880_v18  ;;  %v1536_v1 = vsel %vm1127_vm1, %v1399_v62, 0.0  ;;  %614 = vmatmul.bf16.gmra.mxu0 %v2252_v60  ;;  %814 = vmatmul.bf16.gmra.mxu3 %v535_v42 }
 0x194   : > { %v1537_v23 = vadd.f32 %v1536_v1, %v1535_v46 }
 0x195   : > { %v2472_v63 = vpop.f32.mrf.mxu2 }
 0x196   : > { %3627 = vst [vmem:[#allocation3_spill] sm:$0xff] %v2472_v63  ;;  %v945_v13 = vpack.c.bf16 %v2472_v63, %v2472_v63 }
 0x197   : > { %v2476_v15 = vpop.f32.mrf.mxu1 }
 0x198   : > { %1074 = vst.msk [vmem:[%s2271_s5 + $0x12c] sm:$0xf] %vm998_vm0, %v945_v13  ;;  %v577_v59 = vpop.f32.mrf.mxu0  ;;  %v913_v47 = vpack.c.bf16 %v2476_v15, %v2476_v15 }
 0x199   : > { %v881_v20 = vpack.c.bf16 %v577_v59, %v577_v59  ;;  %v1149_v60 = vsel %vm1127_vm1, %v577_v59, 0.0  ;;  %v1400_v22 = vmul.f32 %v577_v59, %v577_v59 }
 0x19a   : > { %779 = vmatmul.bf16.gmra.mxu2 %v2254_v61  ;;  %v1150_v5 = vadd.f32 %v1149_v60, %v1148_v0  ;;  %1042 = vst.msk [vmem:[%s2271_s5 + $0xac] sm:$0xf] %vm998_vm0, %v913_v47  ;;  %v2486_v24 = vpop.trf.xlu0 }
 0x19b   : > { %1010 = vst.msk [vmem:[%s2271_s5 + $0x2c] sm:$0xf] %vm998_vm0, %v881_v20  ;;  %v1538_v29 = vsel %vm1127_vm1, %v1400_v22, 0.0 }
 0x19c   : > { %v1539_v26 = vadd.f32 %v1538_v29, %v1537_v23 }
 0x19d   : > { %v2491_v28 = vpop.f32.mrf.mxu2 }
 0x19e   : > { %3628 = vst [vmem:[#allocation4_spill] sm:$0xff] %v2491_v28  ;;  %v946_v30 = vpack.c.bf16 %v2491_v28, %v2491_v28 }
 0x19f   : > { %v2495_v33 = vpop.f32.mrf.mxu1 }
 0x1a0   : > { %1075 = vst.msk [vmem:[%s2271_s5 + $0x130] sm:$0xf] %vm998_vm0, %v946_v30  ;;  %v580_v61 = vpop.f32.mrf.mxu0  ;;  %v914_v53 = vpack.c.bf16 %v2495_v33, %v2495_v33 }
 0x1a1   : > { %v882_v37 = vpack.c.bf16 %v580_v61, %v580_v61  ;;  %v1151_v39 = vsel %vm1127_vm1, %v580_v61, 0.0  ;;  %v1401_v54 = vmul.f32 %v580_v61, %v580_v61 }
 0x1a2   : > { %v1152_v35 = vadd.f32 %v1151_v39, %v1150_v5  ;;  %1043 = vst.msk [vmem:[%s2271_s5 + $0xb0] sm:$0xf] %vm998_vm0, %v914_v53  ;;  %v537_v43 = vpop.trf.xlu0  ;;  %699 = vmatmul.bf16.gmra.mxu1 %v2256_v2 }
 0x1a3   : > { %1011 = vst.msk [vmem:[%s2271_s5 + $0x30] sm:$0xf] %vm998_vm0, %v882_v37  ;;  %v1540_v45 = vsel %vm1127_vm1, %v1401_v54, 0.0  ;;  %619 = vmatmul.bf16.gmra.mxu0 %v2258_v3  ;;  %819 = vmatmul.bf16.gmra.mxu3 %v537_v43 }
 0x1a4   : > { %v1541_v46 = vadd.f32 %v1540_v45, %v1539_v26 }
 0x1a5   : > { %v2509_v50 = vpop.f32.mrf.mxu2 }
 0x1a6   : > { %3629 = vst [vmem:[#allocation5_spill] sm:$0xff] %v2509_v50  ;;  %v947_v55 = vpack.c.bf16 %v2509_v50, %v2509_v50 }
 0x1a7   : > { %v2513_v52 = vpop.f32.mrf.mxu1 }
 0x1a8   : > { %1076 = vst.msk [vmem:[%s2271_s5 + $0x134] sm:$0xf] %vm998_vm0, %v947_v55  ;;  %v582_v2 = vpop.f32.mrf.mxu0  ;;  %v915_v18 = vpack.c.bf16 %v2513_v52, %v2513_v52 }
 0x1a9   : > { %v883_v41 = vpack.c.bf16 %v582_v2, %v582_v2  ;;  %v1153_v62 = vsel %vm1127_vm1, %v582_v2, 0.0  ;;  %v1402_v3 = vmul.f32 %v582_v2, %v582_v2 }
 0x1aa   : > { %v1154_v0 = vadd.f32 %v1153_v62, %v1152_v35  ;;  %1044 = vst.msk [vmem:[%s2271_s5 + $0xb4] sm:$0xf] %vm998_vm0, %v915_v18  ;;  %v2522_v42 = vpop.trf.xlu0 }
 0x1ab   : > { %1012 = vst.msk [vmem:[%s2271_s5 + $0x34] sm:$0xf] %vm998_vm0, %v883_v41  ;;  %v1542_v1 = vsel %vm1127_vm1, %v1402_v3, 0.0 }
 0x1ac   : > { %v1543_v23 = vadd.f32 %v1542_v1, %v1541_v46 }
 0x1ad   : > { %v2527_v13 = vpop.f32.mrf.mxu2 }
 0x1ae   : > { %3630 = vst [vmem:[#allocation6_spill] sm:$0xff] %v2527_v13  ;;  %v948_v59 = vpack.c.bf16 %v2527_v13, %v2527_v13 }
 0x1af   : > { %v2531_v47 = vpop.f32.mrf.mxu1 }
 0x1b0   : > { %1077 = vst.msk [vmem:[%s2271_s5 + $0x138] sm:$0xf] %vm998_vm0, %v948_v59  ;;  %v585_v20 = vpop.f32.mrf.mxu0  ;;  %v916_v60 = vpack.c.bf16 %v2531_v47, %v2531_v47 }
 0x1b1   : > { %v884_v22 = vpack.c.bf16 %v585_v20, %v585_v20  ;;  %v1155_v5 = vsel %vm1127_vm1, %v585_v20, 0.0  ;;  %v1403_v29 = vmul.f32 %v585_v20, %v585_v20 }
 0x1b2   : > { %v1156_v26 = vadd.f32 %v1155_v5, %v1154_v0  ;;  %1045 = vst.msk [vmem:[%s2271_s5 + $0xb8] sm:$0xf] %vm998_vm0, %v916_v60  ;;  %v539_v30 = vpop.trf.xlu0 }
 0x1b3   : > { %1013 = vst.msk [vmem:[%s2271_s5 + $0x38] sm:$0xf] %vm998_vm0, %v884_v22  ;;  %v1544_v61 = vsel %vm1127_vm1, %v1403_v29, 0.0  ;;  %624 = vmatmul.bf16.gmra.mxu0 %v2261_v8  ;;  %824 = vmatmul.bf16.gmra.mxu3 %v539_v30 }
 0x1b4   : > { %v1545_v53 = vadd.f32 %v1544_v61, %v1543_v23 }
 0x1b5   : > { %v2544_v37 = vpop.f32.mrf.mxu2 }
 0x1b6   : > { %3631 = vst [vmem:[#allocation7_spill] sm:$0xff] %v2544_v37  ;;  %v949_v39 = vpack.c.bf16 %v2544_v37, %v2544_v37 }
 0x1b7   : > { %v2548_v54 = vpop.f32.mrf.mxu1 }
 0x1b8   : > { %1078 = vst.msk [vmem:[%s2271_s5 + $0x13c] sm:$0xf] %vm998_vm0, %v949_v39  ;;  %v587_v35 = vpop.f32.mrf.mxu0  ;;  %v917_v43 = vpack.c.bf16 %v2548_v54, %v2548_v54 }
 0x1b9   : > { %v885_v45 = vpack.c.bf16 %v587_v35, %v587_v35  ;;  %v1157_v46 = vsel %vm1127_vm1, %v587_v35, 0.0  ;;  %v1404_v8 = vmul.f32 %v587_v35, %v587_v35 }
 0x1ba   : > { %v1158_v55 = vadd.f32 %v1157_v46, %v1156_v26  ;;  %1046 = vst.msk [vmem:[%s2271_s5 + $0xbc] sm:$0xf] %vm998_vm0, %v917_v43 }
 0x1bb   : > { %1014 = vst.msk [vmem:[%s2271_s5 + $0x3c] sm:$0xf] %vm998_vm0, %v885_v45  ;;  %v1546_v2 = vsel %vm1127_vm1, %v1404_v8, 0.0  ;;  %v492_v8 = vpop.trf.xlu1 }
 0x1bc   : > { %v1547_v18 = vadd.f32 %v1546_v2, %v1545_v53  ;;  %704 = vmatmul.bf16.gmra.mxu1 %v492_v8 }
 0x1bd   : > { %v2560_v41 = vpop.f32.mrf.mxu2 }
 0x1be   : > { %3632 = vst [vmem:[#allocation8_spill] sm:$0xff] %v2560_v41  ;;  %v950_v62 = vpack.c.bf16 %v2560_v41, %v2560_v41 }
 0x1bf   : > { %v2564_v3 = vpop.f32.mrf.mxu1 }
 0x1c0   : > { %1079 = vst.msk [vmem:[%s2271_s5 + $0x140] sm:$0xf] %vm998_vm0, %v950_v62  ;;  %v590_v0 = vpop.f32.mrf.mxu0  ;;  %v918_v1 = vpack.c.bf16 %v2564_v3, %v2564_v3 }
 0x1c1   : > { %v886_v23 = vpack.c.bf16 %v590_v0, %v590_v0  ;;  %v1159_v59 = vsel %vm1127_vm1, %v590_v0, 0.0  ;;  %v1405_v20 = vmul.f32 %v590_v0, %v590_v0 }
 0x1c2   : > { %v1160_v60 = vadd.f32 %v1159_v59, %v1158_v55  ;;  %1047 = vst.msk [vmem:[%s2271_s5 + $0xc0] sm:$0xf] %vm998_vm0, %v918_v1 }
 0x1c3   : > { %1015 = vst.msk [vmem:[%s2271_s5 + $0x40] sm:$0xf] %vm998_vm0, %v886_v23  ;;  %v1548_v22 = vsel %vm1127_vm1, %v1405_v20, 0.0  ;;  %829 = vmatmul.bf16.gmra.mxu3 %v2300_v27 }
 0x1c4   : > { %v1549_v5 = vadd.f32 %v1548_v22, %v1547_v18 }
 0x1c5   : > { %v2577_v29 = vpop.f32.mrf.mxu2 }
 0x1c6   : > { %3633 = vst [vmem:[#allocation9_spill] sm:$0xff] %v2577_v29  ;;  %v951_v26 = vpack.c.bf16 %v2577_v29, %v2577_v29  ;;  %v2581_v30 = vpop.f32.mrf.mxu3 }
 0x1c7   : > { %3634 = vst [vmem:[#allocation10_spill] sm:$0xff] %v2581_v30  ;;  %v966_v61 = vpack.c.bf16 %v2581_v30, %v2581_v30  ;;  %v2585_v53 = vpop.f32.mrf.mxu1 }
 0x1c8   : > { %1080 = vst.msk [vmem:[%s2271_s5 + $0x144] sm:$0xf] %vm998_vm0, %v951_v26  ;;  %v592_v39 = vpop.f32.mrf.mxu0  ;;  %v919_v27 = vpack.c.bf16 %v2585_v53, %v2585_v53 }
 0x1c9   : > { %1095 = vst.msk [vmem:[%s2271_s5 + $0x180] sm:$0xf] %vm998_vm0, %v966_v61  ;;  %v887_v35 = vpack.c.bf16 %v592_v39, %v592_v39  ;;  %v1161_v43 = vsel %vm1127_vm1, %v592_v39, 0.0  ;;  %v1406_v45 = vmul.f32 %v592_v39, %v592_v39 }
 0x1ca   : > { %v1162_v46 = vadd.f32 %v1161_v43, %v1160_v60  ;;  %1048 = vst.msk [vmem:[%s2271_s5 + $0xc4] sm:$0xf] %vm998_vm0, %v919_v27 }
 0x1cb   : > { %1016 = vst.msk [vmem:[%s2271_s5 + $0x44] sm:$0xf] %vm998_vm0, %v887_v35  ;;  %v1550_v55 = vsel %vm1127_vm1, %v1406_v45, 0.0 }
 0x1cc   : > { %v1551_v2 = vadd.f32 %v1550_v55, %v1549_v5 }
 0x1cd   : > { %v2599_v18 = vpop.f32.mrf.mxu2 }
 0x1ce   : > { %3635 = vst [vmem:[#allocation11_spill] sm:$0xff] %v2599_v18  ;;  %v952_v62 = vpack.c.bf16 %v2599_v18, %v2599_v18  ;;  %v2603_v0 = vpop.f32.mrf.mxu3 }
 0x1cf   : > { %3636 = vst [vmem:[#allocation12_spill] sm:$0xff] %v2603_v0  ;;  %v967_v1 = vpack.c.bf16 %v2603_v0, %v2603_v0  ;;  %v2607_v23 = vpop.f32.mrf.mxu1 }
 0x1d0   : > { %1081 = vst.msk [vmem:[%s2271_s5 + $0x148] sm:$0xf] %vm998_vm0, %v952_v62  ;;  %v595_v59 = vpop.f32.mrf.mxu0  ;;  %v920_v20 = vpack.c.bf16 %v2607_v23, %v2607_v23 }
 0x1d1   : > { %1096 = vst.msk [vmem:[%s2271_s5 + $0x184] sm:$0xf] %vm998_vm0, %v967_v1  ;;  %v888_v60 = vpack.c.bf16 %v595_v59, %v595_v59  ;;  %v1163_v22 = vsel %vm1127_vm1, %v595_v59, 0.0  ;;  %v1407_v5 = vmul.f32 %v595_v59, %v595_v59 }
 0x1d2   : > { %v1164_v26 = vadd.f32 %v1163_v22, %v1162_v46  ;;  %1049 = vst.msk [vmem:[%s2271_s5 + $0xc8] sm:$0xf] %vm998_vm0, %v920_v20 }
 0x1d3   : > { %1017 = vst.msk [vmem:[%s2271_s5 + $0x48] sm:$0xf] %vm998_vm0, %v888_v60  ;;  %v1552_v61 = vsel %vm1127_vm1, %v1407_v5, 0.0  ;;  %834 = vmatmul.bf16.gmra.mxu3 %v2338_v58 }
 0x1d4   : > { %v1553_v39 = vadd.f32 %v1552_v61, %v1551_v2 }
 0x1d5   : > { %v2622_v27 = vpop.f32.mrf.mxu2 }
 0x1d6   : > { %3637 = vst [vmem:[#allocation13_spill] sm:$0xff] %v2622_v27  ;;  %v953_v35 = vpack.c.bf16 %v2622_v27, %v2622_v27  ;;  %v2626_v43 = vpop.f32.mrf.mxu3 }
 0x1d7   : > { %3638 = vst [vmem:[#allocation14_spill] sm:$0xff] %v2626_v43  ;;  %v968_v45 = vpack.c.bf16 %v2626_v43, %v2626_v43  ;;  %v2630_v46 = vpop.f32.mrf.mxu1 }
 0x1d8   : > { %1082 = vst.msk [vmem:[%s2271_s5 + $0x14c] sm:$0xf] %vm998_vm0, %v953_v35  ;;  %v597_v8 = vpop.f32.mrf.mxu0  ;;  %v921_v58 = vpack.c.bf16 %v2630_v46, %v2630_v46 }
 0x1d9   : > { %1097 = vst.msk [vmem:[%s2271_s5 + $0x188] sm:$0xf] %vm998_vm0, %v968_v45  ;;  %v889_v55 = vpack.c.bf16 %v597_v8, %v597_v8  ;;  %v1165_v2 = vsel %vm1127_vm1, %v597_v8, 0.0  ;;  %v1408_v62 = vmul.f32 %v597_v8, %v597_v8 }
 0x1da   : > { %v1166_v1 = vadd.f32 %v1165_v2, %v1164_v26  ;;  %1050 = vst.msk [vmem:[%s2271_s5 + $0xcc] sm:$0xf] %vm998_vm0, %v921_v58 }
 0x1db   : > { %1018 = vst.msk [vmem:[%s2271_s5 + $0x4c] sm:$0xf] %vm998_vm0, %v889_v55  ;;  %v1554_v59 = vsel %vm1127_vm1, %v1408_v62, 0.0 }
 0x1dc   : > { %v1555_v20 = vadd.f32 %v1554_v59, %v1553_v39 }
 0x1dd   : > { %v2644_v60 = vpop.f32.mrf.mxu2 }
 0x1de   : > { %3639 = vst [vmem:[#allocation15_spill] sm:$0xff] %v2644_v60  ;;  %v954_v22 = vpack.c.bf16 %v2644_v60, %v2644_v60  ;;  %v2648_v5 = vpop.f32.mrf.mxu3 }
 0x1df   : > { %3640 = vst [vmem:[#allocation16_spill] sm:$0xff] %v2648_v5  ;;  %v969_v61 = vpack.c.bf16 %v2648_v5, %v2648_v5  ;;  %v2652_v26 = vpop.f32.mrf.mxu1 }
 0x1e0   : > { %1083 = vst.msk [vmem:[%s2271_s5 + $0x150] sm:$0xf] %vm998_vm0, %v954_v22  ;;  %v600_v35 = vpop.f32.mrf.mxu0  ;;  %v922_v45 = vpack.c.bf16 %v2652_v26, %v2652_v26 }
 0x1e1   : > { %1098 = vst.msk [vmem:[%s2271_s5 + $0x18c] sm:$0xf] %vm998_vm0, %v969_v61  ;;  %v890_v39 = vpack.c.bf16 %v600_v35, %v600_v35  ;;  %v1167_v8 = vsel %vm1127_vm1, %v600_v35, 0.0  ;;  %v1409_v58 = vmul.f32 %v600_v35, %v600_v35 }
 0x1e2   : > { %v2661_v55 = vadd.f32 %v1167_v8, %v1166_v1  ;;  %1051 = vst.msk [vmem:[%s2271_s5 + $0xd0] sm:$0xf] %vm998_vm0, %v922_v45 }
 0x1e3   : > { %1019 = vst.msk [vmem:[%s2271_s5 + $0x50] sm:$0xf] %vm998_vm0, %v890_v39  ;;  %v1556_v2 = vsel %vm1127_vm1, %v1409_v58, 0.0  ;;  %839 = vmatmul.bf16.gmra.mxu3 %v2375_v32 }
 0x1e4   : > { %v2669_v62 = vadd.f32 %v1556_v2, %v1555_v20 }
 0x1e5   : > { %v2671_v59 = vpop.f32.mrf.mxu2 }
 0x1e6   : > { %3641 = vst [vmem:[#allocation17_spill] sm:$0xff] %v2671_v59  ;;  %v955_v22 = vpack.c.bf16 %v2671_v59, %v2671_v59  ;;  %v2675_v1 = vpop.f32.mrf.mxu3 }
 0x1e7   : > { %3642 = vst [vmem:[#allocation18_spill] sm:$0xff] %v2675_v1  ;;  %v970_v61 = vpack.c.bf16 %v2675_v1, %v2675_v1  ;;  %v2679_v35 = vpop.f32.mrf.mxu1 }
 0x1e8   : > { %1084 = vst.msk [vmem:[%s2271_s5 + $0x154] sm:$0xf] %vm998_vm0, %v955_v22  ;;  %v2683_v45 = vpop.f32.mrf.mxu0  ;;  %v923_v32 = vpack.c.bf16 %v2679_v35, %v2679_v35 }
 0x1e9   : > { %1099 = vst.msk [vmem:[%s2271_s5 + $0x190] sm:$0xf] %vm998_vm0, %v970_v61  ;;  %v891_v20 = vpack.c.bf16 %v2683_v45, %v2683_v45 }
 0x1ea   : > { %1052 = vst.msk [vmem:[%s2271_s5 + $0xd4] sm:$0xf] %vm998_vm0, %v923_v32 }
 0x1eb   : > { %1020 = vst.msk [vmem:[%s2271_s5 + $0x54] sm:$0xf] %vm998_vm0, %v891_v20 }
 0x1ed   : > { %v2695_v39 = vpop.f32.mrf.mxu2 }
 0x1ee   : > { %3643 = vst [vmem:[#allocation19_spill] sm:$0xff] %v2695_v39  ;;  %v956_v8 = vpack.c.bf16 %v2695_v39, %v2695_v39  ;;  %v2699_v58 = vpop.f32.mrf.mxu3 }
 0x1ef   : > { %3644 = vst [vmem:[#allocation20_spill] sm:$0xff] %v2699_v58  ;;  %v971_v2 = vpack.c.bf16 %v2699_v58, %v2699_v58  ;;  %v2703_v22 = vpop.f32.mrf.mxu1 }
 0x1f0   : > { %1085 = vst.msk [vmem:[%s2271_s5 + $0x158] sm:$0xf] %vm998_vm0, %v956_v8  ;;  %v2707_v61 = vpop.f32.mrf.mxu0  ;;  %v924_v32 = vpack.c.bf16 %v2703_v22, %v2703_v22 }
 0x1f1   : > { %1100 = vst.msk [vmem:[%s2271_s5 + $0x194] sm:$0xf] %vm998_vm0, %v971_v2  ;;  %v892_v20 = vpack.c.bf16 %v2707_v61, %v2707_v61 }
 0x1f2   : > { %1053 = vst.msk [vmem:[%s2271_s5 + $0xd8] sm:$0xf] %vm998_vm0, %v924_v32 }
 0x1f3   : > { %1021 = vst.msk [vmem:[%s2271_s5 + $0x58] sm:$0xf] %vm998_vm0, %v892_v20  ;;  %844 = vmatmul.bf16.gmra.mxu3 %v2412_v7 }
 0x1f5   : > { %v2720_v8 = vpop.f32.mrf.mxu2 }
 0x1f6   : > { %3645 = vst [vmem:[#allocation21_spill] sm:$0xff] %v2720_v8  ;;  %v957_v58 = vpack.c.bf16 %v2720_v8, %v2720_v8  ;;  %v2724_v1 = vpop.f32.mrf.mxu3 }
 0x1f7   : > { %3646 = vst [vmem:[#allocation22_spill] sm:$0xff] %v2724_v1  ;;  %v972_v2 = vpack.c.bf16 %v2724_v1, %v2724_v1  ;;  %v2728_v5 = vpop.f32.mrf.mxu1 }
 0x1f8   : > { %1086 = vst.msk [vmem:[%s2271_s5 + $0x15c] sm:$0xf] %vm998_vm0, %v957_v58  ;;  %v2732_v32 = vpop.f32.mrf.mxu0  ;;  %v925_v7 = vpack.c.bf16 %v2728_v5, %v2728_v5 }
 0x1f9   : > { %1101 = vst.msk [vmem:[%s2271_s5 + $0x198] sm:$0xf] %vm998_vm0, %v972_v2  ;;  %v893_v20 = vpack.c.bf16 %v2732_v32, %v2732_v32 }
 0x1fa   : > { %1054 = vst.msk [vmem:[%s2271_s5 + $0xdc] sm:$0xf] %vm998_vm0, %v925_v7 }
 0x1fb   : > { %1022 = vst.msk [vmem:[%s2271_s5 + $0x5c] sm:$0xf] %vm998_vm0, %v893_v20 }
 0x1fd   : > { %v2744_v1 = vpop.f32.mrf.mxu2 }
 0x1fe   : > { %3647 = vst [vmem:[#allocation23_spill] sm:$0xff] %v2744_v1  ;;  %v958_v58 = vpack.c.bf16 %v2744_v1, %v2744_v1  ;;  %v2748_v43 = vpop.f32.mrf.mxu3 }
 0x1ff   : > { %3648 = vst [vmem:[#allocation24_spill] sm:$0xff] %v2748_v43  ;;  %v973_v0 = vpack.c.bf16 %v2748_v43, %v2748_v43  ;;  %v2752_v30 = vpop.f32.mrf.mxu1  ;;  %v516_v43 = vpop.trf.xlu2 }
 0x200   : > { %1087 = vst.msk [vmem:[%s2271_s5 + $0x160] sm:$0xf] %vm998_vm0, %v958_v58  ;;  %v2756_v2 = vpop.f32.mrf.mxu0  ;;  %v926_v7 = vpack.c.bf16 %v2752_v30, %v2752_v30  ;;  %784 = vmatmul.bf16.gmra.mxu2 %v516_v43 }
 0x201   : > { %1102 = vst.msk [vmem:[%s2271_s5 + $0x19c] sm:$0xf] %vm998_vm0, %v973_v0  ;;  %v894_v20 = vpack.c.bf16 %v2756_v2, %v2756_v2  ;;  %v1175_v28 = vsel %vm1127_vm1, %v2756_v2, 0.0 }
 0x202   : > { %1055 = vst.msk [vmem:[%s2271_s5 + $0xe0] sm:$0xf] %vm998_vm0, %v926_v7 }
 0x203   : > { %1023 = vst.msk [vmem:[%s2271_s5 + $0x60] sm:$0xf] %vm998_vm0, %v894_v20  ;;  %849 = vmatmul.bf16.gmra.mxu3 %v2449_v44 }
 0x205   : > { %v2769_v58 = vpop.f32.mrf.mxu2 }
 0x206   : > { %3649 = vst [vmem:[#allocation25_spill] sm:$0xff] %v2769_v58  ;;  %v959_v1 = vpack.c.bf16 %v2769_v58, %v2769_v58  ;;  %v2773_v0 = vpop.f32.mrf.mxu3 }
 0x207   : > { %3650 = vst [vmem:[#allocation26_spill] sm:$0xff] %v2773_v0  ;;  %v974_v8 = vpack.c.bf16 %v2773_v0, %v2773_v0  ;;  %v2777_v39 = vpop.f32.mrf.mxu1 }
 0x208   : > { %1088 = vst.msk [vmem:[%s2271_s5 + $0x164] sm:$0xf] %vm998_vm0, %v959_v1  ;;  %v2781_v7 = vpop.f32.mrf.mxu0  ;;  %v927_v44 = vpack.c.bf16 %v2777_v39, %v2777_v39 }
 0x209   : > { %1103 = vst.msk [vmem:[%s2271_s5 + $0x1a0] sm:$0xf] %vm998_vm0, %v974_v8  ;;  %v895_v43 = vpack.c.bf16 %v2781_v7, %v2781_v7 }
 0x20a   : > { %1056 = vst.msk [vmem:[%s2271_s5 + $0xe4] sm:$0xf] %vm998_vm0, %v927_v44 }
 0x20b   : > { %1024 = vst.msk [vmem:[%s2271_s5 + $0x64] sm:$0xf] %vm998_vm0, %v895_v43 }
 0x20d   : > { %v2793_v20 = vpop.f32.mrf.mxu2 }
 0x20e   : > { %3651 = vst [vmem:[#allocation27_spill] sm:$0xff] %v2793_v20  ;;  %v960_v1 = vpack.c.bf16 %v2793_v20, %v2793_v20  ;;  %v2797_v0 = vpop.f32.mrf.mxu3 }
 0x20f   : > { %3652 = vst [vmem:[#allocation28_spill] sm:$0xff] %v2797_v0  ;;  %v975_v58 = vpack.c.bf16 %v2797_v0, %v2797_v0  ;;  %v2801_v59 = vpop.f32.mrf.mxu1 }
 0x210   : > { %1089 = vst.msk [vmem:[%s2271_s5 + $0x168] sm:$0xf] %vm998_vm0, %v960_v1  ;;  %v2805_v8 = vpop.f32.mrf.mxu0  ;;  %v928_v44 = vpack.c.bf16 %v2801_v59, %v2801_v59 }
 0x211   : > { %1104 = vst.msk [vmem:[%s2271_s5 + $0x1a4] sm:$0xf] %vm998_vm0, %v975_v58  ;;  %v896_v43 = vpack.c.bf16 %v2805_v8, %v2805_v8 }
 0x212   : > { %1057 = vst.msk [vmem:[%s2271_s5 + $0xe8] sm:$0xf] %vm998_vm0, %v928_v44 }
 0x213   : > { %1025 = vst.msk [vmem:[%s2271_s5 + $0x68] sm:$0xf] %vm998_vm0, %v896_v43  ;;  %854 = vmatmul.bf16.gmra.mxu3 %v2486_v24 }
 0x215   : > { %v2818_v1 = vpop.f32.mrf.mxu2 }
 0x216   : > { %3653 = vst [vmem:[#allocation29_spill] sm:$0xff] %v2818_v1  ;;  %v961_v0 = vpack.c.bf16 %v2818_v1, %v2818_v1  ;;  %v2822_v20 = vpop.f32.mrf.mxu3 }
 0x217   : > { %3654 = vst [vmem:[#allocation30_spill] sm:$0xff] %v2822_v20  ;;  %v976_v58 = vpack.c.bf16 %v2822_v20, %v2822_v20  ;;  %v2826_v60 = vpop.f32.mrf.mxu1 }
 0x218   : > { %1090 = vst.msk [vmem:[%s2271_s5 + $0x16c] sm:$0xf] %vm998_vm0, %v961_v0  ;;  %v617_v44 = vpop.f32.mrf.mxu0  ;;  %v929_v24 = vpack.c.bf16 %v2826_v60, %v2826_v60 }
 0x219   : > { %1105 = vst.msk [vmem:[%s2271_s5 + $0x1a8] sm:$0xf] %vm998_vm0, %v976_v58  ;;  %v897_v43 = vpack.c.bf16 %v617_v44, %v617_v44 }
 0x21a   : > { %1058 = vst.msk [vmem:[%s2271_s5 + $0xec] sm:$0xf] %vm998_vm0, %v929_v24 }
 0x21b   : > { %1026 = vst.msk [vmem:[%s2271_s5 + $0x6c] sm:$0xf] %vm998_vm0, %v897_v43  ;;  %v1410_v43 = vmul.f32 %v2683_v45, %v2683_v45 }
 0x21d   : > { %v2838_v1 = vpop.f32.mrf.mxu2  ;;  %v1558_v41 = vsel %vm1127_vm1, %v1410_v43, 0.0 }
 0x21e   : > { %3655 = vst [vmem:[#allocation31_spill] sm:$0xff] %v2838_v1  ;;  %v962_v20 = vpack.c.bf16 %v2838_v1, %v2838_v1  ;;  %v2842_v0 = vpop.f32.mrf.mxu3  ;;  %v1169_v1 = vsel %vm1127_vm1, %v2683_v45, 0.0 }
 0x21f   : > { %3656 = vst [vmem:[#allocation32_spill] sm:$0xff] %v2842_v0  ;;  %v977_v27 = vpack.c.bf16 %v2842_v0, %v2842_v0  ;;  %v2846_v18 = vpop.f32.mrf.mxu1  ;;  %v1411_v0 = vmul.f32 %v2707_v61, %v2707_v61  ;;  %v1170_v37 = vadd.f32 %v1169_v1, %v2661_v55  ;;  %v1559_v55 = vadd.f32 %v1558_v41, %v2669_v62 }
 0x220   : > { %1091 = vst.msk [vmem:[%s2271_s5 + $0x170] sm:$0xf] %vm998_vm0, %v962_v20  ;;  %v620_v58 = vpop.f32.mrf.mxu0  ;;  %v930_v24 = vpack.c.bf16 %v2846_v18, %v2846_v18  ;;  %v1177_v41 = vsel %vm1127_vm1, %v2781_v7, 0.0  ;;  %v1415_v62 = vmul.f32 %v2805_v8, %v2805_v8 }
 0x221   : > { %1106 = vst.msk [vmem:[%s2271_s5 + $0x1ac] sm:$0xf] %vm998_vm0, %v977_v27  ;;  %v898_v29 = vpack.c.bf16 %v620_v58, %v620_v58  ;;  %v1171_v27 = vsel %vm1127_vm1, %v2707_v61, 0.0  ;;  %v1413_v61 = vmul.f32 %v2756_v2, %v2756_v2 }
 0x222   : > { %1059 = vst.msk [vmem:[%s2271_s5 + $0xf0] sm:$0xf] %vm998_vm0, %v930_v24  ;;  %v1412_v24 = vmul.f32 %v2732_v32, %v2732_v32  ;;  %v1172_v1 = vadd.f32 %v1171_v27, %v1170_v37 }
 0x223   : > { %1027 = vst.msk [vmem:[%s2271_s5 + $0x70] sm:$0xf] %vm998_vm0, %v898_v29  ;;  %859 = vmatmul.bf16.gmra.mxu3 %v2522_v42  ;;  %v1560_v42 = vsel %vm1127_vm1, %v1411_v0, 0.0  ;;  %v1173_v29 = vsel %vm1127_vm1, %v2732_v32, 0.0  ;;  %v1564_v37 = vsel %vm1127_vm1, %v1413_v61, 0.0 }
 0x224   : > { %v1562_v32 = vsel %vm1127_vm1, %v1412_v24, 0.0  ;;  %v1174_v48 = vadd.f32 %v1173_v29, %v1172_v1  ;;  %v1416_v29 = vmul.f32 %v617_v44, %v617_v44  ;;  %v1181_v1 = vsel %vm1127_vm1, %v617_v44, 0.0 }
 0x225   : > { %v2865_v20 = vpop.f32.mrf.mxu2 }
 0x226   : > { %3657 = vst [vmem:[#allocation33_spill] sm:$0xff] %v2865_v20  ;;  %v963_v45 = vpack.c.bf16 %v2865_v20, %v2865_v20  ;;  %v2875_v13 = vpop.f32.mrf.mxu3  ;;  %v1176_v27 = vadd.f32 %v1175_v28, %v1174_v48 }
 0x227   : > { %3658 = vst [vmem:[#allocation34_spill] sm:$0xff] %v2875_v13  ;;  %v978_v43 = vpack.c.bf16 %v2875_v13, %v2875_v13  ;;  %v2884_v50 = vpop.f32.mrf.mxu1  ;;  %v1414_v13 = vmul.f32 %v2781_v7, %v2781_v7  ;;  %v1568_v7 = vsel %vm1127_vm1, %v1415_v62, 0.0 }
 0x228   : > { %1092 = vst.msk [vmem:[%s2271_s5 + $0x174] sm:$0xf] %vm998_vm0, %v963_v45  ;;  %v622_v20 = vpop.f32.mrf.mxu0  ;;  %v931_v0 = vpack.c.bf16 %v2884_v50, %v2884_v50  ;;  %v1561_v45 = vadd.f32 %v1560_v42, %v1559_v55  ;;  %v1179_v42 = vsel %vm1127_vm1, %v2805_v8, 0.0  ;;  %v1178_v55 = vadd.f32 %v1177_v41, %v1176_v27 }
 0x229   : > { %1107 = vst.msk [vmem:[%s2271_s5 + $0x1b0] sm:$0xf] %vm998_vm0, %v978_v43  ;;  %v899_v63 = vpack.c.bf16 %v622_v20, %v622_v20  ;;  %v1566_v24 = vsel %vm1127_vm1, %v1414_v13, 0.0  ;;  %v1183_v8 = vsel %vm1127_vm1, %v620_v58, 0.0  ;;  %v1185_v44 = vsel %vm1127_vm1, %v622_v20, 0.0 }
 0x22a   : > { %1060 = vst.msk [vmem:[%s2271_s5 + $0xf4] sm:$0xf] %vm998_vm0, %v931_v0  ;;  %v1563_v2 = vadd.f32 %v1562_v32, %v1561_v45  ;;  %v1417_v0 = vmul.f32 %v620_v58, %v620_v58  ;;  %v1180_v28 = vadd.f32 %v1179_v42, %v1178_v55  ;;  %v1570_v32 = vsel %vm1127_vm1, %v1416_v29, 0.0 }
 0x22b   : > { %1028 = vst.msk [vmem:[%s2271_s5 + $0x74] sm:$0xf] %vm998_vm0, %v899_v63  ;;  %v1418_v45 = vmul.f32 %v622_v20, %v622_v20 }
 0x22c   : > { %v1565_v43 = vadd.f32 %v1564_v37, %v1563_v2  ;;  %v1182_v62 = vadd.f32 %v1181_v1, %v1180_v28  ;;  %v1572_v2 = vsel %vm1127_vm1, %v1417_v0, 0.0  ;;  %v1421_v28 = vmul.f32 %v2273_v12, %v2273_v12 }
 0x22d   : > { %v1574_v29 = vsel %vm1127_vm1, %v1418_v45, 0.0 }
 0x22e   : > { %v2910_v61 = vpop.f32.mrf.mxu3  ;;  %v1567_v63 = vadd.f32 %v1566_v24, %v1565_v43  ;;  %v1184_v42 = vadd.f32 %v1183_v8, %v1182_v62  ;;  %v1422_v62 = vmul.f32 %v2289_v21, %v2289_v21 }
 0x22f   : > { %v979_v48 = vpack.c.bf16 %v2910_v61, %v2910_v61 }
 0x230   : > { %v625_v13 = vpop.f32.mrf.mxu0  ;;  %v1569_v41 = vadd.f32 %v1568_v7, %v1567_v63  ;;  %v1186_v55 = vadd.f32 %v1185_v44, %v1184_v42  ;;  %v1193_v42 = vsel %vm1127_vm1, %v2289_v21, 0.0 }
 0x231   : > { %1108 = vst.msk [vmem:[%s2271_s5 + $0x1b4] sm:$0xf] %vm998_vm0, %v979_v48  ;;  %v900_v37 = vpack.c.bf16 %v625_v13, %v625_v13  ;;  %v1419_v27 = vmul.f32 %v625_v13, %v625_v13  ;;  %v1187_v58 = vsel %vm1127_vm1, %v625_v13, 0.0 }
 0x232   : > { %v1571_v24 = vadd.f32 %v1570_v32, %v1569_v41  ;;  %v1188_v0 = vadd.f32 %v1187_v58, %v1186_v55  ;;  %v1191_v41 = vsel %vm1127_vm1, %v2273_v12, 0.0  ;;  %v1582_v55 = vsel %vm1127_vm1, %v1422_v62, 0.0 }
 0x233   : > { %1029 = vst.msk [vmem:[%s2271_s5 + $0x78] sm:$0xf] %vm998_vm0, %v900_v37  ;;  %v1576_v7 = vsel %vm1127_vm1, %v1419_v27, 0.0 }
 0x234   : > { %v1573_v43 = vadd.f32 %v1572_v2, %v1571_v24  ;;  %v1580_v24 = vsel %vm1127_vm1, %v1421_v28, 0.0  ;;  %v1197_v28 = vsel %vm1127_vm1, %v2328_v51, 0.0 }
 0x236   : > { %v2926_v48 = vpop.f32.mrf.mxu3  ;;  %v1575_v1 = vadd.f32 %v1574_v29, %v1573_v43  ;;  %v1423_v29 = vmul.f32 %v2310_v11, %v2310_v11 }
 0x237   : > { %v980_v20 = vpack.c.bf16 %v2926_v48, %v2926_v48 }
 0x238   : > { %v627_v63 = vpop.f32.mrf.mxu0  ;;  %v1577_v45 = vadd.f32 %v1576_v7, %v1575_v1  ;;  %v1195_v7 = vsel %vm1127_vm1, %v2310_v11, 0.0 }
 0x239   : > { %1109 = vst.msk [vmem:[%s2271_s5 + $0x1b8] sm:$0xf] %vm998_vm0, %v980_v20  ;;  %v901_v32 = vpack.c.bf16 %v627_v63, %v627_v63  ;;  %v1189_v13 = vsel %vm1127_vm1, %v627_v63, 0.0  ;;  %v1420_v8 = vmul.f32 %v627_v63, %v627_v63  ;;  %v1424_v20 = vmul.f32 %v2328_v51, %v2328_v51 }
 0x23a   : > { %v1190_v37 = vadd.f32 %v1189_v13, %v1188_v0  ;;  %v1584_v63 = vsel %vm1127_vm1, %v1423_v29, 0.0  ;;  %v540_v13 = vpop.trf.xlu0 }
 0x23b   : > { %1030 = vst.msk [vmem:[%s2271_s5 + $0x7c] sm:$0xf] %vm998_vm0, %v901_v32  ;;  %v1578_v2 = vsel %vm1127_vm1, %v1420_v8, 0.0  ;;  %v1425_v32 = vmul.f32 %v2347_v10, %v2347_v10  ;;  %864 = vmatmul.bf16.gmra.mxu3 %v540_v13  ;;  %v1207_v13 = vsel %vm1127_vm1, %v2421_v19, 0.0 }
 0x23c   : > { %v1192_v44 = vadd.f32 %v1191_v41, %v1190_v37  ;;  %v1579_v27 = vadd.f32 %v1578_v2, %v1577_v45  ;;  %v1586_v45 = vsel %vm1127_vm1, %v1424_v20, 0.0  ;;  %v1199_v37 = vsel %vm1127_vm1, %v2347_v10, 0.0  ;;  %v2983_v20 = vpop.f32.mrf.mxu1 }
 0x23d   : > { %v1426_v41 = vmul.f32 %v2365_v25, %v2365_v25  ;;  %v1588_v51 = vsel %vm1127_vm1, %v1425_v32, 0.0 }
 0x23e   : > { %v1194_v58 = vadd.f32 %v1193_v42, %v1192_v44  ;;  %v1581_v12 = vadd.f32 %v1580_v24, %v1579_v27  ;;  %v2948_v43 = vpop.f32.mrf.mxu3  ;;  %v1201_v44 = vsel %vm1127_vm1, %v2365_v25, 0.0  ;;  %v1427_v27 = vmul.f32 %v2384_v40, %v2384_v40 }
 0x23f   : > { %v981_v1 = vpack.c.bf16 %v2948_v43, %v2948_v43  ;;  %v1590_v10 = vsel %vm1127_vm1, %v1426_v41, 0.0  ;;  %v1431_v41 = vmul.f32 %v2458_v17, %v2458_v17 }
 0x240   : > { %v1196_v0 = vadd.f32 %v1195_v7, %v1194_v58  ;;  %v1583_v21 = vadd.f32 %v1582_v55, %v1581_v12  ;;  %v1203_v58 = vsel %vm1127_vm1, %v2384_v40, 0.0  ;;  %v1428_v12 = vmul.f32 %v2402_v57, %v2402_v57 }
 0x241   : > { %1110 = vst.msk [vmem:[%s2271_s5 + $0x1bc] sm:$0xf] %vm998_vm0, %v981_v1  ;;  %v1592_v1 = vsel %vm1127_vm1, %v1427_v27, 0.0  ;;  %v932_v40 = vpack.c.bf16 %v2983_v20, %v2983_v20  ;;  %v1432_v27 = vmul.f32 %v2476_v15, %v2476_v15 }
 0x242   : > { %v1198_v11 = vadd.f32 %v1197_v28, %v1196_v0  ;;  %v1585_v8 = vadd.f32 %v1584_v63, %v1583_v21  ;;  %v1205_v0 = vsel %vm1127_vm1, %v2402_v57, 0.0  ;;  %v1429_v21 = vmul.f32 %v2421_v19, %v2421_v19 }
 0x243   : > { %v1594_v32 = vsel %vm1127_vm1, %v1428_v12, 0.0  ;;  %1061 = vst.msk [vmem:[%s2271_s5 + $0xf8] sm:$0xf] %vm998_vm0, %v932_v40  ;;  %v1213_v12 = vsel %vm1127_vm1, %v2476_v15, 0.0 }
 0x244   : > { %v1200_v62 = vadd.f32 %v1199_v37, %v1198_v11  ;;  %v1587_v2 = vadd.f32 %v1586_v45, %v1585_v8  ;;  %v1430_v11 = vmul.f32 %v2439_v36, %v2439_v36  ;;  %v1596_v45 = vsel %vm1127_vm1, %v1429_v21, 0.0 }
 0x245   : > { %v1209_v37 = vsel %vm1127_vm1, %v2439_v36, 0.0  ;;  %v1434_v21 = vmul.f32 %v2513_v52, %v2513_v52 }
 0x246   : > { %v1202_v24 = vadd.f32 %v1201_v44, %v1200_v62  ;;  %v1589_v42 = vadd.f32 %v1588_v51, %v1587_v2  ;;  %v2974_v29 = vpop.f32.mrf.mxu3  ;;  %v1598_v19 = vsel %vm1127_vm1, %v1430_v11, 0.0  ;;  %v1211_v44 = vsel %vm1127_vm1, %v2458_v17, 0.0 }
 0x247   : > { %v982_v55 = vpack.c.bf16 %v2974_v29, %v2974_v29 }
 0x248   : > { %v1204_v25 = vadd.f32 %v1203_v58, %v1202_v24  ;;  %v1591_v7 = vadd.f32 %v1590_v10, %v1589_v42  ;;  %v3015_v10 = vpop.f32.mrf.mxu1  ;;  %v1600_v58 = vsel %vm1127_vm1, %v1431_v41, 0.0 }
 0x249   : > { %1111 = vst.msk [vmem:[%s2271_s5 + $0x1c0] sm:$0xf] %vm998_vm0, %v982_v55  ;;  %v1433_v55 = vmul.f32 %v2495_v33, %v2495_v33  ;;  %v933_v17 = vpack.c.bf16 %v3015_v10, %v3015_v10 }
 0x24a   : > { %v1206_v63 = vadd.f32 %v1205_v0, %v1204_v25  ;;  %v1593_v28 = vadd.f32 %v1592_v1, %v1591_v7  ;;  %v1602_v1 = vsel %vm1127_vm1, %v1432_v27, 0.0  ;;  %v1215_v0 = vsel %vm1127_vm1, %v2495_v33, 0.0 }
 0x24b   : > { %1062 = vst.msk [vmem:[%s2271_s5 + $0xfc] sm:$0xf] %vm998_vm0, %v933_v17  ;;  %v1606_v33 = vsel %vm1127_vm1, %v1434_v21, 0.0 }
 0x24c   : > { %v1208_v57 = vadd.f32 %v1207_v13, %v1206_v63  ;;  %v1595_v8 = vadd.f32 %v1594_v32, %v1593_v28  ;;  %v1604_v63 = vsel %vm1127_vm1, %v1433_v55, 0.0  ;;  %v1217_v28 = vsel %vm1127_vm1, %v2513_v52, 0.0 }
 0x24d   : > { %v1435_v32 = vmul.f32 %v2531_v47, %v2531_v47  ;;  %v1439_v55 = vmul.f32 %v2607_v23, %v2607_v23 }
 0x24e   : > { %v1210_v62 = vadd.f32 %v1209_v37, %v1208_v57  ;;  %v1597_v2 = vadd.f32 %v1596_v45, %v1595_v8  ;;  %v3006_v51 = vpop.f32.mrf.mxu3  ;;  %v1219_v8 = vsel %vm1127_vm1, %v2531_v47, 0.0  ;;  %v1436_v45 = vmul.f32 %v2548_v54, %v2548_v54 }
 0x24f   : > { %v983_v24 = vpack.c.bf16 %v3006_v51, %v3006_v51 }
 0x250   : > { %v1212_v36 = vadd.f32 %v1211_v44, %v1210_v62  ;;  %v1599_v42 = vadd.f32 %v1598_v19, %v1597_v2  ;;  %v1608_v62 = vsel %vm1127_vm1, %v1435_v32, 0.0  ;;  %v1221_v2 = vsel %vm1127_vm1, %v2548_v54, 0.0 }
 0x251   : > { %1112 = vst.msk [vmem:[%s2271_s5 + $0x1c4] sm:$0xf] %vm998_vm0, %v983_v24  ;;  %v1437_v19 = vmul.f32 %v2564_v3, %v2564_v3  ;;  %v1610_v27 = vsel %vm1127_vm1, %v1436_v45, 0.0  ;;  %v1223_v24 = vsel %vm1127_vm1, %v2564_v3, 0.0 }
 0x252   : > { %v1214_v25 = vadd.f32 %v1213_v12, %v1212_v36  ;;  %v1601_v7 = vadd.f32 %v1600_v58, %v1599_v42  ;;  %v1438_v36 = vmul.f32 %v2585_v53, %v2585_v53  ;;  %v1225_v12 = vsel %vm1127_vm1, %v2585_v53, 0.0 }
 0x253   : > { %v1612_v54 = vsel %vm1127_vm1, %v1437_v19, 0.0  ;;  %v1235_v19 = vsel %vm1127_vm1, %v2703_v22, 0.0 }
 0x254   : > { %v1216_v15 = vadd.f32 %v1215_v0, %v1214_v25  ;;  %v1603_v40 = vadd.f32 %v1602_v1, %v1601_v7  ;;  %v1614_v3 = vsel %vm1127_vm1, %v1438_v36, 0.0  ;;  %v1227_v1 = vsel %vm1127_vm1, %v2607_v23, 0.0 }
 0x255   : > { %v1440_v0 = vmul.f32 %v2630_v46, %v2630_v46  ;;  %v1237_v36 = vsel %vm1127_vm1, %v2728_v5, 0.0 }
 0x256   : > { %v1218_v13 = vadd.f32 %v1217_v28, %v1216_v15  ;;  %v1605_v11 = vadd.f32 %v1604_v63, %v1603_v40  ;;  %v3038_v57 = vpop.f32.mrf.mxu3  ;;  %v1616_v40 = vsel %vm1127_vm1, %v1439_v55, 0.0  ;;  %v1229_v63 = vsel %vm1127_vm1, %v2630_v46, 0.0 }
 0x257   : > { %v984_v37 = vpack.c.bf16 %v3038_v57, %v3038_v57  ;;  %v1441_v28 = vmul.f32 %v2652_v26, %v2652_v26  ;;  %v1446_v55 = vmul.f32 %v2777_v39, %v2777_v39 }
 0x258   : > { %v1220_v41 = vadd.f32 %v1219_v8, %v1218_v13  ;;  %v1607_v52 = vadd.f32 %v1606_v33, %v1605_v11  ;;  %v1618_v13 = vsel %vm1127_vm1, %v1440_v0, 0.0  ;;  %v1231_v11 = vsel %vm1127_vm1, %v2652_v26, 0.0 }
 0x259   : > { %1113 = vst.msk [vmem:[%s2271_s5 + $0x1c8] sm:$0xf] %vm998_vm0, %v984_v37  ;;  %v1442_v33 = vmul.f32 %v2679_v35, %v2679_v35  ;;  %v1620_v46 = vsel %vm1127_vm1, %v1441_v28, 0.0  ;;  %v1233_v37 = vsel %vm1127_vm1, %v2679_v35, 0.0 }
 0x25a   : > { %v1609_v44 = vadd.f32 %v1608_v62, %v1607_v52  ;;  %v1222_v47 = vadd.f32 %v1221_v2, %v1220_v41  ;;  %v1443_v41 = vmul.f32 %v2703_v22, %v2703_v22 }
 0x25b   : > { %v1622_v26 = vsel %vm1127_vm1, %v1442_v33, 0.0 }
 0x25c   : > { %v1224_v42 = vadd.f32 %v1223_v24, %v1222_v47  ;;  %v1611_v58 = vadd.f32 %v1610_v27, %v1609_v44  ;;  %v1444_v44 = vmul.f32 %v2728_v5, %v2728_v5  ;;  %v1624_v24 = vsel %vm1127_vm1, %v1443_v41, 0.0 }
 0x25d   : > { %v1249_v41 = vsel %vm1127_vm1, %v2884_v50, 0.0 }
 0x25e   : > { %v3064_v17 = vpop.f32.mrf.mxu3  ;;  %v1226_v25 = vadd.f32 %v1225_v12, %v1224_v42  ;;  %v1613_v7 = vadd.f32 %v1612_v54, %v1611_v58  ;;  %v1445_v42 = vmul.f32 %v2752_v30, %v2752_v30  ;;  %v1626_v54 = vsel %vm1127_vm1, %v1444_v44, 0.0 }
 0x25f   : > { %v985_v21 = vpack.c.bf16 %v3064_v17, %v3064_v17  ;;  %v1239_v12 = vsel %vm1127_vm1, %v2752_v30, 0.0  ;;  %v1630_v30 = vsel %vm1127_vm1, %v1446_v55, 0.0  ;;  %v1251_v44 = vsel %vm1127_vm1, %v2983_v20, 0.0 }
 0x260   : > { %v1228_v15 = vadd.f32 %v1227_v1, %v1226_v25  ;;  %v1615_v53 = vadd.f32 %v1614_v3, %v1613_v7  ;;  %v1628_v5 = vsel %vm1127_vm1, %v1445_v42, 0.0  ;;  %v1241_v3 = vsel %vm1127_vm1, %v2777_v39, 0.0 }
 0x261   : > { %1114 = vst.msk [vmem:[%s2271_s5 + $0x1cc] sm:$0xf] %vm998_vm0, %v985_v21  ;;  %v1447_v1 = vmul.f32 %v2801_v59, %v2801_v59  ;;  %v1253_v42 = vsel %vm1127_vm1, %v3015_v10, 0.0 }
 0x262   : > { %v1230_v32 = vadd.f32 %v1229_v63, %v1228_v15  ;;  %v1617_v23 = vadd.f32 %v1616_v40, %v1615_v53  ;;  %v1243_v53 = vsel %vm1127_vm1, %v2801_v59, 0.0  ;;  %v1448_v40 = vmul.f32 %v2826_v60, %v2826_v60 }
 0x264   : > { %v1232_v8 = vadd.f32 %v1231_v11, %v1230_v32  ;;  %v1619_v45 = vadd.f32 %v1618_v13, %v1617_v23  ;;  %v1632_v32 = vsel %vm1127_vm1, %v1447_v1, 0.0  ;;  %v1245_v23 = vsel %vm1127_vm1, %v2826_v60, 0.0 }
 0x265   : > { %v1449_v13 = vmul.f32 %v2846_v18, %v2846_v18  ;;  %v1634_v33 = vsel %vm1127_vm1, %v1448_v40, 0.0 }
 0x266   : > { %v3090_v52 = vpop.f32.mrf.mxu3  ;;  %v1234_v62 = vadd.f32 %v1233_v37, %v1232_v8  ;;  %v1621_v2 = vadd.f32 %v1620_v46, %v1619_v45  ;;  %v1247_v8 = vsel %vm1127_vm1, %v2846_v18, 0.0  ;;  %v1450_v45 = vmul.f32 %v2884_v50, %v2884_v50 }
 0x267   : > { %v986_v47 = vpack.c.bf16 %v3090_v52, %v3090_v52  ;;  %v1636_v60 = vsel %vm1127_vm1, %v1449_v13, 0.0  ;;  %v1263_v13 = vsel %vm1127_vm1, %v2343_v4, 0.0 }
 0x268   : > { %v1236_v27 = vadd.f32 %v1235_v19, %v1234_v62  ;;  %v1623_v35 = vadd.f32 %v1622_v26, %v1621_v2  ;;  %v1451_v62 = vmul.f32 %v2983_v20, %v2983_v20  ;;  %v1638_v18 = vsel %vm1127_vm1, %v1450_v45, 0.0 }
 0x269   : > { %1115 = vst.msk [vmem:[%s2271_s5 + $0x1d0] sm:$0xf] %vm998_vm0, %v986_v47  ;;  %v1452_v47 = vmul.f32 %v3015_v10, %v3015_v10  ;;  %v1257_v10 = vsel %vm1127_vm1, %v2285_v16, 0.0  ;;  %v1459_v45 = vmul.f32 %v2380_v38, %v2380_v38 }
 0x26a   : > { %v1238_v58 = vadd.f32 %v1237_v36, %v1236_v27  ;;  %v1625_v22 = vadd.f32 %v1624_v24, %v1623_v35  ;;  %v1453_v24 = vmul.f32 %v2264_v9, %v2264_v9  ;;  %v1640_v36 = vsel %vm1127_vm1, %v1451_v62, 0.0 }
 0x26b   : > { %v1460_v62 = vmul.f32 %v2398_v56, %v2398_v56 }
 0x26c   : > { %v1240_v25 = vadd.f32 %v1239_v12, %v1238_v58  ;;  %v1627_v7 = vadd.f32 %v1626_v54, %v1625_v22  ;;  %v1255_v22 = vsel %vm1127_vm1, %v2264_v9, 0.0  ;;  %v1454_v54 = vmul.f32 %v2285_v16, %v2285_v16 }
 0x26d   : > { %v1642_v12 = vsel %vm1127_vm1, %v1452_v47, 0.0  ;;  %v1269_v47 = vsel %vm1127_vm1, %v2398_v56, 0.0 }
 0x26e   : > { %v1242_v0 = vadd.f32 %v1241_v3, %v1240_v25  ;;  %v1629_v21 = vadd.f32 %v1628_v5, %v1627_v7  ;;  %v3116_v15 = vpop.f32.mrf.mxu3  ;;  %v1644_v7 = vsel %vm1127_vm1, %v1453_v24, 0.0  ;;  %v1455_v5 = vmul.f32 %v2306_v34, %v2306_v34 }
 0x26f   : > { %v987_v63 = vpack.c.bf16 %v3116_v15, %v3116_v15  ;;  %v1646_v9 = vsel %vm1127_vm1, %v1454_v54, 0.0  ;;  %v1658_v24 = vsel %vm1127_vm1, %v1460_v62, 0.0  ;;  %v3659_v54 = vld [vmem:[#allocation2_spill] sm:$0xff] }
 0x270   : > { %v1244_v28 = vadd.f32 %v1243_v53, %v1242_v0  ;;  %v1631_v39 = vadd.f32 %v1630_v30, %v1629_v21  ;;  %v1259_v21 = vsel %vm1127_vm1, %v2306_v34, 0.0  ;;  %v1456_v30 = vmul.f32 %v2324_v49, %v2324_v49 }
 0x271   : > { %1116 = vst.msk [vmem:[%s2271_s5 + $0x1d4] sm:$0xf] %vm998_vm0, %v987_v63  ;;  %v1648_v63 = vsel %vm1127_vm1, %v1455_v5, 0.0  ;;  %v3660_v5 = vld [vmem:[#allocation3_spill] sm:$0xff] }
 0x272   : > { %v1246_v11 = vadd.f32 %v1245_v23, %v1244_v28  ;;  %v1633_v59 = vadd.f32 %v1632_v32, %v1631_v39  ;;  %v1261_v28 = vsel %vm1127_vm1, %v2324_v49, 0.0  ;;  %v1457_v39 = vmul.f32 %v2343_v4, %v2343_v4 }
 0x273   : > { %v1650_v23 = vsel %vm1127_vm1, %v1456_v30, 0.0  ;;  %v1265_v49 = vsel %vm1127_vm1, %v2361_v6, 0.0 }
 0x274   : > { %v1248_v46 = vadd.f32 %v1247_v8, %v1246_v11  ;;  %v1635_v37 = vadd.f32 %v1634_v33, %v1633_v59  ;;  %v1458_v11 = vmul.f32 %v2361_v6, %v2361_v6  ;;  %v1652_v8 = vsel %vm1127_vm1, %v1457_v39, 0.0 }
 0x276   : > { %v1250_v2 = vadd.f32 %v1249_v41, %v1248_v46  ;;  %v1637_v26 = vadd.f32 %v1636_v60, %v1635_v37  ;;  %v3142_v19 = vpop.f32.mrf.mxu3  ;;  %v1654_v4 = vsel %vm1127_vm1, %v1458_v11, 0.0  ;;  %v1267_v41 = vsel %vm1127_vm1, %v2380_v38, 0.0 }
 0x277   : > { %v988_v27 = vpack.c.bf16 %v3142_v19, %v3142_v19 }
 0x278   : > { %v1252_v35 = vadd.f32 %v1251_v44, %v1250_v2  ;;  %v1639_v50 = vadd.f32 %v1638_v18, %v1637_v26  ;;  %v1656_v44 = vsel %vm1127_vm1, %v1459_v45, 0.0 }
 0x279   : > { %1117 = vst.msk [vmem:[%s2271_s5 + $0x1d8] sm:$0xf] %vm998_vm0, %v988_v27  ;;  %v1461_v27 = vmul.f32 %v2417_v14, %v2417_v14 }
 0x27a   : > { %v1641_v58 = vadd.f32 %v1640_v36, %v1639_v50  ;;  %v1254_v20 = vadd.f32 %v1253_v42, %v1252_v35  ;;  %v1271_v36 = vsel %vm1127_vm1, %v2417_v14, 0.0  ;;  %v1462_v42 = vmul.f32 %v2435_v31, %v2435_v31 }
 0x27c   : > { %v1256_v55 = vadd.f32 %v1255_v22, %v1254_v20  ;;  %v1643_v25 = vadd.f32 %v1642_v12, %v1641_v58  ;;  %v1660_v20 = vsel %vm1127_vm1, %v1461_v27, 0.0  ;;  %v1273_v22 = vsel %vm1127_vm1, %v2435_v31, 0.0 }
 0x27d   : > { %v1463_v12 = vmul.f32 %v3659_v54, %v3659_v54  ;;  %v1662_v14 = vsel %vm1127_vm1, %v1462_v42, 0.0 }
 0x27e   : > { %v1258_v3 = vadd.f32 %v1257_v10, %v1256_v55  ;;  %v1645_v1 = vadd.f32 %v1644_v7, %v1643_v25  ;;  %v3168_v0 = vpop.f32.mrf.mxu3  ;;  %v1275_v10 = vsel %vm1127_vm1, %v3659_v54, 0.0 }
 0x27f   : > { %v989_v53 = vpack.c.bf16 %v3168_v0, %v3168_v0  ;;  %v1664_v30 = vsel %vm1127_vm1, %v1463_v12, 0.0 }
 0x280   : > { %v1260_v40 = vadd.f32 %v1259_v21, %v1258_v3  ;;  %v1647_v16 = vadd.f32 %v1646_v9, %v1645_v1  ;;  %v1464_v3 = vmul.f32 %v3660_v5, %v3660_v5 }
 0x281   : > { %1118 = vst.msk [vmem:[%s2271_s5 + $0x1dc] sm:$0xf] %vm998_vm0, %v989_v53  ;;  %v1277_v53 = vsel %vm1127_vm1, %v3660_v5, 0.0 }
 0x282   : > { %v1262_v32 = vadd.f32 %v1261_v28, %v1260_v40  ;;  %v1649_v34 = vadd.f32 %v1648_v63, %v1647_v16  ;;  %v3661_v40 = vld [vmem:[#allocation4_spill] sm:$0xff] }
 0x283   : > { %v3203_v18 = vpop.f32.mrf.mxu2  ;;  %v1465_v16 = vmul.f32 %v3661_v40, %v3661_v40 }
 0x284   : > { %v1264_v59 = vadd.f32 %v1263_v13, %v1262_v32  ;;  %v1651_v33 = vadd.f32 %v1650_v23, %v1649_v34  ;;  %v964_v38 = vpack.c.bf16 %v3203_v18, %v3203_v18  ;;  %v1666_v32 = vsel %vm1127_vm1, %v1464_v3, 0.0  ;;  %v3662_v23 = vld [vmem:[#allocation5_spill] sm:$0xff] }
 0x285   : > { %v1279_v34 = vsel %vm1127_vm1, %v3661_v40, 0.0  ;;  %v1466_v13 = vmul.f32 %v3662_v23, %v3662_v23 }
 0x286   : > { %v1266_v46 = vadd.f32 %v1265_v49, %v1264_v59  ;;  %v1653_v37 = vadd.f32 %v1652_v8, %v1651_v33  ;;  %v3194_v60 = vpop.f32.mrf.mxu3  ;;  %1093 = vst.msk [vmem:[%s2271_s5 + $0x178] sm:$0xf] %vm998_vm0, %v964_v38  ;;  %v1668_v33 = vsel %vm1127_vm1, %v1465_v16, 0.0  ;;  %v1281_v8 = vsel %vm1127_vm1, %v3662_v23, 0.0  ;;  %v3663_v49 = vld [vmem:[#allocation6_spill] sm:$0xff] }
 0x287   : > { %v990_v2 = vpack.c.bf16 %v3194_v60, %v3194_v60  ;;  %v1467_v45 = vmul.f32 %v3663_v49, %v3663_v49  ;;  %v1283_v62 = vsel %vm1127_vm1, %v3663_v49, 0.0 }
 0x288   : > { %v1268_v6 = vadd.f32 %v1267_v41, %v1266_v46  ;;  %v1655_v26 = vadd.f32 %v1654_v4, %v1653_v37  ;;  %v1670_v41 = vsel %vm1127_vm1, %v1466_v13, 0.0 }
 0x289   : > { %1119 = vst.msk [vmem:[%s2271_s5 + $0x1e0] sm:$0xf] %vm998_vm0, %v990_v2  ;;  %v3664_v2 = vld [vmem:[#allocation7_spill] sm:$0xff]  ;;  %v1672_v27 = vsel %vm1127_vm1, %v1467_v45, 0.0 }
 0x28a   : > { %v1270_v35 = vadd.f32 %v1269_v47, %v1268_v6  ;;  %v1657_v50 = vadd.f32 %v1656_v44, %v1655_v26  ;;  %v1468_v6 = vmul.f32 %v3664_v2, %v3664_v2  ;;  %v1285_v38 = vsel %vm1127_vm1, %v3664_v2, 0.0 }
 0x28b   : > { %v3235_v21 = vpop.f32.mrf.mxu2 }
 0x28c   : > { %v1272_v56 = vadd.f32 %v1271_v36, %v1270_v35  ;;  %v1659_v58 = vadd.f32 %v1658_v24, %v1657_v50  ;;  %v965_v63 = vpack.c.bf16 %v3235_v21, %v3235_v21  ;;  %v3665_v35 = vld [vmem:[#allocation8_spill] sm:$0xff]  ;;  %v1674_v42 = vsel %vm1127_vm1, %v1468_v6, 0.0 }
 0x28d   : > { %v1469_v50 = vmul.f32 %v3665_v35, %v3665_v35 }
 0x28e   : > { %v1274_v55 = vadd.f32 %v1273_v22, %v1272_v56  ;;  %v1661_v25 = vadd.f32 %v1660_v20, %v1659_v58  ;;  %v3226_v7 = vpop.f32.mrf.mxu3  ;;  %1094 = vst.msk [vmem:[%s2271_s5 + $0x17c] sm:$0xf] %vm998_vm0, %v965_v63  ;;  %v1287_v56 = vsel %vm1127_vm1, %v3665_v35, 0.0  ;;  %v3666_v58 = vld [vmem:[#allocation9_spill] sm:$0xff] }
 0x28f   : > { %v991_v1 = vpack.c.bf16 %v3226_v7, %v3226_v7  ;;  %v1470_v20 = vmul.f32 %v3666_v58, %v3666_v58  ;;  %v1676_v12 = vsel %vm1127_vm1, %v1469_v50, 0.0 }
 0x290   : > { %v1276_v31 = vadd.f32 %v1275_v10, %v1274_v55  ;;  %v1663_v9 = vadd.f32 %v1662_v14, %v1661_v25  ;;  %v1289_v55 = vsel %vm1127_vm1, %v3666_v58, 0.0  ;;  %v3667_v25 = vld [vmem:[#allocation11_spill] sm:$0xff] }
 0x291   : > { %1120 = vst.msk [vmem:[%s2271_s5 + $0x1e4] sm:$0xf] %vm998_vm0, %v991_v1  ;;  %v1471_v14 = vmul.f32 %v3667_v25, %v3667_v25  ;;  %v1678_v1 = vsel %vm1127_vm1, %v1470_v20, 0.0 }
 0x292   : > { %v1278_v28 = vadd.f32 %v1277_v53, %v1276_v31  ;;  %v1665_v39 = vadd.f32 %v1664_v30, %v1663_v9  ;;  %v1291_v31 = vsel %vm1127_vm1, %v3667_v25, 0.0  ;;  %v3668_v9 = vld [vmem:[#allocation13_spill] sm:$0xff] }
 0x293   : > { %v1472_v30 = vmul.f32 %v3668_v9, %v3668_v9  ;;  %v1680_v63 = vsel %vm1127_vm1, %v1471_v14, 0.0 }
 0x294   : > { %v1280_v11 = vadd.f32 %v1279_v34, %v1278_v28  ;;  %v1667_v59 = vadd.f32 %v1666_v32, %v1665_v39  ;;  %v1293_v28 = vsel %vm1127_vm1, %v3668_v9, 0.0  ;;  %v3669_v39 = vld [vmem:[#allocation15_spill] sm:$0xff] }
 0x295   : > { %v1473_v32 = vmul.f32 %v3669_v39, %v3669_v39  ;;  %v1682_v13 = vsel %vm1127_vm1, %v1472_v30, 0.0 }
 0x296   : > { %v1282_v46 = vadd.f32 %v1281_v8, %v1280_v11  ;;  %v1669_v37 = vadd.f32 %v1668_v33, %v1667_v59  ;;  %v3258_v4 = vpop.f32.mrf.mxu3  ;;  %v1295_v11 = vsel %vm1127_vm1, %v3669_v39, 0.0  ;;  %v3670_v59 = vld [vmem:[#allocation17_spill] sm:$0xff] }
 0x297   : > { %v992_v26 = vpack.c.bf16 %v3258_v4, %v3258_v4  ;;  %v1474_v33 = vmul.f32 %v3670_v59, %v3670_v59  ;;  %v1684_v45 = vsel %vm1127_vm1, %v1473_v32, 0.0 }
 0x298   : > { %v1284_v44 = vadd.f32 %v1283_v62, %v1282_v46  ;;  %v1671_v47 = vadd.f32 %v1670_v41, %v1669_v37  ;;  %v1297_v46 = vsel %vm1127_vm1, %v3670_v59, 0.0  ;;  %v3671_v37 = vld [vmem:[#allocation19_spill] sm:$0xff] }
 0x299   : > { %1121 = vst.msk [vmem:[%s2271_s5 + $0x1e8] sm:$0xf] %vm998_vm0, %v992_v26  ;;  %v1475_v41 = vmul.f32 %v3671_v37, %v3671_v37  ;;  %v1686_v26 = vsel %vm1127_vm1, %v1474_v33, 0.0 }
 0x29a   : > { %v1673_v24 = vadd.f32 %v1672_v27, %v1671_v47  ;;  %v1286_v36 = vadd.f32 %v1285_v38, %v1284_v44  ;;  %v1299_v44 = vsel %vm1127_vm1, %v3671_v37, 0.0  ;;  %v3672_v47 = vld [vmem:[#allocation21_spill] sm:$0xff] }
 0x29b   : > { %v1476_v27 = vmul.f32 %v3672_v47, %v3672_v47 }
 0x29c   : > { %v1288_v22 = vadd.f32 %v1287_v56, %v1286_v36  ;;  %v1675_v54 = vadd.f32 %v1674_v42, %v1673_v24  ;;  %v1688_v24 = vsel %vm1127_vm1, %v1475_v41, 0.0  ;;  %v1301_v36 = vsel %vm1127_vm1, %v3672_v47, 0.0  ;;  %v3673_v42 = vld [vmem:[#allocation23_spill] sm:$0xff] }
 0x29d   : > { %v1477_v56 = vmul.f32 %v3673_v42, %v3673_v42 }
 0x29e   : > { %v3284_v10 = vpop.f32.mrf.mxu3  ;;  %v1290_v5 = vadd.f32 %v1289_v55, %v1288_v22  ;;  %v1677_v3 = vadd.f32 %v1676_v12, %v1675_v54  ;;  %v1690_v22 = vsel %vm1127_vm1, %v1476_v27, 0.0  ;;  %v1303_v54 = vsel %vm1127_vm1, %v3673_v42, 0.0  ;;  %v3674_v12 = vld [vmem:[#allocation25_spill] sm:$0xff]  ;;  %v3679_v42 = vld [vmem:[#allocation10_spill] sm:$0xff] }
 0x29f   : > { %v993_v53 = vpack.c.bf16 %v3284_v10, %v3284_v10  ;;  %v1478_v55 = vmul.f32 %v3674_v12, %v3674_v12 }
 0x2a0   : > { %v1292_v40 = vadd.f32 %v1291_v31, %v1290_v5  ;;  %v1679_v16 = vadd.f32 %v1678_v1, %v1677_v3  ;;  %v1692_v5 = vsel %vm1127_vm1, %v1477_v56, 0.0  ;;  %v1305_v3 = vsel %vm1127_vm1, %v3674_v12, 0.0  ;;  %v3675_v1 = vld [vmem:[#allocation27_spill] sm:$0xff] }
 0x2a1   : > { %1122 = vst.msk [vmem:[%s2271_s5 + $0x1ec] sm:$0xf] %vm998_vm0, %v993_v53  ;;  %v1479_v31 = vmul.f32 %v3675_v1, %v3675_v1  ;;  %v1485_v56 = vmul.f32 %v3679_v42, %v3679_v42  ;;  %v1319_v12 = vsel %vm1127_vm1, %v3679_v42, 0.0 }
 0x2a2   : > { %v1294_v34 = vadd.f32 %v1293_v28, %v1292_v40  ;;  %v1681_v23 = vadd.f32 %v1680_v63, %v1679_v16  ;;  %v1694_v40 = vsel %vm1127_vm1, %v1478_v55, 0.0  ;;  %v1307_v16 = vsel %vm1127_vm1, %v3675_v1, 0.0  ;;  %v3676_v63 = vld [vmem:[#allocation29_spill] sm:$0xff]  ;;  %v3680_v55 = vld [vmem:[#allocation12_spill] sm:$0xff] }
 0x2a3   : > { %v1480_v28 = vmul.f32 %v3676_v63, %v3676_v63  ;;  %v1321_v1 = vsel %vm1127_vm1, %v3680_v55, 0.0 }
 0x2a4   : > { %v1296_v8 = vadd.f32 %v1295_v11, %v1294_v34  ;;  %v1683_v49 = vadd.f32 %v1682_v13, %v1681_v23  ;;  %v1696_v23 = vsel %vm1127_vm1, %v1479_v31, 0.0  ;;  %v1309_v13 = vsel %vm1127_vm1, %v3676_v63, 0.0  ;;  %v3677_v11 = vld [vmem:[#allocation31_spill] sm:$0xff]  ;;  %v3681_v31 = vld [vmem:[#allocation14_spill] sm:$0xff]  ;;  %v3682_v63 = vld [vmem:[#allocation16_spill] sm:$0xff] }
 0x2a5   : > { %v1481_v59 = vmul.f32 %v3677_v11, %v3677_v11 }
 0x2a6   : > { %v3310_v62 = vpop.f32.mrf.mxu3  ;;  %v1298_v2 = vadd.f32 %v1297_v46, %v1296_v8  ;;  %v1685_v6 = vadd.f32 %v1684_v45, %v1683_v49  ;;  %v1698_v49 = vsel %vm1127_vm1, %v1480_v28, 0.0  ;;  %v1311_v45 = vsel %vm1127_vm1, %v3677_v11, 0.0  ;;  %v3678_v46 = vld [vmem:[#allocation33_spill] sm:$0xff] }
 0x2a7   : > { %v994_v38 = vpack.c.bf16 %v3310_v62, %v3310_v62  ;;  %v1482_v37 = vmul.f32 %v3678_v46, %v3678_v46  ;;  %v1488_v28 = vmul.f32 %v3682_v63, %v3682_v63 }
 0x2a8   : > { %v1300_v35 = vadd.f32 %v1299_v44, %v1298_v2  ;;  %v1687_v50 = vadd.f32 %v1686_v26, %v1685_v6  ;;  %v1700_v6 = vsel %vm1127_vm1, %v1481_v59, 0.0  ;;  %v1313_v26 = vsel %vm1127_vm1, %v3678_v46, 0.0 }
 0x2a9   : > { %1123 = vst.msk [vmem:[%s2271_s5 + $0x1f0] sm:$0xf] %vm998_vm0, %v994_v38  ;;  %v1483_v44 = vmul.f32 %v3203_v18, %v3203_v18  ;;  %v1702_v38 = vsel %vm1127_vm1, %v1482_v37, 0.0 }
 0x2aa   : > { %v1302_v58 = vadd.f32 %v1301_v36, %v1300_v35  ;;  %v1689_v20 = vadd.f32 %v1688_v24, %v1687_v50  ;;  %v1315_v35 = vsel %vm1127_vm1, %v3203_v18, 0.0  ;;  %v1484_v50 = vmul.f32 %v3235_v21, %v3235_v21 }
 0x2ab   : > { %v1486_v18 = vmul.f32 %v3680_v55, %v3680_v55 }
 0x2ac   : > { %v1304_v25 = vadd.f32 %v1303_v54, %v1302_v58  ;;  %v1691_v14 = vadd.f32 %v1690_v22, %v1689_v20  ;;  %v1704_v58 = vsel %vm1127_vm1, %v1483_v44, 0.0  ;;  %v1317_v20 = vsel %vm1127_vm1, %v3235_v21, 0.0 }
 0x2ad   : > { %v1487_v21 = vmul.f32 %v3681_v31, %v3681_v31 }
 0x2ae   : > { %v1306_v9 = vadd.f32 %v1305_v3, %v1304_v25  ;;  %v1693_v30 = vadd.f32 %v1692_v5, %v1691_v14  ;;  %v3336_v53 = vpop.f32.mrf.mxu3  ;;  %v1706_v25 = vsel %vm1127_vm1, %v1484_v50, 0.0  ;;  %v1708_v3 = vsel %vm1127_vm1, %v1485_v56, 0.0 }
 0x2af   : > { %v995_v39 = vpack.c.bf16 %v3336_v53, %v3336_v53 }
 0x2b0   : > { %v1308_v32 = vadd.f32 %v1307_v16, %v1306_v9  ;;  %v1695_v34 = vadd.f32 %v1694_v40, %v1693_v30  ;;  %v1710_v40 = vsel %vm1127_vm1, %v1486_v18, 0.0  ;;  %v1323_v16 = vsel %vm1127_vm1, %v3681_v31, 0.0 }
 0x2b1   : > { %1124 = vst.msk [vmem:[%s2271_s5 + $0x1f4] sm:$0xf] %vm998_vm0, %v995_v39 }
 0x2b2   : > { %v1310_v33 = vadd.f32 %v1309_v13, %v1308_v32  ;;  %v1697_v8 = vadd.f32 %v1696_v23, %v1695_v34  ;;  %v1712_v34 = vsel %vm1127_vm1, %v1487_v21, 0.0  ;;  %v1325_v23 = vsel %vm1127_vm1, %v3682_v63, 0.0  ;;  %v3683_v13 = vld [vmem:[#allocation18_spill] sm:$0xff] }
 0x2b3   : > { %v1489_v11 = vmul.f32 %v3683_v13, %v3683_v13 }
 0x2b4   : > { %v1312_v41 = vadd.f32 %v1311_v45, %v1310_v33  ;;  %v1699_v2 = vadd.f32 %v1698_v49, %v1697_v8  ;;  %v1714_v8 = vsel %vm1127_vm1, %v1488_v28, 0.0  ;;  %v1327_v49 = vsel %vm1127_vm1, %v3683_v13, 0.0  ;;  %v3684_v45 = vld [vmem:[#allocation20_spill] sm:$0xff] }
 0x2b5   : > { %v1490_v46 = vmul.f32 %v3684_v45, %v3684_v45 }
 0x2b6   : > { %v1314_v47 = vadd.f32 %v1313_v26, %v1312_v41  ;;  %v1701_v27 = vadd.f32 %v1700_v6, %v1699_v2  ;;  %v1716_v2 = vsel %vm1127_vm1, %v1489_v11, 0.0  ;;  %v1329_v6 = vsel %vm1127_vm1, %v3684_v45, 0.0  ;;  %v3685_v26 = vld [vmem:[#allocation22_spill] sm:$0xff] }
 0x2b7   : > { %v1491_v44 = vmul.f32 %v3685_v26, %v3685_v26  ;;  %v1718_v50 = vsel %vm1127_vm1, %v1490_v46, 0.0 }
 0x2b8   : > { %v1316_v24 = vadd.f32 %v1315_v35, %v1314_v47  ;;  %v1703_v36 = vadd.f32 %v1702_v38, %v1701_v27 }
 0x2ba   : > { %v1705_v22 = vadd.f32 %v1704_v58, %v1703_v36  ;;  %v1318_v54 = vadd.f32 %v1317_v20, %v1316_v24  ;;  %v1331_v24 = vsel %vm1127_vm1, %v3685_v26, 0.0  ;;  %v3686_v36 = vld [vmem:[#allocation24_spill] sm:$0xff]  ;;  %v1720_v20 = vsel %vm1127_vm1, %v1491_v44, 0.0 }
 0x2bb   : > { %v1492_v42 = vmul.f32 %v3686_v36, %v3686_v36 }
 0x2bc   : > { %v1320_v14 = vadd.f32 %v1319_v12, %v1318_v54  ;;  %v1707_v5 = vadd.f32 %v1706_v25, %v1705_v22  ;;  %v1333_v22 = vsel %vm1127_vm1, %v3686_v36, 0.0  ;;  %v3687_v54 = vld [vmem:[#allocation26_spill] sm:$0xff] }
 0x2bd   : > { %v1493_v12 = vmul.f32 %v3687_v54, %v3687_v54  ;;  %v1722_v25 = vsel %vm1127_vm1, %v1492_v42, 0.0  ;;  %v1347_v42 = vsel %vm1127_vm1, %v2926_v48, 0.0 }
 0x2be   : > { %v1322_v9 = vadd.f32 %v1321_v1, %v1320_v14  ;;  %v1709_v30 = vadd.f32 %v1708_v3, %v1707_v5  ;;  %v3402_v47 = vpop.f32.mrf.mxu3  ;;  %v1335_v14 = vsel %vm1127_vm1, %v3687_v54, 0.0  ;;  %v3688_v5 = vld [vmem:[#allocation28_spill] sm:$0xff]  ;;  %v1501_v54 = vmul.f32 %v2974_v29, %v2974_v29 }
 0x2bf   : > { %v996_v35 = vpack.c.bf16 %v3402_v47, %v3402_v47  ;;  %v1494_v3 = vmul.f32 %v3688_v5, %v3688_v5  ;;  %v1724_v21 = vsel %vm1127_vm1, %v1493_v12, 0.0 }
 0x2c0   : > { %v1324_v39 = vadd.f32 %v1323_v16, %v1322_v9  ;;  %v1711_v32 = vadd.f32 %v1710_v40, %v1709_v30  ;;  %v1337_v9 = vsel %vm1127_vm1, %v3688_v5, 0.0  ;;  %v3689_v30 = vld [vmem:[#allocation30_spill] sm:$0xff] }
 0x2c1   : > { %1125 = vst.msk [vmem:[%s2271_s5 + $0x1f8] sm:$0xf] %vm998_vm0, %v996_v35  ;;  %v1495_v40 = vmul.f32 %v3689_v30, %v3689_v30  ;;  %v1726_v28 = vsel %vm1127_vm1, %v1494_v3, 0.0  ;;  %v1499_v35 = vmul.f32 %v2926_v48, %v2926_v48  ;;  %v1351_v48 = vsel %vm1127_vm1, %v2974_v29, 0.0 }
 0x2c2   : > { %v1326_v59 = vadd.f32 %v1325_v23, %v1324_v39  ;;  %v1713_v33 = vadd.f32 %v1712_v34, %v1711_v32  ;;  %v1339_v39 = vsel %vm1127_vm1, %v3689_v30, 0.0  ;;  %v3690_v32 = vld [vmem:[#allocation32_spill] sm:$0xff]  ;;  %v1740_v3 = vsel %vm1127_vm1, %v1501_v54, 0.0 }
 0x2c3   : > { %v1496_v34 = vmul.f32 %v3690_v32, %v3690_v32  ;;  %v1355_v29 = vsel %vm1127_vm1, %v3038_v57, 0.0  ;;  %v1504_v30 = vmul.f32 %v3064_v17, %v3064_v17 }
 0x2c4   : > { %v1328_v37 = vadd.f32 %v1327_v49, %v1326_v59  ;;  %v1715_v41 = vadd.f32 %v1714_v8, %v1713_v33  ;;  %v1728_v59 = vsel %vm1127_vm1, %v1495_v40, 0.0  ;;  %v1341_v33 = vsel %vm1127_vm1, %v3690_v32, 0.0  ;;  %v3691_v8 = vld [vmem:[#allocation34_spill] sm:$0xff] }
 0x2c5   : > { %v1497_v49 = vmul.f32 %v3691_v8, %v3691_v8 }
 0x2c6   : > { %v1330_v27 = vadd.f32 %v1329_v6, %v1328_v37  ;;  %v1717_v38 = vadd.f32 %v1716_v2, %v1715_v41  ;;  %v3433_v11 = vpop.f32.mrf.mxu3  ;;  %v1730_v41 = vsel %vm1127_vm1, %v1496_v34, 0.0  ;;  %v1343_v2 = vsel %vm1127_vm1, %v3691_v8, 0.0 }
 0x2c7   : > { %v997_v45 = vpack.c.bf16 %v3433_v11, %v3433_v11  ;;  %v1498_v6 = vmul.f32 %v2910_v61, %v2910_v61  ;;  %v1746_v34 = vsel %vm1127_vm1, %v1504_v30, 0.0  ;;  %v1507_v8 = vmul.f32 %v3142_v19, %v3142_v19 }
 0x2c8   : > { %v1332_v56 = vadd.f32 %v1331_v24, %v1330_v27  ;;  %v1719_v58 = vadd.f32 %v1718_v50, %v1717_v38  ;;  %v1732_v27 = vsel %vm1127_vm1, %v1497_v49, 0.0  ;;  %v1345_v38 = vsel %vm1127_vm1, %v2910_v61, 0.0 }
 0x2c9   : > { %1126 = vst.msk [vmem:[%s2271_s5 + $0x1fc] sm:$0xf] %vm998_vm0, %v997_v45  ;;  %v1734_v36 = vsel %vm1127_vm1, %v1498_v6, 0.0  ;;  %v1349_v61 = vsel %vm1127_vm1, %v2948_v43, 0.0  ;;  %v1752_v6 = vsel %vm1127_vm1, %v1507_v8, 0.0 }
 0x2ca   : > { %v1334_v55 = vadd.f32 %v1333_v22, %v1332_v56  ;;  %v1721_v18 = vadd.f32 %v1720_v20, %v1719_v58  ;;  %v1500_v56 = vmul.f32 %v2948_v43, %v2948_v43  ;;  %v1736_v22 = vsel %vm1127_vm1, %v1499_v35, 0.0 }
 0x2cb   : > { %v1353_v43 = vsel %vm1127_vm1, %v3006_v51, 0.0  ;;  %v1510_v35 = vmul.f32 %v3226_v7, %v3226_v7 }
 0x2cc   : > { %v1336_v1 = vadd.f32 %v1335_v14, %v1334_v55  ;;  %v1723_v31 = vadd.f32 %v1722_v25, %v1721_v18  ;;  %v1738_v18 = vsel %vm1127_vm1, %v1500_v56, 0.0  ;;  %v1502_v25 = vmul.f32 %v3006_v51, %v3006_v51 }
 0x2cd   : > { %v1357_v51 = vsel %vm1127_vm1, %v3064_v17, 0.0  ;;  %v1361_v17 = vsel %vm1127_vm1, %v3116_v15, 0.0 }
 0x2ce   : > { %v1338_v16 = vadd.f32 %v1337_v9, %v1336_v1  ;;  %v1725_v63 = vadd.f32 %v1724_v21, %v1723_v31  ;;  %v1503_v1 = vmul.f32 %v3038_v57, %v3038_v57  ;;  %v1742_v9 = vsel %vm1127_vm1, %v1502_v25, 0.0 }
 0x2cf   : > { %v1359_v57 = vsel %vm1127_vm1, %v3090_v52, 0.0 }
 0x2d0   : > { %v1340_v23 = vadd.f32 %v1339_v39, %v1338_v16  ;;  %v1727_v13 = vadd.f32 %v1726_v28, %v1725_v63  ;;  %v1744_v63 = vsel %vm1127_vm1, %v1503_v1, 0.0  ;;  %v1505_v28 = vmul.f32 %v3090_v52, %v3090_v52 }
 0x2d1   : > { %v1363_v52 = vsel %vm1127_vm1, %v3142_v19, 0.0  ;;  %v1367_v19 = vsel %vm1127_vm1, %v3194_v60, 0.0  ;;  %v1515_v1 = vmul.f32 %v3402_v47, %v3402_v47 }
 0x2d2   : > { %v1342_v46 = vadd.f32 %v1341_v33, %v1340_v23  ;;  %v1729_v37 = vadd.f32 %v1728_v59, %v1727_v13  ;;  %v1506_v23 = vmul.f32 %v3116_v15, %v3116_v15  ;;  %v1748_v33 = vsel %vm1127_vm1, %v1505_v28, 0.0 }
 0x2d3   : > { %v1365_v15 = vsel %vm1127_vm1, %v3168_v0, 0.0 }
 0x2d4   : > { %v1344_v26 = vadd.f32 %v1343_v2, %v1342_v46  ;;  %v1731_v44 = vadd.f32 %v1730_v41, %v1729_v37  ;;  %v1750_v46 = vsel %vm1127_vm1, %v1506_v23, 0.0  ;;  %v1508_v37 = vmul.f32 %v3168_v0, %v3168_v0 }
 0x2d5   : > { %v1369_v0 = vsel %vm1127_vm1, %v3226_v7, 0.0  ;;  %v1373_v7 = vsel %vm1127_vm1, %v3284_v10, 0.0 }
 0x2d6   : > { %v1346_v50 = vadd.f32 %v1345_v38, %v1344_v26  ;;  %v1733_v24 = vadd.f32 %v1732_v27, %v1731_v44  ;;  %v1509_v26 = vmul.f32 %v3194_v60, %v3194_v60  ;;  %v1754_v38 = vsel %vm1127_vm1, %v1508_v37, 0.0 }
 0x2d7   : > { %v1371_v60 = vsel %vm1127_vm1, %v3258_v4, 0.0 }
 0x2d8   : > { %v1348_v58 = vadd.f32 %v1347_v42, %v1346_v50  ;;  %v1735_v20 = vadd.f32 %v1734_v36, %v1733_v24  ;;  %v1756_v36 = vsel %vm1127_vm1, %v1509_v26, 0.0  ;;  %v1511_v42 = vmul.f32 %v3258_v4, %v3258_v4 }
 0x2d9   : > { %v1375_v4 = vsel %vm1127_vm1, %v3310_v62, 0.0 }
 0x2da   : > { %v1737_v12 = vadd.f32 %v1736_v22, %v1735_v20  ;;  %v1350_v55 = vadd.f32 %v1349_v61, %v1348_v58  ;;  %v1758_v20 = vsel %vm1127_vm1, %v1510_v35, 0.0  ;;  %v1512_v22 = vmul.f32 %v3284_v10, %v3284_v10 }
 0x2db   : > { %v1377_v10 = vsel %vm1127_vm1, %v3336_v53, 0.0 }
 0x2dc   : > { %v1352_v14 = vadd.f32 %v1351_v48, %v1350_v55  ;;  %v1739_v5 = vadd.f32 %v1738_v18, %v1737_v12  ;;  %v1760_v12 = vsel %vm1127_vm1, %v1511_v42, 0.0  ;;  %v1513_v55 = vmul.f32 %v3310_v62, %v3310_v62 }
 0x2dd   : > { %v1762_v25 = vsel %vm1127_vm1, %v1512_v22, 0.0  ;;  %v1379_v62 = vsel %vm1127_vm1, %v3402_v47, 0.0 }
 0x2de   : > { %v1354_v31 = vadd.f32 %v1353_v43, %v1352_v14  ;;  %v1741_v21 = vadd.f32 %v1740_v3, %v1739_v5  ;;  %v1514_v14 = vmul.f32 %v3336_v53, %v3336_v53  ;;  %v1764_v43 = vsel %vm1127_vm1, %v1513_v55, 0.0 }
 0x2df   : > { %v1381_v53 = vsel %vm1127_vm1, %v3433_v11, 0.0 }
 0x2e0   : > { %v1356_v40 = vadd.f32 %v1355_v29, %v1354_v31  ;;  %v1743_v16 = vadd.f32 %v1742_v9, %v1741_v21  ;;  %v1766_v9 = vsel %vm1127_vm1, %v1514_v14, 0.0  ;;  %v1516_v29 = vmul.f32 %v3433_v11, %v3433_v11 }
 0x2e2   : > { %v1358_v39 = vadd.f32 %v1357_v51, %v1356_v40  ;;  %v1745_v32 = vadd.f32 %v1744_v63, %v1743_v16  ;;  %v1768_v16 = vsel %vm1127_vm1, %v1515_v1, 0.0  ;;  %v1770_v28 = vsel %vm1127_vm1, %v1516_v29, 0.0 }
 0x2e4   : > { %v1360_v13 = vadd.f32 %v1359_v57, %v1358_v39  ;;  %v1747_v59 = vadd.f32 %v1746_v34, %v1745_v32 }
 0x2e6   : > { %v1362_v49 = vadd.f32 %v1361_v17, %v1360_v13  ;;  %v1749_v45 = vadd.f32 %v1748_v33, %v1747_v59 }
 0x2e8   : > { %v1364_v41 = vadd.f32 %v1363_v52, %v1362_v49  ;;  %v1751_v2 = vadd.f32 %v1750_v46, %v1749_v45 }
 0x2ea   : > { %v1366_v44 = vadd.f32 %v1365_v15, %v1364_v41  ;;  %v1753_v27 = vadd.f32 %v1752_v6, %v1751_v2 }
 0x2ec   : > { %v1368_v50 = vadd.f32 %v1367_v19, %v1366_v44  ;;  %v1755_v24 = vadd.f32 %v1754_v38, %v1753_v27 }
 0x2ee   : > { %v1370_v56 = vadd.f32 %v1369_v0, %v1368_v50  ;;  %v1757_v58 = vadd.f32 %v1756_v36, %v1755_v24 }
 0x2f0   : > { %v1372_v61 = vadd.f32 %v1371_v60, %v1370_v56  ;;  %v1759_v54 = vadd.f32 %v1758_v20, %v1757_v58 }
 0x2f2   : > { %v1374_v18 = vadd.f32 %v1373_v7, %v1372_v61  ;;  %v1761_v48 = vadd.f32 %v1760_v12, %v1759_v54 }
 0x2f4   : > { %v1376_v5 = vadd.f32 %v1375_v4, %v1374_v18  ;;  %v1763_v3 = vadd.f32 %v1762_v25, %v1761_v48 }
 0x2f6   : > { %v1378_v31 = vadd.f32 %v1377_v10, %v1376_v5  ;;  %v1765_v21 = vadd.f32 %v1764_v43, %v1763_v3 }
 0x2f8   : > { %v1380_v30 = vadd.f32 %v1379_v62, %v1378_v31  ;;  %v1767_v40 = vadd.f32 %v1766_v9, %v1765_v21 }
 0x2fa   : > { %v1769_v63 = vadd.f32 %v1768_v16, %v1767_v40  ;;  %v1382_v51 = vadd.f32 %v1381_v53, %v1380_v30 }
 0x2fc   : > { %v1383_v39 = vrot.slane %v1382_v51, 4  ;;  %v1771_v32 = vadd.f32 %v1770_v28, %v1769_v63 }
 0x2fe   : > { %v1384_v34 = vadd.f32 %v1383_v39, %v1382_v51  ;;  %v1772_v57 = vrot.slane %v1771_v32, 4 }
 0x300   : > { %v1385_v47 = vrot.slane %v1384_v34, 2  ;;  %v1773_v23 = vadd.f32 %v1772_v57, %v1771_v32 }
 0x302   : > { %v1386_v13 = vadd.f32 %v1385_v47, %v1384_v34  ;;  %v1774_v59 = vrot.slane %v1773_v23, 2 }
 0x304   : > { %v1387_v33 = vrot.slane %v1386_v13, 1  ;;  %v1775_v17 = vadd.f32 %v1774_v59, %v1773_v23 }
 0x306   : > { %v1776_v8 = vrot.slane %v1775_v17, 1  ;;  %v1388_v11 = vadd.f32 %v1387_v33, %v1386_v13 }
 0x308   : > { %v1777_v49 = vadd.f32 %v1776_v8, %v1775_v17 }
 0x30a   : > { %v1779_v45 = vsel %vm1778_vm2, %v1388_v11, %v1777_v49 }
 0x30b   : > { %1781 = vst.msk [vmem:[%s228_s9] sm:$0x3] %vm1780_vm3, %v1779_v45 }
 0x30c PF: > { %s14_s14 = sadd.s32 1, %s1994_s14   ;;  %s3692_s12 = smov %s1990_s13 }
 0x30d   : > { %p11_p5 = scmp.ge.s32.totalorder %s14_s14, 4   ;;  %s3693_s13 = smov %s3695_s15 }
 0x30f   :  { %13 = sbr.rel (!%p11_p5) target bundleno = 2 (0x2), region = 70 }

// kernel: conv_bottleneck.4
= control target key start
LH: loop header
LB: loop body
LE: loop exit
PB: predicated region body
PF: predicated region fallthrough
CT: control target
= control target key end

     0   :  { %s4551_s27 = smov 0   ;;  %s4553_s28 = smov 0   ;;  %s7362_s0 = inlined_call_operand.vmem [shape: bf16[2,32,32,32], index: 0, kind: input, shape index: {}, may-alias: {0,1,2}]   ;;  %s7363_s1 = inlined_call_operand.vmem [shape: bf16[2,32,32,32], index: 1, kind: input, shape index: {}, may-alias: {0,1,2}]   ;;  %s7364_s2 = inlined_call_operand.vmem [shape: bf16[2,32,32,32], index: 2, kind: input, shape index: {}, may-alias: {0,1,2}]   ;;  %s7365_s3 = inlined_call_operand.vmem [shape: f32[1,32], index: 3, kind: input, shape index: {}]   ;;  %s7366_s4 = inlined_call_operand.vmem [shape: f32[1,32], index: 4, kind: input, shape index: {}]   ;;  %s7367_s5 = inlined_call_operand.vmem [shape: f32[288,32], index: 5, kind: input, shape index: {}]   ;;  %s7368_s6 = inlined_call_operand.vmem [shape: f32[1,32], index: 6, kind: input, shape index: {}]   ;;  %s7369_s7 = inlined_call_operand.vmem [shape: bf16[2,1024,32], index: 7, kind: output, shape index: {0}]   ;;  %s7370_s8 = inlined_call_operand.vmem [shape: f32[2,2,2,32], index: 8, kind: output, shape index: {1}]  }
   0x1   :  { %s4555_s29 = smov 0   ;;  %s4557_s30 = smov 0  }
   0x2   :  { %s4559_s9 = smov 0  }
   0x3 LB: > { %s28_s10 = sadd.s32 1, %s4493_s29  ;;  %s31_s11 = sadd.s32 1, %s4497_s30  ;;  %s4501_s9 = sphi %s4559_s9, %s19_s9   ;;  %s4497_s30 = sphi %s4557_s30, %s7653_s30   ;;  %s4493_s29 = sphi %s4555_s29, %s7652_s29   ;;  %s4489_s28 = sphi %s4553_s28, %s7651_s28   ;;  %s4485_s27 = sphi %s4551_s27, %s7650_s27  }
   0x4   : > { %p29_p0 = scmp.ge.s32.totalorder %s28_s10, 2  ;;  %p4146_p1 = scmp.ge.s32.totalorder %s4501_s9, 1 }
   0x5   : > { %p353_p2 = scmp.lt.s32.totalorder %s4501_s9, 5 }
   0x6   : > { %s7655_s10 = smov (%p29_p0, %s28_s10), 0  ;;  %s7657_s11 = smov (!%p29_p0, %s31_s11), %s4497_s30 }
   0x7   : > { %p354_p3 = pnand %p4146_p1, %p353_p2  ;;  %p33_p4 = scmp.ge.s32.totalorder %s7657_s11, 2 }
   0x9   : > { %s7659_s11 = smov (%p33_p4, %s7657_s11), 0  ;;  %357 = sbr.rel (%p354_p3) target bundleno = 863 (0x35f), region = 48 }
   0xe   : > { %v2864_v0 = vld [vmem:[%s7367_s5 + $0x110] sm:$0xff]  ;;  %v2865_v1 = vld [vmem:[%s7367_s5 + $0x118] sm:$0xff]  ;;  %v2862_v2 = vld [vmem:[%s7367_s5 + $0x100] sm:$0xff]  ;;  %s4593_s18 = sshll.u32 %s4485_s27, 4  ;;  %p431_p5 = scmp.lt.s32.totalorder %s4489_s28, 1  ;;  %vm1437_vm1 = vcmask 1040384  }
   0xf   : > { %v4595_v3 = vpack.c.bf16 %v2865_v1, %v2864_v0  ;;  %v2863_v4 = vld [vmem:[%s7367_s5 + $0x108] sm:$0xff]  ;;  %p433_p6 = scmp.lt.s32.totalorder %s4593_s18, 31  ;;  %v4620_v6 = vld [vmem:[%s7365_s3] ss:$0 sm:$0xff]  ;;  %s4623_s16 = sadd.s32 4294967295, %s4593_s18  ;;  %vm1892_vm2 = vcmask 1046528  }
  0x10   : > { %s7661_s28 = smov (!%p431_p5, %s4489_s28), 1  ;;  %v4604_v5 = vpack.c.bf16 %v2863_v4, %v2862_v2  ;;  %v4631_v12 = vld [vmem:[%s7366_s4] ss:$0 sm:$0xff]  ;;  %p443_p7 = scmp.gt.s32.totalorder %s4623_s16, 0  ;;  %vm1130_vm0 = vsmask.f32 256 }
  0x11   : > { %7446 = vst [vmem:[#allocation2_spill] sm:$0xff] %v4595_v3  ;;  %3328 = vmatpush.bf16.msra.mxu2 %v4595_v3  ;;  %s434_s21 = scalar_select %p433_p6, %s4593_s18, 31  ;;  %vm2347_vm3 = vcmask 261120   ;;  %vm4668_vm4 = vmand %vm1437_vm1, %vm1130_vm0  ;;  %vm1475_vm6 = vsmask.f32 7424  ;;  %vm2412_vm7 = vcmask 523264  }
  0x12   : > { %7447 = vst [vmem:[#allocation3_spill] sm:$0xff] %v4604_v5  ;;  %s4608_s22 = sshll.u32 %s7661_s28, 7  ;;  %p4153_p8 = scmp.lt.s32.totalorder %s4623_s16, 31  ;;  %vm2477_vm8 = vcmask 785408   ;;  %vm3555_vm9 = vcmask 257024   ;;  %vm3952_vm11 = vcmask 254976  }
  0x13   : > { %s4148_s23 = sshll.u32 %s434_s21, 2  ;;  %p822_p9 = scmp.eq.s32.totalorder %s4485_s27, 0 }
  0x14   : > { %s437_s24 = sadd.s32 %s4608_s22, %s4148_s23  ;;  %s4503_s15 = smov 96  }
  0x15   : > { %3329 = vmatpush.bf16.msra.mxu2 %v4604_v5  ;;  %s4150_s25 = sshll.u32 %s437_s24, 2  ;;  %s4505_s17 = smov 32  }
  0x16   : > { %s4615_s13 = scalar_lea.vmem %s7362_s0, %s4150_s25  ;;  %p850_p12 = scmp.eq.s32.totalorder %s4485_s27, 1 }
  0x17   : > { %v4216_v7 = vld [vmem:[%s4615_s13] sm:$0xff]   ;;  %v4360_v8 = vld [vmem:[%s4615_s13 + $0x10] sm:$0xff]   ;;  %v4361_v9 = vld [vmem:[%s4615_s13 + $0x18] sm:$0xff]   ;;  %s444_s20 = scalar_select %p443_p7, %s4623_s16, 0 }
  0x18   : > { %v4217_v10 = vunpack.c.l.bf16 %v4216_v7  ;;  %v4218_v11 = vunpack.c.h.bf16 %v4216_v7  ;;  %v4225_v13 = vunpack.c.l.bf16 %v4360_v8  ;;  %v4226_v14 = vunpack.c.h.bf16 %v4360_v8  ;;  %v4359_v15 = vld [vmem:[%s4615_s13 + $0x8] sm:$0xff]   ;;  %s4664_s14 = scalar_select %p822_p9, 1, 0 }
  0x19   : > { %v4229_v16 = vunpack.c.l.bf16 %v4361_v9  ;;  %v4230_v17 = vunpack.c.h.bf16 %v4361_v9  ;;  %v4221_v18 = vunpack.c.l.bf16 %v4359_v15  ;;  %v4222_v19 = vunpack.c.h.bf16 %v4359_v15  ;;  %s7663_s20 = smov (!%p4153_p8, %s444_s20), 31  ;;  %s4504_s16 = smov 64  }
  0x1a   : > { %v627_v20 = vmul.f32 %v4620_v6, %v4217_v10  ;;  %v628_v21 = vmul.f32 %v4620_v6, %v4218_v11  ;;  %v631_v22 = vmul.f32 %v4620_v6, %v4225_v13  ;;  %v632_v23 = vmul.f32 %v4620_v6, %v4226_v14  ;;  %s4158_s21 = sshll.u32 %s7663_s20, 2  ;;  %p487_p13 = scmp.lt.s32.totalorder %s4485_s27, 1 }
  0x1b   : > { %v633_v24 = vmul.f32 %v4620_v6, %v4229_v16  ;;  %v634_v25 = vmul.f32 %v4620_v6, %v4230_v17  ;;  %v629_v26 = vmul.f32 %v4620_v6, %v4221_v18  ;;  %v630_v27 = vmul.f32 %v4620_v6, %v4222_v19  ;;  %s451_s23 = sadd.s32 %s4158_s21, %s4608_s22 }
  0x1c   : > { %v694_v28 = vadd.f32 %v4631_v12, %v627_v20  ;;  %v695_v29 = vadd.f32 %v4631_v12, %v628_v21  ;;  %v698_v30 = vadd.f32 %v4631_v12, %v631_v22  ;;  %v699_v31 = vadd.f32 %v4631_v12, %v632_v23  ;;  %s4160_s24 = sshll.u32 %s451_s23, 2 }
  0x1d   : > { %v700_v32 = vadd.f32 %v4631_v12, %v633_v24  ;;  %v701_v33 = vadd.f32 %v4631_v12, %v634_v25  ;;  %v696_v34 = vadd.f32 %v4631_v12, %v629_v26  ;;  %v697_v35 = vadd.f32 %v4631_v12, %v630_v27  ;;  %s453_s12 = scalar_lea.vmem %s7363_s1, %s4160_s24 }
  0x1e   : > { %v758_v36 = vmax.f32 %v694_v28, 0.0  ;;  %v759_v37 = vmax.f32 %v695_v29, 0.0  ;;  %v762_v38 = vmax.f32 %v698_v30, 0.0  ;;  %v763_v39 = vmax.f32 %v699_v31, 0.0  ;;  %v4344_v62 = vld [vmem:[%s453_s12] sm:$0xff]   ;;  %v4390_v4 = vld [vmem:[%s453_s12 + $0x8] sm:$0xff]  }
  0x1f   : > { %v764_v40 = vmax.f32 %v700_v32, 0.0  ;;  %v765_v41 = vmax.f32 %v701_v33, 0.0  ;;  %v760_v42 = vmax.f32 %v696_v34, 0.0  ;;  %v761_v43 = vmax.f32 %v697_v35, 0.0  ;;  %s871_s25 = scalar_select %p850_p12, 1, 0 }
  0x20   : > { %v882_v44 = vpack.c.bf16 %v758_v36, %v758_v36  ;;  %v883_v45 = vpack.c.bf16 %v759_v37, %v759_v37  ;;  %v886_v46 = vpack.c.bf16 %v762_v38, %v762_v38  ;;  %v887_v47 = vpack.c.bf16 %v763_v39, %v763_v39  ;;  %v4695_v37 = vld [vmem:[%s4615_s13 + $0x20] sm:$0xff]  }
  0x21   : > { %v888_v48 = vpack.c.bf16 %v764_v40, %v764_v40  ;;  %v889_v49 = vpack.c.bf16 %v765_v41, %v765_v41  ;;  %v884_v50 = vpack.c.bf16 %v760_v42, %v760_v42  ;;  %v885_v51 = vpack.c.bf16 %v761_v43, %v761_v43 }
  0x22   : > { %v1026_v52 = vunpack.c.l.b16 %v882_v44  ;;  %v1027_v53 = vunpack.c.l.b16 %v883_v45  ;;  %v1030_v54 = vunpack.c.l.b16 %v886_v46  ;;  %v1031_v55 = vunpack.c.l.b16 %v887_v47 }
  0x23   : > { %v1032_v56 = vunpack.c.l.b16 %v888_v48  ;;  %v1033_v57 = vunpack.c.l.b16 %v889_v49  ;;  %v1028_v58 = vunpack.c.l.b16 %v884_v50  ;;  %v1029_v59 = vunpack.c.l.b16 %v885_v51 }
  0x24   : > { %v1096_v60 = vpack.c.b16 %v1027_v53, %v1026_v52  ;;  %v1098_v61 = vpack.c.b16 %v1031_v55, %v1030_v54  ;;  %v4345_v1 = vunpack.c.l.bf16 %v4344_v62  ;;  %v4346_v2 = vunpack.c.h.bf16 %v4344_v62 }
  0x25   : > { %v1099_v63 = vpack.c.b16 %v1033_v57, %v1032_v56  ;;  %v1097_v0 = vpack.c.b16 %v1029_v59, %v1028_v58  ;;  %v4349_v19 = vunpack.c.l.bf16 %v4390_v4  ;;  %v4350_v20 = vunpack.c.h.bf16 %v4390_v4 }
  0x26   : > { %v1147_v7 = vshrl.u32 %v1096_v60, 16  ;;  %v1150_v8 = vshll.u32 %v1096_v60, 16  ;;  %v1162_v9 = vshrl.u32 %v1098_v61, 16  ;;  %v1165_v10 = vshll.u32 %v1098_v61, 16 }
  0x27   : > { %v1169_v11 = vshrl.u32 %v1099_v63, 16  ;;  %v1172_v13 = vshll.u32 %v1099_v63, 16  ;;  %v1154_v14 = vshrl.u32 %v1097_v0, 16  ;;  %v1157_v15 = vshll.u32 %v1097_v0, 16 }
  0x28   : > { %v1149_v16 = vrot.slane %v1147_v7, 7  ;;  %v1164_v18 = vrot.slane %v1162_v9, 7  ;;  %v831_v23 = vmul.f32 %v4620_v6, %v4345_v1  ;;  %v844_v24 = vstv %s4664_s14  ;;  %s4168_s14 = sshll.u32 %s4485_s27, 6  ;;  %s7671_s27 = smov (!%p487_p13, %s4485_s27), 1 }
  0x29   : > { %v1171_v21 = vrot.slane %v1169_v11, 7  ;;  %v1156_v22 = vrot.slane %v1154_v14, 7  ;;  %v832_v27 = vmul.f32 %v4620_v6, %v4346_v2  ;;  %v833_v28 = vmul.f32 %v4620_v6, %v4349_v19  ;;  %p478_p10 = scmp.lt.s32.totalorder %s4168_s14, 127 }
  0x2a   : > { %v1152_v25 = vor.u32 %v1150_v8, %v1149_v16  ;;  %v1167_v26 = vor.u32 %v1165_v10, %v1164_v18  ;;  %v834_v32 = vmul.f32 %v4620_v6, %v4350_v20  ;;  %v835_v44 = vadd.f32 %v4631_v12, %v831_v23 }
  0x2b   : > { %v1174_v29 = vor.u32 %v1172_v13, %v1171_v21  ;;  %v1159_v30 = vor.u32 %v1157_v15, %v1156_v22  ;;  %v4678_v31 = vsel %vm4668_vm4, %v1156_v22, 0  ;;  %v4692_v36 = vsel %vm4668_vm4, %v1171_v21, 0  ;;  %s7665_s14 = smov (!%p478_p10, %s4168_s14), 127 }
  0x2c   : > { %v4683_v33 = vsel %vm4668_vm4, 0, %v1152_v25  ;;  %v4687_v34 = vsel %vm4668_vm4, 0, %v1167_v26  ;;  %v1901_v35 = vrot.slane %v4678_v31, 1  ;;  %v836_v45 = vadd.f32 %v4631_v12, %v832_v27  ;;  %s481_s21 = sadd.s32 %s4608_s22, %s7665_s14 }
  0x2d   : > { %7450 = vst [vmem:[#allocation4_spill] sm:$0xff] %v4687_v34  ;;  %2038 = vrot.lane.b32.xlu1 %v4683_v33, %s4503_s15  ;;  %2193 = vrot.lane.b32.xlu2 %v4687_v34, %s4504_s16  ;;  %v4702_v38 = vsel %vm1130_vm0, %v1164_v18, %v1174_v29  ;;  %v1903_v39 = vrot.slane %v4687_v34, 1  ;;  %v4706_v40 = vsel %vm1130_vm0, %v1149_v16, %v1159_v30  ;;  %v1898_v41 = vrot.slane %v4683_v33, 1  ;;  %v4363_v18 = vld [vmem:[%s4615_s13 + $0x28] sm:$0xff]   ;;  %s4170_s23 = sshll.u32 %s481_s21, 2 }
  0x2e   : > { %7451 = vst [vmem:[#allocation5_spill] sm:$0xff] %v4702_v38  ;;  %v1904_v42 = vrot.slane %v4702_v38, 1  ;;  %v1899_v43 = vrot.slane %v4706_v40, 1  ;;  %v837_v46 = vadd.f32 %v4631_v12, %v833_v28  ;;  %v838_v47 = vadd.f32 %v4631_v12, %v834_v32  ;;  %s6076_s26 = scalar_lea.vmem %s7369_s7, %s4170_s23 }
  0x2f   : > { %7452 = vst [vmem:[#allocation6_spill] sm:$0xff] %v4706_v40  ;;  %v4233_v48 = vunpack.c.l.bf16 %v4695_v37  ;;  %v1906_v51 = vrot.slane %v4692_v36, 1  ;;  %vm4723_vm5 = vcmp.eq.s32.totalorder %v844_v24, 1  ;;  %v839_v53 = vmax.f32 %v835_v44, 0.0 }
  0x30   : > { %v4717_v49 = vsel %vm1892_vm2, %v1903_v39, %v1904_v42  ;;  %v4720_v50 = vsel %vm1892_vm2, %v1899_v43, %v1901_v35  ;;  %v840_v54 = vmax.f32 %v836_v45, 0.0  ;;  %v841_v55 = vmax.f32 %v837_v46, 0.0 }
  0x31   : > { %4173 = vmatmul.msk.bf16.vlgmr.msra.gmra.mxu2 %vm2347_vm3, %v4717_v49  ;;  %2130 = vrot.lane.b32.xlu0 %v4720_v50, %s4505_s17  ;;  %v842_v56 = vmax.f32 %v838_v47, 0.0  ;;  %v4732_v57 = vsel %vm1892_vm2, %v1898_v41, %v1899_v43  ;;  %v1517_v58 = vshrl.u32 %v4687_v34, 16  ;;  %v1519_v59 = vshll.u32 %v4687_v34, 16 }
  0x32   : > { %v1524_v60 = vshll.u32 %v4702_v38, 16  ;;  %v846_v61 = vsel %vm4723_vm5, 0.0, %v839_v53  ;;  %v847_v62 = vsel %vm4723_vm5, 0.0, %v840_v54  ;;  %v848_v63 = vsel %vm4723_vm5, 0.0, %v841_v55 }
  0x33   : > { %v849_v0 = vsel %vm4723_vm5, 0.0, %v842_v56  ;;  %v878_v1 = vpack.c.bf16 %v846_v61, %v846_v61  ;;  %v879_v2 = vpack.c.bf16 %v847_v62, %v847_v62  ;;  %v880_v4 = vpack.c.bf16 %v848_v63, %v848_v63 }
  0x34   : > { %v881_v7 = vpack.c.bf16 %v849_v0, %v849_v0  ;;  %v1521_v8 = vrot.slane %v1519_v59, 1  ;;  %v1497_v9 = vshrl.u32 %v4683_v33, 16  ;;  %v1499_v10 = vshll.u32 %v4683_v33, 16 }
  0x35   : > { %2195 = vrot.lane.b32.xlu1 %v4702_v38, %s4504_s16  ;;  %2040 = vrot.lane.b32.xlu2 %v4706_v40, %s4503_s15  ;;  %v1504_v11 = vshll.u32 %v4706_v40, 16  ;;  %v1022_v13 = vunpack.c.l.b16 %v878_v1  ;;  %v1023_v14 = vunpack.c.l.b16 %v879_v2  ;;  %v1024_v15 = vunpack.c.l.b16 %v880_v4 }
  0x36   : > { %v1025_v16 = vunpack.c.l.b16 %v881_v7  ;;  %v4754_v19 = vsel %vm1892_vm2, %v1904_v42, %v1906_v51  ;;  %v1526_v20 = vrot.slane %v1524_v60, 1  ;;  %v1501_v21 = vrot.slane %v1499_v10, 1 }
  0x37   : > { %v1528_v22 = vshrl.u32 %v4702_v38, 16  ;;  %v1094_v23 = vpack.c.b16 %v1023_v14, %v1022_v13  ;;  %v1532_v25 = vshll.u32 %v4692_v36, 16  ;;  %v4234_v26 = vunpack.c.h.bf16 %v4695_v37 }
  0x38   : > { %v1095_v24 = vpack.c.b16 %v1025_v16, %v1024_v15  ;;  %v1522_v27 = vor.u32 %v1521_v8, %v1517_v58  ;;  %v1502_v28 = vor.u32 %v1501_v21, %v1497_v9  ;;  %v4761_v29 = vrot.slane %v1504_v11, 1 }
  0x39   : > { %2132 = vrot.lane.b32.xlu0 %v4717_v49, %s4505_s17  ;;  %v4237_v30 = vunpack.c.l.bf16 %v4363_v18  ;;  %v1132_v32 = vshrl.u32 %v1094_v23, 16  ;;  %v1135_v35 = vshll.u32 %v1094_v23, 16  ;;  %v1530_v42 = vor.u32 %v1528_v22, %v1526_v20 }
  0x3a   : > { %v1139_v39 = vshrl.u32 %v1095_v24, 16  ;;  %v1142_v41 = vshll.u32 %v1095_v24, 16  ;;  %v1534_v43 = vrot.slane %v1532_v25, 1  ;;  %v4238_v44 = vunpack.c.h.bf16 %v4363_v18  ;;  %v4381_v25 = vld [vmem:[%s4615_s13 + $0xb8] sm:$0xff]  }
  0x3b   : > { %v635_v45 = vmul.f32 %v4620_v6, %v4233_v48  ;;  %v1134_v36 = vrot.slane %v1132_v32, 7  ;;  %v636_v37 = vmul.f32 %v4620_v6, %v4234_v26  ;;  %v637_v47 = vmul.f32 %v4620_v6, %v4237_v30 }
  0x3c   : > { %v1141_v46 = vrot.slane %v1139_v39, 7  ;;  %v4771_v51 = vsel %vm1475_vm6, %v1522_v27, %v1526_v20  ;;  %v638_v52 = vmul.f32 %v4620_v6, %v4238_v44  ;;  %v4777_v55 = vsel %vm1475_vm6, %v1502_v28, %v4761_v29  ;;  %v4380_v20 = vld [vmem:[%s4615_s13 + $0xb0] sm:$0xff]  }
  0x3d   : > { %2128 = vrot.lane.b32.xlu1 %v4732_v57, %s4505_s17  ;;  %2042 = vrot.lane.b32.xlu2 %v4687_v34, %s4503_s15  ;;  %v702_v53 = vadd.f32 %v4631_v12, %v635_v45  ;;  %v1137_v48 = vor.u32 %v1135_v35, %v1134_v36  ;;  %v703_v56 = vadd.f32 %v4631_v12, %v636_v37  ;;  %v4306_v44 = vunpack.c.h.bf16 %v4380_v20 }
  0x3e   : > { %v1144_v54 = vor.u32 %v1142_v41, %v1141_v46  ;;  %v4781_v58 = vsel %vm1475_vm6, %v1530_v42, %v1534_v43  ;;  %v704_v59 = vadd.f32 %v4631_v12, %v637_v47  ;;  %v705_v60 = vadd.f32 %v4631_v12, %v638_v52 }
  0x3f   : > { %7455 = vst [vmem:[#allocation7_spill] sm:$0xff] %v4781_v58  ;;  %v766_v61 = vmax.f32 %v702_v53, 0.0  ;;  %v4790_v63 = vsel %vm4668_vm4, 0, %v1137_v48  ;;  %v1457_v0 = vsel %vm4668_vm4, %v1141_v46, 0  ;;  %v767_v1 = vmax.f32 %v703_v56, 0.0 }
  0x40   : > { %v4786_v62 = vsel %vm1130_vm0, %v1134_v36, %v1144_v54  ;;  %v1893_v2 = vrot.slane %v4790_v63, 1  ;;  %v768_v7 = vmax.f32 %v704_v59, 0.0  ;;  %v769_v8 = vmax.f32 %v705_v60, 0.0 }
  0x41   : > { %4174 = vmatmul.msk.bf16.gmra.mxu2 %vm2347_vm3, %v4754_v19  ;;  %v1894_v4 = vrot.slane %v4786_v62, 1  ;;  %v890_v9 = vpack.c.bf16 %v766_v61, %v766_v61  ;;  %v891_v10 = vpack.c.bf16 %v767_v1, %v767_v1  ;;  %v1477_v11 = vshrl.u32 %v4790_v63, 16 }
  0x42   : > { %v1479_v13 = vshll.u32 %v4790_v63, 16  ;;  %v892_v15 = vpack.c.bf16 %v768_v7, %v768_v7  ;;  %v893_v16 = vpack.c.bf16 %v769_v8, %v769_v8  ;;  %v1492_v18 = vshll.u32 %v1457_v0, 16  ;;  %v4364_v7 = vld [vmem:[%s4615_s13 + $0x30] sm:$0xff]  }
  0x43   : > { %v1895_v14 = vsel %vm1892_vm2, %v1893_v2, %v1894_v4  ;;  %v1034_v21 = vunpack.c.l.b16 %v890_v9  ;;  %v1035_v22 = vunpack.c.l.b16 %v891_v10  ;;  %v1484_v24 = vshll.u32 %v4786_v62, 16 }
  0x44   : > { %1973 = vrot.lane.b32.xlu0 %v1895_v14, %s4504_s16  ;;  %v1481_v23 = vrot.slane %v1479_v13, 1  ;;  %v1896_v26 = vrot.slane %v1457_v0, 1  ;;  %v1036_v27 = vunpack.c.l.b16 %v892_v15  ;;  %v1037_v28 = vunpack.c.l.b16 %v893_v16 }
  0x45   : > { %1977 = vrot.lane.b32.xlu1 %v4732_v57, %s4504_s16  ;;  %2277 = vrot.lane.b32.xlu2 %v4771_v51, %s4503_s15  ;;  %v1488_v30 = vshrl.u32 %v4786_v62, 16  ;;  %v1100_v32 = vpack.c.b16 %v1035_v22, %v1034_v21  ;;  %v1486_v39 = vrot.slane %v1484_v24, 1  ;;  %v4305_v41 = vunpack.c.l.bf16 %v4380_v20 }
  0x46   : > { %v1482_v35 = vor.u32 %v1481_v23, %v1477_v11  ;;  %v1101_v42 = vpack.c.b16 %v1037_v28, %v1036_v27  ;;  %v1508_v43 = vshrl.u32 %v4706_v40, 16  ;;  %v4309_v45 = vunpack.c.l.bf16 %v4381_v25 }
  0x47   : > { %v1177_v36 = vshrl.u32 %v1100_v32, 16  ;;  %v1180_v57 = vshll.u32 %v1100_v32, 16  ;;  %v1490_v46 = vor.u32 %v1488_v30, %v1486_v39  ;;  %v1494_v37 = vrot.slane %v1492_v18, 1 }
  0x48   : > { %v1897_v47 = vsel %vm1892_vm2, %v1894_v4, %v1896_v26  ;;  %v1184_v52 = vshrl.u32 %v1101_v42, 16  ;;  %v1187_v53 = vshll.u32 %v1101_v42, 16  ;;  %v1512_v48 = vshll.u32 %v4678_v31, 16 }
  0x49   : > { %v1179_v54 = vrot.slane %v1177_v36, 7  ;;  %v1487_v56 = vsel %vm1475_vm6, %v1482_v35, %v1486_v39  ;;  %v4310_v59 = vunpack.c.h.bf16 %v4381_v25  ;;  %v671_v60 = vmul.f32 %v4620_v6, %v4305_v41  ;;  %v4365_v39 = vld [vmem:[%s4615_s13 + $0x38] sm:$0xff]  }
  0x4a   : > { %v1186_v61 = vrot.slane %v1184_v52, 7  ;;  %v4816_v0 = vor.u32 %v1508_v43, %v4761_v29  ;;  %v672_v1 = vmul.f32 %v4620_v6, %v4306_v44  ;;  %v673_v2 = vmul.f32 %v4620_v6, %v4309_v45  ;;  %v4382_v45 = vld [vmem:[%s4615_s13 + $0xc0] sm:$0xff]  }
  0x4b   : > { %v1182_v4 = vor.u32 %v1180_v57, %v1179_v54  ;;  %v4824_v31 = vsel %vm1475_vm6, %v1490_v46, %v1494_v37  ;;  %v674_v8 = vmul.f32 %v4620_v6, %v4310_v59  ;;  %v738_v9 = vadd.f32 %v4631_v12, %v671_v60 }
  0x4c   : > { %1800 = vrot.lane.b32.xlu0 %v4777_v55, %s4505_s17  ;;  %v1189_v29 = vor.u32 %v1187_v53, %v1186_v61  ;;  %v4831_v10 = vrot.slane %v1512_v48, 1  ;;  %v739_v11 = vadd.f32 %v4631_v12, %v672_v1  ;;  %v740_v13 = vadd.f32 %v4631_v12, %v673_v2 }
  0x4d   : > { %1975 = vrot.lane.b32.xlu1 %v1897_v47, %s4504_s16  ;;  %2279 = vrot.lane.b32.xlu2 %v4781_v58, %s4503_s15  ;;  %v4837_v14 = vsel %vm4668_vm4, 0, %v1182_v4  ;;  %v741_v15 = vadd.f32 %v4631_v12, %v674_v8  ;;  %v802_v16 = vmax.f32 %v738_v9, 0.0  ;;  %v4241_v18 = vunpack.c.l.bf16 %v4364_v7 }
  0x4e   : > { %7456 = vst [vmem:[#allocation8_spill] sm:$0xff] %v4837_v14  ;;  %v4841_v20 = vsel %vm1130_vm0, %v1179_v54, %v1189_v29  ;;  %v1908_v21 = vrot.slane %v4837_v14, 1  ;;  %v803_v22 = vmax.f32 %v739_v11, 0.0  ;;  %v804_v23 = vmax.f32 %v740_v13, 0.0 }
  0x4f   : > { %7457 = vst [vmem:[#allocation9_spill] sm:$0xff] %v4841_v20  ;;  %v1909_v24 = vrot.slane %v4841_v20, 1  ;;  %v805_v25 = vmax.f32 %v741_v15, 0.0  ;;  %v926_v26 = vpack.c.bf16 %v802_v16, %v802_v16  ;;  %v1537_v27 = vshrl.u32 %v4837_v14, 16 }
  0x50   : > { %v927_v28 = vpack.c.bf16 %v803_v22, %v803_v22  ;;  %v928_v30 = vpack.c.bf16 %v804_v23, %v804_v23  ;;  %v1539_v32 = vshll.u32 %v4837_v14, 16  ;;  %v1544_v35 = vshll.u32 %v4841_v20, 16 }
  0x51   : > { %v4852_v41 = vsel %vm1892_vm2, %v1908_v21, %v1909_v24  ;;  %v4856_v42 = vsel %vm4668_vm4, %v1186_v61, 0  ;;  %v929_v43 = vpack.c.bf16 %v805_v25, %v805_v25  ;;  %v1070_v44 = vunpack.c.l.b16 %v926_v26 }
  0x52   : > { %4175 = vmatmul.msk.bf16.gmra.mxu2 %vm2347_vm3, %v4852_v41  ;;  %v1071_v36 = vunpack.c.l.b16 %v927_v28  ;;  %v1072_v57 = vunpack.c.l.b16 %v928_v30  ;;  %v1541_v46 = vrot.slane %v1539_v32, 1  ;;  %v4861_v37 = vrot.slane %v1544_v35, 1 }
  0x53   : > { %v1073_v47 = vunpack.c.l.b16 %v929_v43  ;;  %v4242_v52 = vunpack.c.h.bf16 %v4364_v7  ;;  %v4245_v53 = vunpack.c.l.bf16 %v4365_v39  ;;  %v4246_v48 = vunpack.c.h.bf16 %v4365_v39 }
  0x54   : > { %1796 = vrot.lane.b32.xlu0 %v1487_v56, %s4505_s17  ;;  %v1118_v54 = vpack.c.b16 %v1071_v36, %v1070_v44  ;;  %v1542_v59 = vor.u32 %v1541_v46, %v1537_v27  ;;  %v639_v60 = vmul.f32 %v4620_v6, %v4241_v18  ;;  %v4313_v61 = vunpack.c.l.bf16 %v4382_v45 }
  0x55   : > { %2197 = vrot.lane.b32.xlu1 %v4837_v14, %s4504_s16  ;;  %v1119_v1 = vpack.c.b16 %v1073_v47, %v1072_v57  ;;  %v640_v2 = vmul.f32 %v4620_v6, %v4242_v52  ;;  %v641_v4 = vmul.f32 %v4620_v6, %v4245_v53  ;;  %v642_v8 = vmul.f32 %v4620_v6, %v4246_v48 }
  0x56   : > { %v1312_v56 = vshrl.u32 %v1118_v54, 16  ;;  %v1315_v9 = vshll.u32 %v1118_v54, 16  ;;  %v4872_v7 = vsel %vm1475_vm6, %v1542_v59, %v4861_v37  ;;  %v706_v29 = vadd.f32 %v4631_v12, %v639_v60 }
  0x57   : > { %7458 = vst [vmem:[#allocation10_spill] sm:$0xff] %v4872_v7  ;;  %v1319_v11 = vshrl.u32 %v1119_v1, 16  ;;  %v1322_v13 = vshll.u32 %v1119_v1, 16  ;;  %2281 = vrot.lane.b32.xlu2 %v4872_v7, %s4503_s15  ;;  %v707_v15 = vadd.f32 %v4631_v12, %v640_v2  ;;  %v708_v16 = vadd.f32 %v4631_v12, %v641_v4 }
  0x58   : > { %v1314_v18 = vrot.slane %v1312_v56, 7  ;;  %v709_v21 = vadd.f32 %v4631_v12, %v642_v8  ;;  %v770_v22 = vmax.f32 %v706_v29, 0.0  ;;  %v4314_v23 = vunpack.c.h.bf16 %v4382_v45 }
  0x59   : > { %v4880_v25 = vrot.slane %v1319_v11, 7  ;;  %v771_v26 = vmax.f32 %v707_v15, 0.0  ;;  %v772_v27 = vmax.f32 %v708_v16, 0.0  ;;  %v675_v28 = vmul.f32 %v4620_v6, %v4313_v61 }
  0x5a   : > { %v1317_v30 = vor.u32 %v1315_v9, %v1314_v18  ;;  %v773_v32 = vmax.f32 %v709_v21, 0.0  ;;  %v894_v35 = vpack.c.bf16 %v770_v22, %v770_v22  ;;  %v676_v39 = vmul.f32 %v4620_v6, %v4314_v23  ;;  %v4366_v22 = vld [vmem:[%s4615_s13 + $0x40] sm:$0xff]  }
  0x5b   : > { %v1911_v43 = vrot.slane %v4856_v42, 1  ;;  %v895_v44 = vpack.c.bf16 %v771_v26, %v771_v26  ;;  %v896_v36 = vpack.c.bf16 %v772_v27, %v772_v27  ;;  %v742_v45 = vadd.f32 %v4631_v12, %v675_v28 }
  0x5c   : > { %1798 = vrot.lane.b32.xlu0 %v4824_v31, %s4505_s17  ;;  %v1324_v57 = vor.u32 %v1322_v13, %v4880_v25  ;;  %v897_v46 = vpack.c.bf16 %v773_v32, %v773_v32  ;;  %v1038_v47 = vunpack.c.l.b16 %v894_v35  ;;  %v743_v52 = vadd.f32 %v4631_v12, %v676_v39 }
  0x5d   : > { %1979 = vrot.lane.b32.xlu1 %v4720_v50, %s4504_s16  ;;  %v1039_v53 = vunpack.c.l.b16 %v895_v44  ;;  %v1040_v48 = vunpack.c.l.b16 %v896_v36  ;;  %v4894_v31 = vsel %vm4668_vm4, 0, %v1317_v30  ;;  %v4899_v59 = vsel %vm1892_vm2, %v1909_v24, %v1911_v43  ;;  %v4367_v44 = vld [vmem:[%s4615_s13 + $0x48] sm:$0xff]  }
  0x5e   : > { %7459 = vst [vmem:[#allocation11_spill] sm:$0xff] %v4894_v31  ;;  %v1041_v54 = vunpack.c.l.b16 %v897_v46  ;;  %v806_v50 = vmax.f32 %v742_v45, 0.0  ;;  %v807_v61 = vmax.f32 %v743_v52, 0.0  ;;  %v4906_v1 = vsel %vm1475_vm6, %v4816_v0, %v4831_v10 }
  0x5f   : > { %v1102_v60 = vpack.c.b16 %v1039_v53, %v1038_v47  ;;  %2044 = vrot.lane.b32.xlu2 %v4702_v38, %s4503_s15  ;;  %v4909_v2 = vsel %vm1130_vm0, %v1314_v18, %v1324_v57  ;;  %v1548_v8 = vshrl.u32 %v4841_v20, 16  ;;  %v1719_v9 = vshll.u32 %v4894_v31, 16 }
  0x60   : > { %7460 = vst [vmem:[#allocation12_spill] sm:$0xff] %v4909_v2  ;;  %v1103_v4 = vpack.c.b16 %v1041_v54, %v1040_v48  ;;  %v930_v29 = vpack.c.bf16 %v806_v50, %v806_v50  ;;  %v1953_v11 = vrot.slane %v4894_v31, 1  ;;  %v931_v10 = vpack.c.bf16 %v807_v61, %v807_v61  ;;  %v4383_v50 = vld [vmem:[%s4615_s13 + $0xc8] sm:$0xff]  }
  0x61   : > { %v1192_v24 = vshrl.u32 %v1102_v60, 16  ;;  %v1195_v56 = vshll.u32 %v1102_v60, 16  ;;  %v1954_v15 = vrot.slane %v4909_v2, 1  ;;  %v1550_v18 = vor.u32 %v1548_v8, %v4861_v37 }
  0x62   : > { %4176 = vmatmul.msk.bf16.gmra.mxu2 %vm2347_vm3, %v4899_v59  ;;  %v1199_v13 = vshrl.u32 %v1103_v4, 16  ;;  %v1202_v0 = vshll.u32 %v1103_v4, 16  ;;  %v1552_v21 = vshll.u32 %v4856_v42, 16  ;;  %v1717_v26 = vshrl.u32 %v4894_v31, 16 }
  0x63   : > { %v1194_v16 = vrot.slane %v1192_v24, 7  ;;  %v1074_v27 = vunpack.c.l.b16 %v930_v29  ;;  %v1075_v28 = vunpack.c.l.b16 %v931_v10  ;;  %v1721_v32 = vrot.slane %v1719_v9, 1 }
  0x64   : > { %1802 = vrot.lane.b32.xlu0 %v4906_v1, %s4505_s17  ;;  %v4924_v23 = vrot.slane %v1199_v13, 7  ;;  %v1724_v35 = vshll.u32 %v4909_v2, 16  ;;  %v1554_v39 = vrot.slane %v1552_v21, 1  ;;  %v4249_v43 = vunpack.c.l.bf16 %v4366_v22 }
  0x65   : > { %2199 = vrot.lane.b32.xlu1 %v4841_v20, %s4504_s16  ;;  %v1197_v30 = vor.u32 %v1195_v56, %v1194_v16  ;;  %v1120_v57 = vpack.c.b16 %v1075_v28, %v1074_v27  ;;  %v4945_v46 = vsel %vm1892_vm2, %v1953_v11, %v1954_v15  ;;  %v1722_v47 = vor.u32 %v1721_v32, %v1717_v26 }
  0x66   : > { %v1204_v37 = vor.u32 %v1202_v0, %v4924_v23  ;;  %v4930_v42 = vsel %vm1475_vm6, %v1550_v18, %v1554_v39  ;;  %7463 = vst [vmem:[#allocation15_spill] sm:$0xff] %v4945_v46  ;;  %v4947_v52 = vrot.slane %v1724_v35, 1  ;;  %v4250_v53 = vunpack.c.h.bf16 %v4366_v22 }
  0x67   : > { %v4938_v45 = vsel %vm4668_vm4, 0, %v1197_v30  ;;  %2283 = vrot.lane.b32.xlu2 %v4930_v42, %s4503_s15  ;;  %v4253_v48 = vunpack.c.l.bf16 %v4367_v44  ;;  %v4254_v54 = vunpack.c.h.bf16 %v4367_v44  ;;  %v643_v60 = vmul.f32 %v4620_v6, %v4249_v43 }
  0x68   : > { %v4934_v36 = vsel %vm1130_vm0, %v1194_v16, %v1204_v37  ;;  %7462 = vst [vmem:[#allocation14_spill] sm:$0xff] %v4938_v45  ;;  %v1913_v61 = vrot.slane %v4938_v45, 1  ;;  %v644_v8 = vmul.f32 %v4620_v6, %v4250_v53  ;;  %v1327_v24 = vshrl.u32 %v1120_v57, 16 }
  0x69   : > { %7461 = vst [vmem:[#allocation13_spill] sm:$0xff] %v4934_v36  ;;  %v1914_v4 = vrot.slane %v4934_v36, 1  ;;  %v645_v56 = vmul.f32 %v4620_v6, %v4253_v48  ;;  %v646_v9 = vmul.f32 %v4620_v6, %v4254_v54  ;;  %v710_v29 = vadd.f32 %v4631_v12, %v643_v60 }
  0x6a   : > { %v4963_v11 = vsel %vm1475_vm6, %v1722_v47, %v4947_v52  ;;  %v711_v13 = vadd.f32 %v4631_v12, %v644_v8  ;;  %v4317_v0 = vunpack.c.l.bf16 %v4383_v50  ;;  %v4318_v10 = vunpack.c.h.bf16 %v4383_v50  ;;  %v2860_v8 = vld [vmem:[%s7367_s5 + $0xf0] sm:$0xff] }
  0x6b   : > { %7464 = vst [vmem:[#allocation16_spill] sm:$0xff] %v4963_v11  ;;  %v1330_v16 = vshll.u32 %v1120_v57, 16  ;;  %v712_v18 = vadd.f32 %v4631_v12, %v645_v56  ;;  %v713_v21 = vadd.f32 %v4631_v12, %v646_v9  ;;  %v774_v22 = vmax.f32 %v710_v29, 0.0 }
  0x6c   : > { %2134 = vrot.lane.b32.xlu0 %v4754_v19, %s4505_s17  ;;  %v4971_v26 = vsel %vm1892_vm2, %v1913_v61, %v1914_v4  ;;  %v775_v27 = vmax.f32 %v711_v13, 0.0  ;;  %v677_v28 = vmul.f32 %v4620_v6, %v4317_v0  ;;  %v678_v30 = vmul.f32 %v4620_v6, %v4318_v10  ;;  %v2858_v0 = vld [vmem:[%s7367_s5 + $0xe0] sm:$0xff]  ;;  %v2859_v10 = vld [vmem:[%s7367_s5 + $0xe8] sm:$0xff] }
  0x6d   : > { %2021 = vrot.lane.b32.xlu1 %v4945_v46, %s4504_s16  ;;  %v4975_v32 = vrot.slane %v1327_v24, 7  ;;  %v776_v35 = vmax.f32 %v712_v18, 0.0  ;;  %v777_v39 = vmax.f32 %v713_v21, 0.0  ;;  %v898_v37 = vpack.c.bf16 %v774_v22, %v774_v22  ;;  %v2861_v24 = vld [vmem:[%s7367_s5 + $0xf8] sm:$0xff] }
  0x6e   : > { %v899_v43 = vpack.c.bf16 %v775_v27, %v775_v27  ;;  %v744_v44 = vadd.f32 %v4631_v12, %v677_v28  ;;  %v745_v57 = vadd.f32 %v4631_v12, %v678_v30  ;;  %v1559_v54 = vshll.u32 %v4938_v45, 16 }
  0x6f   : > { %1804 = vrot.lane.b32.xlu2 %v4771_v51, %s4505_s17  ;;  %v900_v47 = vpack.c.bf16 %v776_v35, %v776_v35  ;;  %v901_v53 = vpack.c.bf16 %v777_v39, %v777_v39  ;;  %v1042_v48 = vunpack.c.l.b16 %v898_v37  ;;  %v1332_v56 = vor.u32 %v1330_v16, %v4975_v32 }
  0x70   : > { %v1043_v60 = vunpack.c.l.b16 %v899_v43  ;;  %v808_v50 = vmax.f32 %v744_v44, 0.0  ;;  %v809_v61 = vmax.f32 %v745_v57, 0.0  ;;  %v4995_v13 = vpack.c.bf16 %v2861_v24, %v2860_v8  ;;  %v4368_v24 = vld [vmem:[%s4615_s13 + $0x50] sm:$0xff]  }
  0x71   : > { %v1044_v9 = vunpack.c.l.b16 %v900_v47  ;;  %v1045_v29 = vunpack.c.l.b16 %v901_v53  ;;  %v1557_v18 = vshrl.u32 %v4938_v45, 16  ;;  %v1561_v21 = vrot.slane %v1559_v54, 1  ;;  %v4384_v47 = vld [vmem:[%s4615_s13 + $0xd0] sm:$0xff]  }
  0x72   : > { %4177 = vmatmul.msk.bf16.gmra.mxu2 %vm2347_vm3, %v4971_v26  ;;  %v1104_v16 = vpack.c.b16 %v1043_v60, %v1042_v48  ;;  %3153 = vmatpush.bf16.msra.mxu1 %v4995_v13  ;;  %v1564_v22 = vshll.u32 %v4934_v36, 16  ;;  %v5011_v27 = vpack.c.bf16 %v2859_v10, %v2858_v0  ;;  %v932_v30 = vpack.c.bf16 %v808_v50, %v808_v50  ;;  %v2856_v60 = vld [vmem:[%s7367_s5 + $0xd0] sm:$0xff] }
  0x73   : > { %v1105_v28 = vpack.c.b16 %v1045_v29, %v1044_v9  ;;  %v933_v35 = vpack.c.bf16 %v809_v61, %v809_v61  ;;  %v5015_v39 = vsel %vm4668_vm4, 0, %v1332_v56  ;;  %v1469_v37 = vsel %vm4668_vm4, %v4880_v25, 0  ;;  %v2857_v25 = vld [vmem:[%s7367_s5 + $0xd8] sm:$0xff] }
  0x74   : > { %1844 = vrot.lane.b32.xlu0 %v4963_v11, %s4505_s17  ;;  %7465 = vst [vmem:[#allocation17_spill] sm:$0xff] %v5015_v39  ;;  %v1562_v43 = vor.u32 %v1561_v21, %v1557_v18  ;;  %v5023_v44 = vrot.slane %v1564_v22, 1  ;;  %v1207_v57 = vshrl.u32 %v1104_v16, 16  ;;  %v1076_v48 = vunpack.c.l.b16 %v932_v30  ;;  %v2854_v22 = vld [vmem:[%s7367_s5 + $0xc0] sm:$0xff] }
  0x75   : > { %1981 = vrot.lane.b32.xlu1 %v4717_v49, %s4504_s16  ;;  %v5007_v49 = vsel %vm4668_vm4, %v4924_v23, 0  ;;  %v1214_v53 = vshrl.u32 %v1105_v28, 16  ;;  %v1077_v54 = vunpack.c.l.b16 %v933_v35  ;;  %v1956_v50 = vrot.slane %v1469_v37, 1  ;;  %v4369_v35 = vld [vmem:[%s4615_s13 + $0x58] sm:$0xff]  }
  0x76   : > { %v1916_v23 = vrot.slane %v5007_v49, 1  ;;  %3154 = vmatpush.bf16.msra.mxu1 %v5011_v27  ;;  %v1728_v61 = vshrl.u32 %v4909_v2, 16  ;;  %v5038_v8 = vpack.c.bf16 %v2857_v25, %v2856_v60  ;;  %v1732_v9 = vshll.u32 %v1469_v37, 16 }
  0x77   : > { %2046 = vrot.lane.b32.xlu2 %v4837_v14, %s4503_s15  ;;  %v5048_v29 = vsel %vm1475_vm6, %v1562_v43, %v5023_v44  ;;  %v4321_v0 = vunpack.c.l.bf16 %v4384_v47  ;;  %v1209_v10 = vrot.slane %v1207_v57, 7  ;;  %v1210_v18 = vshll.u32 %v1104_v16, 16 }
  0x78   : > { %v5044_v56 = vsel %vm1892_vm2, %v1914_v4, %v1916_v23  ;;  %v1217_v21 = vshll.u32 %v1105_v28, 16  ;;  %v2855_v4 = vld [vmem:[%s7367_s5 + $0xc8] sm:$0xff]  ;;  %v4322_v30 = vunpack.c.h.bf16 %v4384_v47  ;;  %v5058_v23 = vrot.slane %v1214_v53, 7 }
  0x79   : > { %v1121_v37 = vpack.c.b16 %v1077_v54, %v1076_v48  ;;  %v5060_v43 = vpack.c.bf16 %v2855_v4, %v2854_v22  ;;  %v4257_v57 = vunpack.c.l.bf16 %v4368_v24  ;;  %v4258_v16 = vunpack.c.h.bf16 %v4368_v24 }
  0x7a   : > { %3155 = vmatpush.bf16.msra.mxu1 %v5038_v8  ;;  %v5067_v28 = vsel %vm1892_vm2, %v1954_v15, %v1956_v50  ;;  %v1730_v60 = vor.u32 %v1728_v61, %v4947_v52  ;;  %v1734_v25 = vrot.slane %v1732_v9, 1  ;;  %v4261_v47 = vunpack.c.l.bf16 %v4369_v35  ;;  %v2852_v52 = vld [vmem:[%s7367_s5 + $0xb0] sm:$0xff]  ;;  %v2853_v61 = vld [vmem:[%s7367_s5 + $0xb8] sm:$0xff] }
  0x7b   : > { %7466 = vst [vmem:[#allocation18_spill] sm:$0xff] %v5067_v28  ;;  %v1212_v53 = vor.u32 %v1210_v18, %v1209_v10  ;;  %v679_v48 = vmul.f32 %v4620_v6, %v4321_v0  ;;  %v680_v54 = vmul.f32 %v4620_v6, %v4322_v30  ;;  %v1219_v15 = vor.u32 %v1217_v21, %v5058_v23  ;;  %v2844_v18 = vld [vmem:[%s7367_s5 + $0x70] sm:$0xff]  ;;  %v2845_v21 = vld [vmem:[%s7367_s5 + $0x78] sm:$0xff] }
  0x7c   : > { %2086 = vrot.lane.b32.xlu0 %v5015_v39, %s4503_s15  ;;  %v1334_v50 = vshrl.u32 %v1121_v37, 16  ;;  %v4262_v24 = vunpack.c.h.bf16 %v4369_v35  ;;  %v647_v9 = vmul.f32 %v4620_v6, %v4257_v57  ;;  %v5087_v0 = vpack.c.bf16 %v2853_v61, %v2852_v52 }
  0x7d   : > { %2201 = vrot.lane.b32.xlu1 %v4938_v45, %s4504_s16  ;;  %v648_v22 = vmul.f32 %v4620_v6, %v4258_v16  ;;  %v5097_v4 = vsel %vm1475_vm6, %v1730_v60, %v1734_v25  ;;  %v2873_v30 = vpack.c.bf16 %v2845_v21, %v2844_v18  ;;  %v649_v35 = vmul.f32 %v4620_v6, %v4261_v47  ;;  %v2851_v25 = vld [vmem:[%s7367_s5 + $0xa8] sm:$0xff]  ;;  %v5129_v47 = vld [vmem:[%s7366_s4] ss:$0 sm:$0xff] }
  0x7e   : > { %3156 = vmatpush.bf16.msra.mxu1 %v5060_v43  ;;  %7467 = vst [vmem:[#allocation19_spill] sm:$0xff] %v5097_v4  ;;  %v1337_v52 = vshll.u32 %v1121_v37, 16  ;;  %v746_v61 = vadd.f32 %v4631_v12, %v679_v48  ;;  %v747_v11 = vadd.f32 %v4631_v12, %v680_v54  ;;  %v5107_v46 = vsel %vm1130_vm0, %v1209_v10, %v1219_v15  ;;  %v2850_v37 = vld [vmem:[%s7367_s5 + $0xa0] sm:$0xff] }
  0x7f   : > { %2285 = vrot.lane.b32.xlu2 %v5048_v29, %s4503_s15  ;;  %7468 = vst [vmem:[#allocation20_spill] sm:$0xff] %v5107_v46  ;;  %v5111_v16 = vsel %vm4668_vm4, 0, %v1212_v53  ;;  %v5113_v60 = vrot.slane %v1334_v50, 7  ;;  %2984 = vmatpush.bf16.msra.mxu0 %v2873_v30  ;;  %v5124_v10 = vpack.c.bf16 %v2851_v25, %v2850_v37  ;;  %v715_v53 = vadd.f32 %v5129_v47, %v648_v22  ;;  %v2842_v18 = vld [vmem:[%s7367_s5 + $0x60] sm:$0xff] }
  0x80   : > { %7469 = vst [vmem:[#allocation21_spill] sm:$0xff] %v5111_v16  ;;  %4392 = vmatpush.bf16.msra.mxu3 %v2873_v30  ;;  %v716_v48 = vadd.f32 %v5129_v47, %v649_v35  ;;  %v811_v15 = vmax.f32 %v747_v11, 0.0  ;;  %v1918_v50 = vrot.slane %v5111_v16, 1  ;;  %v2848_v11 = vld [vmem:[%s7367_s5 + $0x90] sm:$0xff]  ;;  %v2849_v30 = vld [vmem:[%s7367_s5 + $0x98] sm:$0xff]  ;;  %v7470_v38 = vrot.slane %v5107_v46, 1 }
  0x81   : > { %v2840_v35 = vld [vmem:[%s7367_s5 + $0x50] sm:$0xff] }
  0x82   : > { %4178 = vmatmul.msk.bf16.gmra.mxu2 %vm2347_vm3, %v5044_v56  ;;  %3157 = vmatpush.bf16.msra.mxu1 %v5087_v0  ;;  %v780_v37 = vmax.f32 %v716_v48, 0.0  ;;  %v5169_v2 = vsel %vm1892_vm2, %v1918_v50, %v7470_v38  ;;  %v2847_v48 = vld [vmem:[%s7367_s5 + $0x88] sm:$0xff]  ;;  %v1739_v50 = vshll.u32 %v5015_v39, 16 }
  0x83   : > { %7471 = vst [vmem:[#allocation22_spill] sm:$0xff] %v5169_v2 }
  0x84   : > { %2136 = vrot.lane.b32.xlu0 %v4852_v41, %s4505_s17 }
  0x85   : > { %2023 = vrot.lane.b32.xlu1 %v5067_v28, %s4504_s16  ;;  %v650_v28 = vmul.f32 %v4620_v6, %v4262_v24  ;;  %v714_v6 = vadd.f32 %v4631_v12, %v647_v9  ;;  %v810_v12 = vmax.f32 %v746_v61, 0.0  ;;  %v1339_v9 = vor.u32 %v1337_v52, %v5113_v60  ;;  %v2841_v52 = vld [vmem:[%s7367_s5 + $0x58] sm:$0xff] }
  0x86   : > { %3158 = vmatpush.bf16.msra.mxu1 %v5124_v10  ;;  %v779_v61 = vmax.f32 %v715_v53, 0.0  ;;  %v2871_v14 = vpack.c.bf16 %v2841_v52, %v2840_v35  ;;  %v1737_v35 = vshrl.u32 %v5015_v39, 16 }
  0x87   : > { %v5100_v57 = vpop.permute.xlu2 %2193  ;;  %1806 = vrot.lane.b32.xlu2 %v4781_v58, %s4505_s17  ;;  %v717_v54 = vadd.f32 %v5129_v47, %v650_v28  ;;  %v2843_v28 = vld [vmem:[%s7367_s5 + $0x68] sm:$0xff]  ;;  %v778_v21 = vmax.f32 %v714_v6, 0.0  ;;  %v5160_v6 = vpack.c.bf16 %v2849_v30, %v2848_v11  ;;  %v934_v24 = vpack.c.bf16 %v810_v12, %v810_v12 }
  0x88   : > { %v2872_v22 = vpack.c.bf16 %v2843_v28, %v2842_v18  ;;  %v1572_v18 = vshll.u32 %v5007_v49, 16  ;;  %v5173_v53 = vsel %vm1130_vm0, %v4975_v32, %v1339_v9  ;;  %v2846_v49 = vld [vmem:[%s7367_s5 + $0x80] sm:$0xff]  ;;  %v903_v12 = vpack.c.bf16 %v779_v61, %v779_v61 }
  0x89   : > { %v781_v25 = vmax.f32 %v717_v54, 0.0  ;;  %7472 = vst [vmem:[#allocation23_spill] sm:$0xff] %v5173_v53  ;;  %v902_v54 = vpack.c.bf16 %v778_v21, %v778_v21  ;;  %v5184_v38 = vpack.c.bf16 %v2847_v48, %v2846_v49  ;;  %v1958_v21 = vrot.slane %v5015_v39, 1 }
  0x8a   : > { %2985 = vmatpush.bf16.msra.mxu0 %v2872_v22  ;;  %4393 = vmatpush.bf16.msra.mxu3 %v2872_v22  ;;  %v1574_v11 = vrot.slane %v1572_v18, 1  ;;  %v1078_v22 = vunpack.c.l.b16 %v934_v24  ;;  %v2839_v24 = vld [vmem:[%s7367_s5 + $0x48] sm:$0xff]  ;;  %v7386_v18 = vrot.slane %v5173_v53, 1  ;;  %v1741_v49 = vrot.slane %v1739_v50, 1 }
  0x8b   : > { %3159 = vmatpush.bf16.msra.mxu1 %v5160_v6  ;;  %v905_v32 = vpack.c.bf16 %v781_v25, %v781_v25  ;;  %v1046_v52 = vunpack.c.l.b16 %v902_v54  ;;  %v1744_v48 = vshll.u32 %v5173_v53, 16 }
  0x8c   : > { %1846 = vrot.lane.b32.xlu0 %v5097_v4, %s4505_s17  ;;  %v935_v4 = vpack.c.bf16 %v811_v15, %v811_v15  ;;  %v904_v15 = vpack.c.bf16 %v780_v37, %v780_v37  ;;  %v5227_v39 = vsel %vm1892_vm2, %v1958_v21, %v7386_v18  ;;  %v2835_v21 = vld [vmem:[%s7367_s5 + $0x28] sm:$0xff] }
  0x8d   : > { %1983 = vrot.lane.b32.xlu1 %v4754_v19, %s4504_s16  ;;  %v1568_v19 = vshrl.u32 %v4934_v36, 16  ;;  %v1049_v37 = vunpack.c.l.b16 %v905_v32  ;;  %7475 = vst [vmem:[#allocation26_spill] sm:$0xff] %v5227_v39 }
  0x8e   : > { %v1079_v30 = vunpack.c.l.b16 %v935_v4  ;;  %2986 = vmatpush.bf16.msra.mxu0 %v2871_v14  ;;  %v1047_v4 = vunpack.c.l.b16 %v903_v12  ;;  %v1048_v61 = vunpack.c.l.b16 %v904_v15  ;;  %4394 = vmatpush.bf16.msra.mxu3 %v2871_v14  ;;  %v2837_v12 = vld [vmem:[%s7367_s5 + $0x38] sm:$0xff]  ;;  %v5220_v14 = vsel %vm4668_vm4, %v5058_v23, 0 }
  0x8f   : > { %v5164_v28 = vpop.permute.xlu2 %2040  ;;  %2048 = vrot.lane.b32.xlu2 %v4841_v20, %s4503_s15  ;;  %v1570_v9 = vor.u32 %v1568_v19, %v5023_v44  ;;  %3160 = vmatpush.bf16.msra.mxu1 %v5184_v38  ;;  %v2838_v44 = vld [vmem:[%s7367_s5 + $0x40] sm:$0xff]  ;;  %v4385_v19 = vld [vmem:[%s4615_s13 + $0xd8] sm:$0xff]   ;;  %v2836_v20 = vld [vmem:[%s7367_s5 + $0x30] sm:$0xff]  ;;  %v1921_v23 = vrot.slane %v5220_v14, 1 }
  0x90   : > { %v2870_v25 = vpack.c.bf16 %v2839_v24, %v2838_v44  ;;  %v1122_v32 = vpack.c.b16 %v1079_v30, %v1078_v22  ;;  %v2869_v50 = vpack.c.bf16 %v2837_v12, %v2836_v20  ;;  %v1107_v44 = vpack.c.b16 %v1049_v37, %v1048_v61  ;;  %v4371_v61 = vld [vmem:[%s4615_s13 + $0x68] sm:$0xff]  }
  0x91   : > { %v5207_v54 = vsel %vm1475_vm6, %v1570_v9, %v1574_v11  ;;  %v4325_v9 = vunpack.c.l.bf16 %v4385_v19  ;;  %v1106_v11 = vpack.c.b16 %v1047_v4, %v1046_v52  ;;  %v4326_v24 = vunpack.c.h.bf16 %v4385_v19  ;;  %v2834_v52 = vld [vmem:[%s7367_s5 + $0x20] sm:$0xff] }
  0x92   : > { %4179 = vmatmul.msk.bf16.gmra.mxu2 %vm2347_vm3, %v5169_v2  ;;  %7473 = vst [vmem:[#allocation24_spill] sm:$0xff] %v5207_v54  ;;  %2987 = vmatpush.bf16.msra.mxu0 %v2870_v25  ;;  %v1742_v22 = vor.u32 %v1741_v49, %v1737_v35  ;;  %v5230_v30 = vrot.slane %v1744_v48, 1  ;;  %v1342_v20 = vshrl.u32 %v1122_v32, 16  ;;  %v5243_v4 = vld [vmem:[%s7365_s3] ss:$0 sm:$0xff]  ;;  %v2868_v19 = vpack.c.bf16 %v2835_v21, %v2834_v52 }
  0x93   : > { %4395 = vmatpush.bf16.msra.mxu3 %v2870_v25  ;;  %v681_v35 = vmul.f32 %v5243_v4, %v4325_v9  ;;  %v1222_v37 = vshrl.u32 %v1106_v11, 16  ;;  %v1229_v25 = vshrl.u32 %v1107_v44, 16  ;;  %v682_v49 = vmul.f32 %v5243_v4, %v4326_v24  ;;  %v4370_v48 = vld [vmem:[%s4615_s13 + $0x60] sm:$0xff]   ;;  %v2833_v24 = vld [vmem:[%s7367_s5 + $0x18] sm:$0xff] }
  0x94   : > { %2088 = vrot.lane.b32.xlu0 %v5173_v53, %s4503_s15  ;;  %v7476_v12 = vrot.slane %v5107_v46, 1  ;;  %v5258_v34 = vsel %vm1475_vm6, %v1742_v22, %v5230_v30  ;;  %v1345_v9 = vshll.u32 %v1122_v32, 16  ;;  %v1225_v3 = vshll.u32 %v1106_v11, 16 }
  0x95   : > { %2203 = vrot.lane.b32.xlu1 %v4934_v36, %s4504_s16  ;;  %7478 = vst [vmem:[#allocation28_spill] sm:$0xff] %v5258_v34  ;;  %v4270_v52 = vunpack.c.h.bf16 %v4371_v61  ;;  %v748_v32 = vadd.f32 %v5129_v47, %v681_v35  ;;  %v1224_v40 = vrot.slane %v1222_v37, 7  ;;  %v5273_v11 = vrot.slane %v1229_v25, 7 }
  0x96   : > { %2988 = vmatpush.bf16.msra.mxu0 %v2869_v50  ;;  %v5254_v18 = vsel %vm1892_vm2, %v7476_v12, %v1921_v23  ;;  %v4269_v23 = vunpack.c.l.bf16 %v4371_v61  ;;  %v4265_v12 = vunpack.c.l.bf16 %v4370_v48  ;;  %v1232_v31 = vshll.u32 %v1107_v44, 16 }
  0x97   : > { %v5215_v15 = vpop.permute.xlu2 %2042  ;;  %2287 = vrot.lane.b32.xlu2 %v5207_v54, %s4503_s15  ;;  %4396 = vmatpush.bf16.msra.mxu3 %v2869_v50  ;;  %7477 = vst [vmem:[#allocation27_spill] sm:$0xff] %v5254_v18  ;;  %v2832_v50 = vld [vmem:[%s7367_s5 + $0x10] sm:$0xff]  ;;  %v749_v54 = vadd.f32 %v5129_v47, %v682_v49  ;;  %v1579_v35 = vshll.u32 %v5111_v16, 16  ;;  %v654_v37 = vmul.f32 %v5243_v4, %v4270_v52  ;;  %v812_v25 = vmax.f32 %v748_v32, 0.0  ;;  %v2831_v49 = vld [vmem:[%s7367_s5 + $0x8] sm:$0xff] }
  0x98   : > { %7474 = vst [vmem:[#allocation25_spill] sm:$0xff] %v5215_v15  ;;  %v2867_v22 = vpack.c.bf16 %v2833_v24, %v2832_v50  ;;  %v651_v50 = vmul.f32 %v5243_v4, %v4265_v12  ;;  %v1234_v52 = vor.u32 %v1232_v31, %v5273_v11 }
  0x9a   : > { %2989 = vmatpush.bf16.msra.mxu0 %v2868_v19 }
  0x9b   : > { %4397 = vmatpush.bf16.msra.mxu3 %v2868_v19  ;;  %v2830_v19 = vld [vmem:[%s7367_s5] sm:$0xff] }
  0x9c   : > { %2138 = vrot.lane.b32.xlu0 %v4899_v59, %s4505_s17  ;;  %v2866_v32 = vpack.c.bf16 %v2831_v49, %v2830_v19 }
  0x9d   : > { %2025 = vrot.lane.b32.xlu1 %v5227_v39, %s4504_s16  ;;  %v5262_v39 = vrot.slane %v1342_v20, 7  ;;  %v4266_v20 = vunpack.c.h.bf16 %v4370_v48  ;;  %v653_v48 = vmul.f32 %v5243_v4, %v4269_v23  ;;  %v1227_v23 = vor.u32 %v1225_v3, %v1224_v40 }
  0x9e   : > { %2990 = vmatpush.bf16.msra.mxu0 %v2867_v22 }
  0x9f   : > { %v5260_v5 = vpop.permute.xlu1 %2038  ;;  %v5270_v21 = vpop.permute.xlu2 %2277  ;;  %1808 = vrot.lane.b32.xlu2 %v4872_v7, %s4505_s17  ;;  %v1347_v44 = vor.u32 %v1345_v9, %v5262_v39  ;;  %v652_v24 = vmul.f32 %v5243_v4, %v4266_v20  ;;  %v813_v9 = vmax.f32 %v749_v54, 0.0  ;;  %4398 = vmatpush.bf16.msra.mxu3 %v2867_v22  ;;  %v1584_v7 = vshll.u32 %v5107_v46, 16 }
  0xa0   : > { %v720_v12 = vadd.f32 %v5129_v47, %v653_v48  ;;  %v721_v20 = vadd.f32 %v5129_v47, %v654_v37  ;;  %v5312_v54 = vsel %vm1130_vm0, %v1224_v40, %v1234_v52  ;;  %v5316_v22 = vsel %vm4668_vm4, 0, %v1227_v23 }
  0xa1   : > { %v5307_v3 = vsel %vm4668_vm4, 0, %v1347_v44  ;;  %v719_v31 = vadd.f32 %v5129_v47, %v652_v24  ;;  %7479 = vst [vmem:[#allocation29_spill] sm:$0xff] %v5316_v22  ;;  %v937_v48 = vpack.c.bf16 %v813_v9, %v813_v9  ;;  %v5322_v19 = vrot.slane %v1584_v7, 1  ;;  %v4386_v9 = vld [vmem:[%s4615_s13 + $0xe0] sm:$0xff]  }
  0xa2   : > { %4180 = vmatmul.msk.bf16.gmra.mxu2 %vm2347_vm3, %v5254_v18  ;;  %v1581_v18 = vrot.slane %v1579_v35, 1  ;;  %2991 = vmatpush.bf16.msra.mxu0 %v2866_v32  ;;  %v936_v35 = vpack.c.bf16 %v812_v25, %v812_v25  ;;  %v1470_v40 = vsel %vm4668_vm4, %v5113_v60, 0  ;;  %v784_v49 = vmax.f32 %v720_v12, 0.0 }
  0xa3   : > { %v5280_v61 = vpop.permute.xlu0 %2130  ;;  %4399 = vmatpush.bf16.msra.mxu3 %v2866_v32  ;;  %v1923_v24 = vrot.slane %v5316_v22, 1  ;;  %v1081_v23 = vunpack.c.l.b16 %v937_v48  ;;  %v1961_v52 = vrot.slane %v1470_v40, 1  ;;  %v1748_v12 = vshrl.u32 %v5173_v53, 16 }
  0xa4   : > { %1848 = vrot.lane.b32.xlu0 %v5258_v34, %s4505_s17  ;;  %v1577_v34 = vshrl.u32 %v5111_v16, 16  ;;  %v1080_v60 = vunpack.c.l.b16 %v936_v35  ;;  %v7481_v35 = vrot.slane %v5312_v54, 1 }
  0xa5   : > { %1985 = vrot.lane.b32.xlu1 %v4852_v41, %s4504_s16  ;;  %v718_v41 = vadd.f32 %v5129_v47, %v651_v50  ;;  %v785_v50 = vmax.f32 %v721_v20, 0.0  ;;  %v1752_v20 = vshll.u32 %v1470_v40, 16  ;;  %v4329_v40 = vunpack.c.l.bf16 %v4386_v9 }
  0xa6   : > { %v1582_v44 = vor.u32 %v1581_v18, %v1577_v34  ;;  %v783_v18 = vmax.f32 %v719_v31, 0.0  ;;  %v908_v34 = vpack.c.bf16 %v784_v49, %v784_v49  ;;  %v5348_v48 = vsel %vm1892_vm2, %v1923_v24, %v7481_v35 }
  0xa7   : > { %v5301_v15 = vpop.permute.xlu1 %2195  ;;  %2050 = vrot.lane.b32.xlu2 %v4938_v45, %s4503_s15  ;;  %v5320_v37 = vpop.permute.xlu2 %2279  ;;  %4400 = vmatpush.bf16.msrb.mxu3 %v4995_v13  ;;  %v782_v7 = vmax.f32 %v718_v41, 0.0  ;;  %v909_v41 = vpack.c.bf16 %v785_v50, %v785_v50  ;;  %v1123_v58 = vpack.c.b16 %v1081_v23, %v1080_v60  ;;  %v4330_v49 = vunpack.c.h.bf16 %v4386_v9 }
  0xa8   : > { %v5338_v13 = vsel %vm1475_vm6, %v1582_v44, %v5322_v19  ;;  %v907_v44 = vpack.c.bf16 %v783_v18, %v783_v18  ;;  %v683_v9 = vmul.f32 %v5243_v4, %v4329_v40 }
  0xa9   : > { %7480 = vst [vmem:[#allocation30_spill] sm:$0xff] %v5338_v13  ;;  %v906_v45 = vpack.c.bf16 %v782_v7, %v782_v7  ;;  %v1053_v7 = vunpack.c.l.b16 %v909_v41 }
  0xaa   : > { %v1051_v23 = vunpack.c.l.b16 %v907_v44  ;;  %v750_v35 = vadd.f32 %v5129_v47, %v683_v9 }
  0xab   : > { %v5330_v25 = vpop.permute.xlu0 %2132  ;;  %4401 = vmatpush.bf16.msrb.mxu3 %v5011_v27  ;;  %v1050_v60 = vunpack.c.l.b16 %v906_v45 }
  0xac   : > { %2090 = vrot.lane.b32.xlu0 %v5307_v3, %s4503_s15 }
  0xad   : > { %2205 = vrot.lane.b32.xlu1 %v5111_v16, %s4504_s16 }
  0xaf   : > { %v2129_v32 = vpop.permute.xlu1 %2128  ;;  %2289 = vrot.lane.b32.xlu2 %v5338_v13, %s4503_s15  ;;  %4402 = vmatpush.bf16.msrb.mxu3 %v5038_v8 }
  0xb0   : > { %v2576_v31 = vsel %vm2347_vm3, %v4777_v55, %v2129_v32  ;;  %v7482_v55 = vrot.slane %v5173_v53, 1 }
  0xb1   : > { %v2671_v2 = vsel %vm2412_vm7, %v2576_v31, %v5100_v57  ;;  %v5361_v24 = vpop.permute.xlu2 %2281  ;;  %v1052_v57 = vunpack.c.l.b16 %v908_v34  ;;  %v684_v34 = vmul.f32 %v5243_v4, %v4330_v49  ;;  %v1352_v31 = vshll.u32 %v1123_v58, 16 }
  0xb2   : > { %v2735_v27 = vsel %vm2477_vm8, %v2671_v2, %v5270_v21  ;;  %v5359_v50 = vsel %vm1892_vm2, %v7482_v55, %v1961_v52  ;;  %4181 = vmatmul.msk.bf16.gmra.mxu2 %vm2347_vm3, %v5348_v48  ;;  %v1750_v2 = vor.u32 %v1748_v12, %v5230_v30  ;;  %v1754_v21 = vrot.slane %v1752_v20, 1 }
  0xb3   : > { %7483 = vst [vmem:[#allocation31_spill] sm:$0xff] %v5359_v50  ;;  %3161 = vmatmul.bf16.vlgmr.msra.gmra.mxu1 %v2735_v27  ;;  %v1349_v52 = vshrl.u32 %v1123_v58, 16  ;;  %v5382_v30 = vsel %vm4668_vm4, %v5273_v11, 0  ;;  %v1109_v45 = vpack.c.b16 %v1053_v7, %v1052_v57  ;;  %v1108_v12 = vpack.c.b16 %v1051_v23, %v1050_v60  ;;  %4403 = vmatpush.bf16.msrb.mxu3 %v5060_v43  ;;  %v4372_v58 = vld [vmem:[%s4615_s13 + $0x70] sm:$0xff]  }
  0xb4   : > { %2140 = vrot.lane.b32.xlu0 %v4971_v26, %s4505_s17  ;;  %v5367_v18 = vpop.f32.mrf.mxu2  ;;  %v5385_v8 = vsel %vm1475_vm6, %v1750_v2, %v1754_v21  ;;  %v751_v11 = vadd.f32 %v5129_v47, %v684_v34  ;;  %v1926_v44 = vrot.slane %v5382_v30, 1  ;;  %v2579_v55 = vsel %vm2347_vm3, %v4906_v1, %v5280_v61  ;;  %v4373_v21 = vld [vmem:[%s4615_s13 + $0x78] sm:$0xff]  }
  0xb5   : > { %7484 = vst [vmem:[#allocation32_spill] sm:$0xff] %v5367_v18  ;;  %2027 = vrot.lane.b32.xlu1 %v5359_v50, %s4504_s16  ;;  %v5388_v20 = vrot.slane %v1349_v52, 7  ;;  %v1244_v49 = vshrl.u32 %v1109_v45, 16  ;;  %v1237_v27 = vshrl.u32 %v1108_v12, 16  ;;  %v814_v7 = vmax.f32 %v750_v35, 0.0 }
  0xb6   : > { %v5375_v32 = vpop.permute.xlu0 %1973  ;;  %7485 = vst [vmem:[#allocation33_spill] sm:$0xff] %v5385_v8  ;;  %v815_v2 = vmax.f32 %v751_v11, 0.0  ;;  %v2673_v60 = vsel %vm2412_vm7, %v2579_v55, %v5301_v15  ;;  %v7487_v52 = vrot.slane %v5312_v54, 1  ;;  %v1588_v1 = vshrl.u32 %v5107_v46, 16 }
  0xb7   : > { %v5377_v41 = vpop.permute.xlu1 %1977  ;;  %1810 = vrot.lane.b32.xlu2 %v4930_v42, %s4505_s17  ;;  %4404 = vmatpush.bf16.msrb.mxu3 %v5087_v0  ;;  %v1354_v57 = vor.u32 %v1352_v31, %v5388_v20  ;;  %v1592_v61 = vshll.u32 %v5220_v14, 16  ;;  %v5423_v9 = vrot.slane %v1244_v49, 7  ;;  %v1247_v34 = vshll.u32 %v1109_v45, 16 }
  0xb8   : > { %v5417_v0 = vsel %vm1892_vm2, %v7487_v52, %v1926_v44  ;;  %v4273_v31 = vunpack.c.l.bf16 %v4372_v58  ;;  %v4274_v35 = vunpack.c.h.bf16 %v4372_v58  ;;  %v1239_v11 = vrot.slane %v1237_v27, 7 }
  0xb9   : > { %v5395_v40 = vpop.permute.xlu2 %2044  ;;  %v1240_v15 = vshll.u32 %v1108_v12, 16  ;;  %v4277_v55 = vunpack.c.l.bf16 %v4373_v21  ;;  %v5428_v44 = vsel %vm1130_vm0, %v5262_v39, %v1354_v57  ;;  %v938_v14 = vpack.c.bf16 %v814_v7, %v814_v7 }
  0xba   : > { %v939_v52 = vpack.c.bf16 %v815_v2, %v815_v2  ;;  %v2738_v45 = vsel %vm2477_vm8, %v2673_v60, %v5320_v37  ;;  %v1759_v49 = vshll.u32 %v5307_v3, 16  ;;  %v1590_v12 = vor.u32 %v1588_v1, %v5322_v19 }
  0xbb   : > { %4405 = vmatpush.bf16.msrb.mxu3 %v5124_v10  ;;  %v1594_v27 = vrot.slane %v1592_v61, 1  ;;  %v1249_v39 = vor.u32 %v1247_v34, %v5423_v9  ;;  %v655_v58 = vmul.f32 %v5243_v4, %v4273_v31  ;;  %v656_v57 = vmul.f32 %v5243_v4, %v4274_v35 }
  0xbc   : > { %1850 = vrot.lane.b32.xlu0 %v5385_v8, %s4505_s17  ;;  %v5399_v43 = vpop.f32.mrf.mxu2  ;;  %v4278_v8 = vunpack.c.h.bf16 %v4373_v21  ;;  %v1242_v19 = vor.u32 %v1240_v15, %v1239_v11  ;;  %v657_v7 = vmul.f32 %v5243_v4, %v4277_v55  ;;  %v1963_v21 = vrot.slane %v5307_v3, 1 }
  0xbd   : > { %7486 = vst [vmem:[#allocation34_spill] sm:$0xff] %v5399_v43  ;;  %1987 = vrot.lane.b32.xlu1 %v4899_v59, %s4504_s16  ;;  %v1082_v1 = vunpack.c.l.b16 %v938_v14  ;;  %v1083_v61 = vunpack.c.l.b16 %v939_v52  ;;  %v1757_v31 = vshrl.u32 %v5307_v3, 16  ;;  %v1761_v35 = vrot.slane %v1759_v49, 1 }
  0xbe   : > { %v5412_v23 = vpop.permute.xlu0 %1800  ;;  %v658_v2 = vmul.f32 %v5243_v4, %v4278_v8  ;;  %v1764_v15 = vshll.u32 %v5428_v44, 16  ;;  %v5457_v55 = vsel %vm1475_vm6, %v1590_v12, %v1594_v27  ;;  %v4387_v8 = vld [vmem:[%s4615_s13 + $0xe8] sm:$0xff]   ;;  %v722_v14 = vadd.f32 %v5129_v47, %v655_v58 }
  0xbf   : > { %v5421_v59 = vpop.permute.xlu1 %1975  ;;  %2052 = vrot.lane.b32.xlu2 %v4934_v36, %s4503_s15  ;;  %4406 = vmatpush.bf16.msrb.mxu3 %v5160_v6  ;;  %v5463_v36 = vsel %vm1130_vm0, %v1239_v11, %v1249_v39  ;;  %v723_v52 = vadd.f32 %v5129_v47, %v656_v57  ;;  %v5471_v60 = vsel %vm4668_vm4, 0, %v1242_v19  ;;  %v724_v12 = vadd.f32 %v5129_v47, %v657_v7 }
  0xc0   : > { %7489 = vst [vmem:[#allocation36_spill] sm:$0xff] %v5463_v36  ;;  %v725_v27 = vadd.f32 %v5129_v47, %v658_v2  ;;  %v1124_v11 = vpack.c.b16 %v1083_v61, %v1082_v1  ;;  %v4333_v39 = vunpack.c.l.bf16 %v4387_v8  ;;  %v4334_v58 = vunpack.c.h.bf16 %v4387_v8 }
  0xc1   : > { %v5439_v10 = vpop.permute.xlu2 %2283  ;;  %v1762_v19 = vor.u32 %v1761_v35, %v1757_v31  ;;  %v5485_v7 = vrot.slane %v1764_v15, 1  ;;  %v1928_v1 = vrot.slane %v5471_v60, 1  ;;  %v1929_v61 = vrot.slane %v5463_v36, 1 }
  0xc2   : > { %4182 = vmatmul.msk.bf16.gmra.mxu2 %vm2347_vm3, %v5417_v0  ;;  %v788_v8 = vmax.f32 %v724_v12, 0.0  ;;  %v685_v31 = vmul.f32 %v5243_v4, %v4333_v39  ;;  %v686_v35 = vmul.f32 %v5243_v4, %v4334_v58  ;;  %v2582_v15 = vsel %vm2347_vm3, %v4771_v51, %v5330_v25 }
  0xc3   : > { %3166 = vmatmul.bf16.gmra.mxu1 %v2738_v45  ;;  %4407 = vmatpush.bf16.msrb.mxu3 %v5184_v38  ;;  %v786_v38 = vmax.f32 %v722_v14, 0.0 }
  0xc4   : > { %2092 = vrot.lane.b32.xlu0 %v5428_v44, %s4503_s15  ;;  %v5445_v37 = vpop.f32.mrf.mxu2  ;;  %v912_v39 = vpack.c.bf16 %v788_v8, %v788_v8  ;;  %v752_v51 = vadd.f32 %v5129_v47, %v685_v31  ;;  %v753_v25 = vadd.f32 %v5129_v47, %v686_v35 }
  0xc5   : > { %7488 = vst [vmem:[#allocation35_spill] sm:$0xff] %v5445_v37  ;;  %2207 = vrot.lane.b32.xlu1 %v5107_v46, %s4504_s16 }
  0xc6   : > { %v1797_v34 = vpop.permute.xlu0 %1796  ;;  %v1056_v8 = vunpack.c.l.b16 %v912_v39  ;;  %v817_v31 = vmax.f32 %v753_v25, 0.0 }
  0xc7   : > { %v2349_v6 = vsel %vm2347_vm3, %v4790_v63, %v1797_v34  ;;  %v2198_v45 = vpop.permute.xlu1 %2197  ;;  %2291 = vrot.lane.b32.xlu2 %v5457_v55, %s4503_s15  ;;  %v787_v34 = vmax.f32 %v723_v52, 0.0 }
  0xc8   : > { %v2414_v49 = vsel %vm2412_vm7, %v2349_v6, %v5375_v32  ;;  %v7490_v32 = vrot.slane %v5428_v44, 1  ;;  %v789_v6 = vmax.f32 %v725_v27, 0.0  ;;  %v2675_v52 = vsel %vm2412_vm7, %v2582_v15, %v2198_v45 }
  0xc9   : > { %v2479_v63 = vsel %vm2477_vm8, %v2414_v49, %v5260_v5  ;;  %v5487_v2 = vpop.permute.xlu2 %1804  ;;  %v911_v12 = vpack.c.bf16 %v787_v34, %v787_v34  ;;  %v5506_v27 = vsel %vm1892_vm2, %v1928_v1, %v1929_v61  ;;  %v2741_v45 = vsel %vm2477_vm8, %v2675_v52, %v5361_v24 }
  0xca   : > { %2992 = vmatmul.bf16.vlgmr.msra.gmra.mxu0 %v2479_v63  ;;  %v5483_v57 = vsel %vm1892_vm2, %v1963_v21, %v7490_v32  ;;  %v1357_v21 = vshrl.u32 %v1124_v11, 16  ;;  %v910_v63 = vpack.c.bf16 %v786_v38, %v786_v38  ;;  %v5510_v32 = vsel %vm1475_vm6, %v1762_v19, %v5485_v7 }
  0xcb   : > { %7491 = vst [vmem:[#allocation37_spill] sm:$0xff] %v5483_v57  ;;  %v913_v58 = vpack.c.bf16 %v789_v6, %v789_v6  ;;  %v1055_v34 = vunpack.c.l.b16 %v911_v12  ;;  %v1599_v1 = vshll.u32 %v5316_v22, 16  ;;  %v5535_v24 = vsel %vm4668_vm4, %v5423_v9, 0 }
  0xcc   : > { %2142 = vrot.lane.b32.xlu0 %v5044_v56, %s4505_s17  ;;  %v5491_v5 = vpop.f32.mrf.mxu2  ;;  %7493 = vst [vmem:[#allocation39_spill] sm:$0xff] %v5510_v32  ;;  %v1597_v52 = vshrl.u32 %v5316_v22, 16  ;;  %v1931_v39 = vrot.slane %v5535_v24, 1  ;;  %v941_v25 = vpack.c.bf16 %v817_v31, %v817_v31 }
  0xcd   : > { %7492 = vst [vmem:[#allocation38_spill] sm:$0xff] %v5491_v5  ;;  %2029 = vrot.lane.b32.xlu1 %v5483_v57, %s4504_s16  ;;  %v5512_v57 = vrot.slane %v1357_v21, 7  ;;  %v1360_v5 = vshll.u32 %v1124_v11, 16  ;;  %v1054_v11 = vunpack.c.l.b16 %v910_v63  ;;  %v1057_v6 = vunpack.c.l.b16 %v913_v58 }
  0xce   : > { %v1799_v14 = vpop.permute.xlu0 %1798  ;;  %v816_v21 = vmax.f32 %v752_v51, 0.0  ;;  %v1601_v63 = vrot.slane %v1599_v1, 1  ;;  %v2353_v1 = vsel %vm2347_vm3, %v4683_v33, %v5412_v23 }
  0xcf   : > { %v5503_v49 = vpop.permute.xlu1 %1979  ;;  %1812 = vrot.lane.b32.xlu2 %v5048_v29, %s4505_s17  ;;  %v2351_v38 = vsel %vm2347_vm3, %v4786_v62, %v1799_v14  ;;  %v1362_v62 = vor.u32 %v1360_v5, %v5512_v57  ;;  %v1110_v12 = vpack.c.b16 %v1055_v34, %v1054_v11  ;;  %v1111_v9 = vpack.c.b16 %v1057_v6, %v1056_v8 }
  0xd0   : > { %v2416_v14 = vsel %vm2412_vm7, %v2351_v38, %v5421_v59  ;;  %v940_v59 = vpack.c.bf16 %v816_v21, %v816_v21  ;;  %v1602_v38 = vor.u32 %v1601_v63, %v1597_v52  ;;  %v5567_v8 = vsel %vm1892_vm2, %v1929_v61, %v1931_v39  ;;  %v4374_v52 = vld [vmem:[%s4615_s13 + $0x80] sm:$0xff]   ;;  %v4375_v39 = vld [vmem:[%s4615_s13 + $0x88] sm:$0xff]  }
  0xd1   : > { %v5524_v19 = vpop.permute.xlu2 %2046  ;;  %v2482_v58 = vsel %vm2477_vm8, %v2416_v14, %v5164_v28  ;;  %v5550_v51 = vsel %vm4668_vm4, 0, %v1362_v62  ;;  %v1252_v34 = vshrl.u32 %v1110_v12, 16  ;;  %7496 = vst [vmem:[#allocation42_spill] sm:$0xff] %v5567_v8  ;;  %v1259_v6 = vshrl.u32 %v1111_v9, 16  ;;  %v4388_v62 = vld [vmem:[%s4615_s13 + $0xf0] sm:$0xff]  }
  0xd2   : > { %4183 = vmatmul.msk.bf16.gmra.mxu2 %vm2347_vm3, %v5506_v27  ;;  %7495 = vst [vmem:[#allocation41_spill] sm:$0xff] %v5550_v51  ;;  %v1768_v21 = vshrl.u32 %v5428_v44, 16  ;;  %v1084_v31 = vunpack.c.l.b16 %v940_v59  ;;  %v1085_v14 = vunpack.c.l.b16 %v941_v25  ;;  %v4337_v59 = vunpack.c.l.bf16 %v4388_v62 }
  0xd3   : > { %3171 = vmatmul.bf16.gmra.mxu1 %v2741_v45  ;;  %v1471_v45 = vsel %vm4668_vm4, %v5388_v20, 0  ;;  %v1254_v43 = vrot.slane %v1252_v34, 7  ;;  %v4338_v25 = vunpack.c.h.bf16 %v4388_v62  ;;  %v5586_v18 = vrot.slane %v1259_v6, 7 }
  0xd4   : > { %1852 = vrot.lane.b32.xlu0 %v5510_v32, %s4505_s17  ;;  %v1966_v20 = vrot.slane %v1471_v45, 1  ;;  %v1772_v23 = vshll.u32 %v1471_v45, 16  ;;  %v4281_v45 = vunpack.c.l.bf16 %v4374_v52 }
  0xd5   : > { %1989 = vrot.lane.b32.xlu1 %v4971_v26, %s4504_s16  ;;  %v5539_v15 = vpop.f32.mrf.mxu2  ;;  %v1604_v26 = vshll.u32 %v5312_v54, 16 }
  0xd6   : > { %v5537_v35 = vpop.permute.xlu0 %1802  ;;  %7494 = vst [vmem:[#allocation40_spill] sm:$0xff] %v5539_v15  ;;  %v1774_v6 = vrot.slane %v1772_v23, 1 }
  0xd7   : > { %v2200_v5 = vpop.permute.xlu1 %2199  ;;  %2054 = vrot.lane.b32.xlu2 %v5111_v16, %s4503_s15  ;;  %v5557_v11 = vrot.slane %v1604_v26, 1  ;;  %v1255_v26 = vshll.u32 %v1110_v12, 16  ;;  %v7498_v16 = vld [vmem:[#allocation7_spill] sm:$0xff]  ;;  %v4282_v12 = vunpack.c.h.bf16 %v4374_v52 }
  0xd9   : > { %v5559_v28 = vpop.permute.xlu2 %2285  ;;  %v5578_v61 = vsel %vm1475_vm6, %v1602_v38, %v5557_v11  ;;  %v4285_v38 = vunpack.c.l.bf16 %v4375_v39 }
  0xda   : > { %2997 = vmatmul.bf16.gmra.mxu0 %v2482_v58  ;;  %v1262_v58 = vshll.u32 %v1111_v9, 16  ;;  %v1125_v9 = vpack.c.b16 %v1085_v14, %v1084_v31  ;;  %v687_v31 = vmul.f32 %v5243_v4, %v4337_v59  ;;  %v7503_v59 = vld [vmem:[#allocation25_spill] sm:$0xff] }
  0xdc   : > { %2094 = vrot.lane.b32.xlu0 %v5550_v51, %s4503_s15  ;;  %v1264_v14 = vor.u32 %v1262_v58, %v5586_v18 }
  0xdd   : > { %2209 = vrot.lane.b32.xlu1 %v5316_v22, %s4504_s16  ;;  %v5574_v33 = vpop.f32.mrf.mxu2 }
  0xde   : > { %v2135_v63 = vpop.permute.xlu0 %2134  ;;  %7497 = vst [vmem:[#allocation43_spill] sm:$0xff] %v5574_v33  ;;  %v4286_v33 = vunpack.c.h.bf16 %v4375_v39 }
  0xdf   : > { %v2585_v15 = vsel %vm2347_vm3, %v7498_v16, %v2135_v63  ;;  %v5583_v37 = vpop.permute.xlu1 %2021  ;;  %2293 = vrot.lane.b32.xlu2 %v5578_v61, %s4503_s15  ;;  %v7499_v63 = vrot.slane %v5428_v44, 1 }
  0xe0   : > { %v2677_v50 = vsel %vm2412_vm7, %v2585_v15, %v2200_v5  ;;  %v2418_v15 = vsel %vm2412_vm7, %v2353_v1, %v5377_v41  ;;  %v1770_v5 = vor.u32 %v1768_v21, %v5485_v7  ;;  %v659_v41 = vmul.f32 %v5243_v4, %v4281_v45 }
  0xe1   : > { %v2744_v16 = vsel %vm2477_vm8, %v2677_v50, %v5439_v10  ;;  %v5595_v34 = vsel %vm1892_vm2, %v7499_v63, %v1966_v20  ;;  %v5602_v62 = vpop.permute.xlu2 %1806  ;;  %v688_v50 = vmul.f32 %v5243_v4, %v4338_v25  ;;  %v7501_v10 = vld [vmem:[#allocation22_spill] sm:$0xff]  ;;  %v1257_v20 = vor.u32 %v1255_v26, %v1254_v43 }
  0xe2   : > { %7500 = vst [vmem:[#allocation7_spill] sm:$0xff] %v5595_v34  ;;  %4184 = vmatmul.msk.bf16.gmra.mxu2 %vm2347_vm3, %v5567_v8  ;;  %v660_v1 = vmul.f32 %v5243_v4, %v4282_v12  ;;  %v1364_v7 = vshrl.u32 %v1125_v9, 16  ;;  %v661_v21 = vmul.f32 %v5243_v4, %v4285_v38  ;;  %v662_v52 = vmul.f32 %v5243_v4, %v4286_v33 }
  0xe3   : > { %3176 = vmatmul.bf16.gmra.mxu1 %v2744_v16  ;;  %v2485_v26 = vsel %vm2477_vm8, %v2418_v15, %v7503_v59  ;;  %v5622_v58 = vsel %vm1475_vm6, %v1770_v5, %v1774_v6  ;;  %v754_v45 = vadd.f32 %v5129_v47, %v687_v31  ;;  %v755_v12 = vadd.f32 %v5129_v47, %v688_v50  ;;  %v7506_v5 = vld [vmem:[#allocation24_spill] sm:$0xff] }
  0xe4   : > { %2144 = vrot.lane.b32.xlu0 %v7501_v10, %s4505_s17  ;;  %7504 = vst [vmem:[#allocation25_spill] sm:$0xff] %v5622_v58  ;;  %v5627_v16 = vsel %vm1130_vm0, %v1254_v43, %v1264_v14  ;;  %v5631_v33 = vsel %vm4668_vm4, 0, %v1257_v20  ;;  %v726_v38 = vadd.f32 %v5129_v47, %v659_v41  ;;  %v727_v63 = vadd.f32 %v5129_v47, %v660_v1  ;;  %v7507_v43 = vld [vmem:[#allocation11_spill] sm:$0xff] }
  0xe5   : > { %2031 = vrot.lane.b32.xlu1 %v5595_v34, %s4504_s16  ;;  %v5615_v39 = vpop.f32.mrf.mxu2  ;;  %7505 = vst [vmem:[#allocation44_spill] sm:$0xff] %v5627_v16  ;;  %v5635_v15 = vrot.slane %v1364_v7, 7  ;;  %v1367_v59 = vshll.u32 %v1125_v9, 16  ;;  %v728_v6 = vadd.f32 %v5129_v47, %v661_v21  ;;  %v729_v31 = vadd.f32 %v5129_v47, %v662_v52 }
  0xe6   : > { %v1845_v23 = vpop.permute.xlu0 %1844  ;;  %7502 = vst [vmem:[#allocation22_spill] sm:$0xff] %v5615_v39  ;;  %v818_v14 = vmax.f32 %v754_v45, 0.0  ;;  %v819_v41 = vmax.f32 %v755_v12, 0.0  ;;  %v1933_v9 = vrot.slane %v5631_v33, 1  ;;  %v790_v7 = vmax.f32 %v726_v38, 0.0 }
  0xe7   : > { %v5619_v25 = vpop.permute.xlu1 %1981  ;;  %1814 = vrot.lane.b32.xlu2 %v7506_v5, %s4505_s17  ;;  %v2397_v50 = vsel %vm2347_vm3, %v7507_v43, %v1845_v23  ;;  %v791_v34 = vmax.f32 %v727_v63, 0.0  ;;  %v1369_v47 = vor.u32 %v1367_v59, %v5635_v15  ;;  %v792_v21 = vmax.f32 %v728_v6, 0.0 }
  0xe8   : > { %v793_v52 = vmax.f32 %v729_v31, 0.0  ;;  %v2462_v45 = vsel %vm2412_vm7, %v2397_v50, %v5583_v37  ;;  %v1608_v12 = vshrl.u32 %v5312_v54, 16  ;;  %v1612_v43 = vshll.u32 %v5382_v30, 16 }
  0xe9   : > { %v5643_v20 = vpop.permute.xlu2 %2048  ;;  %v942_v1 = vpack.c.bf16 %v818_v14, %v818_v14  ;;  %v943_v39 = vpack.c.bf16 %v819_v41, %v819_v41  ;;  %v7510_v6 = vrot.slane %v5627_v16, 1  ;;  %v914_v37 = vpack.c.bf16 %v790_v7, %v790_v7 }
  0xea   : > { %3002 = vmatmul.bf16.gmra.mxu0 %v2485_v26  ;;  %v915_v50 = vpack.c.bf16 %v791_v34, %v791_v34  ;;  %v5669_v30 = vsel %vm1130_vm0, %v5512_v57, %v1369_v47  ;;  %v916_v14 = vpack.c.bf16 %v792_v21, %v792_v21  ;;  %v917_v41 = vpack.c.bf16 %v793_v52, %v793_v52 }
  0xeb   : > { %v5665_v31 = vsel %vm1892_vm2, %v1933_v9, %v7510_v6  ;;  %v1086_v9 = vunpack.c.l.b16 %v942_v1  ;;  %v1087_v57 = vunpack.c.l.b16 %v943_v39  ;;  %v1058_v47 = vunpack.c.l.b16 %v914_v37  ;;  %v7513_v1 = vld [vmem:[#allocation3_spill] sm:$0xff]  ;;  %v4389_v37 = vld [vmem:[%s4615_s13 + $0xf8] sm:$0xff]  }
  0xec   : > { %1854 = vrot.lane.b32.xlu0 %v5622_v58, %s4505_s17  ;;  %v1059_v21 = vunpack.c.l.b16 %v915_v50  ;;  %v1060_v52 = vunpack.c.l.b16 %v916_v14  ;;  %v1777_v6 = vshrl.u32 %v5550_v51, 16  ;;  %v7515_v50 = vld [vmem:[#allocation10_spill] sm:$0xff]  ;;  %v5704_v14 = vsel %vm4668_vm4, %v5586_v18, 0 }
  0xed   : > { %1991 = vrot.lane.b32.xlu1 %v5044_v56, %s4504_s16  ;;  %v5652_v26 = vpop.f32.mrf.mxu2  ;;  %v7509_v56 = vld [vmem:[#allocation6_spill] sm:$0xff]  ;;  %v7516_v18 = vrot.slane %v5669_v30, 1 }
  0xee   : > { %v2087_v23 = vpop.permute.xlu0 %2086  ;;  %7508 = vst [vmem:[#allocation24_spill] sm:$0xff] %v5652_v26  ;;  %v2355_v59 = vsel %vm2347_vm3, %v7509_v56, %v5537_v35  ;;  %v1779_v35 = vshll.u32 %v5550_v51, 16 }
  0xef   : > { %v2551_v38 = vsel %vm2477_vm8, %v2462_v45, %v2087_v23  ;;  %v2202_v63 = vpop.permute.xlu1 %2201  ;;  %7511 = vst [vmem:[#allocation6_spill] sm:$0xff] %v5665_v31  ;;  %2056 = vrot.lane.b32.xlu2 %v5107_v46, %s4503_s15  ;;  %v7512_v23 = vld [vmem:[#allocation2_spill] sm:$0xff]  ;;  %v1610_v45 = vor.u32 %v1608_v12, %v5557_v11  ;;  %v2420_v7 = vsel %vm2412_vm7, %v2355_v59, %v5503_v49  ;;  %v1968_v11 = vrot.slane %v5550_v51, 1 }
  0xf0   : > { %3112 = vmatmul.bf16.vlgmr.msra.gmra.mxu3 %v2551_v38  ;;  %v1614_v38 = vrot.slane %v1612_v43, 1  ;;  %v1061_v12 = vunpack.c.l.b16 %v917_v41  ;;  %v1784_v49 = vshll.u32 %v5669_v30, 16  ;;  %v1126_v41 = vpack.c.b16 %v1087_v57, %v1086_v9 }
  0xf1   : > { %4408 = vmatpush.bf16.msra.mxu3 %v7512_v23  ;;  %v5678_v34 = vpop.permute.xlu2 %2287  ;;  %v1781_v23 = vrot.slane %v1779_v35, 1  ;;  %v2488_v35 = vsel %vm2477_vm8, %v2420_v7, %v5395_v40  ;;  %v5716_v40 = vsel %vm1892_vm2, %v1968_v11, %v7516_v18  ;;  %v7518_v7 = vld [vmem:[#allocation27_spill] sm:$0xff] }
  0xf2   : > { %4185 = vmatmul.msk.bf16.gmra.mxu2 %vm2347_vm3, %v5665_v31  ;;  %v5694_v59 = vsel %vm1475_vm6, %v1610_v45, %v1614_v38  ;;  %v1112_v45 = vpack.c.b16 %v1059_v21, %v1058_v47  ;;  %7517 = vst [vmem:[#allocation3_spill] sm:$0xff] %v5716_v40  ;;  %v5719_v9 = vrot.slane %v1784_v49, 1  ;;  %v4377_v47 = vld [vmem:[%s4615_s13 + $0x98] sm:$0xff]   ;;  %v7520_v49 = vrot.slane %v5627_v16, 1 }
  0xf4   : > { %2096 = vrot.lane.b32.xlu0 %v5669_v30, %s4503_s15  ;;  %v1267_v21 = vshrl.u32 %v1112_v45, 16  ;;  %v1270_v26 = vshll.u32 %v1112_v45, 16  ;;  %v7522_v45 = vld [vmem:[#allocation4_spill] sm:$0xff] }
  0xf5   : > { %2211 = vrot.lane.b32.xlu1 %v5312_v54, %s4504_s16  ;;  %4409 = vmatpush.bf16.msra.mxu3 %v7513_v1  ;;  %v5689_v56 = vpop.f32.mrf.mxu2 }
  0xf6   : > { %v2137_v39 = vpop.permute.xlu0 %2136  ;;  %7514 = vst [vmem:[#allocation2_spill] sm:$0xff] %v5689_v56  ;;  %v4342_v56 = vunpack.c.h.bf16 %v4389_v37  ;;  %v1269_v8 = vrot.slane %v1267_v21, 7 }
  0xf7   : > { %v2588_v46 = vsel %vm2347_vm3, %v7515_v50, %v2137_v39  ;;  %v5699_v43 = vpop.permute.xlu1 %2023  ;;  %2295 = vrot.lane.b32.xlu2 %v5694_v59, %s4503_s15  ;;  %v1113_v39 = vpack.c.b16 %v1061_v12, %v1060_v52  ;;  %v4341_v50 = vunpack.c.l.bf16 %v4389_v37  ;;  %v4376_v37 = vld [vmem:[%s4615_s13 + $0x90] sm:$0xff]  }
  0xf8   : > { %v2679_v1 = vsel %vm2412_vm7, %v2588_v46, %v2202_v63  ;;  %v1936_v46 = vrot.slane %v5704_v14, 1  ;;  %v1782_v63 = vor.u32 %v1781_v23, %v1777_v6  ;;  %v690_v12 = vmul.f32 %v5243_v4, %v4342_v56 }
  0xf9   : > { %v2747_v38 = vsel %vm2477_vm8, %v2679_v1, %v5559_v28  ;;  %v1372_v28 = vshrl.u32 %v1126_v41, 16  ;;  %v5721_v57 = vpop.permute.xlu2 %1808  ;;  %v1274_v52 = vshrl.u32 %v1113_v39, 16  ;;  %v689_v11 = vmul.f32 %v5243_v4, %v4341_v50 }
  0xfa   : > { %3007 = vmatmul.bf16.gmra.mxu0 %v2488_v35  ;;  %3181 = vmatmul.bf16.gmra.mxu1 %v2747_v38  ;;  %v5736_v35 = vsel %vm1892_vm2, %v7520_v49, %v1936_v46  ;;  %v5740_v1 = vsel %vm1475_vm6, %v1782_v63, %v5719_v9  ;;  %v1375_v50 = vshll.u32 %v1126_v41, 16  ;;  %v4294_v56 = vunpack.c.h.bf16 %v4377_v47  ;;  %v5753_v46 = vld [vmem:[%s7366_s4] ss:$0 sm:$0xff] }
  0xfb   : > { %7521 = vst [vmem:[#allocation27_spill] sm:$0xff] %v5736_v35  ;;  %v5744_v18 = vrot.slane %v1372_v28, 7  ;;  %v1277_v31 = vshll.u32 %v1113_v39, 16  ;;  %v4289_v51 = vunpack.c.l.bf16 %v4376_v37  ;;  %v5746_v58 = vrot.slane %v1274_v52, 7  ;;  %v7523_v28 = vld [vmem:[#allocation12_spill] sm:$0xff] }
  0xfc   : > { %2146 = vrot.lane.b32.xlu0 %v7518_v7, %s4505_s17  ;;  %v756_v63 = vadd.f32 %v5753_v46, %v689_v11  ;;  %v757_v41 = vadd.f32 %v5753_v46, %v690_v12  ;;  %v2357_v39 = vsel %vm2347_vm3, %v7522_v45, %v5487_v2  ;;  %v1619_v52 = vshll.u32 %v5471_v60, 16 }
  0xfd   : > { %2033 = vrot.lane.b32.xlu1 %v5716_v40, %s4504_s16  ;;  %v5731_v23 = vpop.f32.mrf.mxu2  ;;  %v4293_v40 = vunpack.c.l.bf16 %v4377_v47  ;;  %v666_v11 = vmul.f32 %v5243_v4, %v4294_v56  ;;  %v2422_v12 = vsel %vm2412_vm7, %v2357_v39, %v5619_v25  ;;  %v1377_v2 = vor.u32 %v1375_v50, %v5744_v18 }
  0xfe   : > { %v1847_v6 = vpop.permute.xlu0 %1846  ;;  %7519 = vst [vmem:[#allocation10_spill] sm:$0xff] %v5731_v23  ;;  %v4290_v23 = vunpack.c.h.bf16 %v4376_v37  ;;  %v1272_v45 = vor.u32 %v1270_v26, %v1269_v8  ;;  %v821_v56 = vmax.f32 %v757_v41, 0.0  ;;  %v1617_v50 = vshrl.u32 %v5471_v60, 16 }
  0xff   : > { %v5742_v38 = vpop.permute.xlu1 %1983  ;;  %1816 = vrot.lane.b32.xlu2 %v5338_v13, %s4505_s17  ;;  %v2399_v47 = vsel %vm2347_vm3, %v7523_v28, %v1847_v6  ;;  %v665_v37 = vmul.f32 %v5243_v4, %v4293_v40  ;;  %v663_v6 = vmul.f32 %v5243_v4, %v4289_v51  ;;  %v1279_v40 = vor.u32 %v1277_v31, %v5746_v58 }
 0x100   : > { %v664_v49 = vmul.f32 %v5243_v4, %v4290_v23  ;;  %v820_v28 = vmax.f32 %v756_v63, 0.0  ;;  %v2464_v25 = vsel %vm2412_vm7, %v2399_v47, %v5699_v43  ;;  %v1621_v39 = vrot.slane %v1619_v52, 1 }
 0x101   : > { %v5764_v21 = vpop.permute.xlu2 %2050  ;;  %v1624_v51 = vshll.u32 %v5463_v36, 16  ;;  %v733_v26 = vadd.f32 %v5753_v46, %v666_v11  ;;  %v2491_v31 = vsel %vm2477_vm8, %v2422_v12, %v5524_v19  ;;  %v5792_v63 = vsel %vm4668_vm4, 0, %v1377_v2 }
 0x102   : > { %4186 = vmatmul.msk.bf16.gmra.mxu2 %vm2347_vm3, %v5736_v35  ;;  %v730_v43 = vadd.f32 %v5753_v46, %v663_v6  ;;  %v731_v41 = vadd.f32 %v5753_v46, %v664_v49  ;;  %v5797_v47 = vsel %vm1130_vm0, %v1269_v8, %v1279_v40  ;;  %v944_v52 = vpack.c.bf16 %v820_v28, %v820_v28 }
 0x103   : > { %v945_v19 = vpack.c.bf16 %v821_v56, %v821_v56  ;;  %v5805_v11 = vrot.slane %v1624_v51, 1  ;;  %v1472_v12 = vsel %vm4668_vm4, %v5635_v15, 0  ;;  %v797_v6 = vmax.f32 %v733_v26, 0.0 }
 0x104   : > { %1856 = vrot.lane.b32.xlu0 %v5740_v1, %s4505_s17  ;;  %v1939_v28 = vrot.slane %v5797_v47, 1  ;;  %v795_v40 = vmax.f32 %v731_v41, 0.0  ;;  %v1088_v56 = vunpack.c.l.b16 %v944_v52 }
 0x105   : > { %1993 = vrot.lane.b32.xlu1 %v7501_v10, %s4504_s16  ;;  %v5779_v13 = vpop.f32.mrf.mxu2  ;;  %v732_v10 = vadd.f32 %v5753_v46, %v665_v37  ;;  %v1622_v37 = vor.u32 %v1621_v39, %v1617_v50  ;;  %v1971_v39 = vrot.slane %v1472_v12, 1 }
 0x106   : > { %v2089_v35 = vpop.permute.xlu0 %2088  ;;  %7524 = vst [vmem:[#allocation4_spill] sm:$0xff] %v5779_v13 }
 0x107   : > { %v2554_v4 = vsel %vm2477_vm8, %v2464_v25, %v2089_v35  ;;  %v2204_v23 = vpop.permute.xlu1 %2203  ;;  %v5801_v35 = vsel %vm4668_vm4, 0, %v1272_v45  ;;  %2058 = vrot.lane.b32.xlu2 %v5316_v22, %s4503_s15  ;;  %v796_v8 = vmax.f32 %v732_v10, 0.0  ;;  %v794_v45 = vmax.f32 %v730_v43, 0.0 }
 0x108   : > { %3117 = vmatmul.bf16.gmra.mxu3 %v2554_v4  ;;  %v1938_v49 = vrot.slane %v5801_v35, 1  ;;  %v1089_v25 = vunpack.c.l.b16 %v945_v19  ;;  %v5822_v51 = vsel %vm1475_vm6, %v1622_v37, %v5805_v11  ;;  %v919_v19 = vpack.c.bf16 %v795_v40, %v795_v40 }
 0x109   : > { %v5810_v2 = vpop.permute.xlu2 %2289  ;;  %v920_v26 = vpack.c.bf16 %v796_v8, %v796_v8  ;;  %v918_v52 = vpack.c.bf16 %v794_v45, %v794_v45  ;;  %v1788_v37 = vshrl.u32 %v5669_v30, 16  ;;  %v7527_v45 = vld [vmem:[#allocation5_spill] sm:$0xff] }
 0x10a   : > { %3012 = vmatmul.bf16.gmra.mxu0 %v2491_v31  ;;  %v921_v31 = vpack.c.bf16 %v797_v6, %v797_v6  ;;  %v5830_v41 = vsel %vm1892_vm2, %v1938_v49, %v1939_v28  ;;  %v1127_v13 = vpack.c.b16 %v1089_v25, %v1088_v56  ;;  %v1063_v49 = vunpack.c.l.b16 %v919_v19  ;;  %v7529_v19 = vld [vmem:[#allocation17_spill] sm:$0xff] }
 0x10b   : > { %v1064_v6 = vunpack.c.l.b16 %v920_v26  ;;  %v1790_v40 = vor.u32 %v1788_v37, %v5719_v9 }
 0x10c   : > { %2098 = vrot.lane.b32.xlu0 %v5792_v63, %s4503_s15  ;;  %v1379_v25 = vshrl.u32 %v1127_v13, 16 }
 0x10d   : > { %2213 = vrot.lane.b32.xlu1 %v5471_v60, %s4504_s16  ;;  %v5818_v15 = vpop.f32.mrf.mxu2 }
 0x10e   : > { %v2139_v50 = vpop.permute.xlu0 %2138  ;;  %7525 = vst [vmem:[#allocation45_spill] sm:$0xff] %v5818_v15  ;;  %v1792_v15 = vshll.u32 %v1472_v12, 16  ;;  %v1062_v12 = vunpack.c.l.b16 %v918_v52  ;;  %v5868_v52 = vrot.slane %v1379_v25, 7 }
 0x10f   : > { %v2591_v4 = vsel %vm2347_vm3, %v4930_v42, %v2139_v50  ;;  %v2026_v10 = vpop.permute.xlu1 %2025  ;;  %2297 = vrot.lane.b32.xlu2 %v5822_v51, %s4503_s15  ;;  %v7526_v42 = vrot.slane %v5669_v30, 1 }
 0x110   : > { %v2681_v43 = vsel %vm2412_vm7, %v2591_v4, %v2204_v23  ;;  %v1794_v56 = vrot.slane %v1792_v15, 1 }
 0x111   : > { %v2750_v22 = vsel %vm2477_vm8, %v2681_v43, %v5678_v34  ;;  %v5840_v23 = vsel %vm1892_vm2, %v7526_v42, %v1971_v39  ;;  %v5844_v8 = vpop.permute.xlu2 %1810  ;;  %v1065_v34 = vunpack.c.l.b16 %v921_v31  ;;  %v5861_v43 = vsel %vm4668_vm4, %v5746_v58, 0 }
 0x112   : > { %3186 = vmatmul.bf16.gmra.mxu1 %v2750_v22  ;;  %4187 = vmatmul.msk.bf16.gmra.mxu2 %vm2347_vm3, %v5830_v41  ;;  %v2359_v22 = vsel %vm2347_vm3, %v7527_v45, %v5602_v62  ;;  %v1114_v62 = vpack.c.b16 %v1063_v49, %v1062_v12  ;;  %v5866_v15 = vsel %vm1475_vm6, %v1790_v40, %v1794_v56  ;;  %v1941_v37 = vrot.slane %v5861_v43, 1  ;;  %v4379_v56 = vld [vmem:[%s4615_s13 + $0xa8] sm:$0xff]  }
 0x113   : > { %v2424_v50 = vsel %vm2412_vm7, %v2359_v22, %v5742_v38  ;;  %v1115_v31 = vpack.c.b16 %v1065_v34, %v1064_v6  ;;  %7528 = vst [vmem:[#allocation5_spill] sm:$0xff] %v5866_v15  ;;  %v1382_v38 = vshll.u32 %v1127_v13, 16  ;;  %v4378_v34 = vld [vmem:[%s4615_s13 + $0xa0] sm:$0xff]   ;;  %v1628_v22 = vshrl.u32 %v5463_v36, 16  ;;  %s4214_s13 = sadd.s32 16, %s4593_s18 }
 0x114   : > { %2148 = vrot.lane.b32.xlu0 %v5348_v48, %s4505_s17  ;;  %v2494_v9 = vsel %vm2477_vm8, %v2424_v50, %v5643_v20  ;;  %v1282_v20 = vshrl.u32 %v1114_v62, 16  ;;  %v1632_v40 = vshll.u32 %v5535_v24, 16  ;;  %p6213_p11 = scmp.lt.s32.totalorder %s4214_s13, 31 }
 0x115   : > { %2035 = vrot.lane.b32.xlu1 %v5840_v23, %s4504_s16  ;;  %v5856_v4 = vpop.f32.mrf.mxu2  ;;  %v1289_v42 = vshrl.u32 %v1115_v31, 16  ;;  %v1384_v13 = vor.u32 %v1382_v38, %v5868_v52 }
 0x116   : > { %v1849_v39 = vpop.permute.xlu0 %1848  ;;  %v1284_v38 = vrot.slane %v1282_v20, 7  ;;  %s7667_s13 = smov (!%p6213_p11, %s4214_s13), 31 }
 0x117   : > { %v1986_v26 = vpop.permute.xlu1 %1985  ;;  %1818 = vrot.lane.b32.xlu2 %v5457_v55, %s4505_s17  ;;  %v2401_v58 = vsel %vm2347_vm3, %v7529_v19, %v1849_v39  ;;  %v5895_v39 = vrot.slane %v1289_v42, 7  ;;  %v1285_v19 = vshll.u32 %v1114_v62, 16  ;;  %v5899_v24 = vsel %vm1130_vm0, %v5744_v18, %v1384_v13  ;;  %v5914_v42 = vld [vmem:[%s7365_s3] ss:$0 sm:$0xff]  ;;  %v7530_v13 = vld [vmem:[#allocation8_spill] sm:$0xff]  ;;  %s7669_s13 = smov (!%p6213_p11, %s7667_s13), 31 }
 0x118   : > { %v2466_v45 = vsel %vm2412_vm7, %v2401_v58, %v2026_v10  ;;  %v4297_v10 = vunpack.c.l.bf16 %v4378_v34  ;;  %v4298_v58 = vunpack.c.h.bf16 %v4378_v34  ;;  %v2361_v34 = vsel %vm2347_vm3, %v7530_v13, %v5721_v57  ;;  %s4165_s12 = sshll.u32 %s7669_s13, 2 }
 0x119   : > { %v5875_v6 = vpop.permute.xlu2 %2052  ;;  %v1287_v18 = vor.u32 %v1285_v19, %v1284_v38  ;;  %s468_s14 = sadd.s32 %s4165_s12, %s4608_s22 }
 0x11a   : > { %3017 = vmatmul.bf16.gmra.mxu0 %v2494_v9  ;;  %v1292_v9 = vshll.u32 %v1115_v31, 16  ;;  %v667_v20 = vmul.f32 %v5914_v42, %v4297_v10  ;;  %s4167_s19 = sshll.u32 %s468_s14, 2 }
 0x11b   : > { %s6292_s21 = scalar_lea.vmem %s7364_s2, %s4167_s19 }
 0x11c   : > { %1858 = vrot.lane.b32.xlu0 %v5866_v15, %s4505_s17  ;;  %v1294_v31 = vor.u32 %v1292_v9, %v5895_v39 }
 0x11d   : > { %1995 = vrot.lane.b32.xlu1 %v7518_v7, %s4504_s16  ;;  %v5883_v49 = vpop.f32.mrf.mxu2  ;;  %v5893_v7 = vsel %vm1892_vm2, %v1939_v28, %v1941_v37  ;;  %v1630_v28 = vor.u32 %v1628_v22, %v5805_v11  ;;  %v1634_v37 = vrot.slane %v1632_v40, 1  ;;  %v668_v11 = vmul.f32 %v5914_v42, %v4298_v58 }
 0x11e   : > { %v2091_v12 = vpop.permute.xlu0 %2090  ;;  %v2426_v40 = vsel %vm2412_vm7, %v2361_v34, %v1986_v26  ;;  %v5934_v57 = vsel %vm1130_vm0, %v1284_v38, %v1294_v31  ;;  %v734_v26 = vadd.f32 %v5753_v46, %v667_v20 }
 0x11f   : > { %v2557_v25 = vsel %vm2477_vm8, %v2466_v45, %v2091_v12  ;;  %v2206_v50 = vpop.permute.xlu1 %2205  ;;  %2060 = vrot.lane.b32.xlu2 %v5312_v54, %s4503_s15  ;;  %v4301_v12 = vunpack.c.l.bf16 %v4379_v56  ;;  %v4302_v45 = vunpack.c.h.bf16 %v4379_v56  ;;  %v5929_v9 = vsel %vm1475_vm6, %v1630_v28, %v1634_v37 }
 0x120   : > { %3122 = vmatmul.bf16.gmra.mxu3 %v2557_v25  ;;  %v2497_v28 = vsel %vm2477_vm8, %v2426_v40, %v5764_v21  ;;  %v1944_v21 = vrot.slane %v5934_v57, 1 }
 0x121   : > { %v5907_v62 = vpop.permute.xlu2 %2291  ;;  %v669_v22 = vmul.f32 %v5914_v42, %v4301_v12  ;;  %v670_v19 = vmul.f32 %v5914_v42, %v4302_v45  ;;  %v5939_v12 = vsel %vm4668_vm4, 0, %v1287_v18  ;;  %v735_v45 = vadd.f32 %v5753_v46, %v668_v11 }
 0x122   : > { %4188 = vmatmul.msk.bf16.gmra.mxu2 %vm2347_vm3, %v5893_v7  ;;  %v1943_v31 = vrot.slane %v5939_v12, 1  ;;  %v798_v18 = vmax.f32 %v734_v26, 0.0 }
 0x123   : > { %v736_v38 = vadd.f32 %v5753_v46, %v669_v22 }
 0x124   : > { %2100 = vrot.lane.b32.xlu0 %v5899_v24, %s4503_s15  ;;  %v922_v40 = vpack.c.bf16 %v798_v18, %v798_v18 }
 0x125   : > { %2215 = vrot.lane.b32.xlu1 %v5463_v36, %s4504_s16  ;;  %v5926_v25 = vpop.f32.mrf.mxu2  ;;  %v800_v20 = vmax.f32 %v736_v38, 0.0  ;;  %v7534_v38 = vld [vmem:[#allocation9_spill] sm:$0xff] }
 0x126   : > { %v2141_v56 = vpop.permute.xlu0 %2140  ;;  %7531 = vst [vmem:[#allocation8_spill] sm:$0xff] %v5926_v25  ;;  %v1066_v18 = vunpack.c.l.b16 %v922_v40  ;;  %v1637_v25 = vshrl.u32 %v5631_v33, 16 }
 0x127   : > { %v2594_v10 = vsel %vm2347_vm3, %v5048_v29, %v2141_v56  ;;  %v2028_v58 = vpop.permute.xlu1 %2027  ;;  %2299 = vrot.lane.b32.xlu2 %v5929_v9, %s4503_s15 }
 0x128   : > { %v2683_v13 = vsel %vm2412_vm7, %v2594_v10, %v2206_v50  ;;  %v737_v50 = vadd.f32 %v5753_v46, %v670_v19  ;;  %v5962_v19 = vsel %vm1892_vm2, %v1943_v31, %v1944_v21  ;;  %v7535_v31 = vld [vmem:[#allocation26_spill] sm:$0xff] }
 0x129   : > { %v2753_v29 = vsel %vm2477_vm8, %v2683_v13, %v5810_v2  ;;  %v5951_v37 = vpop.permute.xlu2 %1812  ;;  %v799_v2 = vmax.f32 %v735_v45, 0.0  ;;  %7533 = vst [vmem:[#allocation47_spill] sm:$0xff] %v5962_v19  ;;  %v924_v13 = vpack.c.bf16 %v800_v20, %v800_v20 }
 0x12a   : > { %3022 = vmatmul.bf16.gmra.mxu0 %v2497_v28  ;;  %3191 = vmatmul.bf16.gmra.mxu1 %v2753_v29  ;;  %v801_v11 = vmax.f32 %v737_v50, 0.0  ;;  %v1639_v29 = vshll.u32 %v5631_v33, 16  ;;  %v2363_v50 = vsel %vm2347_vm3, %v7534_v38, %v5844_v8  ;;  %v1644_v38 = vshll.u32 %v5627_v16, 16 }
 0x12b   : > { %v923_v56 = vpack.c.bf16 %v799_v2, %v799_v2 }
 0x12c   : > { %2150 = vrot.lane.b32.xlu0 %v5417_v0, %s4505_s17  ;;  %v925_v26 = vpack.c.bf16 %v801_v11, %v801_v11  ;;  %v1068_v11 = vunpack.c.l.b16 %v924_v13  ;;  %v1641_v8 = vrot.slane %v1639_v29, 1  ;;  %v5994_v13 = vsel %vm4668_vm4, %v5895_v39, 0 }
 0x12d   : > { %2241 = vrot.lane.b32.xlu1 %v5307_v3, %s4504_s16  ;;  %v5959_v46 = vpop.f32.mrf.mxu2  ;;  %v1067_v2 = vunpack.c.l.b16 %v923_v56 }
 0x12e   : > { %v1851_v34 = vpop.permute.xlu0 %1850  ;;  %7532 = vst [vmem:[#allocation46_spill] sm:$0xff] %v5959_v46 }
 0x12f   : > { %v1988_v22 = vpop.permute.xlu1 %1987  ;;  %1820 = vrot.lane.b32.xlu2 %v5578_v61, %s4505_s17  ;;  %v2403_v45 = vsel %vm2347_vm3, %v5173_v53, %v1851_v34  ;;  %v1069_v34 = vunpack.c.l.b16 %v925_v26  ;;  %v1642_v26 = vor.u32 %v1641_v8, %v1637_v25 }
 0x130   : > { %v5964_v10 = vpop.f32.mrf.mxu1  ;;  %v2428_v20 = vsel %vm2412_vm7, %v2363_v50, %v1988_v22  ;;  %v2468_v46 = vsel %vm2412_vm7, %v2403_v45, %v2028_v58  ;;  %v1116_v22 = vpack.c.b16 %v1067_v2, %v1066_v18  ;;  %v5998_v45 = vrot.slane %v1644_v38, 1 }
 0x131   : > { %v5972_v28 = vpop.permute.xlu2 %2054  ;;  %v1117_v58 = vpack.c.b16 %v1069_v34, %v1068_v11 }
 0x132   : > { %4189 = vmatmul.msk.bf16.gmra.mxu2 %vm2347_vm3, %v5962_v19  ;;  %v1297_v39 = vshrl.u32 %v1116_v22, 16  ;;  %v6014_v25 = vsel %vm1475_vm6, %v1642_v26, %v5998_v45 }
 0x133   : > { %v1304_v29 = vshrl.u32 %v1117_v58, 16  ;;  %v1307_v26 = vshll.u32 %v1117_v58, 16 }
 0x134   : > { %2176 = vrot.lane.b32.xlu0 %v7535_v31, %s4505_s17  ;;  %v1299_v8 = vrot.slane %v1297_v39, 7  ;;  %v7540_v39 = vld [vmem:[#allocation14_spill] sm:$0xff] }
 0x135   : > { %1997 = vrot.lane.b32.xlu1 %v5348_v48, %s4504_s16  ;;  %v5983_v19 = vpop.f32.mrf.mxu2  ;;  %v2500_v48 = vsel %vm2477_vm8, %v2428_v20, %v5875_v6  ;;  %v1946_v6 = vrot.slane %v5994_v13, 1 }
 0x136   : > { %v2093_v53 = vpop.permute.xlu0 %2092  ;;  %7536 = vst [vmem:[#allocation9_spill] sm:$0xff] %v5983_v19 }
 0x137   : > { %v2560_v40 = vsel %vm2477_vm8, %v2468_v46, %v2093_v53  ;;  %v2208_v56 = vpop.permute.xlu1 %2207  ;;  %2062 = vrot.lane.b32.xlu2 %v5471_v60, %s4503_s15  ;;  %v6020_v34 = vsel %vm1892_vm2, %v1944_v21, %v1946_v6 }
 0x138   : > { %3127 = vmatmul.bf16.gmra.mxu3 %v2560_v40  ;;  %v6000_v53 = vpop.f32.mrf.mxu1  ;;  %7538 = vst [vmem:[#allocation48_spill] sm:$0xff] %v6020_v34  ;;  %v1300_v40 = vshll.u32 %v1116_v22, 16 }
 0x139   : > { %v6002_v46 = vpop.permute.xlu2 %2293 }
 0x13a   : > { %3027 = vmatmul.bf16.gmra.mxu0 %v2500_v48  ;;  %v6024_v48 = vrot.slane %v1304_v29, 7  ;;  %v2365_v29 = vsel %vm2347_vm3, %v7540_v39, %v5951_v37 }
 0x13c   : > { %2325 = vrot.lane.b32.xlu0 %v5510_v32, %s4503_s15  ;;  %v1309_v22 = vor.u32 %v1307_v26, %v6024_v48 }
 0x13d   : > { %2217 = vrot.lane.b32.xlu1 %v5631_v33, %s4504_s16  ;;  %v6010_v18 = vpop.f32.mrf.mxu2 }
 0x13e   : > { %v2143_v50 = vpop.permute.xlu0 %2142  ;;  %7537 = vst [vmem:[#allocation26_spill] sm:$0xff] %v6010_v18 }
 0x13f   : > { %v2597_v2 = vsel %vm2347_vm3, %v7506_v5, %v2143_v50  ;;  %v2030_v20 = vpop.permute.xlu1 %2029  ;;  %2301 = vrot.lane.b32.xlu2 %v6014_v25, %s4503_s15 }
 0x140   : > { %v2685_v11 = vsel %vm2412_vm7, %v2597_v2, %v2208_v56  ;;  %v6039_v21 = vpop.f32.mrf.mxu1  ;;  %v1302_v56 = vor.u32 %v1300_v40, %v1299_v8  ;;  %v6055_v40 = vsel %vm1130_vm0, %v1299_v8, %v1309_v22  ;;  %v7542_v8 = vld [vmem:[#allocation31_spill] sm:$0xff] }
 0x141   : > { %v2756_v38 = vsel %vm2477_vm8, %v2685_v11, %v5907_v62  ;;  %v6030_v5 = vpop.permute.xlu2 %1814  ;;  %v6037_v62 = vld [vmem:[%s7368_s6] ss:$0 sm:$0xff] }
 0x142   : > { %3196 = vmatmul.bf16.gmra.mxu1 %v2756_v38  ;;  %4190 = vmatmul.msk.bf16.gmra.mxu2 %vm2347_vm3, %v6020_v34  ;;  %v6059_v26 = vsel %vm4668_vm4, 0, %v1302_v56 }
 0x143   : > { %v1948_v56 = vrot.slane %v6059_v26, 1 }
 0x144   : > { %2152 = vrot.lane.b32.xlu0 %v5506_v27, %s4505_s17 }
 0x145   : > { %2243 = vrot.lane.b32.xlu1 %v5428_v44, %s4504_s16  ;;  %v6044_v6 = vpop.f32.mrf.mxu2 }
 0x146   : > { %v1853_v58 = vpop.permute.xlu0 %1852  ;;  %7539 = vst [vmem:[#allocation49_spill] sm:$0xff] %v6044_v6 }
 0x147   : > { %v2993_v50 = vpop.f32.mrf.mxu0  ;;  %v1990_v2 = vpop.permute.xlu1 %1989  ;;  %1822 = vrot.lane.b32.xlu2 %v5694_v59, %s4505_s17  ;;  %v2405_v39 = vsel %vm2347_vm3, %v5307_v3, %v1853_v58 }
 0x148   : > { %v2994_v11 = vadd.f32 %v6037_v62, %v2993_v50  ;;  %v2430_v38 = vsel %vm2412_vm7, %v2365_v29, %v1990_v2  ;;  %v2470_v58 = vsel %vm2412_vm7, %v2405_v39, %v2030_v20  ;;  %v1648_v2 = vshrl.u32 %v5627_v16, 16 }
 0x149   : > { %v2503_v34 = vsel %vm2477_vm8, %v2430_v38, %v5972_v28  ;;  %v6066_v29 = vpop.permute.xlu2 %2056  ;;  %v7541_v28 = vld [vmem:[#allocation32_spill] sm:$0xff] }
 0x14a   : > { %v3163_v37 = vadd.f32 %v5964_v10, %v2994_v11  ;;  %3032 = vmatmul.bf16.gmra.mxu0 %v2503_v34  ;;  %v1652_v11 = vshll.u32 %v5704_v14, 16  ;;  %v1650_v20 = vor.u32 %v1648_v2, %v5998_v45 }
 0x14c   : > { %v3332_v50 = vadd.f32 %v7541_v28, %v3163_v37  ;;  %2178 = vrot.lane.b32.xlu0 %v7542_v8, %s4505_s17  ;;  %v1654_v39 = vrot.slane %v1652_v11, 1 }
 0x14d   : > { %1999 = vrot.lane.b32.xlu1 %v5417_v0, %s4504_s16  ;;  %v6080_v34 = vpop.f32.mrf.mxu2  ;;  %v7544_v0 = vrot.slane %v6055_v40, 1 }
 0x14e   : > { %v3491_v3 = vpack.c.bf16 %v3332_v50, %v3332_v50  ;;  %v2095_v10 = vpop.permute.xlu0 %2094  ;;  %7543 = vst [vmem:[#allocation14_spill] sm:$0xff] %v6080_v34  ;;  %v3169_v34 = vpop.f32.mrf.mxu1 }
 0x14f   : > { %v2995_v38 = vpop.f32.mrf.mxu0  ;;  %v2563_v37 = vsel %vm2477_vm8, %v2470_v58, %v2095_v10  ;;  %v2210_v28 = vpop.permute.xlu1 %2209  ;;  %v6092_v6 = vsel %vm1892_vm2, %v1948_v56, %v7544_v0  ;;  %2064 = vrot.lane.b32.xlu2 %v5463_v36, %s4503_s15  ;;  %v3753_v10 = vmul.f32 %v3332_v50, %v3332_v50  ;;  %v7546_v58 = vld [vmem:[#allocation34_spill] sm:$0xff]  ;;  %v7547_v56 = vld [vmem:[#allocation25_spill] sm:$0xff]  ;;  %v6112_v0 = vsel %vm1475_vm6, %v1650_v20, %v1654_v39 }
 0x150   : > { %3556 = vst.msk [vmem:[%s6076_s26] sm:$0xf] %vm3555_vm9, %v3491_v3  ;;  %v2996_v22 = vadd.f32 %v6037_v62, %v2995_v38  ;;  %3132 = vmatmul.bf16.gmra.mxu3 %v2563_v37  ;;  %v3620_v37 = vsel %vm2347_vm3, %v3332_v50, 0.0  ;;  %v6127_v39 = vsel %vm4668_vm4, %v6024_v48, 0 }
 0x151   : > { %7545 = vst [vmem:[#allocation32_spill] sm:$0xff] %v6092_v6  ;;  %v6100_v3 = vpop.permute.xlu2 %2295  ;;  %v3817_v50 = vsel %vm2347_vm3, %v3753_v10, 0.0 }
 0x152   : > { %v3165_v14 = vadd.f32 %v6000_v53, %v2996_v22  ;;  %4191 = vmatmul.msk.bf16.gmra.mxu2 %vm2347_vm3, %v6092_v6  ;;  %7550 = vst [vmem:[#allocation34_spill] sm:$0xff] %v6127_v39 }
 0x154   : > { %v3334_v38 = vadd.f32 %v7546_v58, %v3165_v14  ;;  %2327 = vrot.lane.b32.xlu0 %v7547_v56, %s4503_s15  ;;  %v7549_v14 = vld [vmem:[#allocation30_spill] sm:$0xff] }
 0x155   : > { %2219 = vrot.lane.b32.xlu1 %v5627_v16, %s4504_s16  ;;  %v6109_v11 = vpop.f32.mrf.mxu2 }
 0x156   : > { %v3492_v53 = vpack.c.bf16 %v3334_v38, %v3334_v38  ;;  %v3621_v45 = vsel %vm2347_vm3, %v3334_v38, 0.0  ;;  %v3754_v22 = vmul.f32 %v3334_v38, %v3334_v38  ;;  %v2145_v2 = vpop.permute.xlu0 %2144  ;;  %7548 = vst [vmem:[#allocation31_spill] sm:$0xff] %v6109_v11 }
 0x157   : > { %v3622_v6 = vadd.f32 %v3621_v45, %v3620_v37  ;;  %v2600_v58 = vsel %vm2347_vm3, %v7549_v14, %v2145_v2  ;;  %v2998_v56 = vpop.f32.mrf.mxu0  ;;  %v2032_v36 = vpop.permute.xlu1 %2031  ;;  %2303 = vrot.lane.b32.xlu2 %v6112_v0, %s4503_s15 }
 0x158   : > { %3557 = vst.msk [vmem:[%s6076_s26 + $0x4] sm:$0xf] %vm3555_vm9, %v3492_v53  ;;  %v3818_v18 = vsel %vm2347_vm3, %v3754_v22, 0.0  ;;  %v2999_v38 = vadd.f32 %v6037_v62, %v2998_v56  ;;  %v2687_v32 = vsel %vm2412_vm7, %v2600_v58, %v2210_v28  ;;  %v3172_v37 = vpop.f32.mrf.mxu1  ;;  %v7551_v28 = vld [vmem:[#allocation35_spill] sm:$0xff]  ;;  %v7552_v53 = vld [vmem:[#allocation42_spill] sm:$0xff]  ;;  %v7555_v58 = vld [vmem:[#allocation13_spill] sm:$0xff] }
 0x159   : > { %v3819_v11 = vadd.f32 %v3818_v18, %v3817_v50  ;;  %v2759_v20 = vsel %vm2477_vm8, %v2687_v32, %v6002_v46  ;;  %v6132_v56 = vpop.permute.xlu2 %1816  ;;  %v1951_v32 = vrot.slane %v6127_v39, 1  ;;  %v7553_v46 = vld [vmem:[#allocation41_spill] sm:$0xff]  ;;  %v2367_v50 = vsel %vm2347_vm3, %v7555_v58, %v6030_v5  ;;  %v7558_v58 = vld [vmem:[#allocation38_spill] sm:$0xff] }
 0x15a   : > { %v3168_v10 = vadd.f32 %v6039_v21, %v2999_v38  ;;  %3201 = vmatmul.bf16.gmra.mxu1 %v2759_v20 }
 0x15c   : > { %v3337_v18 = vadd.f32 %v7551_v28, %v3168_v10  ;;  %2154 = vrot.lane.b32.xlu0 %v7552_v53, %s4505_s17 }
 0x15d   : > { %2245 = vrot.lane.b32.xlu1 %v7553_v46, %s4504_s16  ;;  %v6141_v2 = vpop.f32.mrf.mxu2 }
 0x15e   : > { %v3493_v48 = vpack.c.bf16 %v3337_v18, %v3337_v18  ;;  %v3623_v45 = vsel %vm2347_vm3, %v3337_v18, 0.0  ;;  %v3755_v22 = vmul.f32 %v3337_v18, %v3337_v18  ;;  %v1855_v21 = vpop.permute.xlu0 %1854  ;;  %7554 = vst [vmem:[#allocation30_spill] sm:$0xff] %v6141_v2  ;;  %v7556_v18 = vrot.slane %v6055_v40, 1 }
 0x15f   : > { %v3624_v14 = vadd.f32 %v3623_v45, %v3622_v6  ;;  %v3000_v38 = vpop.f32.mrf.mxu0  ;;  %v1992_v20 = vpop.permute.xlu1 %1991  ;;  %1824 = vrot.lane.b32.xlu2 %v5822_v51, %s4505_s17  ;;  %v2407_v5 = vsel %vm2347_vm3, %v5428_v44, %v1855_v21  ;;  %v1657_v44 = vshrl.u32 %v5801_v35, 16 }
 0x160   : > { %3558 = vst.msk [vmem:[%s6076_s26 + $0x8] sm:$0xf] %vm3555_vm9, %v3493_v48  ;;  %v3820_v10 = vsel %vm2347_vm3, %v3755_v22, 0.0  ;;  %v3001_v28 = vadd.f32 %v6037_v62, %v3000_v38  ;;  %v2432_v39 = vsel %vm2412_vm7, %v2367_v50, %v1992_v20  ;;  %v6154_v19 = vsel %vm1892_vm2, %v7556_v18, %v1951_v32  ;;  %v7559_v50 = vld [vmem:[#allocation37_spill] sm:$0xff] }
 0x161   : > { %7557 = vst [vmem:[#allocation35_spill] sm:$0xff] %v6154_v19  ;;  %v3821_v6 = vadd.f32 %v3820_v10, %v3819_v11  ;;  %v2506_v45 = vsel %vm2477_vm8, %v2432_v39, %v6066_v29  ;;  %v6164_v22 = vpop.permute.xlu2 %2058  ;;  %v1659_v32 = vshll.u32 %v5801_v35, 16  ;;  %v3174_v29 = vpop.f32.mrf.mxu1  ;;  %v2472_v39 = vsel %vm2412_vm7, %v2407_v5, %v2032_v36 }
 0x162   : > { %v3170_v48 = vadd.f32 %v3169_v34, %v3001_v28  ;;  %3037 = vmatmul.bf16.gmra.mxu0 %v2506_v45  ;;  %4192 = vmatmul.msk.bf16.gmra.mxu2 %vm2347_vm3, %v6154_v19  ;;  %v1664_v18 = vshll.u32 %v5797_v47, 16 }
 0x163   : > { %v1661_v34 = vrot.slane %v1659_v32, 1 }
 0x164   : > { %v3339_v11 = vadd.f32 %v7558_v58, %v3170_v48  ;;  %2180 = vrot.lane.b32.xlu0 %v7559_v50, %s4505_s17  ;;  %v6185_v2 = vrot.slane %v1664_v18, 1 }
 0x165   : > { %2001 = vrot.lane.b32.xlu1 %v5506_v27, %s4504_s16  ;;  %v6175_v28 = vpop.f32.mrf.mxu2 }
 0x166   : > { %v3494_v21 = vpack.c.bf16 %v3339_v11, %v3339_v11  ;;  %v3625_v38 = vsel %vm2347_vm3, %v3339_v11, 0.0  ;;  %v3756_v20 = vmul.f32 %v3339_v11, %v3339_v11  ;;  %v2097_v10 = vpop.permute.xlu0 %2096  ;;  %7560 = vst [vmem:[#allocation42_spill] sm:$0xff] %v6175_v28  ;;  %v1662_v28 = vor.u32 %v1661_v34, %v1657_v44 }
 0x167   : > { %v3626_v45 = vadd.f32 %v3625_v38, %v3624_v14  ;;  %v3003_v48 = vpop.f32.mrf.mxu0  ;;  %v2566_v58 = vsel %vm2477_vm8, %v2472_v39, %v2097_v10  ;;  %v2212_v36 = vpop.permute.xlu1 %2211  ;;  %2066 = vrot.lane.b32.xlu2 %v5631_v33, %s4503_s15  ;;  %v7561_v39 = vld [vmem:[#allocation40_spill] sm:$0xff] }
 0x168   : > { %3559 = vst.msk [vmem:[%s6076_s26 + $0xc] sm:$0xf] %vm3555_vm9, %v3494_v21  ;;  %v3822_v27 = vsel %vm2347_vm3, %v3756_v20, 0.0  ;;  %v3004_v5 = vadd.f32 %v6037_v62, %v3003_v48  ;;  %3137 = vmatmul.bf16.gmra.mxu3 %v2566_v58  ;;  %v6199_v34 = vsel %vm1475_vm6, %v1662_v28, %v6185_v2 }
 0x169   : > { %v3823_v32 = vadd.f32 %v3822_v27, %v3821_v6  ;;  %v6187_v14 = vpop.permute.xlu2 %2297 }
 0x16a   : > { %v3173_v11 = vadd.f32 %v3172_v37, %v3004_v5 }
 0x16c   : > { %v3342_v38 = vadd.f32 %v7561_v39, %v3173_v11  ;;  %2329 = vrot.lane.b32.xlu0 %v5740_v1, %s4503_s15  ;;  %v3177_v39 = vpop.f32.mrf.mxu1 }
 0x16d   : > { %2221 = vrot.lane.b32.xlu1 %v5801_v35, %s4504_s16  ;;  %v6195_v44 = vpop.f32.mrf.mxu2 }
 0x16e   : > { %v3495_v6 = vpack.c.bf16 %v3342_v38, %v3342_v38  ;;  %v3627_v21 = vsel %vm2347_vm3, %v3342_v38, 0.0  ;;  %v3757_v20 = vmul.f32 %v3342_v38, %v3342_v38  ;;  %v2147_v37 = vpop.permute.xlu0 %2146  ;;  %7562 = vst [vmem:[#allocation41_spill] sm:$0xff] %v6195_v44 }
 0x16f   : > { %v3628_v10 = vadd.f32 %v3627_v21, %v3626_v45  ;;  %v2603_v18 = vsel %vm2347_vm3, %v5457_v55, %v2147_v37  ;;  %v3005_v48 = vpop.f32.mrf.mxu0  ;;  %v2034_v58 = vpop.permute.xlu1 %2033  ;;  %2305 = vrot.lane.b32.xlu2 %v6199_v34, %s4503_s15  ;;  %v7564_v45 = vld [vmem:[#allocation15_spill] sm:$0xff] }
 0x170   : > { %3560 = vst.msk [vmem:[%s6076_s26 + $0x10] sm:$0xf] %vm3555_vm9, %v3495_v6  ;;  %v3824_v27 = vsel %vm2347_vm3, %v3757_v20, 0.0  ;;  %v3006_v5 = vadd.f32 %v6037_v62, %v3005_v48  ;;  %v2689_v11 = vsel %vm2412_vm7, %v2603_v18, %v2212_v36 }
 0x171   : > { %v3825_v38 = vadd.f32 %v3824_v27, %v3823_v32  ;;  %v2762_v28 = vsel %vm2477_vm8, %v2689_v11, %v6100_v3  ;;  %v6219_v36 = vpop.permute.xlu2 %1818  ;;  %v7565_v32 = vld [vmem:[#allocation43_spill] sm:$0xff]  ;;  %v7566_v3 = vld [vmem:[#allocation6_spill] sm:$0xff]  ;;  %v7568_v11 = vld [vmem:[#allocation21_spill] sm:$0xff] }
 0x172   : > { %v3175_v55 = vadd.f32 %v3174_v29, %v3006_v5  ;;  %3206 = vmatmul.bf16.gmra.mxu1 %v2762_v28  ;;  %4193 = vmatmul.msk.bf16.gmra.mxu2 %vm2347_vm3, %v7564_v45  ;;  %v2369_v28 = vsel %vm2347_vm3, %v7568_v11, %v6132_v56  ;;  %v4391_v45 = vld [vmem:[%s6292_s21 + $0x8] sm:$0xff]  }
 0x174   : > { %v3344_v6 = vadd.f32 %v7565_v32, %v3175_v55  ;;  %2156 = vrot.lane.b32.xlu0 %v7566_v3, %s4505_s17 }
 0x175   : > { %2247 = vrot.lane.b32.xlu1 %v5669_v30, %s4504_s16  ;;  %v6227_v18 = vpop.f32.mrf.mxu2 }
 0x176   : > { %v3496_v29 = vpack.c.bf16 %v3344_v6, %v3344_v6  ;;  %v3629_v21 = vsel %vm2347_vm3, %v3344_v6, 0.0  ;;  %v3758_v20 = vmul.f32 %v3344_v6, %v3344_v6  ;;  %v1857_v37 = vpop.permute.xlu0 %1856  ;;  %7567 = vst [vmem:[#allocation13_spill] sm:$0xff] %v6227_v18 }
 0x177   : > { %v3630_v48 = vadd.f32 %v3629_v21, %v3628_v10  ;;  %v3008_v27 = vpop.f32.mrf.mxu0  ;;  %v1994_v32 = vpop.permute.xlu1 %1993  ;;  %1826 = vrot.lane.b32.xlu2 %v5929_v9, %s4505_s17  ;;  %v2409_v10 = vsel %vm2347_vm3, %v7553_v46, %v1857_v37  ;;  %v1668_v46 = vshrl.u32 %v5797_v47, 16 }
 0x178   : > { %3561 = vst.msk [vmem:[%s6076_s26 + $0x14] sm:$0xf] %vm3555_vm9, %v3496_v29  ;;  %v3826_v5 = vsel %vm2347_vm3, %v3758_v20, 0.0  ;;  %v3009_v55 = vadd.f32 %v6037_v62, %v3008_v27  ;;  %v2434_v18 = vsel %vm2412_vm7, %v2369_v28, %v1994_v32  ;;  %v3179_v20 = vpop.f32.mrf.mxu1  ;;  %v7569_v27 = vld [vmem:[#allocation22_spill] sm:$0xff]  ;;  %v2474_v11 = vsel %vm2412_vm7, %v2409_v10, %v2034_v58 }
 0x179   : > { %v3827_v6 = vadd.f32 %v3826_v5, %v3825_v38  ;;  %v2509_v29 = vsel %vm2477_vm8, %v2434_v18, %v6164_v22  ;;  %v6250_v56 = vpop.permute.xlu2 %2060  ;;  %v7570_v5 = vld [vmem:[#allocation7_spill] sm:$0xff] }
 0x17a   : > { %v3178_v21 = vadd.f32 %v3177_v39, %v3009_v55  ;;  %3042 = vmatmul.bf16.gmra.mxu0 %v2509_v29  ;;  %v1672_v55 = vshll.u32 %v5861_v43, 16  ;;  %v1670_v43 = vor.u32 %v1668_v46, %v6185_v2 }
 0x17c   : > { %v3347_v38 = vadd.f32 %v7569_v27, %v3178_v21  ;;  %2182 = vrot.lane.b32.xlu0 %v7570_v5, %s4505_s17 }
 0x17d   : > { %2003 = vrot.lane.b32.xlu1 %v7552_v53, %s4504_s16  ;;  %v6260_v28 = vpop.f32.mrf.mxu2 }
 0x17e   : > { %v3497_v22 = vpack.c.bf16 %v3347_v38, %v3347_v38  ;;  %v3631_v39 = vsel %vm2347_vm3, %v3347_v38, 0.0  ;;  %v3759_v37 = vmul.f32 %v3347_v38, %v3347_v38  ;;  %v2099_v18 = vpop.permute.xlu0 %2098  ;;  %7571 = vst [vmem:[#allocation38_spill] sm:$0xff] %v6260_v28  ;;  %v7572_v28 = vld [vmem:[#allocation18_spill] sm:$0xff] }
 0x17f   : > { %v3632_v32 = vadd.f32 %v3631_v39, %v3630_v48  ;;  %v3010_v21 = vpop.f32.mrf.mxu0  ;;  %v2569_v58 = vsel %vm2477_vm8, %v2474_v11, %v2099_v18  ;;  %v2214_v29 = vpop.permute.xlu1 %2213  ;;  %2068 = vrot.lane.b32.xlu2 %v5627_v16, %s4503_s15  ;;  %v1674_v48 = vrot.slane %v1672_v55, 1 }
 0x180   : > { %3562 = vst.msk [vmem:[%s6076_s26 + $0x18] sm:$0xf] %vm3555_vm9, %v3497_v22  ;;  %v3828_v53 = vsel %vm2347_vm3, %v3759_v37, 0.0  ;;  %v3011_v10 = vadd.f32 %v6037_v62, %v3010_v21  ;;  %3142 = vmatmul.bf16.gmra.mxu3 %v2569_v58  ;;  %v3182_v39 = vpop.f32.mrf.mxu1  ;;  %v7573_v22 = vld [vmem:[#allocation24_spill] sm:$0xff] }
 0x181   : > { %v3829_v27 = vadd.f32 %v3828_v53, %v3827_v6  ;;  %v6274_v11 = vpop.permute.xlu2 %2299  ;;  %v6285_v55 = vsel %vm1475_vm6, %v1670_v43, %v1674_v48 }
 0x182   : > { %v3180_v38 = vadd.f32 %v3179_v20, %v3011_v10  ;;  %4194 = vmatmul.msk.bf16.gmra.mxu2 %vm2347_vm3, %v7572_v28  ;;  %v2110_v28 = vshll.u32 %v5899_v24, 16 }
 0x184   : > { %v3349_v37 = vadd.f32 %v7573_v22, %v3180_v38  ;;  %2331 = vrot.lane.b32.xlu0 %v5866_v15, %s4503_s15  ;;  %v7578_v15 = vld [vmem:[#allocation20_spill] sm:$0xff] }
 0x185   : > { %2223 = vrot.lane.b32.xlu1 %v5797_v47, %s4504_s16  ;;  %v6282_v18 = vpop.f32.mrf.mxu2 }
 0x186   : > { %v3498_v6 = vpack.c.bf16 %v3349_v37, %v3349_v37  ;;  %v3633_v2 = vsel %vm2347_vm3, %v3349_v37, 0.0  ;;  %v3760_v20 = vmul.f32 %v3349_v37, %v3349_v37  ;;  %v2149_v46 = vpop.permute.xlu0 %2148  ;;  %7574 = vst [vmem:[#allocation37_spill] sm:$0xff] %v6282_v18  ;;  %v4352_v37 = vld [vmem:[%s6292_s21] sm:$0xff]  }
 0x187   : > { %v3634_v21 = vadd.f32 %v3633_v2, %v3632_v32  ;;  %v2606_v58 = vsel %vm2347_vm3, %v5578_v61, %v2149_v46  ;;  %v3013_v53 = vpop.f32.mrf.mxu0  ;;  %v2036_v48 = vpop.permute.xlu1 %2035  ;;  %2307 = vrot.lane.b32.xlu2 %v6285_v55, %s4503_s15  ;;  %v2105_v2 = vshll.u32 %v5792_v63, 16  ;;  %v7575_v46 = vld [vmem:[#allocation2_spill] sm:$0xff] }
 0x188   : > { %3563 = vst.msk [vmem:[%s6076_s26 + $0x1c] sm:$0xf] %vm3555_vm9, %v3498_v6  ;;  %v3830_v10 = vsel %vm2347_vm3, %v3760_v20, 0.0  ;;  %v3014_v38 = vadd.f32 %v6037_v62, %v3013_v53  ;;  %v2691_v43 = vsel %vm2412_vm7, %v2606_v58, %v2214_v29  ;;  %v4353_v20 = vunpack.c.l.bf16 %v4352_v37  ;;  %v7576_v29 = vld [vmem:[#allocation27_spill] sm:$0xff] }
 0x189   : > { %v3831_v32 = vadd.f32 %v3830_v10, %v3829_v27  ;;  %v2765_v61 = vsel %vm2477_vm8, %v2691_v43, %v6187_v14  ;;  %v6305_v6 = vpop.permute.xlu2 %1820  ;;  %v3184_v27 = vpop.f32.mrf.mxu1  ;;  %v4354_v14 = vunpack.c.h.bf16 %v4352_v37  ;;  %v2107_v18 = vrot.slane %v2105_v2, 1 }
 0x18a   : > { %v3183_v22 = vadd.f32 %v3182_v39, %v3014_v38  ;;  %3211 = vmatmul.bf16.gmra.mxu1 %v2765_v61  ;;  %v2103_v61 = vshrl.u32 %v5792_v63, 16  ;;  %v859_v44 = vmul.f32 %v5914_v42, %v4353_v20 }
 0x18b   : > { %v860_v20 = vmul.f32 %v5914_v42, %v4354_v14 }
 0x18c   : > { %v3352_v53 = vadd.f32 %v7575_v46, %v3183_v22  ;;  %2158 = vrot.lane.b32.xlu0 %v7576_v29, %s4505_s17 }
 0x18d   : > { %2249 = vrot.lane.b32.xlu1 %v5792_v63, %s4504_s16  ;;  %v6313_v43 = vpop.f32.mrf.mxu2 }
 0x18e   : > { %v3499_v58 = vpack.c.bf16 %v3352_v53, %v3352_v53  ;;  %v3635_v39 = vsel %vm2347_vm3, %v3352_v53, 0.0  ;;  %v3761_v10 = vmul.f32 %v3352_v53, %v3352_v53  ;;  %v1859_v38 = vpop.permute.xlu0 %1858  ;;  %7577 = vst [vmem:[#allocation40_spill] sm:$0xff] %v6313_v43  ;;  %v2371_v53 = vsel %vm2347_vm3, %v7578_v15, %v6219_v36 }
 0x18f   : > { %v3636_v22 = vadd.f32 %v3635_v39, %v3634_v21  ;;  %v3015_v46 = vpop.f32.mrf.mxu0  ;;  %v1996_v16 = vpop.permute.xlu1 %1995  ;;  %v2411_v21 = vsel %vm2347_vm3, %v5669_v30, %v1859_v38  ;;  %1828 = vrot.lane.b32.xlu2 %v6014_v25, %s4505_s17  ;;  %v4357_v36 = vunpack.c.l.bf16 %v4391_v45  ;;  %v4358_v39 = vunpack.c.h.bf16 %v4391_v45  ;;  %v7580_v45 = vld [vmem:[#allocation3_spill] sm:$0xff] }
 0x190   : > { %3564 = vst.msk [vmem:[%s6076_s26 + $0x20] sm:$0xf] %vm3555_vm9, %v3499_v58  ;;  %v3832_v37 = vsel %vm2347_vm3, %v3761_v10, 0.0  ;;  %v3016_v43 = vadd.f32 %v6037_v62, %v3015_v46  ;;  %v2436_v2 = vsel %vm2412_vm7, %v2371_v53, %v1996_v16  ;;  %v6337_v30 = vrot.slane %v2110_v28, 1 }
 0x191   : > { %v3833_v19 = vadd.f32 %v3832_v37, %v3831_v32  ;;  %v2512_v15 = vsel %vm2477_vm8, %v2436_v2, %v6250_v56  ;;  %v2108_v32 = vor.u32 %v2107_v18, %v2103_v61  ;;  %v6339_v16 = vpop.permute.xlu2 %2062  ;;  %v1679_v10 = vshll.u32 %v5939_v12, 16  ;;  %v7579_v56 = vld [vmem:[#allocation10_spill] sm:$0xff]  ;;  %v3187_v28 = vpop.f32.mrf.mxu1 }
 0x192   : > { %v3185_v58 = vadd.f32 %v3184_v27, %v3016_v43  ;;  %4195 = vmatmul.msk.bf16.gmra.mxu2 %vm2347_vm3, %v7535_v31  ;;  %3047 = vmatmul.bf16.gmra.mxu0 %v2512_v15  ;;  %v4460_v27 = vld [vmem:[%s7366_s4] ss:$0 sm:$0xff]  ;;  %v2476_v31 = vsel %vm2412_vm7, %v2411_v21, %v2036_v48  ;;  %v861_v18 = vmul.f32 %v5914_v42, %v4357_v36  ;;  %v1677_v43 = vshrl.u32 %v5939_v12, 16 }
 0x193   : > { %v863_v14 = vadd.f32 %v4460_v27, %v859_v44  ;;  %v1681_v61 = vrot.slane %v1679_v10, 1  ;;  %v1684_v46 = vshll.u32 %v5934_v57, 16  ;;  %v862_v44 = vmul.f32 %v5914_v42, %v4358_v39 }
 0x194   : > { %v3354_v38 = vadd.f32 %v7579_v56, %v3185_v58  ;;  %2184 = vrot.lane.b32.xlu0 %v7580_v45, %s4505_s17  ;;  %v864_v58 = vadd.f32 %v4460_v27, %v860_v20  ;;  %v6363_v10 = vsel %vm1475_vm6, %v2108_v32, %v6337_v30  ;;  %v872_v32 = vstv %s871_s25 }
 0x195   : > { %2005 = vrot.lane.b32.xlu1 %v7566_v3, %s4504_s16  ;;  %v6358_v2 = vpop.f32.mrf.mxu2  ;;  %v867_v56 = vmax.f32 %v863_v14, 0.0  ;;  %v1682_v45 = vor.u32 %v1681_v61, %v1677_v43  ;;  %vm6373_vm10 = vcmp.eq.s32.totalorder %v872_v32, 1 }
 0x196   : > { %v3500_v37 = vpack.c.bf16 %v3354_v38, %v3354_v38  ;;  %v3637_v53 = vsel %vm2347_vm3, %v3354_v38, 0.0  ;;  %v3762_v48 = vmul.f32 %v3354_v38, %v3354_v38  ;;  %v2101_v21 = vpop.permute.xlu0 %2100  ;;  %7581 = vst [vmem:[#allocation43_spill] sm:$0xff] %v6358_v2  ;;  %v865_v2 = vadd.f32 %v4460_v27, %v861_v18 }
 0x197   : > { %v3638_v15 = vadd.f32 %v3637_v53, %v3636_v22  ;;  %v3018_v3 = vpop.f32.mrf.mxu0  ;;  %v2572_v36 = vsel %vm2477_vm8, %v2476_v31, %v2101_v21  ;;  %v2216_v38 = vpop.permute.xlu1 %2215  ;;  %2070 = vrot.lane.b32.xlu2 %v5801_v35, %s4503_s15  ;;  %v6371_v22 = vrot.slane %v1684_v46, 1  ;;  %v866_v31 = vadd.f32 %v4460_v27, %v862_v44  ;;  %v7584_v21 = vld [vmem:[#allocation4_spill] sm:$0xff] }
 0x198   : > { %3565 = vst.msk [vmem:[%s6076_s26 + $0x24] sm:$0xf] %vm3555_vm9, %v3500_v37  ;;  %v3834_v42 = vsel %vm2347_vm3, %v3762_v48, 0.0  ;;  %v3019_v39 = vadd.f32 %v6037_v62, %v3018_v3  ;;  %3147 = vmatmul.bf16.gmra.mxu3 %v2572_v36  ;;  %v868_v14 = vmax.f32 %v864_v58, 0.0  ;;  %v6424_v37 = vsel %vm4668_vm4, %v5868_v52, 0 }
 0x199   : > { %v3835_v20 = vadd.f32 %v3834_v42, %v3833_v19  ;;  %v6377_v48 = vpop.permute.xlu2 %2301  ;;  %v869_v19 = vmax.f32 %v865_v2, 0.0  ;;  %v6386_v27 = vsel %vm1475_vm6, %v1682_v45, %v6371_v22  ;;  %v870_v18 = vmax.f32 %v866_v31, 0.0  ;;  %v3189_v42 = vpop.f32.mrf.mxu1 }
 0x19a   : > { %v3188_v53 = vadd.f32 %v3187_v28, %v3019_v39  ;;  %v874_v28 = vsel %vm6373_vm10, 0.0, %v867_v56  ;;  %v875_v2 = vsel %vm6373_vm10, 0.0, %v868_v14  ;;  %v2114_v52 = vshrl.u32 %v5899_v24, 16 }
 0x19b   : > { %v947_v14 = vpack.c.bf16 %v875_v2, %v875_v2 }
 0x19c   : > { %v3357_v3 = vadd.f32 %v7584_v21, %v3188_v53  ;;  %2333 = vrot.lane.b32.xlu0 %v6363_v10, %s4503_s15  ;;  %v876_v21 = vsel %vm6373_vm10, 0.0, %v869_v19 }
 0x19d   : > { %2225 = vrot.lane.b32.xlu1 %v5939_v12, %s4504_s16  ;;  %v6391_v58 = vpop.f32.mrf.mxu2 }
 0x19e   : > { %v3501_v43 = vpack.c.bf16 %v3357_v3, %v3357_v3  ;;  %v3639_v61 = vsel %vm2347_vm3, %v3357_v3, 0.0  ;;  %v3763_v46 = vmul.f32 %v3357_v3, %v3357_v3  ;;  %v2151_v44 = vpop.permute.xlu0 %2150 }
 0x19f   : > { %v3640_v36 = vadd.f32 %v3639_v61, %v3638_v15  ;;  %v2609_v45 = vsel %vm2347_vm3, %v5694_v59, %v2151_v44  ;;  %v3020_v39 = vpop.f32.mrf.mxu0  ;;  %v2242_v53 = vpop.permute.xlu1 %2241  ;;  %2309 = vrot.lane.b32.xlu2 %v6386_v27, %s4503_s15  ;;  %v946_v59 = vpack.c.bf16 %v874_v28, %v874_v28  ;;  %v877_v61 = vsel %vm6373_vm10, 0.0, %v870_v18 }
 0x1a0   : > { %3566 = vst.msk [vmem:[%s6076_s26 + $0x28] sm:$0xf] %vm3555_vm9, %v3501_v43  ;;  %v3836_v56 = vsel %vm2347_vm3, %v3763_v46, 0.0  ;;  %v3021_v31 = vadd.f32 %v6037_v62, %v3020_v39  ;;  %v2693_v32 = vsel %vm2412_vm7, %v2609_v45, %v2216_v38  ;;  %v6410_v46 = vpop.f32.mrf.mxu3  ;;  %v949_v18 = vpack.c.bf16 %v877_v61, %v877_v61 }
 0x1a1   : > { %v3837_v3 = vadd.f32 %v3836_v56, %v3835_v20  ;;  %v2768_v15 = vsel %vm2477_vm8, %v2693_v32, %v6274_v11  ;;  %v6414_v38 = vpop.permute.xlu2 %1822  ;;  %v7585_v20 = vld [vmem:[#allocation45_spill] sm:$0xff]  ;;  %v948_v11 = vpack.c.bf16 %v876_v21, %v876_v21  ;;  %v1090_v28 = vunpack.c.l.b16 %v946_v59 }
 0x1a2   : > { %v3190_v43 = vadd.f32 %v3189_v42, %v3021_v31  ;;  %3216 = vmatmul.bf16.gmra.mxu1 %v2768_v15  ;;  %4196 = vmatmul.msk.bf16.gmra.mxu2 %vm2347_vm3, %v7542_v8  ;;  %v1091_v8 = vunpack.c.l.b16 %v947_v14  ;;  %v7587_v31 = vld [vmem:[#allocation29_spill] sm:$0xff]  ;;  %v2118_v61 = vshll.u32 %v6424_v37, 16 }
 0x1a3   : > { %v2373_v32 = vsel %vm2347_vm3, %v7587_v31, %v6305_v6  ;;  %v7588_v6 = vld [vmem:[#allocation28_spill] sm:$0xff] }
 0x1a4   : > { %v3359_v19 = vadd.f32 %v7585_v20, %v3190_v43  ;;  %2160 = vrot.lane.b32.xlu0 %v5830_v41, %s4505_s17  ;;  %v1092_v20 = vunpack.c.l.b16 %v948_v11 }
 0x1a5   : > { %2251 = vrot.lane.b32.xlu1 %v5899_v24, %s4504_s16  ;;  %v6427_v39 = vpop.f32.mrf.mxu2 }
 0x1a6   : > { %v3502_v44 = vpack.c.bf16 %v3359_v19, %v3359_v19  ;;  %v3641_v2 = vsel %vm2347_vm3, %v3359_v19, 0.0  ;;  %v3764_v42 = vmul.f32 %v3359_v19, %v3359_v19  ;;  %v2177_v45 = vpop.permute.xlu0 %2176  ;;  %7586 = vst [vmem:[#allocation6_spill] sm:$0xff] %v6427_v39  ;;  %v1128_v39 = vpack.c.b16 %v1091_v8, %v1090_v28 }
 0x1a7   : > { %v3642_v56 = vadd.f32 %v3641_v2, %v3640_v36  ;;  %v3023_v21 = vpop.f32.mrf.mxu0  ;;  %v3192_v15 = vpop.f32.mrf.mxu1  ;;  %v1093_v2 = vunpack.c.l.b16 %v949_v18  ;;  %1830 = vrot.lane.b32.xlu2 %v6112_v0, %s4505_s17  ;;  %v2648_v31 = vsel %vm2347_vm3, %v7588_v6, %v2177_v45  ;;  %v2120_v18 = vrot.slane %v2118_v61, 1 }
 0x1a8   : > { %3567 = vst.msk [vmem:[%s6076_s26 + $0x2c] sm:$0xf] %vm3555_vm9, %v3502_v44  ;;  %v3838_v59 = vsel %vm2347_vm3, %v3764_v42, 0.0  ;;  %v3024_v14 = vadd.f32 %v6037_v62, %v3023_v21  ;;  %v1998_v43 = vpop.permute.xlu1 %1997  ;;  %v6451_v28 = vpop.f32.mrf.mxu3  ;;  %v2719_v8 = vsel %vm2412_vm7, %v2648_v31, %v2242_v53  ;;  %v1387_v45 = vshrl.u32 %v1128_v39, 16 }
 0x1a9   : > { %v3839_v19 = vadd.f32 %v3838_v59, %v3837_v3  ;;  %v2438_v36 = vsel %vm2412_vm7, %v2373_v32, %v1998_v43  ;;  %v6445_v21 = vpop.permute.xlu2 %2064  ;;  %v2116_v3 = vor.u32 %v2114_v52, %v6337_v30  ;;  %v1688_v32 = vshrl.u32 %v5934_v57, 16 }
 0x1aa   : > { %v3193_v44 = vadd.f32 %v3192_v15, %v3024_v14  ;;  %v2515_v42 = vsel %vm2477_vm8, %v2438_v36, %v6339_v16  ;;  %v1129_v16 = vpack.c.b16 %v1093_v2, %v1092_v20  ;;  %v1692_v30 = vshll.u32 %v5994_v13, 16 }
 0x1ab   : > { %3052 = vmatmul.bf16.gmra.mxu0 %v2515_v42  ;;  %v6467_v2 = vsel %vm1475_vm6, %v2116_v3, %v2120_v18  ;;  %v1389_v42 = vrot.slane %v1387_v45, 7 }
 0x1ac   : > { %v3362_v11 = vadd.f32 %v5856_v4, %v3193_v44  ;;  %2186 = vrot.lane.b32.xlu0 %v5840_v23, %s4505_s17  ;;  %v1394_v13 = vshrl.u32 %v1129_v16, 16 }
 0x1ad   : > { %2007 = vrot.lane.b32.xlu1 %v7576_v29, %s4504_s16  ;;  %v6458_v43 = vpop.f32.mrf.mxu2 }
 0x1ae   : > { %v3503_v15 = vpack.c.bf16 %v3362_v11, %v3362_v11  ;;  %v3643_v4 = vsel %vm2347_vm3, %v3362_v11, 0.0  ;;  %v3765_v59 = vmul.f32 %v3362_v11, %v3362_v11  ;;  %v2326_v14 = vpop.permute.xlu0 %2325  ;;  %v1390_v11 = vshll.u32 %v1128_v39, 16 }
 0x1af   : > { %v3644_v52 = vadd.f32 %v3643_v4, %v3642_v56  ;;  %v3025_v61 = vpop.f32.mrf.mxu0  ;;  %v2807_v53 = vsel %vm2477_vm8, %v2719_v8, %v2326_v14  ;;  %v3194_v44 = vpop.f32.mrf.mxu1  ;;  %2072 = vrot.lane.b32.xlu2 %v5797_v47, %s4503_s15  ;;  %v1690_v8 = vor.u32 %v1688_v32, %v6371_v22  ;;  %v6483_v18 = vrot.slane %v1394_v13, 7 }
 0x1b0   : > { %3568 = vst.msk [vmem:[%s6076_s26 + $0x30] sm:$0xf] %vm3555_vm9, %v3503_v15  ;;  %v3840_v29 = vsel %vm2347_vm3, %v3765_v59, 0.0  ;;  %v3026_v20 = vadd.f32 %v6037_v62, %v3025_v61  ;;  %3281 = vmatmul.bf16.vlgmr.msrb.gmra.mxu3 %v2807_v53  ;;  %v2218_v36 = vpop.permute.xlu1 %2217  ;;  %v1694_v15 = vrot.slane %v1692_v30, 1  ;;  %v6479_v39 = vpop.f32.mrf.mxu3  ;;  %v1397_v22 = vshll.u32 %v1129_v16, 16 }
 0x1b1   : > { %v3841_v31 = vadd.f32 %v3840_v29, %v3839_v19  ;;  %v6474_v4 = vpop.permute.xlu2 %2303  ;;  %v1392_v19 = vor.u32 %v1390_v11, %v1389_v42 }
 0x1b2   : > { %v3195_v56 = vadd.f32 %v3194_v44, %v3026_v20  ;;  %4197 = vmatmul.msk.bf16.gmra.mxu2 %vm2347_vm3, %v7559_v50  ;;  %v1399_v13 = vor.u32 %v1397_v22, %v6483_v18 }
 0x1b4   : > { %v3364_v3 = vadd.f32 %v5883_v49, %v3195_v56  ;;  %2335 = vrot.lane.b32.xlu0 %v6467_v2, %s4503_s15  ;;  %v6489_v49 = vsel %vm1475_vm6, %v1690_v8, %v1694_v15  ;;  %v7445_v56 = vrot.slane %v5899_v24, 1 }
 0x1b5   : > { %2227 = vrot.lane.b32.xlu1 %v5934_v57, %s4504_s16  ;;  %v6486_v14 = vpop.f32.mrf.mxu2 }
 0x1b6   : > { %v3504_v45 = vpack.c.bf16 %v3364_v3, %v3364_v3  ;;  %v3645_v50 = vsel %vm2347_vm3, %v3364_v3, 0.0  ;;  %v3766_v32 = vmul.f32 %v3364_v3, %v3364_v3  ;;  %v2153_v59 = vpop.permute.xlu0 %2152 }
 0x1b7   : > { %v3646_v30 = vadd.f32 %v3645_v50, %v3644_v52  ;;  %v2612_v61 = vsel %vm2347_vm3, %v5822_v51, %v2153_v59  ;;  %v3028_v29 = vpop.f32.mrf.mxu0  ;;  %2311 = vrot.lane.b32.xlu2 %v6489_v49, %s4503_s15  ;;  %v6504_v51 = vsel %vm4668_vm4, 0, %v1392_v19 }
 0x1b8   : > { %3569 = vst.msk [vmem:[%s6076_s26 + $0x34] sm:$0xf] %vm3555_vm9, %v3504_v45  ;;  %v3842_v53 = vsel %vm2347_vm3, %v3766_v32, 0.0  ;;  %v2695_v16 = vsel %vm2412_vm7, %v2612_v61, %v2218_v36  ;;  %v2244_v20 = vpop.permute.xlu1 %2243  ;;  %v6511_v36 = vsel %vm1130_vm0, %v1389_v42, %v1399_v13  ;;  %v3029_v8 = vadd.f32 %v6037_v62, %v3028_v29  ;;  %v6521_v19 = vpop.f32.mrf.mxu3  ;;  %v7589_v29 = vld [vmem:[#allocation33_spill] sm:$0xff] }
 0x1b9   : > { %v3843_v44 = vadd.f32 %v3842_v53, %v3841_v31  ;;  %v2771_v11 = vsel %vm2477_vm8, %v2695_v16, %v6377_v48  ;;  %v6506_v52 = vpop.permute.xlu2 %1824  ;;  %v2260_v48 = vshll.u32 %v6504_v51, 16  ;;  %v2123_v31 = vrot.slane %v5792_v63, 1  ;;  %v7590_v16 = vld [vmem:[#allocation8_spill] sm:$0xff] }
 0x1ba   : > { %3221 = vmatmul.bf16.gmra.mxu1 %v2771_v11  ;;  %v2375_v42 = vsel %vm2347_vm3, %v5312_v54, %v6414_v38  ;;  %v2265_v32 = vshll.u32 %v6511_v36, 16  ;;  %v2258_v63 = vshrl.u32 %v6504_v51, 16  ;;  %v2269_v17 = vshrl.u32 %v6511_v36, 16 }
 0x1bb   : > { %v2262_v59 = vrot.slane %v2260_v48, 1  ;;  %v6532_v53 = vsel %vm1892_vm2, %v2123_v31, %v7445_v56  ;;  %v1699_v31 = vshll.u32 %v6059_v26, 16  ;;  %v1704_v56 = vshll.u32 %v6055_v40, 16 }
 0x1bc   : > { %2162 = vrot.lane.b32.xlu0 %v5893_v7, %s4505_s17 }
 0x1bd   : > { %2253 = vrot.lane.b32.xlu1 %v6504_v51, %s4504_s16  ;;  %v6519_v3 = vpop.f32.mrf.mxu2 }
 0x1be   : > { %v2179_v15 = vpop.permute.xlu0 %2178 }
 0x1bf   : > { %v3197_v22 = vpop.f32.mrf.mxu1  ;;  %1832 = vrot.lane.b32.xlu2 %v6199_v34, %s4505_s17  ;;  %v2651_v54 = vsel %vm2347_vm3, %v7589_v29, %v2179_v15  ;;  %v3030_v38 = vpop.f32.mrf.mxu0  ;;  %v6549_v15 = vrot.slane %v2265_v32, 1  ;;  %v1701_v32 = vrot.slane %v1699_v31, 1 }
 0x1c0   : > { %v3198_v45 = vadd.f32 %v3197_v22, %v3029_v8  ;;  %v2000_v50 = vpop.permute.xlu1 %1999 }
 0x1c1   : > { %v2440_v61 = vsel %vm2412_vm7, %v2375_v42, %v2000_v50  ;;  %v6543_v48 = vpop.permute.xlu2 %2066  ;;  %v2721_v50 = vsel %vm2412_vm7, %v2651_v54, %v2244_v20 }
 0x1c2   : > { %v3367_v11 = vadd.f32 %v7590_v16, %v3198_v45  ;;  %v2518_v13 = vsel %vm2477_vm8, %v2440_v61, %v6445_v21  ;;  %4198 = vmatmul.msk.bf16.gmra.mxu2 %vm2347_vm3, %v7570_v5  ;;  %v3031_v45 = vadd.f32 %v6037_v62, %v3030_v38  ;;  %v2263_v5 = vor.u32 %v2262_v59, %v2258_v63  ;;  %v6562_v62 = vpop.f32.mrf.mxu3  ;;  %v7591_v38 = vld [vmem:[#allocation46_spill] sm:$0xff] }
 0x1c3   : > { %3057 = vmatmul.bf16.gmra.mxu0 %v2518_v13  ;;  %v1697_v13 = vshrl.u32 %v6059_v26, 16 }
 0x1c4   : > { %v3505_v8 = vpack.c.bf16 %v3367_v11, %v3367_v11  ;;  %v3647_v22 = vsel %vm2347_vm3, %v3367_v11, 0.0  ;;  %v3767_v42 = vmul.f32 %v3367_v11, %v3367_v11  ;;  %2188 = vrot.lane.b32.xlu0 %v6532_v53, %s4505_s17  ;;  %v2268_v59 = vsel %vm1475_vm6, %v2263_v5, %v6549_v15 }
 0x1c5   : > { %v3648_v21 = vadd.f32 %v3647_v22, %v3646_v30  ;;  %2009 = vrot.lane.b32.xlu1 %v5830_v41, %s4504_s16  ;;  %v6558_v11 = vpop.f32.mrf.mxu2  ;;  %v6570_v22 = vrot.slane %v1704_v56, 1 }
 0x1c6   : > { %3570 = vst.msk [vmem:[%s6076_s26 + $0x38] sm:$0xf] %vm3555_vm9, %v3505_v8  ;;  %v3844_v61 = vsel %vm2347_vm3, %v3767_v42, 0.0  ;;  %v2328_v16 = vpop.permute.xlu0 %2327  ;;  %v1702_v8 = vor.u32 %v1701_v32, %v1697_v13 }
 0x1c7   : > { %v3845_v30 = vadd.f32 %v3844_v61, %v3843_v44  ;;  %v3199_v20 = vpop.f32.mrf.mxu1  ;;  %v2810_v54 = vsel %vm2477_vm8, %v2721_v50, %v2328_v16  ;;  %2074 = vrot.lane.b32.xlu2 %v5939_v12, %s4503_s15 }
 0x1c8   : > { %v3200_v41 = vadd.f32 %v3199_v20, %v3031_v45  ;;  %3286 = vmatmul.bf16.gmra.mxu3 %v2810_v54  ;;  %v2220_v63 = vpop.permute.xlu1 %2219  ;;  %v6585_v56 = vsel %vm1475_vm6, %v1702_v8, %v6570_v22 }
 0x1c9   : > { %v6572_v42 = vpop.permute.xlu2 %2305 }
 0x1ca   : > { %v3369_v31 = vadd.f32 %v7591_v38, %v3200_v41  ;;  %v6590_v41 = vpop.f32.mrf.mxu3 }
 0x1cb   : > { %7593 = vst [vmem:[#allocation22_spill] sm:$0xff] %v6590_v41  ;;  %v7597_v41 = vld [vmem:[#allocation9_spill] sm:$0xff] }
 0x1cc   : > { %v3506_v44 = vpack.c.bf16 %v3369_v31, %v3369_v31  ;;  %v3649_v50 = vsel %vm2347_vm3, %v3369_v31, 0.0  ;;  %v3768_v61 = vmul.f32 %v3369_v31, %v3369_v31  ;;  %2337 = vrot.lane.b32.xlu0 %v2268_v59, %s4503_s15  ;;  %v3033_v59 = vpop.f32.mrf.mxu0 }
 0x1cd   : > { %v3650_v45 = vadd.f32 %v3649_v50, %v3648_v21  ;;  %2229 = vrot.lane.b32.xlu1 %v6059_v26, %s4504_s16  ;;  %v6581_v13 = vpop.f32.mrf.mxu2  ;;  %v6614_v50 = vsel %vm4668_vm4, %v6483_v18, 0 }
 0x1ce   : > { %3571 = vst.msk [vmem:[%s6076_s26 + $0x3c] sm:$0xf] %vm3555_vm9, %v3506_v44  ;;  %v3846_v5 = vsel %vm2347_vm3, %v3768_v61, 0.0  ;;  %v2155_v16 = vpop.permute.xlu0 %2154  ;;  %v2273_v18 = vshll.u32 %v6614_v50, 16 }
 0x1cf   : > { %7592 = vst [vmem:[#allocation21_spill] sm:$0xff] %v6581_v13  ;;  %v3847_v32 = vadd.f32 %v3846_v5, %v3845_v30  ;;  %v2615_v20 = vsel %vm2347_vm3, %v5929_v9, %v2155_v16  ;;  %2313 = vrot.lane.b32.xlu2 %v6585_v56, %s4503_s15  ;;  %v7594_v30 = vld [vmem:[#allocation47_spill] sm:$0xff]  ;;  %v2126_v9 = vrot.slane %v6424_v37, 1  ;;  %v2377_v37 = vsel %vm2347_vm3, %v5471_v60, %v6506_v52 }
 0x1d0   : > { %v2697_v21 = vsel %vm2412_vm7, %v2615_v20, %v2220_v63  ;;  %v2246_v54 = vpop.permute.xlu1 %2245  ;;  %v6606_v63 = vld [vmem:[%s7368_s6] ss:$0 sm:$0xff] }
 0x1d1   : > { %v2774_v38 = vsel %vm2477_vm8, %v2697_v21, %v6474_v4  ;;  %v6596_v31 = vpop.permute.xlu2 %1826  ;;  %v3034_v4 = vadd.f32 %v6606_v63, %v3033_v59  ;;  %v7596_v59 = vrot.slane %v5899_v24, 1 }
 0x1d2   : > { %3226 = vmatmul.bf16.gmra.mxu1 %v2774_v38  ;;  %v6619_v20 = vpop.f32.mrf.mxu3 }
 0x1d3   : > { %v6625_v38 = vsel %vm1892_vm2, %v7596_v59, %v2126_v9 }
 0x1d4   : > { %2164 = vrot.lane.b32.xlu0 %v7594_v30, %s4505_s17 }
 0x1d5   : > { %2255 = vrot.lane.b32.xlu1 %v6511_v36, %s4504_s16  ;;  %v6609_v44 = vpop.f32.mrf.mxu2 }
 0x1d6   : > { %v2181_v8 = vpop.permute.xlu0 %2180  ;;  %7595 = vst [vmem:[#allocation7_spill] sm:$0xff] %v6609_v44 }
 0x1d7   : > { %v3202_v61 = vpop.f32.mrf.mxu1  ;;  %1834 = vrot.lane.b32.xlu2 %v6285_v55, %s4505_s17 }
 0x1d8   : > { %v3203_v5 = vadd.f32 %v3202_v61, %v3034_v4  ;;  %v2002_v16 = vpop.permute.xlu1 %2001  ;;  %v3035_v4 = vpop.f32.mrf.mxu0  ;;  %v7598_v61 = vld [vmem:[#allocation39_spill] sm:$0xff] }
 0x1d9   : > { %v2442_v21 = vsel %vm2412_vm7, %v2377_v37, %v2002_v16  ;;  %v2654_v24 = vsel %vm2347_vm3, %v7598_v61, %v2181_v8  ;;  %v6636_v9 = vpop.permute.xlu2 %2068 }
 0x1da   : > { %v3372_v60 = vadd.f32 %v7597_v41, %v3203_v5  ;;  %v2521_v52 = vsel %vm2477_vm8, %v2442_v21, %v6543_v48  ;;  %v2271_v48 = vor.u32 %v2269_v17, %v6549_v15  ;;  %v2275_v41 = vrot.slane %v2273_v18, 1  ;;  %v7600_v18 = vld [vmem:[#allocation34_spill] sm:$0xff] }
 0x1db   : > { %3062 = vmatmul.bf16.gmra.mxu0 %v2521_v52  ;;  %v3036_v5 = vadd.f32 %v6606_v63, %v3035_v4  ;;  %v1708_v17 = vshrl.u32 %v6055_v40, 16  ;;  %v1712_v4 = vshll.u32 %v7600_v18, 16 }
 0x1dc   : > { %v3507_v37 = vpack.c.bf16 %v3372_v60, %v3372_v60  ;;  %v3651_v16 = vsel %vm2347_vm3, %v3372_v60, 0.0  ;;  %v3769_v59 = vmul.f32 %v3372_v60, %v3372_v60  ;;  %2190 = vrot.lane.b32.xlu0 %v6625_v38, %s4505_s17  ;;  %v2723_v60 = vsel %vm2412_vm7, %v2654_v24, %v2246_v54  ;;  %v6658_v54 = vpop.f32.mrf.mxu3 }
 0x1dd   : > { %v3652_v44 = vadd.f32 %v3651_v16, %v3650_v45  ;;  %2011 = vrot.lane.b32.xlu1 %v5893_v7, %s4504_s16  ;;  %v6648_v52 = vpop.f32.mrf.mxu2  ;;  %v2276_v15 = vsel %vm1475_vm6, %v2271_v48, %v2275_v41  ;;  %7602 = vst [vmem:[#allocation2_spill] sm:$0xff] %v6658_v54  ;;  %v1714_v24 = vrot.slane %v1712_v4, 1 }
 0x1de   : > { %3572 = vst.msk [vmem:[%s6076_s26 + $0x40] sm:$0xf] %vm3555_vm9, %v3507_v37  ;;  %v3848_v8 = vsel %vm2347_vm3, %v3769_v59, 0.0  ;;  %v2330_v21 = vpop.permute.xlu0 %2329  ;;  %v7601_v37 = vld [vmem:[#allocation26_spill] sm:$0xff] }
 0x1df   : > { %7599 = vst [vmem:[#allocation24_spill] sm:$0xff] %v6648_v52  ;;  %v3849_v61 = vadd.f32 %v3848_v8, %v3847_v32  ;;  %v3204_v13 = vpop.f32.mrf.mxu1  ;;  %v2813_v45 = vsel %vm2477_vm8, %v2723_v60, %v2330_v21  ;;  %2076 = vrot.lane.b32.xlu2 %v5934_v57, %s4503_s15 }
 0x1e0   : > { %v3205_v16 = vadd.f32 %v3204_v13, %v3036_v5  ;;  %3291 = vmatmul.bf16.gmra.mxu3 %v2813_v45  ;;  %v2222_v7 = vpop.permute.xlu1 %2221  ;;  %v1710_v13 = vor.u32 %v1708_v17, %v6570_v22  ;;  %v3038_v18 = vpop.f32.mrf.mxu0 }
 0x1e1   : > { %v6660_v32 = vpop.permute.xlu2 %2307 }
 0x1e2   : > { %v3374_v59 = vadd.f32 %v7601_v37, %v3205_v16  ;;  %v6673_v22 = vsel %vm1475_vm6, %v1710_v13, %v1714_v24  ;;  %v7606_v24 = vld [vmem:[#allocation36_spill] sm:$0xff] }
 0x1e4   : > { %v3508_v5 = vpack.c.bf16 %v3374_v59, %v3374_v59  ;;  %v3653_v8 = vsel %vm2347_vm3, %v3374_v59, 0.0  ;;  %v3770_v48 = vmul.f32 %v3374_v59, %v3374_v59  ;;  %2339 = vrot.lane.b32.xlu0 %v2276_v15, %s4503_s15  ;;  %v6682_v37 = vpop.f32.mrf.mxu3 }
 0x1e5   : > { %v3654_v41 = vadd.f32 %v3653_v8, %v3652_v44  ;;  %2231 = vrot.lane.b32.xlu1 %v6055_v40, %s4504_s16  ;;  %v6670_v45 = vpop.f32.mrf.mxu2 }
 0x1e6   : > { %3573 = vst.msk [vmem:[%s6076_s26 + $0x44] sm:$0xf] %vm3555_vm9, %v3508_v5  ;;  %v3850_v21 = vsel %vm2347_vm3, %v3770_v48, 0.0  ;;  %v2157_v60 = vpop.permute.xlu0 %2156  ;;  %v2379_v5 = vsel %vm2347_vm3, %v7606_v24, %v6596_v31 }
 0x1e7   : > { %7603 = vst [vmem:[#allocation27_spill] sm:$0xff] %v6670_v45  ;;  %v3851_v16 = vadd.f32 %v3850_v21, %v3849_v61  ;;  %v2618_v17 = vsel %vm2347_vm3, %v6014_v25, %v2157_v60  ;;  %2315 = vrot.lane.b32.xlu2 %v6673_v22, %s4503_s15  ;;  %v7604_v61 = vld [vmem:[#allocation48_spill] sm:$0xff]  ;;  %v3039_v25 = vadd.f32 %v6606_v63, %v3038_v18  ;;  %v7607_v60 = vld [vmem:[#allocation49_spill] sm:$0xff] }
 0x1e8   : > { %v2699_v15 = vsel %vm2412_vm7, %v2618_v17, %v2222_v7  ;;  %v2248_v44 = vpop.permute.xlu1 %2247  ;;  %v7608_v18 = vld [vmem:[#allocation25_spill] sm:$0xff] }
 0x1e9   : > { %v2777_v4 = vsel %vm2477_vm8, %v2699_v15, %v6572_v42  ;;  %v6684_v59 = vpop.permute.xlu2 %1828  ;;  %v3040_v15 = vpop.f32.mrf.mxu0 }
 0x1ea   : > { %3231 = vmatmul.bf16.gmra.mxu1 %v2777_v4 }
 0x1ec   : > { %2166 = vrot.lane.b32.xlu0 %v7604_v61, %s4505_s17  ;;  %v6707_v24 = vpop.f32.mrf.mxu3 }
 0x1ed   : > { %2013 = vrot.lane.b32.xlu1 %v7594_v30, %s4504_s16  ;;  %v6691_v13 = vpop.f32.mrf.mxu2  ;;  %7609 = vst [vmem:[#allocation10_spill] sm:$0xff] %v6707_v24  ;;  %v7612_v24 = vld [vmem:[#allocation16_spill] sm:$0xff] }
 0x1ee   : > { %v2183_v7 = vpop.permute.xlu0 %2182  ;;  %7605 = vst [vmem:[#allocation20_spill] sm:$0xff] %v6691_v13 }
 0x1ef   : > { %v3207_v42 = vpop.f32.mrf.mxu1  ;;  %2078 = vrot.lane.b32.xlu2 %v6059_v26, %s4503_s15  ;;  %v2657_v4 = vsel %vm2347_vm3, %v7608_v18, %v2183_v7 }
 0x1f0   : > { %v3208_v8 = vadd.f32 %v3207_v42, %v3039_v25  ;;  %v2004_v48 = vpop.permute.xlu1 %2003 }
 0x1f1   : > { %v2444_v21 = vsel %vm2412_vm7, %v2379_v5, %v2004_v48  ;;  %v2071_v54 = vpop.permute.xlu2 %2070 }
 0x1f2   : > { %v3377_v30 = vadd.f32 %v7607_v60, %v3208_v8  ;;  %v2524_v17 = vsel %vm2477_vm8, %v2444_v21, %v6636_v9  ;;  %v7610_v8 = vld [vmem:[#allocation11_spill] sm:$0xff]  ;;  %v3041_v9 = vadd.f32 %v6606_v63, %v3040_v15  ;;  %v2725_v60 = vsel %vm2412_vm7, %v2657_v4, %v2248_v44  ;;  %v7613_v15 = vld [vmem:[#allocation14_spill] sm:$0xff] }
 0x1f3   : > { %3067 = vmatmul.bf16.gmra.mxu0 %v2524_v17 }
 0x1f4   : > { %v3509_v31 = vpack.c.bf16 %v3377_v30, %v3377_v30  ;;  %v3655_v25 = vsel %vm2347_vm3, %v3377_v30, 0.0  ;;  %v3771_v42 = vmul.f32 %v3377_v30, %v3377_v30  ;;  %1836 = vrot.lane.b32.xlu0 %v6386_v27, %s4505_s17  ;;  %v6727_v44 = vpop.f32.mrf.mxu3 }
 0x1f5   : > { %v3656_v5 = vadd.f32 %v3655_v25, %v3654_v41  ;;  %2233 = vrot.lane.b32.xlu1 %v7610_v8, %s4504_s16  ;;  %v6715_v21 = vpop.f32.mrf.mxu2 }
 0x1f6   : > { %3574 = vst.msk [vmem:[%s6076_s26 + $0x48] sm:$0xf] %vm3555_vm9, %v3509_v31  ;;  %v3852_v7 = vsel %vm2347_vm3, %v3771_v42, 0.0  ;;  %v2332_v48 = vpop.permute.xlu0 %2331 }
 0x1f7   : > { %7611 = vst [vmem:[#allocation4_spill] sm:$0xff] %v6715_v21  ;;  %v3853_v30 = vadd.f32 %v3852_v7, %v3851_v16  ;;  %v3209_v17 = vpop.f32.mrf.mxu1  ;;  %v2816_v18 = vsel %vm2477_vm8, %v2725_v60, %v2332_v48  ;;  %2317 = vrot.lane.b32.xlu2 %v7612_v24, %s4503_s15  ;;  %v7614_v16 = vld [vmem:[#allocation32_spill] sm:$0xff] }
 0x1f8   : > { %v3210_v41 = vadd.f32 %v3209_v17, %v3041_v9  ;;  %3296 = vmatmul.bf16.gmra.mxu3 %v2816_v18  ;;  %v2224_v25 = vpop.permute.xlu1 %2223 }
 0x1f9   : > { %v6722_v13 = vpop.permute.xlu2 %2309 }
 0x1fa   : > { %v3379_v31 = vadd.f32 %v7613_v15, %v3210_v41  ;;  %v3043_v15 = vpop.f32.mrf.mxu0 }
 0x1fc   : > { %v3510_v42 = vpack.c.bf16 %v3379_v31, %v3379_v31  ;;  %v3657_v21 = vsel %vm2347_vm3, %v3379_v31, 0.0  ;;  %v3772_v45 = vmul.f32 %v3379_v31, %v3379_v31  ;;  %2168 = vrot.lane.b32.xlu0 %v7614_v16, %s4505_s17  ;;  %v2381_v31 = vsel %vm2347_vm3, %v5631_v33, %v6684_v59 }
 0x1fd   : > { %v3658_v4 = vadd.f32 %v3657_v21, %v3656_v5  ;;  %2015 = vrot.lane.b32.xlu1 %v7604_v61, %s4504_s16  ;;  %v6734_v48 = vpop.f32.mrf.mxu2 }
 0x1fe   : > { %3575 = vst.msk [vmem:[%s6076_s26 + $0x4c] sm:$0xf] %vm3555_vm9, %v3510_v42  ;;  %v3854_v9 = vsel %vm2347_vm3, %v3772_v45, 0.0  ;;  %v2159_v7 = vpop.permute.xlu0 %2158  ;;  %v7616_v45 = vld [vmem:[#allocation12_spill] sm:$0xff] }
 0x1ff   : > { %7615 = vst [vmem:[#allocation45_spill] sm:$0xff] %v6734_v48  ;;  %v3855_v60 = vadd.f32 %v3854_v9, %v3853_v30  ;;  %v2621_v17 = vsel %vm2347_vm3, %v6112_v0, %v2159_v7  ;;  %2080 = vrot.lane.b32.xlu2 %v6055_v40, %s4503_s15  ;;  %v3044_v0 = vadd.f32 %v6606_v63, %v3043_v15 }
 0x200   : > { %v2701_v18 = vsel %vm2412_vm7, %v2621_v17, %v2224_v25  ;;  %v2250_v41 = vpop.permute.xlu1 %2249  ;;  %v6752_v25 = vpop.f32.mrf.mxu3  ;;  %v7619_v17 = vld [vmem:[#allocation19_spill] sm:$0xff] }
 0x201   : > { %v2780_v5 = vsel %vm2477_vm8, %v2701_v18, %v6660_v32  ;;  %v6743_v61 = vpop.permute.xlu2 %1830  ;;  %7618 = vst [vmem:[#allocation28_spill] sm:$0xff] %v6752_v25  ;;  %v7620_v18 = vld [vmem:[#allocation31_spill] sm:$0xff] }
 0x202   : > { %3236 = vmatmul.bf16.gmra.mxu1 %v2780_v5 }
 0x204   : > { %1838 = vrot.lane.b32.xlu0 %v6489_v49, %s4505_s17 }
 0x205   : > { %2235 = vrot.lane.b32.xlu1 %v7616_v45, %s4504_s16  ;;  %v6750_v30 = vpop.f32.mrf.mxu2 }
 0x206   : > { %v2185_v21 = vpop.permute.xlu0 %2184  ;;  %7617 = vst [vmem:[#allocation29_spill] sm:$0xff] %v6750_v30  ;;  %v3045_v30 = vpop.f32.mrf.mxu0 }
 0x207   : > { %v3212_v32 = vpop.f32.mrf.mxu1  ;;  %2319 = vrot.lane.b32.xlu2 %v7619_v17, %s4503_s15  ;;  %v2660_v25 = vsel %vm2347_vm3, %v5740_v1, %v2185_v21 }
 0x208   : > { %v3213_v42 = vadd.f32 %v3212_v32, %v3044_v0  ;;  %v2006_v9 = vpop.permute.xlu1 %2005  ;;  %v7621_v0 = vld [vmem:[#allocation35_spill] sm:$0xff] }
 0x209   : > { %v2446_v7 = vsel %vm2412_vm7, %v2381_v31, %v2006_v9  ;;  %v2073_v48 = vpop.permute.xlu2 %2072  ;;  %v3046_v31 = vadd.f32 %v6606_v63, %v3045_v30  ;;  %v6776_v9 = vpop.f32.mrf.mxu3 }
 0x20a   : > { %v3382_v15 = vadd.f32 %v7620_v18, %v3213_v42  ;;  %v2527_v5 = vsel %vm2477_vm8, %v2446_v7, %v2071_v54  ;;  %v2727_v42 = vsel %vm2412_vm7, %v2660_v25, %v2250_v41 }
 0x20b   : > { %3072 = vmatmul.bf16.gmra.mxu0 %v2527_v5 }
 0x20c   : > { %v3511_v52 = vpack.c.bf16 %v3382_v15, %v3382_v15  ;;  %v3659_v33 = vsel %vm2347_vm3, %v3382_v15, 0.0  ;;  %v3773_v59 = vmul.f32 %v3382_v15, %v3382_v15  ;;  %2170 = vrot.lane.b32.xlu0 %v7621_v0, %s4505_s17 }
 0x20d   : > { %v3660_v32 = vadd.f32 %v3659_v33, %v3658_v4  ;;  %2017 = vrot.lane.b32.xlu1 %v7614_v16, %s4504_s16  ;;  %v6773_v21 = vpop.f32.mrf.mxu2 }
 0x20e   : > { %3576 = vst.msk [vmem:[%s6076_s26 + $0x50] sm:$0xf] %vm3555_vm9, %v3511_v52  ;;  %v3856_v54 = vsel %vm2347_vm3, %v3773_v59, 0.0  ;;  %v2334_v1 = vpop.permute.xlu0 %2333  ;;  %v7622_v52 = vld [vmem:[#allocation30_spill] sm:$0xff]  ;;  %v7623_v59 = vld [vmem:[#allocation17_spill] sm:$0xff] }
 0x20f   : > { %v3857_v7 = vadd.f32 %v3856_v54, %v3855_v60  ;;  %v3214_v18 = vpop.f32.mrf.mxu1  ;;  %v2819_v4 = vsel %vm2477_vm8, %v2727_v42, %v2334_v1  ;;  %2082 = vrot.lane.b32.xlu2 %v7610_v8, %s4503_s15 }
 0x210   : > { %v3215_v15 = vadd.f32 %v3214_v18, %v3046_v31  ;;  %3301 = vmatmul.bf16.gmra.mxu3 %v2819_v4  ;;  %v2226_v16 = vpop.permute.xlu1 %2225 }
 0x211   : > { %v6782_v5 = vpop.permute.xlu2 %2311 }
 0x212   : > { %v3384_v30 = vadd.f32 %v7622_v52, %v3215_v15  ;;  %v6797_v15 = vpop.f32.mrf.mxu3 }
 0x214   : > { %v3512_v33 = vpack.c.bf16 %v3384_v30, %v3384_v30  ;;  %v3661_v41 = vsel %vm2347_vm3, %v3384_v30, 0.0  ;;  %v3774_v25 = vmul.f32 %v3384_v30, %v3384_v30  ;;  %1840 = vrot.lane.b32.xlu0 %v6585_v56, %s4505_s17  ;;  %v7624_v30 = vld [vmem:[#allocation15_spill] sm:$0xff] }
 0x215   : > { %v3662_v60 = vadd.f32 %v3661_v41, %v3660_v32  ;;  %2237 = vrot.lane.b32.xlu1 %v7623_v59, %s4504_s16  ;;  %v6792_v54 = vpop.f32.mrf.mxu2  ;;  %v3048_v32 = vpop.f32.mrf.mxu0 }
 0x216   : > { %3577 = vst.msk [vmem:[%s6076_s26 + $0x54] sm:$0xf] %vm3555_vm9, %v3512_v33  ;;  %v3858_v31 = vsel %vm2347_vm3, %v3774_v25, 0.0  ;;  %v2161_v8 = vpop.permute.xlu0 %2160 }
 0x217   : > { %v3859_v1 = vadd.f32 %v3858_v31, %v3857_v7  ;;  %v2624_v42 = vsel %vm2347_vm3, %v6199_v34, %v2161_v8  ;;  %2321 = vrot.lane.b32.xlu2 %v7588_v6, %s4503_s15  ;;  %v3049_v7 = vadd.f32 %v6606_v63, %v3048_v32 }
 0x218   : > { %v2703_v18 = vsel %vm2412_vm7, %v2624_v42, %v2226_v16  ;;  %v2252_v4 = vpop.permute.xlu1 %2251 }
 0x219   : > { %v2783_v52 = vsel %vm2477_vm8, %v2703_v18, %v6722_v13  ;;  %v6807_v34 = vpop.permute.xlu2 %1832  ;;  %v7625_v13 = vld [vmem:[#allocation44_spill] sm:$0xff] }
 0x21a   : > { %3241 = vmatmul.bf16.gmra.mxu1 %v2783_v52  ;;  %v2383_v25 = vsel %vm2347_vm3, %v7625_v13, %v6743_v61  ;;  %v7627_v52 = vld [vmem:[#allocation5_spill] sm:$0xff] }
 0x21b   : > { %v6815_v31 = vpop.f32.mrf.mxu3 }
 0x21c   : > { %2172 = vrot.lane.b32.xlu0 %v7624_v30, %s4505_s17 }
 0x21d   : > { %2019 = vrot.lane.b32.xlu1 %v7621_v0, %s4504_s16  ;;  %v6810_v33 = vpop.f32.mrf.mxu2  ;;  %v7626_v0 = vld [vmem:[#allocation42_spill] sm:$0xff]  ;;  %v3050_v32 = vpop.f32.mrf.mxu0 }
 0x21e   : > { %v2187_v16 = vpop.permute.xlu0 %2186 }
 0x21f   : > { %v3217_v41 = vpop.f32.mrf.mxu1  ;;  %2084 = vrot.lane.b32.xlu2 %v7616_v45, %s4503_s15  ;;  %v2663_v30 = vsel %vm2347_vm3, %v7627_v52, %v2187_v16  ;;  %v3051_v45 = vadd.f32 %v6606_v63, %v3050_v32  ;;  %v7629_v32 = vld [vmem:[#allocation41_spill] sm:$0xff] }
 0x220   : > { %v3218_v6 = vadd.f32 %v3217_v41, %v3049_v7  ;;  %v2008_v59 = vpop.permute.xlu1 %2007 }
 0x221   : > { %v2448_v8 = vsel %vm2412_vm7, %v2383_v25, %v2008_v59  ;;  %v7628_v25 = vld [vmem:[#allocation23_spill] sm:$0xff]  ;;  %v2729_v59 = vsel %vm2412_vm7, %v2663_v30, %v2252_v4  ;;  %v2075_v52 = vpop.permute.xlu2 %2074 }
 0x222   : > { %v3387_v42 = vadd.f32 %v7626_v0, %v3218_v6  ;;  %v2530_v18 = vsel %vm2477_vm8, %v2448_v8, %v2073_v48 }
 0x223   : > { %3077 = vmatmul.bf16.gmra.mxu0 %v2530_v18 }
 0x224   : > { %v3513_v61 = vpack.c.bf16 %v3387_v42, %v3387_v42  ;;  %v3663_v7 = vsel %vm2347_vm3, %v3387_v42, 0.0  ;;  %v3775_v41 = vmul.f32 %v3387_v42, %v3387_v42  ;;  %1842 = vrot.lane.b32.xlu0 %v6673_v22, %s4505_s17 }
 0x225   : > { %v3664_v13 = vadd.f32 %v3663_v7, %v3662_v60  ;;  %2239 = vrot.lane.b32.xlu1 %v7628_v25, %s4504_s16  ;;  %v6833_v16 = vpop.f32.mrf.mxu2  ;;  %v6840_v7 = vpop.f32.mrf.mxu3 }
 0x226   : > { %3578 = vst.msk [vmem:[%s6076_s26 + $0x58] sm:$0xf] %vm3555_vm9, %v3513_v61  ;;  %v3860_v48 = vsel %vm2347_vm3, %v3775_v41, 0.0  ;;  %v2336_v6 = vpop.permute.xlu0 %2335 }
 0x227   : > { %v3861_v8 = vadd.f32 %v3860_v48, %v3859_v1  ;;  %v3219_v0 = vpop.f32.mrf.mxu1  ;;  %v2822_v42 = vsel %vm2477_vm8, %v2729_v59, %v2336_v6  ;;  %2323 = vrot.lane.b32.xlu2 %v7589_v29, %s4503_s15  ;;  %v7630_v1 = vld [vmem:[#allocation18_spill] sm:$0xff] }
 0x228   : > { %v3220_v60 = vadd.f32 %v3219_v0, %v3051_v45  ;;  %3306 = vmatmul.bf16.gmra.mxu3 %v2822_v42  ;;  %v2228_v18 = vpop.permute.xlu1 %2227 }
 0x22a   : > { %v3389_v61 = vadd.f32 %v7629_v32, %v3220_v60  ;;  %v3053_v60 = vpop.f32.mrf.mxu0 }
 0x22c   : > { %v3514_v41 = vpack.c.bf16 %v3389_v61, %v3389_v61  ;;  %v3665_v25 = vsel %vm2347_vm3, %v3389_v61, 0.0  ;;  %v3776_v4 = vmul.f32 %v3389_v61, %v3389_v61  ;;  %2174 = vrot.lane.b32.xlu0 %v7630_v1, %s4505_s17  ;;  %v3114_v61 = vadd.f32 %v6606_v63, %v6410_v46  ;;  %s4171_s17 = sshll.u32 %s7661_s28, 1 }
 0x22d   : > { %v3666_v30 = vadd.f32 %v3665_v25, %v3664_v13  ;;  %v6848_v6 = vpop.f32.mrf.mxu2  ;;  %v2314_v13 = vpop.permute.xlu2 %2313 }
 0x22e   : > { %3579 = vst.msk [vmem:[%s6076_s26 + $0x5c] sm:$0xf] %vm3555_vm9, %v3514_v41  ;;  %v3862_v45 = vsel %vm2347_vm3, %v3776_v4, 0.0  ;;  %v2163_v48 = vpop.permute.xlu0 %2162 }
 0x22f   : > { %v3863_v29 = vadd.f32 %v3862_v45, %v3861_v8  ;;  %v2627_v59 = vsel %vm2347_vm3, %v6285_v55, %v2163_v48  ;;  %v3054_v8 = vadd.f32 %v6606_v63, %v3053_v60 }
 0x230   : > { %v2705_v0 = vsel %vm2412_vm7, %v2627_v59, %v2228_v18  ;;  %v2254_v42 = vpop.permute.xlu1 %2253  ;;  %v2385_v18 = vsel %vm2347_vm3, %v5801_v35, %v6807_v34 }
 0x231   : > { %v2786_v32 = vsel %vm2477_vm8, %v2705_v0, %v6782_v5  ;;  %v7631_v0 = vld [vmem:[#allocation13_spill] sm:$0xff] }
 0x232   : > { %3246 = vmatmul.bf16.gmra.mxu1 %v2786_v32 }
 0x233   : > { %v3282_v41 = vpop.f32.mrf.mxu3 }
 0x234   : > { %v3283_v25 = vadd.f32 %v3282_v41, %v3114_v61  ;;  %v3116_v61 = vadd.f32 %v6606_v63, %v6451_v28  ;;  %v3055_v41 = vpop.f32.mrf.mxu0 }
 0x235   : > { %v3451_v1 = vpop.f32.mrf.mxu2 }
 0x236   : > { %v2189_v4 = vpop.permute.xlu0 %2188  ;;  %v6858_v45 = vadd.f32 %v3451_v1, %v3283_v25 }
 0x237   : > { %v3222_v55 = vpop.f32.mrf.mxu1  ;;  %v2666_v25 = vsel %vm2347_vm3, %v6363_v10, %v2189_v4 }
 0x238   : > { %v3223_v5 = vadd.f32 %v3222_v55, %v3054_v8  ;;  %v2010_v48 = vpop.permute.xlu1 %2009  ;;  %v3539_v59 = vpack.c.bf16 %v6858_v45, %v6858_v45  ;;  %v1835_v55 = vpop.permute.xlu2 %1834  ;;  %v2731_v4 = vsel %vm2412_vm7, %v2666_v25, %v2254_v42 }
 0x239   : > { %v2450_v46 = vsel %vm2412_vm7, %v2385_v18, %v2010_v48 }
 0x23a   : > { %v3392_v32 = vadd.f32 %v7631_v0, %v3223_v5  ;;  %v2533_v60 = vsel %vm2477_vm8, %v2450_v46, %v2075_v52  ;;  %3604 = vst.msk [vmem:[%s6076_s26 + $0xc0] sm:$0xf] %vm3555_vm9, %v3539_v59  ;;  %v3056_v52 = vadd.f32 %v6606_v63, %v3055_v41  ;;  %v7632_v41 = vld [vmem:[#allocation38_spill] sm:$0xff] }
 0x23b   : > { %v3284_v35 = vpop.f32.mrf.mxu3  ;;  %3082 = vmatmul.bf16.gmra.mxu0 %v2533_v60 }
 0x23c   : > { %v3515_v34 = vpack.c.bf16 %v3392_v32, %v3392_v32  ;;  %v3667_v8 = vsel %vm2347_vm3, %v3392_v32, 0.0  ;;  %v3777_v1 = vmul.f32 %v3392_v32, %v3392_v32  ;;  %v3285_v5 = vadd.f32 %v3284_v35, %v3116_v61 }
 0x23d   : > { %v3668_v18 = vadd.f32 %v3667_v8, %v3666_v30  ;;  %v3453_v10 = vpop.f32.mrf.mxu2 }
 0x23e   : > { %3580 = vst.msk [vmem:[%s6076_s26 + $0x60] sm:$0xf] %vm3555_vm9, %v3515_v34  ;;  %v3864_v28 = vsel %vm2347_vm3, %v3777_v1, 0.0  ;;  %v2338_v48 = vpop.permute.xlu0 %2337  ;;  %v6880_v0 = vadd.f32 %v3453_v10, %v3285_v5 }
 0x23f   : > { %v3865_v59 = vadd.f32 %v3864_v28, %v3863_v29  ;;  %v3224_v46 = vpop.f32.mrf.mxu1  ;;  %v2825_v32 = vsel %vm2477_vm8, %v2731_v4, %v2338_v48 }
 0x240   : > { %v3225_v30 = vadd.f32 %v3224_v46, %v3056_v52  ;;  %3311 = vmatmul.bf16.gmra.mxu3 %v2825_v32  ;;  %v2230_v60 = vpop.permute.xlu1 %2229  ;;  %v3540_v61 = vpack.c.bf16 %v6880_v0, %v6880_v0  ;;  %v2077_v5 = vpop.permute.xlu2 %2076 }
 0x241   : > { %v3058_v48 = vpop.f32.mrf.mxu0 }
 0x242   : > { %v3394_v35 = vadd.f32 %v7632_v41, %v3225_v30  ;;  %3605 = vst.msk [vmem:[%s6076_s26 + $0xc4] sm:$0xf] %vm3555_vm9, %v3540_v61  ;;  %v3059_v41 = vadd.f32 %v6606_v63, %v3058_v48 }
 0x244   : > { %v3516_v34 = vpack.c.bf16 %v3394_v35, %v3394_v35  ;;  %v3669_v8 = vsel %vm2347_vm3, %v3394_v35, 0.0  ;;  %v3778_v42 = vmul.f32 %v3394_v35, %v3394_v35 }
 0x245   : > { %v3670_v29 = vadd.f32 %v3669_v8, %v3668_v18  ;;  %v3456_v32 = vpop.f32.mrf.mxu2  ;;  %v3119_v18 = vadd.f32 %v6606_v63, %v6479_v39 }
 0x246   : > { %3581 = vst.msk [vmem:[%s6076_s26 + $0x64] sm:$0xf] %vm3555_vm9, %v3516_v34  ;;  %v3866_v25 = vsel %vm2347_vm3, %v3778_v42, 0.0  ;;  %v2165_v1 = vpop.permute.xlu0 %2164 }
 0x247   : > { %v3867_v52 = vadd.f32 %v3866_v25, %v3865_v59  ;;  %v2630_v28 = vsel %vm2347_vm3, %v6386_v27, %v2165_v1  ;;  %v3121_v25 = vadd.f32 %v6606_v63, %v6521_v19 }
 0x248   : > { %v2707_v10 = vsel %vm2412_vm7, %v2630_v28, %v2230_v60  ;;  %v2256_v4 = vpop.permute.xlu1 %2255  ;;  %v2316_v27 = vpop.permute.xlu2 %2315  ;;  %v2387_v60 = vsel %vm2347_vm3, %v5797_v47, %v1835_v55  ;;  %v7633_v28 = vld [vmem:[#allocation37_spill] sm:$0xff] }
 0x249   : > { %v2789_v46 = vsel %vm2477_vm8, %v2707_v10, %v2314_v13  ;;  %v3060_v1 = vpop.f32.mrf.mxu0 }
 0x24a   : > { %3251 = vmatmul.bf16.gmra.mxu1 %v2789_v46 }
 0x24b   : > { %v3287_v30 = vpop.f32.mrf.mxu3 }
 0x24c   : > { %v3288_v61 = vadd.f32 %v3287_v30, %v3119_v18 }
 0x24d   : > { %v3458_v46 = vpop.f32.mrf.mxu2 }
 0x24e   : > { %v6899_v59 = vadd.f32 %v3456_v32, %v3288_v61  ;;  %v2191_v35 = vpop.permute.xlu0 %2190 }
 0x24f   : > { %v3227_v34 = vpop.f32.mrf.mxu1  ;;  %v2669_v47 = vsel %vm2347_vm3, %v6467_v2, %v2191_v35 }
 0x250   : > { %v3541_v13 = vpack.c.bf16 %v6899_v59, %v6899_v59  ;;  %v3228_v8 = vadd.f32 %v3227_v34, %v3059_v41  ;;  %v2012_v42 = vpop.permute.xlu1 %2011  ;;  %v3061_v41 = vadd.f32 %v6606_v63, %v3060_v1  ;;  %v2733_v2 = vsel %vm2412_vm7, %v2669_v47, %v2256_v4  ;;  %v7634_v1 = vld [vmem:[#allocation40_spill] sm:$0xff] }
 0x251   : > { %v2452_v39 = vsel %vm2412_vm7, %v2387_v60, %v2012_v42 }
 0x252   : > { %3606 = vst.msk [vmem:[%s6076_s26 + $0xc8] sm:$0xf] %vm3555_vm9, %v3541_v13  ;;  %v3397_v48 = vadd.f32 %v7633_v28, %v3228_v8  ;;  %v2536_v10 = vsel %vm2477_vm8, %v2452_v39, %v2077_v5 }
 0x253   : > { %v3289_v55 = vpop.f32.mrf.mxu3  ;;  %3087 = vmatmul.bf16.gmra.mxu0 %v2536_v10 }
 0x254   : > { %v3517_v32 = vpack.c.bf16 %v3397_v48, %v3397_v48  ;;  %v3671_v18 = vsel %vm2347_vm3, %v3397_v48, 0.0  ;;  %v3779_v30 = vmul.f32 %v3397_v48, %v3397_v48  ;;  %v3290_v61 = vadd.f32 %v3289_v55, %v3121_v25  ;;  %v2079_v25 = vpop.permute.xlu2 %2078 }
 0x255   : > { %v3672_v19 = vadd.f32 %v3671_v18, %v3670_v29 }
 0x256   : > { %3582 = vst.msk [vmem:[%s6076_s26 + $0x68] sm:$0xf] %vm3555_vm9, %v3517_v32  ;;  %v3868_v34 = vsel %vm2347_vm3, %v3779_v30, 0.0  ;;  %v6919_v5 = vadd.f32 %v3458_v46, %v3290_v61  ;;  %v2340_v60 = vpop.permute.xlu0 %2339 }
 0x257   : > { %v3869_v35 = vadd.f32 %v3868_v34, %v3867_v52  ;;  %v3229_v13 = vpop.f32.mrf.mxu1  ;;  %v2828_v8 = vsel %vm2477_vm8, %v2733_v2, %v2340_v60  ;;  %v3124_v34 = vadd.f32 %v6606_v63, %v6562_v62 }
 0x258   : > { %v3542_v42 = vpack.c.bf16 %v6919_v5, %v6919_v5  ;;  %v3230_v29 = vadd.f32 %v3229_v13, %v3061_v41  ;;  %3316 = vmatmul.bf16.gmra.mxu3 %v2828_v8  ;;  %v2232_v39 = vpop.permute.xlu1 %2231  ;;  %v3063_v61 = vpop.f32.mrf.mxu0 }
 0x259   : > { %v3064_v13 = vadd.f32 %v6606_v63, %v3063_v61 }
 0x25a   : > { %3607 = vst.msk [vmem:[%s6076_s26 + $0xcc] sm:$0xf] %vm3555_vm9, %v3542_v42  ;;  %v3399_v28 = vadd.f32 %v7634_v1, %v3230_v29  ;;  %v7636_v1 = vld [vmem:[#allocation43_spill] sm:$0xff] }
 0x25c   : > { %v3518_v48 = vpack.c.bf16 %v3399_v28, %v3399_v28  ;;  %v3673_v10 = vsel %vm2347_vm3, %v3399_v28, 0.0  ;;  %v3780_v55 = vmul.f32 %v3399_v28, %v3399_v28 }
 0x25d   : > { %v3674_v4 = vadd.f32 %v3673_v10, %v3672_v19  ;;  %v2318_v19 = vpop.permute.xlu2 %2317 }
 0x25e   : > { %3583 = vst.msk [vmem:[%s6076_s26 + $0x6c] sm:$0xf] %vm3555_vm9, %v3518_v48  ;;  %v3870_v52 = vsel %vm2347_vm3, %v3780_v55, 0.0  ;;  %v2167_v47 = vpop.permute.xlu0 %2166 }
 0x25f   : > { %v3871_v46 = vadd.f32 %v3870_v52, %v3869_v35  ;;  %v2633_v32 = vsel %vm2347_vm3, %v6489_v49, %v2167_v47 }
 0x260   : > { %v2709_v18 = vsel %vm2412_vm7, %v2633_v32, %v2232_v39  ;;  %v2014_v30 = vpop.permute.xlu1 %2013  ;;  %v3065_v48 = vpop.f32.mrf.mxu0 }
 0x261   : > { %v2792_v41 = vsel %vm2477_vm8, %v2709_v18, %v2316_v27  ;;  %v7635_v27 = vld [vmem:[#allocation3_spill] sm:$0xff]  ;;  %v3066_v32 = vadd.f32 %v6606_v63, %v3065_v48 }
 0x262   : > { %3256 = vmatmul.bf16.gmra.mxu1 %v2792_v41 }
 0x263   : > { %v3292_v60 = vpop.f32.mrf.mxu3 }
 0x264   : > { %v6938_v2 = vadd.f32 %v3292_v60, %v3124_v34 }
 0x266   : > { %v1837_v35 = vpop.permute.xlu0 %1836 }
 0x267   : > { %v2389_v49 = vsel %vm2347_vm3, %v5939_v12, %v1837_v35  ;;  %v3232_v8 = vpop.f32.mrf.mxu1  ;;  %v2081_v12 = vpop.permute.xlu2 %2080 }
 0x268   : > { %v2454_v42 = vsel %vm2412_vm7, %v2389_v49, %v2014_v30  ;;  %v3233_v29 = vadd.f32 %v3232_v8, %v3064_v13  ;;  %4199 = vmatmul.msk.bf16.vlgmr.msra.gmra.mxu3 %vm2347_vm3, %v7635_v27  ;;  %v2234_v62 = vpop.permute.xlu1 %2233 }
 0x269   : > { %v2539_v39 = vsel %vm2477_vm8, %v2454_v42, %v2079_v25 }
 0x26a   : > { %v3402_v28 = vadd.f32 %v7636_v1, %v3233_v29  ;;  %3092 = vmatmul.bf16.gmra.mxu0 %v2539_v39 }
 0x26b   : > { %v6958_v49 = vpop.f32.mrf.mxu3 }
 0x26c   : > { %v3519_v10 = vpack.c.bf16 %v3402_v28, %v3402_v28  ;;  %v3675_v55 = vsel %vm2347_vm3, %v3402_v28, 0.0  ;;  %v3781_v52 = vmul.f32 %v3402_v28, %v3402_v28 }
 0x26d   : > { %v3676_v47 = vadd.f32 %v3675_v55, %v3674_v4 }
 0x26e   : > { %3584 = vst.msk [vmem:[%s6076_s26 + $0x70] sm:$0xf] %vm3555_vm9, %v3519_v10  ;;  %v3872_v18 = vsel %vm2347_vm3, %v3781_v52, 0.0  ;;  %v2169_v30 = vpop.permute.xlu0 %2168  ;;  %v3129_v10 = vadd.f32 %v6606_v63, %v6619_v20  ;;  %v7637_v20 = vld [vmem:[#allocation6_spill] sm:$0xff] }
 0x26f   : > { %v3873_v61 = vadd.f32 %v3872_v18, %v3871_v46  ;;  %v2636_v25 = vsel %vm2347_vm3, %v6585_v56, %v2169_v30  ;;  %v3234_v41 = vpop.f32.mrf.mxu1 }
 0x270   : > { %v2711_v34 = vsel %vm2412_vm7, %v2636_v25, %v2234_v62  ;;  %v3235_v60 = vadd.f32 %v3234_v41, %v3066_v32  ;;  %v2016_v13 = vpop.permute.xlu1 %2015  ;;  %v2320_v62 = vpop.permute.xlu2 %2319 }
 0x271   : > { %v2795_v35 = vsel %vm2477_vm8, %v2711_v34, %v2318_v19  ;;  %v3068_v28 = vpop.f32.mrf.mxu0 }
 0x272   : > { %v3404_v4 = vadd.f32 %v6391_v58, %v3235_v60  ;;  %3261 = vmatmul.bf16.gmra.mxu1 %v2795_v35 }
 0x274   : > { %v3520_v8 = vpack.c.bf16 %v3404_v4, %v3404_v4  ;;  %v3677_v42 = vsel %vm2347_vm3, %v3404_v4, 0.0  ;;  %v3782_v29 = vmul.f32 %v3404_v4, %v3404_v4 }
 0x275   : > { %v3678_v46 = vadd.f32 %v3677_v42, %v3676_v47  ;;  %v3069_v47 = vadd.f32 %v6606_v63, %v3068_v28 }
 0x276   : > { %3585 = vst.msk [vmem:[%s6076_s26 + $0x74] sm:$0xf] %vm3555_vm9, %v3520_v8  ;;  %v3874_v56 = vsel %vm2347_vm3, %v3782_v29, 0.0  ;;  %v1839_v27 = vpop.permute.xlu0 %1838 }
 0x277   : > { %v3875_v39 = vadd.f32 %v3874_v56, %v3873_v61  ;;  %v2391_v19 = vsel %vm2347_vm3, %v5934_v57, %v1839_v27 }
 0x278   : > { %v2456_v58 = vsel %vm2412_vm7, %v2391_v19, %v2016_v13  ;;  %4200 = vmatmul.msk.bf16.gmra.mxu3 %vm2347_vm3, %v5840_v23  ;;  %v2236_v1 = vpop.permute.xlu1 %2235 }
 0x279   : > { %v2542_v48 = vsel %vm2477_vm8, %v2456_v58, %v2081_v12  ;;  %v2083_v12 = vpop.permute.xlu2 %2082  ;;  %v3070_v34 = vpop.f32.mrf.mxu0 }
 0x27a   : > { %3097 = vmatmul.bf16.gmra.mxu0 %v2542_v48  ;;  %v3071_v8 = vadd.f32 %v6606_v63, %v3070_v34 }
 0x27b   : > { %v3297_v55 = vpop.f32.mrf.mxu3 }
 0x27c   : > { %v6972_v52 = vadd.f32 %v3297_v55, %v3129_v10 }
 0x27e   : > { %v2171_v32 = vpop.permute.xlu0 %2170 }
 0x27f   : > { %v2639_v57 = vsel %vm2347_vm3, %v6673_v22, %v2171_v32  ;;  %v3237_v18 = vpop.f32.mrf.mxu1 }
 0x280   : > { %v2713_v23 = vsel %vm2412_vm7, %v2639_v57, %v2236_v1  ;;  %v3238_v30 = vadd.f32 %v3237_v18, %v3069_v47  ;;  %v2018_v61 = vpop.permute.xlu1 %2017 }
 0x281   : > { %v2798_v25 = vsel %vm2477_vm8, %v2713_v23, %v2320_v62  ;;  %v2322_v28 = vpop.permute.xlu2 %2321 }
 0x282   : > { %v3407_v41 = vadd.f32 %v7637_v20, %v3238_v30  ;;  %3266 = vmatmul.bf16.gmra.mxu1 %v2798_v25  ;;  %v3134_v30 = vadd.f32 %v6606_v63, %v6682_v37 }
 0x283   : > { %v6992_v48 = vpop.f32.mrf.mxu3 }
 0x284   : > { %v3521_v60 = vpack.c.bf16 %v3407_v41, %v3407_v41  ;;  %v3679_v13 = vsel %vm2347_vm3, %v3407_v41, 0.0  ;;  %v3783_v35 = vmul.f32 %v3407_v41, %v3407_v41 }
 0x285   : > { %v3680_v4 = vadd.f32 %v3679_v13, %v3678_v46 }
 0x286   : > { %3586 = vst.msk [vmem:[%s6076_s26 + $0x78] sm:$0xf] %vm3555_vm9, %v3521_v60  ;;  %v3876_v22 = vsel %vm2347_vm3, %v3783_v35, 0.0  ;;  %v1841_v42 = vpop.permute.xlu0 %1840 }
 0x287   : > { %v3877_v29 = vadd.f32 %v3876_v22, %v3875_v39  ;;  %v2393_v56 = vsel %vm2347_vm3, %v6059_v26, %v1841_v42  ;;  %v3239_v27 = vpop.f32.mrf.mxu1 }
 0x288   : > { %v2458_v62 = vsel %vm2412_vm7, %v2393_v56, %v2018_v61  ;;  %v3240_v19 = vadd.f32 %v3239_v27, %v3071_v8  ;;  %4201 = vmatmul.msk.bf16.gmra.mxu3 %vm2347_vm3, %v6532_v53  ;;  %v2238_v58 = vpop.permute.xlu1 %2237  ;;  %v3073_v18 = vpop.f32.mrf.mxu0 }
 0x289   : > { %v2545_v46 = vsel %vm2477_vm8, %v2458_v62, %v2083_v12  ;;  %v2085_v20 = vpop.permute.xlu2 %2084  ;;  %v3074_v41 = vadd.f32 %v6606_v63, %v3073_v18 }
 0x28a   : > { %v3409_v1 = vadd.f32 %v6458_v43, %v3240_v19  ;;  %3102 = vmatmul.bf16.gmra.mxu0 %v2545_v46 }
 0x28c   : > { %v3522_v39 = vpack.c.bf16 %v3409_v1, %v3409_v1  ;;  %v3681_v10 = vsel %vm2347_vm3, %v3409_v1, 0.0  ;;  %v3784_v26 = vmul.f32 %v3409_v1, %v3409_v1 }
 0x28d   : > { %v3682_v55 = vadd.f32 %v3681_v10, %v3680_v4 }
 0x28e   : > { %3587 = vst.msk [vmem:[%s6076_s26 + $0x7c] sm:$0xf] %vm3555_vm9, %v3522_v39  ;;  %v3878_v47 = vsel %vm2347_vm3, %v3784_v26, 0.0  ;;  %v2173_v32 = vpop.permute.xlu0 %2172  ;;  %v2342_v39 = vrot.slane %v6504_v51, 1  ;;  %v2343_v26 = vrot.slane %v6511_v36, 1 }
 0x28f   : > { %v3879_v53 = vadd.f32 %v3878_v47, %v3877_v29  ;;  %v2642_v57 = vsel %vm2347_vm3, %v7612_v24, %v2173_v32 }
 0x290   : > { %v2715_v43 = vsel %vm2412_vm7, %v2642_v57, %v2238_v58  ;;  %v2020_v12 = vpop.permute.xlu1 %2019  ;;  %v3075_v8 = vpop.f32.mrf.mxu0 }
 0x291   : > { %v2801_v23 = vsel %vm2477_vm8, %v2715_v43, %v2322_v28  ;;  %v2344_v43 = vsel %vm1892_vm2, %v2342_v39, %v2343_v26 }
 0x292   : > { %3271 = vmatmul.bf16.gmra.mxu1 %v2801_v23 }
 0x293   : > { %v3302_v61 = vpop.f32.mrf.mxu3 }
 0x294   : > { %v7004_v25 = vadd.f32 %v3302_v61, %v3134_v30 }
 0x296   : > { %v1843_v34 = vpop.permute.xlu0 %1842 }
 0x297   : > { %v2395_v24 = vsel %vm2347_vm3, %v6055_v40, %v1843_v34  ;;  %v3242_v60 = vpop.f32.mrf.mxu1  ;;  %v3076_v40 = vadd.f32 %v6606_v63, %v3075_v8 }
 0x298   : > { %v2460_v13 = vsel %vm2412_vm7, %v2395_v24, %v2020_v12  ;;  %v3243_v35 = vadd.f32 %v3242_v60, %v3074_v41  ;;  %4202 = vmatmul.msk.bf16.gmra.mxu3 %vm2347_vm3, %v6625_v38  ;;  %v2240_v27 = vpop.permute.xlu1 %2239  ;;  %v2324_v38 = vpop.permute.xlu2 %2323  ;;  %v2345_v41 = vrot.slane %v6614_v50, 1 }
 0x299   : > { %v2548_v37 = vsel %vm2477_vm8, %v2460_v13, %v2085_v20 }
 0x29a   : > { %v3412_v4 = vadd.f32 %v6486_v14, %v3243_v35  ;;  %3107 = vmatmul.bf16.gmra.mxu0 %v2548_v37 }
 0x29b   : > { %v7026_v47 = vpop.f32.mrf.mxu3 }
 0x29c   : > { %v3523_v22 = vpack.c.bf16 %v3412_v4, %v3412_v4  ;;  %v3683_v42 = vsel %vm2347_vm3, %v3412_v4, 0.0  ;;  %v3785_v29 = vmul.f32 %v3412_v4, %v3412_v4  ;;  %v7046_v4 = vld [vmem:[%s7368_s6] ss:$0 sm:$0xff] }
 0x29d   : > { %v3684_v56 = vadd.f32 %v3683_v42, %v3682_v55  ;;  %v7638_v42 = vld [vmem:[#allocation21_spill] sm:$0xff] }
 0x29e   : > { %3588 = vst.msk [vmem:[%s6076_s26 + $0x80] sm:$0xf] %vm3555_vm9, %v3523_v22  ;;  %v3880_v62 = vsel %vm2347_vm3, %v3785_v29, 0.0  ;;  %v2175_v19 = vpop.permute.xlu0 %2174 }
 0x29f   : > { %v3881_v46 = vadd.f32 %v3880_v62, %v3879_v53  ;;  %v2645_v14 = vsel %vm2347_vm3, %v7619_v17, %v2175_v19  ;;  %v3244_v58 = vpop.f32.mrf.mxu1 }
 0x2a0   : > { %v2717_v1 = vsel %vm2412_vm7, %v2645_v14, %v2240_v27  ;;  %v3245_v28 = vadd.f32 %v3244_v58, %v3076_v40  ;;  %v3078_v36 = vpop.f32.mrf.mxu0  ;;  %v3144_v58 = vadd.f32 %v7046_v4, %v6776_v9 }
 0x2a1   : > { %v2804_v10 = vsel %vm2477_vm8, %v2717_v1, %v2324_v38  ;;  %v3079_v61 = vadd.f32 %v6606_v63, %v3078_v36 }
 0x2a2   : > { %v3414_v55 = vadd.f32 %v6519_v3, %v3245_v28  ;;  %3276 = vmatmul.bf16.gmra.mxu1 %v2804_v10  ;;  %v3139_v3 = vadd.f32 %v6606_v63, %v6727_v44  ;;  %v2346_v44 = vsel %vm1892_vm2, %v2343_v26, %v2345_v41 }
 0x2a4   : > { %v3524_v32 = vpack.c.bf16 %v3414_v55, %v3414_v55  ;;  %v3685_v53 = vsel %vm2347_vm3, %v3414_v55, 0.0  ;;  %v3786_v57 = vmul.f32 %v3414_v55, %v3414_v55  ;;  %v7639_v55 = vld [vmem:[#allocation7_spill] sm:$0xff] }
 0x2a5   : > { %v3686_v17 = vadd.f32 %v3685_v53, %v3684_v56 }
 0x2a6   : > { %3589 = vst.msk [vmem:[%s6076_s26 + $0x84] sm:$0xf] %vm3555_vm9, %v3524_v32  ;;  %v3882_v51 = vsel %vm2347_vm3, %v3786_v57, 0.0 }
 0x2a7   : > { %v3883_v18 = vadd.f32 %v3882_v51, %v3881_v46 }
 0x2a8   : > { %4203 = vmatmul.msk.bf16.gmra.mxu3 %vm2347_vm3, %v2344_v43  ;;  %v3080_v24 = vpop.f32.mrf.mxu0 }
 0x2a9   : > { %v3081_v63 = vadd.f32 %v7046_v4, %v3080_v24 }
 0x2ab   : > { %v3307_v23 = vpop.f32.mrf.mxu3 }
 0x2ac   : > { %v7036_v30 = vadd.f32 %v3307_v23, %v3139_v3 }
 0x2af   : > { %v3247_v12 = vpop.f32.mrf.mxu1 }
 0x2b0   : > { %v3248_v20 = vadd.f32 %v3247_v12, %v3079_v61  ;;  %v7640_v61 = vld [vmem:[#allocation24_spill] sm:$0xff] }
 0x2b2   : > { %v3417_v34 = vadd.f32 %v6558_v11, %v3248_v20 }
 0x2b3   : > { %v7054_v56 = vpop.f32.mrf.mxu3 }
 0x2b4   : > { %v3525_v60 = vpack.c.bf16 %v3417_v34, %v3417_v34  ;;  %v3687_v13 = vsel %vm2347_vm3, %v3417_v34, 0.0  ;;  %v3787_v35 = vmul.f32 %v3417_v34, %v3417_v34 }
 0x2b5   : > { %v3688_v37 = vadd.f32 %v3687_v13, %v3686_v17 }
 0x2b6   : > { %3590 = vst.msk [vmem:[%s6076_s26 + $0x88] sm:$0xf] %vm3555_vm9, %v3525_v60  ;;  %v3884_v11 = vsel %vm2347_vm3, %v3787_v35, 0.0 }
 0x2b7   : > { %v3885_v50 = vadd.f32 %v3884_v11, %v3883_v18  ;;  %v3249_v8 = vpop.f32.mrf.mxu1 }
 0x2b8   : > { %v3250_v22 = vadd.f32 %v3249_v8, %v3081_v63  ;;  %4204 = vmatmul.msk.bf16.gmra.mxu3 %vm2347_vm3, %v2346_v44  ;;  %v3083_v14 = vpop.f32.mrf.mxu0  ;;  %v3149_v44 = vadd.f32 %v7046_v4, %v6815_v31 }
 0x2b9   : > { %v3084_v39 = vadd.f32 %v7046_v4, %v3083_v14  ;;  %v7642_v14 = vld [vmem:[#allocation20_spill] sm:$0xff] }
 0x2ba   : > { %v3419_v29 = vadd.f32 %v7638_v42, %v3250_v22 }
 0x2bc   : > { %v3526_v27 = vpack.c.bf16 %v3419_v29, %v3419_v29  ;;  %v3689_v40 = vsel %vm2347_vm3, %v3419_v29, 0.0  ;;  %v3788_v62 = vmul.f32 %v3419_v29, %v3419_v29  ;;  %v7641_v29 = vld [vmem:[#allocation27_spill] sm:$0xff] }
 0x2bd   : > { %v3690_v19 = vadd.f32 %v3689_v40, %v3688_v37 }
 0x2be   : > { %3591 = vst.msk [vmem:[%s6076_s26 + $0x8c] sm:$0xf] %vm3555_vm9, %v3526_v27  ;;  %v3886_v38 = vsel %vm2347_vm3, %v3788_v62, 0.0 }
 0x2bf   : > { %v3887_v46 = vadd.f32 %v3886_v38, %v3885_v50 }
 0x2c0   : > { %v3085_v53 = vpop.f32.mrf.mxu0 }
 0x2c1   : > { %v3086_v18 = vadd.f32 %v7046_v4, %v3085_v53 }
 0x2c3   : > { %v3312_v1 = vpop.f32.mrf.mxu3 }
 0x2c4   : > { %v7062_v28 = vadd.f32 %v3312_v1, %v3144_v58 }
 0x2c7   : > { %v3252_v10 = vpop.f32.mrf.mxu1 }
 0x2c8   : > { %v3253_v26 = vadd.f32 %v3252_v10, %v3084_v39 }
 0x2ca   : > { %v3422_v32 = vadd.f32 %v7639_v55, %v3253_v26 }
 0x2cb   : > { %v7072_v20 = vpop.f32.mrf.mxu3 }
 0x2cc   : > { %v3527_v57 = vpack.c.bf16 %v3422_v32, %v3422_v32  ;;  %v3691_v17 = vsel %vm2347_vm3, %v3422_v32, 0.0  ;;  %v3789_v43 = vmul.f32 %v3422_v32, %v3422_v32 }
 0x2cd   : > { %v3692_v51 = vadd.f32 %v3691_v17, %v3690_v19 }
 0x2ce   : > { %3592 = vst.msk [vmem:[%s6076_s26 + $0x90] sm:$0xf] %vm3555_vm9, %v3527_v57  ;;  %v3888_v9 = vsel %vm2347_vm3, %v3789_v43, 0.0  ;;  %v7643_v57 = vld [vmem:[#allocation22_spill] sm:$0xff] }
 0x2cf   : > { %v3889_v36 = vadd.f32 %v3888_v9, %v3887_v46  ;;  %v3254_v3 = vpop.f32.mrf.mxu1  ;;  %v3126_v17 = vadd.f32 %v7046_v4, %v7643_v57 }
 0x2d0   : > { %v3255_v23 = vadd.f32 %v3254_v3, %v3086_v18  ;;  %v3088_v13 = vpop.f32.mrf.mxu0 }
 0x2d1   : > { %v3089_v50 = vadd.f32 %v7046_v4, %v3088_v13 }
 0x2d2   : > { %v3424_v12 = vadd.f32 %v7640_v61, %v3255_v23 }
 0x2d4   : > { %v3528_v41 = vpack.c.bf16 %v3424_v12, %v3424_v12  ;;  %v3693_v34 = vsel %vm2347_vm3, %v3424_v12, 0.0  ;;  %v3790_v24 = vmul.f32 %v3424_v12, %v3424_v12 }
 0x2d5   : > { %v7075_v60 = vadd.f32 %v3693_v34, %v3692_v51  ;;  %v3295_v51 = vadd.f32 %v6958_v49, %v3126_v17  ;;  %v7645_v34 = vld [vmem:[#allocation45_spill] sm:$0xff] }
 0x2d6   : > { %3593 = vst.msk [vmem:[%s6076_s26 + $0x94] sm:$0xf] %vm3555_vm9, %v3528_v41  ;;  %v3890_v35 = vsel %vm2347_vm3, %v3790_v24, 0.0 }
 0x2d7   : > { %v7080_v37 = vadd.f32 %v3890_v35, %v3889_v36 }
 0x2d8   : > { %v3090_v8 = vpop.f32.mrf.mxu0 }
 0x2d9   : > { %v3091_v31 = vadd.f32 %v7046_v4, %v3090_v8 }
 0x2db   : > { %v3317_v63 = vpop.f32.mrf.mxu3 }
 0x2dc   : > { %v7084_v11 = vadd.f32 %v3317_v63, %v3149_v44 }
 0x2df   : > { %v3257_v22 = vpop.f32.mrf.mxu1 }
 0x2e0   : > { %v3258_v42 = vadd.f32 %v3257_v22, %v3089_v50 }
 0x2e2   : > { %v7088_v27 = vadd.f32 %v7641_v29, %v3258_v42  ;;  %v7646_v42 = vld [vmem:[#allocation2_spill] sm:$0xff] }
 0x2e3   : > { %v7090_v40 = vpop.f32.mrf.mxu3  ;;  %v3131_v29 = vadd.f32 %v7046_v4, %v7646_v42 }
 0x2e4   : > { %v3529_v62 = vpack.c.bf16 %v7088_v27, %v7088_v27 }
 0x2e6   : > { %3594 = vst.msk [vmem:[%s6076_s26 + $0x98] sm:$0xf] %vm3555_vm9, %v3529_v62 }
 0x2e7   : > { %v3093_v19 = vpop.f32.mrf.mxu0  ;;  %v3259_v38 = vpop.f32.mrf.mxu1 }
 0x2e8   : > { %v3260_v46 = vadd.f32 %v3259_v38, %v3091_v31  ;;  %v3094_v26 = vadd.f32 %v7046_v4, %v3093_v19  ;;  %v3300_v31 = vadd.f32 %v6992_v48, %v3131_v29 }
 0x2ea   : > { %v7098_v58 = vadd.f32 %v7642_v14, %v3260_v46 }
 0x2eb   : > { %v3461_v1 = vpop.f32.mrf.mxu3 }
 0x2ec   : > { %v3530_v39 = vpack.c.bf16 %v7098_v58, %v7098_v58  ;;  %v7103_v10 = vadd.f32 %v3461_v1, %v6938_v2  ;;  %v7644_v2 = vld [vmem:[#allocation4_spill] sm:$0xff]  ;;  %v3697_v29 = vsel %vm2347_vm3, %v7098_v58, 0.0 }
 0x2ee   : > { %3595 = vst.msk [vmem:[%s6076_s26 + $0x9c] sm:$0xf] %vm3555_vm9, %v3530_v39  ;;  %v3543_v55 = vpack.c.bf16 %v7103_v10, %v7103_v10 }
 0x2ef   : > { %v3095_v32 = vpop.f32.mrf.mxu0  ;;  %v3262_v53 = vpop.f32.mrf.mxu1 }
 0x2f0   : > { %3608 = vst.msk [vmem:[%s6076_s26 + $0xd0] sm:$0xf] %vm3555_vm9, %v3543_v55  ;;  %v3263_v43 = vadd.f32 %v3262_v53, %v3094_v26  ;;  %v3096_v23 = vadd.f32 %v7046_v4, %v3095_v32 }
 0x2f2   : > { %v7116_v18 = vadd.f32 %v7644_v2, %v3263_v43 }
 0x2f3   : > { %v3463_v9 = vpop.f32.mrf.mxu3 }
 0x2f4   : > { %v3531_v36 = vpack.c.bf16 %v7116_v18, %v7116_v18  ;;  %v7120_v3 = vadd.f32 %v3463_v9, %v3295_v51 }
 0x2f6   : > { %3596 = vst.msk [vmem:[%s6076_s26 + $0xa0] sm:$0xf] %vm3555_vm9, %v3531_v36  ;;  %v3544_v61 = vpack.c.bf16 %v7120_v3, %v7120_v3  ;;  %v7648_v36 = vld [vmem:[#allocation10_spill] sm:$0xff] }
 0x2f7   : > { %v3098_v12 = vpop.f32.mrf.mxu0  ;;  %v3264_v49 = vpop.f32.mrf.mxu1 }
 0x2f8   : > { %3609 = vst.msk [vmem:[%s6076_s26 + $0xd4] sm:$0xf] %vm3555_vm9, %v3544_v61  ;;  %v3265_v41 = vadd.f32 %v3264_v49, %v3096_v23  ;;  %v3099_v63 = vadd.f32 %v7046_v4, %v3098_v12  ;;  %v3136_v23 = vadd.f32 %v7046_v4, %v7648_v36 }
 0x2fa   : > { %v7130_v24 = vadd.f32 %v7645_v34, %v3265_v41  ;;  %v3791_v34 = vmul.f32 %v7088_v27, %v7088_v27 }
 0x2fb   : > { %v3466_v13 = vpop.f32.mrf.mxu3 }
 0x2fc   : > { %v3532_v35 = vpack.c.bf16 %v7130_v24, %v7130_v24  ;;  %v7135_v44 = vadd.f32 %v3466_v13, %v6972_v52  ;;  %v7647_v52 = vld [vmem:[#allocation29_spill] sm:$0xff]  ;;  %v3892_v42 = vsel %vm2347_vm3, %v3791_v34, 0.0 }
 0x2fe   : > { %3597 = vst.msk [vmem:[%s6076_s26 + $0xa4] sm:$0xf] %vm3555_vm9, %v3532_v35  ;;  %v3545_v50 = vpack.c.bf16 %v7135_v44, %v7135_v44 }
 0x2ff   : > { %v3100_v8 = vpop.f32.mrf.mxu0  ;;  %v3267_v22 = vpop.f32.mrf.mxu1 }
 0x300   : > { %3610 = vst.msk [vmem:[%s6076_s26 + $0xd8] sm:$0xf] %vm3555_vm9, %v3545_v50  ;;  %v3268_v62 = vadd.f32 %v3267_v22, %v3099_v63  ;;  %v3101_v1 = vadd.f32 %v7046_v4, %v3100_v8  ;;  %v3792_v63 = vmul.f32 %v7098_v58, %v7098_v58  ;;  %v3793_v8 = vmul.f32 %v7116_v18, %v7116_v18 }
 0x301   : > { %v3893_v58 = vadd.f32 %v3892_v42, %v7080_v37 }
 0x302   : > { %v7148_v19 = vadd.f32 %v7647_v52, %v3268_v62  ;;  %v3894_v52 = vsel %vm2347_vm3, %v3792_v63, 0.0 }
 0x303   : > { %v3468_v38 = vpop.f32.mrf.mxu3 }
 0x304   : > { %v3533_v46 = vpack.c.bf16 %v7148_v19, %v7148_v19  ;;  %v7152_v14 = vadd.f32 %v3468_v38, %v3300_v31  ;;  %v3699_v38 = vsel %vm2347_vm3, %v7116_v18, 0.0 }
 0x306   : > { %3598 = vst.msk [vmem:[%s6076_s26 + $0xa8] sm:$0xf] %vm3555_vm9, %v3533_v46  ;;  %v3546_v39 = vpack.c.bf16 %v7152_v14, %v7152_v14  ;;  %v3794_v46 = vmul.f32 %v7130_v24, %v7130_v24 }
 0x307   : > { %v3103_v26 = vpop.f32.mrf.mxu0  ;;  %v3269_v48 = vpop.f32.mrf.mxu1 }
 0x308   : > { %3611 = vst.msk [vmem:[%s6076_s26 + $0xdc] sm:$0xf] %vm3555_vm9, %v3546_v39  ;;  %v3270_v55 = vadd.f32 %v3269_v48, %v3101_v1  ;;  %v3104_v43 = vadd.f32 %v7046_v4, %v3103_v26  ;;  %v3795_v48 = vmul.f32 %v7148_v19, %v7148_v19 }
 0x30a   : > { %v3439_v32 = vadd.f32 %v6773_v21, %v3270_v55  ;;  %v3895_v55 = vadd.f32 %v3894_v52, %v3893_v58 }
 0x30b   : > { %v3471_v53 = vpop.f32.mrf.mxu3 }
 0x30c   : > { %v3534_v57 = vpack.c.bf16 %v3439_v32, %v3439_v32  ;;  %v7163_v17 = vadd.f32 %v3471_v53, %v7004_v25  ;;  %v3305_v25 = vadd.f32 %v7026_v47, %v3136_v23 }
 0x30e   : > { %3599 = vst.msk [vmem:[%s6076_s26 + $0xac] sm:$0xf] %vm3555_vm9, %v3534_v57  ;;  %v3547_v51 = vpack.c.bf16 %v7163_v17, %v7163_v17  ;;  %v3796_v57 = vmul.f32 %v3439_v32, %v3439_v32 }
 0x30f   : > { %v3105_v2 = vpop.f32.mrf.mxu0  ;;  %v3272_v9 = vpop.f32.mrf.mxu1 }
 0x310   : > { %3612 = vst.msk [vmem:[%s6076_s26 + $0xe0] sm:$0xf] %vm3555_vm9, %v3547_v51  ;;  %v3273_v21 = vadd.f32 %v3272_v9, %v3104_v43  ;;  %v3106_v13 = vadd.f32 %v7046_v4, %v3105_v2  ;;  %v7649_v43 = vld [vmem:[#allocation28_spill] sm:$0xff]  ;;  %v3898_v2 = vsel %vm2347_vm3, %v3794_v46, 0.0  ;;  %v3902_v63 = vsel %vm2347_vm3, %v3796_v57, 0.0 }
 0x311   : > { %v3141_v51 = vadd.f32 %v7046_v4, %v7649_v43 }
 0x312   : > { %v3442_v61 = vadd.f32 %v6792_v54, %v3273_v21  ;;  %v3695_v54 = vsel %vm2347_vm3, %v7088_v27, 0.0 }
 0x313   : > { %v3473_v12 = vpop.f32.mrf.mxu3  ;;  %v3696_v31 = vadd.f32 %v3695_v54, %v7075_v60  ;;  %v3701_v60 = vsel %vm2347_vm3, %v7130_v24, 0.0  ;;  %v3703_v24 = vsel %vm2347_vm3, %v7148_v19, 0.0 }
 0x314   : > { %v3535_v49 = vpack.c.bf16 %v3442_v61, %v3442_v61  ;;  %v7176_v41 = vadd.f32 %v3473_v12, %v3305_v25  ;;  %v3797_v21 = vmul.f32 %v3442_v61, %v3442_v61  ;;  %v3310_v25 = vadd.f32 %v7054_v56, %v3141_v51 }
 0x315   : > { %v3698_v26 = vadd.f32 %v3697_v29, %v3696_v31  ;;  %v3900_v12 = vsel %vm2347_vm3, %v3795_v48, 0.0  ;;  %v3707_v54 = vsel %vm2347_vm3, %v3442_v61, 0.0  ;;  %v3801_v48 = vmul.f32 %v6858_v45, %v6858_v45 }
 0x316   : > { %3600 = vst.msk [vmem:[%s6076_s26 + $0xb0] sm:$0xf] %vm3555_vm9, %v3535_v49  ;;  %v3548_v35 = vpack.c.bf16 %v7176_v41, %v7176_v41  ;;  %v3705_v49 = vsel %vm2347_vm3, %v3439_v32, 0.0  ;;  %v3904_v32 = vsel %vm2347_vm3, %v3797_v21, 0.0 }
 0x317   : > { %v3274_v47 = vpop.f32.mrf.mxu1  ;;  %v3108_v22 = vpop.f32.mrf.mxu0  ;;  %v3700_v53 = vadd.f32 %v3699_v38, %v3698_v26 }
 0x318   : > { %3613 = vst.msk [vmem:[%s6076_s26 + $0xe4] sm:$0xf] %vm3555_vm9, %v3548_v35  ;;  %v3275_v50 = vadd.f32 %v3274_v47, %v3106_v13  ;;  %v3109_v18 = vadd.f32 %v7046_v4, %v3108_v22 }
 0x319   : > { %v3702_v23 = vadd.f32 %v3701_v60, %v3700_v53 }
 0x31a   : > { %v3444_v62 = vadd.f32 %v6810_v33, %v3275_v50  ;;  %v3896_v33 = vsel %vm2347_vm3, %v3793_v8, 0.0 }
 0x31b   : > { %v3476_v27 = vpop.f32.mrf.mxu3  ;;  %v3897_v36 = vadd.f32 %v3896_v33, %v3895_v55  ;;  %v3704_v35 = vadd.f32 %v3703_v24, %v3702_v23  ;;  %v3715_v24 = vsel %vm2347_vm3, %v6858_v45, 0.0  ;;  %v3717_v45 = vsel %vm2347_vm3, %v6880_v0, 0.0 }
 0x31c   : > { %v3536_v1 = vpack.c.bf16 %v3444_v62, %v3444_v62  ;;  %v7204_v39 = vadd.f32 %v3476_v27, %v7036_v30  ;;  %v3798_v50 = vmul.f32 %v3444_v62, %v3444_v62  ;;  %v3709_v29 = vsel %vm2347_vm3, %v3444_v62, 0.0 }
 0x31d   : > { %v3899_v13 = vadd.f32 %v3898_v2, %v3897_v36  ;;  %v3706_v42 = vadd.f32 %v3705_v49, %v3704_v35  ;;  %v3719_v35 = vsel %vm2347_vm3, %v6899_v59, 0.0 }
 0x31e   : > { %3601 = vst.msk [vmem:[%s6076_s26 + $0xb4] sm:$0xf] %vm3555_vm9, %v3536_v1  ;;  %v3549_v30 = vpack.c.bf16 %v7204_v39, %v7204_v39  ;;  %v3906_v46 = vsel %vm2347_vm3, %v3798_v50, 0.0  ;;  %v3721_v50 = vsel %vm2347_vm3, %v6919_v5, 0.0 }
 0x31f   : > { %v3277_v37 = vpop.f32.mrf.mxu1  ;;  %v3110_v19 = vpop.f32.mrf.mxu0  ;;  %v3901_v56 = vadd.f32 %v3900_v12, %v3899_v13  ;;  %v3708_v27 = vadd.f32 %v3707_v54, %v3706_v42  ;;  %v3803_v12 = vmul.f32 %v6899_v59, %v6899_v59 }
 0x320   : > { %3614 = vst.msk [vmem:[%s6076_s26 + $0xe8] sm:$0xf] %vm3555_vm9, %v3549_v30  ;;  %v3278_v9 = vadd.f32 %v3277_v37, %v3109_v18 }
 0x321   : > { %v3903_v61 = vadd.f32 %v3902_v63, %v3901_v56  ;;  %v3710_v62 = vadd.f32 %v3709_v29, %v3708_v27  ;;  %v3916_v54 = vsel %vm2347_vm3, %v3803_v12, 0.0  ;;  %v3806_v29 = vmul.f32 %v7120_v3, %v7120_v3 }
 0x322   : > { %v3447_v34 = vadd.f32 %v6833_v16, %v3278_v9  ;;  %v3111_v16 = vadd.f32 %v7046_v4, %v3110_v19  ;;  %v3807_v27 = vmul.f32 %v7135_v44, %v7135_v44 }
 0x323   : > { %v3478_v47 = vpop.f32.mrf.mxu3  ;;  %v3905_v26 = vadd.f32 %v3904_v32, %v3903_v61 }
 0x324   : > { %v3537_v8 = vpack.c.bf16 %v3447_v34, %v3447_v34  ;;  %v7230_v22 = vadd.f32 %v3478_v47, %v3310_v25  ;;  %v3799_v31 = vmul.f32 %v3447_v34, %v3447_v34  ;;  %v3711_v1 = vsel %vm2347_vm3, %v3447_v34, 0.0 }
 0x325   : > { %v3907_v18 = vadd.f32 %v3906_v46, %v3905_v26  ;;  %v3712_v30 = vadd.f32 %v3711_v1, %v3710_v62  ;;  %v3912_v25 = vsel %vm2347_vm3, %v3801_v48, 0.0  ;;  %v3727_v1 = vsel %vm2347_vm3, %v7135_v44, 0.0 }
 0x326   : > { %3602 = vst.msk [vmem:[%s6076_s26 + $0xb8] sm:$0xf] %vm3555_vm9, %v3537_v8  ;;  %v3550_v52 = vpack.c.bf16 %v7230_v22, %v7230_v22  ;;  %v3908_v33 = vsel %vm2347_vm3, %v3799_v31, 0.0  ;;  %v3805_v8 = vmul.f32 %v7103_v10, %v7103_v10  ;;  %v3809_v48 = vmul.f32 %v7163_v17, %v7163_v17 }
 0x327   : > { %v3279_v38 = vpop.f32.mrf.mxu1  ;;  %v3909_v51 = vadd.f32 %v3908_v33, %v3907_v18 }
 0x328   : > { %3615 = vst.msk [vmem:[%s6076_s26 + $0xec] sm:$0xf] %vm3555_vm9, %v3550_v52  ;;  %v3280_v58 = vadd.f32 %v3279_v38, %v3111_v16  ;;  %v3920_v61 = vsel %vm2347_vm3, %v3805_v8, 0.0 }
 0x32a   : > { %v3449_v60 = vadd.f32 %v6848_v6, %v3280_v58  ;;  %v3802_v6 = vmul.f32 %v6880_v0, %v6880_v0  ;;  %v3808_v58 = vmul.f32 %v7152_v14, %v7152_v14 }
 0x32b   : > { %v3481_v55 = vpop.f32.mrf.mxu3 }
 0x32c   : > { %v3538_v53 = vpack.c.bf16 %v3449_v60, %v3449_v60  ;;  %v3713_v57 = vsel %vm2347_vm3, %v3449_v60, 0.0  ;;  %v3800_v37 = vmul.f32 %v3449_v60, %v3449_v60  ;;  %v7249_v43 = vadd.f32 %v3481_v55, %v7062_v28 }
 0x32d   : > { %v3714_v2 = vadd.f32 %v3713_v57, %v3712_v30  ;;  %v3146_v28 = vadd.f32 %v7046_v4, %v6797_v15  ;;  %v3914_v13 = vsel %vm2347_vm3, %v3802_v6, 0.0  ;;  %v3804_v15 = vmul.f32 %v6919_v5, %v6919_v5 }
 0x32e   : > { %3603 = vst.msk [vmem:[%s6076_s26 + $0xbc] sm:$0xf] %vm3555_vm9, %v3538_v53  ;;  %v3910_v9 = vsel %vm2347_vm3, %v3800_v37, 0.0  ;;  %v3551_v36 = vpack.c.bf16 %v7249_v43, %v7249_v43  ;;  %v3725_v5 = vsel %vm2347_vm3, %v7120_v3, 0.0  ;;  %v3924_v3 = vsel %vm2347_vm3, %v3807_v27, 0.0 }
 0x32f   : > { %v3716_v23 = vadd.f32 %v3715_v24, %v3714_v2  ;;  %v3911_v21 = vadd.f32 %v3910_v9, %v3909_v51  ;;  %v3315_v63 = vadd.f32 %v7072_v20, %v3146_v28  ;;  %v3918_v32 = vsel %vm2347_vm3, %v3804_v15, 0.0 }
 0x330   : > { %3616 = vst.msk [vmem:[%s6076_s26 + $0xf0] sm:$0xf] %vm3555_vm9, %v3551_v36  ;;  %v3723_v20 = vsel %vm2347_vm3, %v7103_v10, 0.0  ;;  %v3922_v10 = vsel %vm2347_vm3, %v3806_v29, 0.0  ;;  %v3729_v60 = vsel %vm2347_vm3, %v7152_v14, 0.0  ;;  %v3926_v44 = vsel %vm2347_vm3, %v3808_v58, 0.0 }
 0x331   : > { %v3718_v49 = vadd.f32 %v3717_v45, %v3716_v23  ;;  %v3913_v34 = vadd.f32 %v3912_v25, %v3911_v21  ;;  %v3731_v53 = vsel %vm2347_vm3, %v7163_v17, 0.0  ;;  %v3810_v57 = vmul.f32 %v7176_v41, %v7176_v41 }
 0x332   : > { %v3151_v14 = vadd.f32 %v7046_v4, %v6840_v7  ;;  %v3928_v24 = vsel %vm2347_vm3, %v3809_v48, 0.0  ;;  %v3811_v6 = vmul.f32 %v7204_v39, %v7204_v39  ;;  %v3735_v21 = vsel %vm2347_vm3, %v7204_v39, 0.0 }
 0x333   : > { %v3720_v19 = vadd.f32 %v3719_v35, %v3718_v49  ;;  %v3915_v47 = vadd.f32 %v3914_v13, %v3913_v34  ;;  %v3483_v0 = vpop.f32.mrf.mxu3  ;;  %v3930_v23 = vsel %vm2347_vm3, %v3810_v57, 0.0  ;;  %v3812_v7 = vmul.f32 %v7230_v22, %v7230_v22 }
 0x334   : > { %v3484_v56 = vadd.f32 %v3483_v0, %v3315_v63  ;;  %v3320_v36 = vadd.f32 %v7090_v40, %v3151_v14  ;;  %v3932_v25 = vsel %vm2347_vm3, %v3811_v6, 0.0  ;;  %v3737_v45 = vsel %vm2347_vm3, %v7230_v22, 0.0 }
 0x335   : > { %v3722_v42 = vadd.f32 %v3721_v50, %v3720_v19  ;;  %v3917_v59 = vadd.f32 %v3916_v54, %v3915_v47  ;;  %v3813_v40 = vmul.f32 %v7249_v43, %v7249_v43  ;;  %v3934_v39 = vsel %vm2347_vm3, %v3812_v7, 0.0 }
 0x336   : > { %v3552_v16 = vpack.c.bf16 %v3484_v56, %v3484_v56  ;;  %v3739_v13 = vsel %vm2347_vm3, %v7249_v43, 0.0  ;;  %v3814_v35 = vmul.f32 %v3484_v56, %v3484_v56  ;;  %v3741_v22 = vsel %vm2347_vm3, %v3484_v56, 0.0 }
 0x337   : > { %v3724_v31 = vadd.f32 %v3723_v20, %v3722_v42  ;;  %v3919_v52 = vadd.f32 %v3918_v32, %v3917_v59  ;;  %v3936_v47 = vsel %vm2347_vm3, %v3813_v40, 0.0 }
 0x338   : > { %3617 = vst.msk [vmem:[%s6076_s26 + $0xf4] sm:$0xf] %vm3555_vm9, %v3552_v16  ;;  %v3938_v8 = vsel %vm2347_vm3, %v3814_v35, 0.0 }
 0x339   : > { %v3921_v38 = vadd.f32 %v3920_v61, %v3919_v52  ;;  %v3726_v46 = vadd.f32 %v3725_v5, %v3724_v31 }
 0x33b   : > { %v3728_v26 = vadd.f32 %v3727_v1, %v3726_v46  ;;  %v3923_v62 = vadd.f32 %v3922_v10, %v3921_v38  ;;  %v3486_v33 = vpop.f32.mrf.mxu3 }
 0x33c   : > { %v3487_v18 = vadd.f32 %v3486_v33, %v7084_v11  ;;  %v3733_v11 = vsel %vm2347_vm3, %v7176_v41, 0.0 }
 0x33d   : > { %v3730_v30 = vadd.f32 %v3729_v60, %v3728_v26  ;;  %v3925_v55 = vadd.f32 %v3924_v3, %v3923_v62 }
 0x33e   : > { %v3553_v37 = vpack.c.bf16 %v3487_v18, %v3487_v18  ;;  %v3815_v0 = vmul.f32 %v3487_v18, %v3487_v18  ;;  %v3743_v43 = vsel %vm2347_vm3, %v3487_v18, 0.0 }
 0x33f   : > { %v3732_v51 = vadd.f32 %v3731_v53, %v3730_v30  ;;  %v3927_v2 = vadd.f32 %v3926_v44, %v3925_v55 }
 0x340   : > { %3618 = vst.msk [vmem:[%s6076_s26 + $0xf8] sm:$0xf] %vm3555_vm9, %v3553_v37  ;;  %v3940_v20 = vsel %vm2347_vm3, %v3815_v0, 0.0 }
 0x341   : > { %v3734_v17 = vadd.f32 %v3733_v11, %v3732_v51  ;;  %v3929_v9 = vadd.f32 %v3928_v24, %v3927_v2 }
 0x343   : > { %v3736_v4 = vadd.f32 %v3735_v21, %v3734_v17  ;;  %v3931_v28 = vadd.f32 %v3930_v23, %v3929_v9  ;;  %v3488_v41 = vpop.f32.mrf.mxu3 }
 0x344   : > { %v3489_v12 = vadd.f32 %v3488_v41, %v3320_v36 }
 0x345   : > { %v3738_v49 = vadd.f32 %v3737_v45, %v3736_v4  ;;  %v3933_v34 = vadd.f32 %v3932_v25, %v3931_v28 }
 0x346   : > { %v3554_v15 = vpack.c.bf16 %v3489_v12, %v3489_v12  ;;  %v3816_v42 = vmul.f32 %v3489_v12, %v3489_v12  ;;  %v3745_v29 = vsel %vm2347_vm3, %v3489_v12, 0.0 }
 0x347   : > { %v3740_v63 = vadd.f32 %v3739_v13, %v3738_v49  ;;  %v3935_v19 = vadd.f32 %v3934_v39, %v3933_v34 }
 0x348   : > { %3619 = vst.msk [vmem:[%s6076_s26 + $0xfc] sm:$0xf] %vm3555_vm9, %v3554_v15  ;;  %v3942_v31 = vsel %vm2347_vm3, %v3816_v42, 0.0  ;;  %s490_s26 = sadd.s32 %s4171_s17, %s7671_s27 }
 0x349   : > { %v3937_v54 = vadd.f32 %v3936_v47, %v3935_v19  ;;  %v3742_v50 = vadd.f32 %v3741_v22, %v3740_v63  ;;  %s4172_s12 = sshll.u32 %s490_s26, 1 }
 0x34a   : > { %s492_s22 = scalar_lea.vmem %s7370_s8, %s4172_s12 }
 0x34b   : > { %v3939_v59 = vadd.f32 %v3938_v8, %v3937_v54  ;;  %v3744_v32 = vadd.f32 %v3743_v43, %v3742_v50 }
 0x34d   : > { %v3941_v16 = vadd.f32 %v3940_v20, %v3939_v59  ;;  %v3746_v56 = vadd.f32 %v3745_v29, %v3744_v32 }
 0x34f   : > { %v3747_v52 = vrot.slane %v3746_v56, 4  ;;  %v3943_v61 = vadd.f32 %v3942_v31, %v3941_v16 }
 0x351   : > { %v3748_v5 = vadd.f32 %v3747_v52, %v3746_v56  ;;  %v3944_v27 = vrot.slane %v3943_v61, 4 }
 0x353   : > { %v3749_v38 = vrot.slane %v3748_v5, 2  ;;  %v3945_v46 = vadd.f32 %v3944_v27, %v3943_v61 }
 0x355   : > { %v3750_v10 = vadd.f32 %v3749_v38, %v3748_v5  ;;  %v3946_v1 = vrot.slane %v3945_v46, 2 }
 0x357   : > { %v3751_v58 = vrot.slane %v3750_v10, 1  ;;  %v3947_v26 = vadd.f32 %v3946_v1, %v3945_v46 }
 0x359   : > { %v3948_v62 = vrot.slane %v3947_v26, 1  ;;  %v3752_v33 = vadd.f32 %v3751_v58, %v3750_v10 }
 0x35b   : > { %v3949_v3 = vadd.f32 %v3948_v62, %v3947_v26 }
 0x35d   : > { %v3951_v60 = vsel %vm1437_vm1, %v3752_v33, %v3949_v3 }
 0x35e   : > { %3953 = vst.msk [vmem:[%s492_s22] sm:$0x3] %vm3952_vm11, %v3951_v60 }
 0x35f PF: > { %s19_s9 = sadd.s32 1, %s4501_s9   ;;  %s7650_s27 = smov %s4493_s29 }
 0x360   : > { %p16_p0 = scmp.ge.s32.totalorder %s19_s9, 6   ;;  %s7651_s28 = smov %s4497_s30 }
 0x361   : > { %s7652_s29 = smov %s7655_s10  ;;  %s7653_s30 = smov %s7659_s11 }
 0x362   :  { %18 = sbr.rel (!%p16_p0) target bundleno = 3 (0x3), region = 96 }

// kernel: conv_bottleneck.5
= control target key start
LH: loop header
LB: loop body
LE: loop exit
PB: predicated region body
PF: predicated region fallthrough
CT: control target
= control target key end

     0   :  { %vm1442_vm0 = vcmask 261120   ;;  %vm3766_vm1 = vcmask 1040384   ;;  %s8030_s3 = inlined_call_operand.vmem [shape: f32[32,128], index: 3, kind: input, shape index: {}]   ;;  %s8031_s0 = inlined_call_operand.vmem [shape: bf16[2048,32], index: 0, kind: input, shape index: {}]   ;;  %s8032_s1 = inlined_call_operand.vmem [shape: f32[1,32], index: 1, kind: input, shape index: {}]   ;;  %s8033_s2 = inlined_call_operand.vmem [shape: f32[1,32], index: 2, kind: input, shape index: {}]   ;;  %s8034_s4 = inlined_call_operand.vmem [shape: bf16[2048,128], index: 4, kind: output, shape index: {0}]   ;;  %s8035_s5 = inlined_call_operand.vmem [shape: f32[1,2,128], index: 5, kind: output, shape index: {1}]  }
   0x1   :  { %v1438_v0 = vld [vmem:[%s8030_s3 + $0x10] sm:$0xff]  ;;  %v1439_v1 = vld [vmem:[%s8030_s3 + $0x18] sm:$0xff]  ;;  %v1436_v2 = vld [vmem:[%s8030_s3] sm:$0xff] }
   0x2   :  { %v1441_v3 = vpack.c.bf16 %v1439_v1, %v1438_v0  ;;  %v1437_v4 = vld [vmem:[%s8030_s3 + $0x8] sm:$0xff]  ;;  %v3906_v5 = vld [vmem:[%s8031_s0] sm:$0xff]   ;;  %v5058_v27 = vld [vmem:[%s8031_s0 + $0x10] sm:$0xff]  }
   0x3   :  { %v3907_v6 = vunpack.c.l.bf16 %v3906_v5  ;;  %v3908_v7 = vunpack.c.h.bf16 %v3906_v5  ;;  %v5375_v8 = vld [vmem:[%s8032_s1] ss:$0 sm:$0xff]  ;;  %v1440_v10 = vpack.c.bf16 %v1437_v4, %v1436_v2  ;;  %v5057_v13 = vld [vmem:[%s8031_s0 + $0x8] sm:$0xff]   ;;  %v3915_v29 = vunpack.c.l.bf16 %v5058_v27  ;;  %v5059_v37 = vld [vmem:[%s8031_s0 + $0x18] sm:$0xff]  }
   0x4   :  { %v5380_v9 = vld [vmem:[%s8033_s2] ss:$0 sm:$0xff]  ;;  %1833 = vmatpush.bf16.msra.mxu0 %v1441_v3  ;;  %5311 = vmatpush.bf16.msra.mxu1 %v1441_v3  ;;  %v3911_v18 = vunpack.c.l.bf16 %v5057_v13  ;;  %v3912_v19 = vunpack.c.h.bf16 %v5057_v13  ;;  %v3916_v30 = vunpack.c.h.bf16 %v5058_v27  ;;  %v3919_v39 = vunpack.c.l.bf16 %v5059_v37  ;;  %v5061_v57 = vld [vmem:[%s8031_s0 + $0x28] sm:$0xff]  }
   0x5   :  { %v536_v11 = vmul.f32 %v5375_v8, %v3907_v6  ;;  %v537_v12 = vmul.f32 %v5375_v8, %v3908_v7  ;;  %5312 = vmatpush.bf16.msra.mxu2 %v1441_v3  ;;  %5313 = vmatpush.bf16.msra.mxu3 %v1441_v3  ;;  %v540_v31 = vmul.f32 %v5375_v8, %v3915_v29  ;;  %v3920_v40 = vunpack.c.h.bf16 %v5059_v37  ;;  %v5060_v47 = vld [vmem:[%s8031_s0 + $0x20] sm:$0xff]   ;;  %v5062_v3 = vld [vmem:[%s8031_s0 + $0x30] sm:$0xff]   ;;  %v5089_v29 = vld [vmem:[%s8031_s0 + $0x108] sm:$0xff]  }
   0x6   :  { %v538_v21 = vmul.f32 %v5375_v8, %v3911_v18  ;;  %v539_v22 = vmul.f32 %v5375_v8, %v3912_v19  ;;  %v541_v32 = vmul.f32 %v5375_v8, %v3916_v30  ;;  %v542_v41 = vmul.f32 %v5375_v8, %v3919_v39  ;;  %v5088_v7 = vld [vmem:[%s8031_s0 + $0x100] sm:$0xff]  }
   0x7   :  { %v796_v14 = vadd.f32 %v5380_v9, %v536_v11  ;;  %v797_v15 = vadd.f32 %v5380_v9, %v537_v12  ;;  %v800_v33 = vadd.f32 %v5380_v9, %v540_v31  ;;  %v543_v42 = vmul.f32 %v5375_v8, %v3920_v40 }
   0x8   :  { %1834 = vmatpush.bf16.msra.mxu0 %v1440_v10  ;;  %5314 = vmatpush.bf16.msra.mxu1 %v1440_v10  ;;  %v798_v23 = vadd.f32 %v5380_v9, %v538_v21  ;;  %v799_v24 = vadd.f32 %v5380_v9, %v539_v22  ;;  %v801_v34 = vadd.f32 %v5380_v9, %v541_v32  ;;  %v3923_v49 = vunpack.c.l.bf16 %v5060_v47 }
   0x9   :  { %v1052_v16 = vmax.f32 %v796_v14, 0.0  ;;  %v1053_v17 = vmax.f32 %v797_v15, 0.0  ;;  %5315 = vmatpush.bf16.msra.mxu2 %v1440_v10  ;;  %5316 = vmatpush.bf16.msra.mxu3 %v1440_v10  ;;  %v1056_v35 = vmax.f32 %v800_v33, 0.0  ;;  %v802_v43 = vadd.f32 %v5380_v9, %v542_v41 }
   0xa   :  { %v1054_v25 = vmax.f32 %v798_v23, 0.0  ;;  %v1055_v26 = vmax.f32 %v799_v24, 0.0  ;;  %v1057_v36 = vmax.f32 %v801_v34, 0.0  ;;  %v803_v44 = vadd.f32 %v5380_v9, %v543_v42 }
   0xb   :  { %v1308_v20 = vpack.c.bf16 %v1053_v17, %v1052_v16  ;;  %v1058_v45 = vmax.f32 %v802_v43, 0.0  ;;  %v3924_v50 = vunpack.c.h.bf16 %v5060_v47  ;;  %v544_v51 = vmul.f32 %v5375_v8, %v3923_v49  ;;  %v5090_v49 = vld [vmem:[%s8031_s0 + $0x110] sm:$0xff]  }
   0xc   :  { %v1309_v28 = vpack.c.bf16 %v1055_v26, %v1054_v25  ;;  %v1310_v38 = vpack.c.bf16 %v1057_v36, %v1056_v35  ;;  %v1059_v46 = vmax.f32 %v803_v44, 0.0  ;;  %v3927_v59 = vunpack.c.l.bf16 %v5061_v57  ;;  %v5063_v25 = vld [vmem:[%s8031_s0 + $0x38] sm:$0xff]  }
   0xd   :  { %3777 = vmatmul.msk.bf16.vlgmr.msra.gmra.mxu0 %vm1442_vm0, %v1308_v20  ;;  %v545_v52 = vmul.f32 %v5375_v8, %v3924_v50  ;;  %v804_v53 = vadd.f32 %v5380_v9, %v544_v51  ;;  %v3928_v60 = vunpack.c.h.bf16 %v5061_v57  ;;  %v3931_v5 = vunpack.c.l.bf16 %v5062_v3 }
   0xe   :  { %v1311_v48 = vpack.c.bf16 %v1059_v46, %v1058_v45  ;;  %v546_v61 = vmul.f32 %v5375_v8, %v3927_v59  ;;  %v3932_v6 = vunpack.c.h.bf16 %v5062_v3  ;;  %v4035_v10 = vunpack.c.l.bf16 %v5088_v7  ;;  %v5064_v45 = vld [vmem:[%s8031_s0 + $0x40] sm:$0xff]  }
   0xf   :  { %v805_v54 = vadd.f32 %v5380_v9, %v545_v52  ;;  %v1060_v55 = vmax.f32 %v804_v53, 0.0  ;;  %v547_v62 = vmul.f32 %v5375_v8, %v3928_v60  ;;  %v4036_v11 = vunpack.c.h.bf16 %v5088_v7 }
  0x10   :  { %v806_v63 = vadd.f32 %v5380_v9, %v546_v61  ;;  %v548_v12 = vmul.f32 %v5375_v8, %v3931_v5  ;;  %v549_v13 = vmul.f32 %v5375_v8, %v3932_v6  ;;  %v600_v14 = vmul.f32 %v5375_v8, %v4035_v10  ;;  %v5091_v6 = vld [vmem:[%s8031_s0 + $0x118] sm:$0xff]  }
  0x11   :  { %v1061_v56 = vmax.f32 %v805_v54, 0.0  ;;  %v807_v0 = vadd.f32 %v5380_v9, %v547_v62  ;;  %v601_v15 = vmul.f32 %v5375_v8, %v4036_v11  ;;  %v3935_v27 = vunpack.c.l.bf16 %v5063_v25 }
  0x12   :  { %v1062_v1 = vmax.f32 %v806_v63, 0.0  ;;  %v860_v16 = vadd.f32 %v5380_v9, %v600_v14  ;;  %v808_v18 = vadd.f32 %v5380_v9, %v548_v12  ;;  %v809_v19 = vadd.f32 %v5380_v9, %v549_v13 }
  0x13   :  { %v1312_v58 = vpack.c.bf16 %v1061_v56, %v1060_v55  ;;  %v1063_v2 = vmax.f32 %v807_v0, 0.0  ;;  %v861_v17 = vadd.f32 %v5380_v9, %v601_v15  ;;  %v4039_v30 = vunpack.c.l.bf16 %v5089_v29 }
  0x14   :  { %v1116_v20 = vmax.f32 %v860_v16, 0.0  ;;  %v1064_v23 = vmax.f32 %v808_v18, 0.0  ;;  %v1065_v24 = vmax.f32 %v809_v19, 0.0  ;;  %v4040_v31 = vunpack.c.h.bf16 %v5089_v29 }
  0x15   :  { %v1313_v4 = vpack.c.bf16 %v1063_v2, %v1062_v1  ;;  %v1117_v21 = vmax.f32 %v861_v17, 0.0  ;;  %v550_v32 = vmul.f32 %v5375_v8, %v3935_v27  ;;  %v602_v34 = vmul.f32 %v5375_v8, %v4039_v30  ;;  %v5065_v1 = vld [vmem:[%s8031_s0 + $0x48] sm:$0xff]   ;;  %v5066_v30 = vld [vmem:[%s8031_s0 + $0x50] sm:$0xff]  }
  0x16   :  { %v1314_v26 = vpack.c.bf16 %v1065_v24, %v1064_v23  ;;  %v603_v35 = vmul.f32 %v5375_v8, %v4040_v31  ;;  %v3939_v47 = vunpack.c.l.bf16 %v5064_v45  ;;  %v4043_v50 = vunpack.c.l.bf16 %v5090_v49 }
  0x17   :  { %v1340_v22 = vpack.c.bf16 %v1117_v21, %v1116_v20  ;;  %v862_v36 = vadd.f32 %v5380_v9, %v602_v34  ;;  %v4044_v51 = vunpack.c.h.bf16 %v5090_v49  ;;  %v3943_v3 = vunpack.c.l.bf16 %v5065_v1 }
  0x18   :  { %v863_v37 = vadd.f32 %v5380_v9, %v603_v35  ;;  %v552_v52 = vmul.f32 %v5375_v8, %v3939_v47  ;;  %v604_v54 = vmul.f32 %v5375_v8, %v4043_v50  ;;  %v4047_v7 = vunpack.c.l.bf16 %v5091_v6  ;;  %v5092_v35 = vld [vmem:[%s8031_s0 + $0x120] sm:$0xff]  }
  0x19   :  { %3809 = vmatmul.msk.bf16.vlgmr.msra.gmra.mxu1 %vm1442_vm0, %v1340_v22  ;;  %v1118_v40 = vmax.f32 %v862_v36, 0.0  ;;  %v605_v55 = vmul.f32 %v5375_v8, %v4044_v51  ;;  %v4048_v10 = vunpack.c.h.bf16 %v5091_v6  ;;  %v554_v11 = vmul.f32 %v5375_v8, %v3943_v3 }
  0x1a   :  { %v1119_v41 = vmax.f32 %v863_v37, 0.0  ;;  %v864_v56 = vadd.f32 %v5380_v9, %v604_v54  ;;  %v606_v13 = vmul.f32 %v5375_v8, %v4047_v7  ;;  %v3947_v31 = vunpack.c.l.bf16 %v5066_v30 }
  0x1b   :  { %v865_v57 = vadd.f32 %v5380_v9, %v605_v55  ;;  %v607_v14 = vmul.f32 %v5375_v8, %v4048_v10  ;;  %v814_v17 = vadd.f32 %v5380_v9, %v554_v11 }
  0x1c   :  { %v1341_v42 = vpack.c.bf16 %v1119_v41, %v1118_v40  ;;  %v1120_v60 = vmax.f32 %v864_v56, 0.0  ;;  %v866_v15 = vadd.f32 %v5380_v9, %v606_v13  ;;  %v556_v40 = vmul.f32 %v5375_v8, %v3947_v31  ;;  %v5094_v31 = vld [vmem:[%s8031_s0 + $0x130] sm:$0xff]  }
  0x1d   :  { %3778 = vmatmul.msk.bf16.gmra.mxu0 %vm1442_vm0, %v1309_v28  ;;  %v3936_v28 = vunpack.c.h.bf16 %v5063_v25  ;;  %v1121_v61 = vmax.f32 %v865_v57, 0.0  ;;  %v867_v16 = vadd.f32 %v5380_v9, %v607_v14 }
  0x1e   :  { %v1122_v19 = vmax.f32 %v866_v15, 0.0  ;;  %v816_v47 = vadd.f32 %v5380_v9, %v556_v40 }
  0x1f   :  { %v551_v33 = vmul.f32 %v5375_v8, %v3936_v28  ;;  %v1342_v62 = vpack.c.bf16 %v1121_v61, %v1120_v60  ;;  %v1123_v20 = vmax.f32 %v867_v16, 0.0  ;;  %v1070_v28 = vmax.f32 %v814_v17, 0.0 }
  0x20   :  { %v1072_v57 = vmax.f32 %v816_v47, 0.0 }
  0x21   :  { %v811_v39 = vadd.f32 %v5380_v9, %v551_v33  ;;  %v3948_v33 = vunpack.c.h.bf16 %v5066_v30 }
  0x23   :  { %v1067_v44 = vmax.f32 %v811_v39, 0.0  ;;  %v4052_v39 = vunpack.c.h.bf16 %v5092_v35 }
  0x29   :  { %3810 = vmatmul.msk.bf16.gmra.mxu1 %vm1442_vm0, %v1341_v42  ;;  %v557_v42 = vmul.f32 %v5375_v8, %v3948_v33 }
  0x2d   :  { %3779 = vmatmul.msk.bf16.gmra.mxu0 %vm1442_vm0, %v1310_v38  ;;  %v810_v38 = vadd.f32 %v5380_v9, %v550_v32 }
  0x2f   :  { %v1066_v43 = vmax.f32 %v810_v38, 0.0  ;;  %v4051_v38 = vunpack.c.l.bf16 %v5092_v35  ;;  %v4060_v35 = vunpack.c.h.bf16 %v5094_v31 }
  0x31   :  { %v1315_v46 = vpack.c.bf16 %v1067_v44, %v1066_v43  ;;  %v608_v43 = vmul.f32 %v5375_v8, %v4051_v38  ;;  %v609_v44 = vmul.f32 %v5375_v8, %v4052_v39  ;;  %v613_v40 = vmul.f32 %v5375_v8, %v4060_v35 }
  0x39   :  { %3811 = vmatmul.msk.bf16.gmra.mxu1 %vm1442_vm0, %v1342_v62 }
  0x3d   :  { %3780 = vmatmul.msk.bf16.gmra.mxu0 %vm1442_vm0, %v1311_v48  ;;  %v3940_v48 = vunpack.c.h.bf16 %v5064_v45  ;;  %v868_v45 = vadd.f32 %v5380_v9, %v608_v43 }
  0x3f   :  { %v553_v53 = vmul.f32 %v5375_v8, %v3940_v48  ;;  %v817_v48 = vadd.f32 %v5380_v9, %v557_v42  ;;  %v1124_v49 = vmax.f32 %v868_v45, 0.0  ;;  %v873_v42 = vadd.f32 %v5380_v9, %v613_v40 }
  0x41   :  { %v813_v59 = vadd.f32 %v5380_v9, %v553_v53 }
  0x43   :  { %v1069_v0 = vmax.f32 %v813_v59, 0.0  ;;  %v5067_v59 = vld [vmem:[%s8031_s0 + $0x58] sm:$0xff]  }
  0x44   :  { %v3951_v60 = vunpack.c.l.bf16 %v5067_v59  ;;  %v3952_v62 = vunpack.c.h.bf16 %v5067_v59 }
  0x46   :  { %v559_v7 = vmul.f32 %v5375_v8, %v3952_v62 }
  0x48   :  { %v819_v15 = vadd.f32 %v5380_v9, %v559_v7 }
  0x4d   :  { %3781 = vmatmul.msk.bf16.gmra.mxu0 %vm1442_vm0, %v1312_v58  ;;  %v812_v58 = vadd.f32 %v5380_v9, %v552_v52 }
  0x4f   :  { %v1068_v63 = vmax.f32 %v812_v58, 0.0  ;;  %v1073_v58 = vmax.f32 %v817_v48, 0.0 }
  0x51   :  { %v1316_v2 = vpack.c.bf16 %v1069_v0, %v1068_v63  ;;  %v1318_v61 = vpack.c.bf16 %v1073_v58, %v1072_v57  ;;  %v5093_v0 = vld [vmem:[%s8031_s0 + $0x128] sm:$0xff]  }
  0x52   :  { %v4055_v3 = vunpack.c.l.bf16 %v5093_v0 }
  0x54   :  { %v610_v10 = vmul.f32 %v5375_v8, %v4055_v3 }
  0x5d   :  { %3782 = vmatmul.msk.bf16.gmra.mxu0 %vm1442_vm0, %v1313_v4  ;;  %v3944_v4 = vunpack.c.h.bf16 %v5065_v1 }
  0x5f   :  { %v555_v12 = vmul.f32 %v5375_v8, %v3944_v4  ;;  %v4056_v4 = vunpack.c.h.bf16 %v5093_v0 }
  0x61   :  { %v815_v18 = vadd.f32 %v5380_v9, %v555_v12  ;;  %v611_v11 = vmul.f32 %v5375_v8, %v4056_v4  ;;  %v870_v12 = vadd.f32 %v5380_v9, %v610_v10 }
  0x63   :  { %v1071_v29 = vmax.f32 %v815_v18, 0.0  ;;  %v871_v13 = vadd.f32 %v5380_v9, %v611_v11  ;;  %v1126_v16 = vmax.f32 %v870_v12, 0.0 }
  0x65   :  { %v1317_v32 = vpack.c.bf16 %v1071_v29, %v1070_v28  ;;  %v1127_v17 = vmax.f32 %v871_v13, 0.0 }
  0x6d   :  { %3783 = vmatmul.msk.bf16.gmra.mxu0 %vm1442_vm0, %v1314_v26  ;;  %v1343_v26 = vpack.c.bf16 %v1123_v20, %v1122_v19 }
  0x6f   :  { %3812 = vmatmul.msk.bf16.gmra.mxu1 %vm1442_vm0, %v1343_v26  ;;  %v5068_v26 = vld [vmem:[%s8031_s0 + $0x60] sm:$0xff]  }
  0x70   :  { %v3956_v29 = vunpack.c.h.bf16 %v5068_v26 }
  0x72   :  { %v561_v38 = vmul.f32 %v5375_v8, %v3956_v29 }
  0x7d   :  { %3784 = vmatmul.msk.bf16.gmra.mxu0 %vm1442_vm0, %v1315_v46  ;;  %v869_v46 = vadd.f32 %v5380_v9, %v609_v44  ;;  %v821_v44 = vadd.f32 %v5380_v9, %v561_v38 }
  0x7f   :  { %v1125_v50 = vmax.f32 %v869_v46, 0.0  ;;  %v1129_v46 = vmax.f32 %v873_v42, 0.0 }
  0x81   :  { %v1344_v55 = vpack.c.bf16 %v1125_v50, %v1124_v49 }
  0x83   :  { %3813 = vmatmul.msk.bf16.gmra.mxu1 %vm1442_vm0, %v1344_v55  ;;  %v5069_v55 = vld [vmem:[%s8031_s0 + $0x68] sm:$0xff]  }
  0x84   :  { %v3960_v57 = vunpack.c.h.bf16 %v5069_v55 }
  0x8a   :  { %v1836_v5 = vpop.f32.mrf.mxu0 }
  0x8b   :  { %v3249_v21 = vmul.f32 %v1836_v5, %v1836_v5 }
  0x8d   :  { %3785 = vmatmul.msk.bf16.gmra.mxu0 %vm1442_vm0, %v1316_v2 }
  0x92   :  { %v1838_v22 = vpop.f32.mrf.mxu0 }
  0x93   :  { %v4420_v23 = vpack.c.bf16 %v1838_v22, %v1836_v5  ;;  %v2988_v24 = vadd.f32 %v1838_v22, %v1836_v5  ;;  %v3250_v25 = vmul.f32 %v1838_v22, %v1838_v22  ;;  %v558_v5 = vmul.f32 %v5375_v8, %v3951_v60  ;;  %v5095_v60 = vld [vmem:[%s8031_s0 + $0x138] sm:$0xff]  }
  0x94   :  { %v1345_v22 = vpack.c.bf16 %v1127_v17, %v1126_v16  ;;  %v4064_v0 = vunpack.c.h.bf16 %v5095_v60 }
  0x95   :  { %4421 = vst [vmem:[%s8034_s4] sm:$0xff] %v4420_v23   ;;  %v3505_v27 = vadd.f32 %v3250_v25, %v3249_v21  ;;  %v818_v14 = vadd.f32 %v5380_v9, %v558_v5  ;;  %v1075_v25 = vmax.f32 %v819_v15, 0.0 }
  0x96   :  { %3814 = vmatmul.msk.bf16.gmra.mxu1 %vm1442_vm0, %v1345_v22  ;;  %v615_v5 = vmul.f32 %v5375_v8, %v4064_v0 }
  0x98   :  { %v875_v7 = vadd.f32 %v5380_v9, %v615_v5 }
  0x9a   :  { %v1841_v34 = vpop.f32.mrf.mxu0  ;;  %v1131_v13 = vmax.f32 %v875_v7, 0.0 }
  0x9b   :  { %v2989_v36 = vadd.f32 %v2988_v24, %v1841_v34  ;;  %v3251_v37 = vmul.f32 %v1841_v34, %v1841_v34  ;;  %v1074_v24 = vmax.f32 %v818_v14, 0.0 }
  0x9d   :  { %v3506_v41 = vadd.f32 %v3505_v27, %v3251_v37  ;;  %3786 = vmatmul.msk.bf16.gmra.mxu0 %vm1442_vm0, %v1317_v32  ;;  %v3955_v27 = vunpack.c.l.bf16 %v5068_v26  ;;  %v1319_v28 = vpack.c.bf16 %v1075_v25, %v1074_v24  ;;  %v5070_v25 = vld [vmem:[%s8031_s0 + $0x70] sm:$0xff]  }
  0x9e   :  { %v3963_v29 = vunpack.c.l.bf16 %v5070_v25 }
  0xa0   :  { %v564_v42 = vmul.f32 %v5375_v8, %v3963_v29 }
  0xa2   :  { %v1843_v51 = vpop.f32.mrf.mxu0 }
  0xa3   :  { %v4425_v52 = vpack.c.bf16 %v1843_v51, %v1841_v34  ;;  %v2990_v53 = vadd.f32 %v2989_v36, %v1843_v51  ;;  %v3252_v54 = vmul.f32 %v1843_v51, %v1843_v51  ;;  %v4059_v34 = vunpack.c.l.bf16 %v5094_v31 }
  0xa4   :  { %v560_v36 = vmul.f32 %v5375_v8, %v3955_v27 }
  0xa5   :  { %5184 = vst [vmem:[%s8034_s4 + $0x8] sm:$0xff] %v4425_v52   ;;  %v3507_v56 = vadd.f32 %v3506_v41, %v3252_v54  ;;  %v612_v39 = vmul.f32 %v5375_v8, %v4059_v34  ;;  %v1077_v54 = vmax.f32 %v821_v44, 0.0  ;;  %v5096_v34 = vld [vmem:[%s8031_s0 + $0x140] sm:$0xff]  }
  0xa6   :  { %v820_v43 = vadd.f32 %v5380_v9, %v560_v36  ;;  %v4068_v40 = vunpack.c.h.bf16 %v5096_v34 }
  0xa7   :  { %v872_v41 = vadd.f32 %v5380_v9, %v612_v39  ;;  %v4067_v39 = vunpack.c.l.bf16 %v5096_v34 }
  0xa9   :  { %v1128_v45 = vmax.f32 %v872_v41, 0.0 }
  0xaa   :  { %v1846_v63 = vpop.f32.mrf.mxu0 }
  0xab   :  { %v2991_v1 = vadd.f32 %v2990_v53, %v1846_v63  ;;  %v3253_v2 = vmul.f32 %v1846_v63, %v1846_v63  ;;  %v1346_v51 = vpack.c.bf16 %v1129_v46, %v1128_v45  ;;  %v1076_v53 = vmax.f32 %v820_v43, 0.0 }
  0xac   :  { %v616_v45 = vmul.f32 %v5375_v8, %v4067_v39  ;;  %v617_v46 = vmul.f32 %v5375_v8, %v4068_v40  ;;  %v5122_v39 = vld [vmem:[%s8031_s0 + $0x210] sm:$0xff]  }
  0xad   :  { %v3508_v6 = vadd.f32 %v3507_v56, %v3253_v2  ;;  %3787 = vmatmul.msk.bf16.gmra.mxu0 %vm1442_vm0, %v1318_v61  ;;  %3815 = vmatmul.msk.bf16.gmra.mxu1 %vm1442_vm0, %v1346_v51  ;;  %v3959_v56 = vunpack.c.l.bf16 %v5069_v55  ;;  %v1320_v58 = vpack.c.bf16 %v1077_v54, %v1076_v53  ;;  %v563_v2 = vmul.f32 %v5375_v8, %v3960_v57 }
  0xaf   :  { %v823_v11 = vadd.f32 %v5380_v9, %v563_v2 }
  0xb2   :  { %v1848_v18 = vpop.f32.mrf.mxu0 }
  0xb3   :  { %v4430_v19 = vpack.c.bf16 %v1848_v18, %v1846_v63  ;;  %v2992_v20 = vadd.f32 %v2991_v1, %v1848_v18  ;;  %v3254_v21 = vmul.f32 %v1848_v18, %v1848_v18  ;;  %v4063_v63 = vunpack.c.l.bf16 %v5095_v60 }
  0xb4   :  { %v562_v1 = vmul.f32 %v5375_v8, %v3959_v56 }
  0xb5   :  { %5185 = vst [vmem:[%s8034_s4 + $0x10] sm:$0xff] %v4430_v19   ;;  %v3509_v23 = vadd.f32 %v3508_v6, %v3254_v21  ;;  %v614_v4 = vmul.f32 %v5375_v8, %v4063_v63  ;;  %v5120_v21 = vld [vmem:[%s8031_s0 + $0x200] sm:$0xff]   ;;  %v5071_v63 = vld [vmem:[%s8031_s0 + $0x78] sm:$0xff]  }
  0xb6   :  { %v822_v10 = vadd.f32 %v5380_v9, %v562_v1  ;;  %v4164_v24 = vunpack.c.h.bf16 %v5120_v21 }
  0xb7   :  { %v874_v6 = vadd.f32 %v5380_v9, %v614_v4 }
  0xb8   :  { %v1078_v19 = vmax.f32 %v822_v10, 0.0  ;;  %v665_v27 = vmul.f32 %v5375_v8, %v4164_v24 }
  0xb9   :  { %v1130_v12 = vmax.f32 %v874_v6, 0.0  ;;  %v3968_v6 = vunpack.c.h.bf16 %v5071_v63 }
  0xba   :  { %v1851_v30 = vpop.f32.mrf.mxu0 }
  0xbb   :  { %v2993_v32 = vadd.f32 %v2992_v20, %v1851_v30  ;;  %v3255_v33 = vmul.f32 %v1851_v30, %v1851_v30  ;;  %v1347_v18 = vpack.c.bf16 %v1131_v13, %v1130_v12  ;;  %v1079_v20 = vmax.f32 %v823_v11, 0.0  ;;  %v5097_v13 = vld [vmem:[%s8031_s0 + $0x148] sm:$0xff]  }
  0xbd   :  { %v3510_v37 = vadd.f32 %v3509_v23, %v3255_v33  ;;  %3788 = vmatmul.msk.bf16.gmra.mxu0 %vm1442_vm0, %v1319_v28  ;;  %3816 = vmatmul.msk.bf16.gmra.mxu1 %vm1442_vm0, %v1347_v18  ;;  %v4163_v23 = vunpack.c.l.bf16 %v5120_v21  ;;  %v1321_v28 = vpack.c.bf16 %v1079_v20, %v1078_v19  ;;  %v4071_v20 = vunpack.c.l.bf16 %v5097_v13 }
  0xbf   :  { %v664_v26 = vmul.f32 %v5375_v8, %v4163_v23  ;;  %v4072_v23 = vunpack.c.h.bf16 %v5097_v13 }
  0xc1   :  { %v924_v31 = vadd.f32 %v5380_v9, %v664_v26  ;;  %v619_v26 = vmul.f32 %v5375_v8, %v4072_v23 }
  0xc2   :  { %v1853_v47 = vpop.f32.mrf.mxu0 }
  0xc3   :  { %v4435_v48 = vpack.c.bf16 %v1853_v47, %v1851_v30  ;;  %v2994_v49 = vadd.f32 %v2993_v32, %v1853_v47  ;;  %v3256_v50 = vmul.f32 %v1853_v47, %v1853_v47  ;;  %v3964_v30 = vunpack.c.h.bf16 %v5070_v25 }
  0xc4   :  { %v925_v32 = vadd.f32 %v5380_v9, %v665_v27  ;;  %v876_v47 = vadd.f32 %v5380_v9, %v616_v45  ;;  %v618_v25 = vmul.f32 %v5375_v8, %v4071_v20  ;;  %v4172_v45 = vunpack.c.h.bf16 %v5122_v39 }
  0xc5   :  { %5186 = vst [vmem:[%s8034_s4 + $0x18] sm:$0xff] %v4435_v48   ;;  %v3511_v52 = vadd.f32 %v3510_v37, %v3256_v50  ;;  %v1180_v37 = vmax.f32 %v924_v31, 0.0  ;;  %v565_v43 = vmul.f32 %v5375_v8, %v3964_v30  ;;  %v877_v48 = vadd.f32 %v5380_v9, %v617_v46 }
  0xc6   :  { %v1181_v38 = vmax.f32 %v925_v32, 0.0  ;;  %v1132_v53 = vmax.f32 %v876_v47, 0.0  ;;  %v879_v30 = vadd.f32 %v5380_v9, %v619_v26 }
  0xc7   :  { %v825_v50 = vadd.f32 %v5380_v9, %v565_v43  ;;  %v1133_v54 = vmax.f32 %v877_v48, 0.0  ;;  %v669_v48 = vmul.f32 %v5375_v8, %v4172_v45 }
  0xc8   :  { %v1372_v44 = vpack.c.bf16 %v1181_v38, %v1180_v37  ;;  %v1135_v37 = vmax.f32 %v879_v30, 0.0 }
  0xca   :  { %v1856_v59 = vpop.f32.mrf.mxu0  ;;  %3841 = vmatmul.msk.bf16.vlgmr.msra.gmra.mxu2 %vm1442_vm0, %v1372_v44  ;;  %v4171_v44 = vunpack.c.l.bf16 %v5122_v39 }
  0xcb   :  { %v2995_v61 = vadd.f32 %v2994_v49, %v1856_v59  ;;  %v3257_v62 = vmul.f32 %v1856_v59, %v1856_v59  ;;  %v824_v49 = vadd.f32 %v5380_v9, %v564_v42  ;;  %v5072_v42 = vld [vmem:[%s8031_s0 + $0x80] sm:$0xff]  }
  0xcc   :  { %v668_v46 = vmul.f32 %v5375_v8, %v4171_v44  ;;  %v3971_v47 = vunpack.c.l.bf16 %v5072_v42 }
  0xcd   :  { %v3512_v3 = vadd.f32 %v3511_v52, %v3257_v62  ;;  %3789 = vmatmul.msk.bf16.gmra.mxu0 %vm1442_vm0, %v1320_v58  ;;  %v5592_v52 = vpop.f32.mrf.mxu1  ;;  %v1348_v58 = vpack.c.bf16 %v1133_v54, %v1132_v53  ;;  %v1081_v62 = vmax.f32 %v825_v50, 0.0  ;;  %v3972_v50 = vunpack.c.h.bf16 %v5072_v42 }
  0xcf   :  { %3817 = vmatmul.msk.bf16.gmra.mxu1 %vm1442_vm0, %v1348_v58 }
  0xd2   :  { %v1858_v14 = vpop.f32.mrf.mxu0 }
  0xd3   :  { %v4440_v15 = vpack.c.bf16 %v1858_v14, %v1856_v59  ;;  %v2996_v16 = vadd.f32 %v2995_v61, %v1858_v14  ;;  %v3258_v17 = vmul.f32 %v1858_v14, %v1858_v14  ;;  %v5121_v59 = vld [vmem:[%s8031_s0 + $0x208] sm:$0xff]   ;;  %v1080_v61 = vmax.f32 %v824_v49, 0.0 }
  0xd4   :  { %v4167_v0 = vunpack.c.l.bf16 %v5121_v59  ;;  %v4168_v1 = vunpack.c.h.bf16 %v5121_v59 }
  0xd5   :  { %5187 = vst [vmem:[%s8034_s4 + $0x20] sm:$0xff] %v4440_v15   ;;  %v3513_v22 = vadd.f32 %v3512_v3, %v3258_v17  ;;  %v3967_v3 = vunpack.c.l.bf16 %v5071_v63  ;;  %v1322_v5 = vpack.c.bf16 %v1081_v62, %v1080_v61  ;;  %v5607_v11 = vpop.f32.mrf.mxu1 }
  0xd6   :  { %v666_v2 = vmul.f32 %v5375_v8, %v4167_v0  ;;  %v667_v4 = vmul.f32 %v5375_v8, %v4168_v1  ;;  %v569_v1 = vmul.f32 %v5375_v8, %v3972_v50 }
  0xd7   :  { %v566_v17 = vmul.f32 %v5375_v8, %v3967_v3 }
  0xd8   :  { %v926_v7 = vadd.f32 %v5380_v9, %v666_v2  ;;  %v927_v12 = vadd.f32 %v5380_v9, %v667_v4 }
  0xd9   :  { %v826_v27 = vadd.f32 %v5380_v9, %v566_v17 }
  0xda   :  { %v1861_v33 = vpop.f32.mrf.mxu0  ;;  %v1182_v18 = vmax.f32 %v926_v7, 0.0  ;;  %v1183_v19 = vmax.f32 %v927_v12, 0.0 }
  0xdb   :  { %v2997_v35 = vadd.f32 %v2996_v16, %v1861_v33  ;;  %v3259_v36 = vmul.f32 %v1861_v33, %v1861_v33  ;;  %v4580_v16 = vpack.c.bf16 %v5607_v11, %v5592_v52  ;;  %v1082_v38 = vmax.f32 %v826_v27, 0.0 }
  0xdc   :  { %v1373_v24 = vpack.c.bf16 %v1183_v19, %v1182_v18 }
  0xdd   :  { %v3514_v41 = vadd.f32 %v3513_v22, %v3259_v36  ;;  %3790 = vmatmul.msk.bf16.gmra.mxu0 %vm1442_vm0, %v1321_v28  ;;  %v567_v22 = vmul.f32 %v5375_v8, %v3968_v6  ;;  %5215 = vst [vmem:[%s8034_s4 + $0x100] sm:$0xff] %v4580_v16   ;;  %v878_v28 = vadd.f32 %v5380_v9, %v618_v25  ;;  %v5628_v32 = vpop.f32.mrf.mxu1 }
  0xde   :  { %3842 = vmatmul.msk.bf16.gmra.mxu2 %vm1442_vm0, %v1373_v24  ;;  %v5073_v24 = vld [vmem:[%s8031_s0 + $0x88] sm:$0xff]  }
  0xdf   :  { %v827_v29 = vadd.f32 %v5380_v9, %v567_v22 }
  0xe2   :  { %v1863_v51 = vpop.f32.mrf.mxu0 }
  0xe3   :  { %v4445_v55 = vpack.c.bf16 %v1863_v51, %v1861_v33  ;;  %v2998_v56 = vadd.f32 %v2997_v35, %v1863_v51  ;;  %v3260_v57 = vmul.f32 %v1863_v51, %v1863_v51  ;;  %v1134_v33 = vmax.f32 %v878_v28, 0.0 }
  0xe4   :  { %v928_v51 = vadd.f32 %v5380_v9, %v668_v46 }
  0xe5   :  { %5188 = vst [vmem:[%s8034_s4 + $0x28] sm:$0xff] %v4445_v55   ;;  %v3515_v60 = vadd.f32 %v3514_v41, %v3260_v57  ;;  %v1083_v41 = vmax.f32 %v827_v29, 0.0  ;;  %v1349_v43 = vpack.c.bf16 %v1135_v37, %v1134_v33  ;;  %v5643_v54 = vpop.f32.mrf.mxu1  ;;  %v929_v55 = vadd.f32 %v5380_v9, %v669_v48 }
  0xe6   :  { %v4585_v59 = vpack.c.bf16 %v5643_v54, %v5628_v32  ;;  %v1184_v61 = vmax.f32 %v928_v51, 0.0  ;;  %v3975_v29 = vunpack.c.l.bf16 %v5073_v24  ;;  %v3976_v33 = vunpack.c.h.bf16 %v5073_v24 }
  0xe7   :  { %3818 = vmatmul.msk.bf16.gmra.mxu1 %vm1442_vm0, %v1349_v43  ;;  %v1323_v49 = vpack.c.bf16 %v1083_v41, %v1082_v38  ;;  %v1185_v62 = vmax.f32 %v929_v55, 0.0  ;;  %v5099_v38 = vld [vmem:[%s8031_s0 + $0x158] sm:$0xff]  }
  0xe8   :  { %5216 = vst [vmem:[%s8034_s4 + $0x108] sm:$0xff] %v4585_v59   ;;  %v570_v42 = vmul.f32 %v5375_v8, %v3975_v29  ;;  %v4079_v45 = vunpack.c.l.bf16 %v5099_v38  ;;  %v4080_v48 = vunpack.c.h.bf16 %v5099_v38 }
  0xe9   :  { %v1374_v3 = vpack.c.bf16 %v1185_v62, %v1184_v61 }
  0xea   :  { %v1866_v10 = vpop.f32.mrf.mxu0  ;;  %v622_v50 = vmul.f32 %v5375_v8, %v4079_v45  ;;  %v623_v51 = vmul.f32 %v5375_v8, %v4080_v48 }
  0xeb   :  { %v2999_v14 = vadd.f32 %v2998_v56, %v1866_v10  ;;  %v3261_v15 = vmul.f32 %v1866_v10, %v1866_v10  ;;  %v5098_v56 = vld [vmem:[%s8031_s0 + $0x150] sm:$0xff]  }
  0xec   :  { %v4075_v63 = vunpack.c.l.bf16 %v5098_v56  ;;  %v4076_v2 = vunpack.c.h.bf16 %v5098_v56  ;;  %v882_v55 = vadd.f32 %v5380_v9, %v622_v50  ;;  %v5125_v50 = vld [vmem:[%s8031_s0 + $0x228] sm:$0xff]  }
  0xed   :  { %v3516_v21 = vadd.f32 %v3515_v60, %v3261_v15  ;;  %3791 = vmatmul.msk.bf16.gmra.mxu0 %vm1442_vm0, %v1322_v5  ;;  %v568_v60 = vmul.f32 %v5375_v8, %v3971_v47  ;;  %v571_v47 = vmul.f32 %v5375_v8, %v3976_v33 }
  0xee   :  { %v620_v4 = vmul.f32 %v5375_v8, %v4075_v63  ;;  %v621_v5 = vmul.f32 %v5375_v8, %v4076_v2  ;;  %3843 = vmatmul.msk.bf16.gmra.mxu2 %vm1442_vm0, %v1374_v3  ;;  %v5124_v2 = vld [vmem:[%s8031_s0 + $0x220] sm:$0xff]  }
  0xef   :  { %v828_v6 = vadd.f32 %v5380_v9, %v568_v60  ;;  %v831_v56 = vadd.f32 %v5380_v9, %v571_v47  ;;  %v1138_v60 = vmax.f32 %v882_v55, 0.0  ;;  %v5075_v55 = vld [vmem:[%s8031_s0 + $0x98] sm:$0xff]  }
  0xf0   :  { %v880_v7 = vadd.f32 %v5380_v9, %v620_v4  ;;  %v881_v12 = vadd.f32 %v5380_v9, %v621_v5  ;;  %v5074_v5 = vld [vmem:[%s8031_s0 + $0x90] sm:$0xff]  }
  0xf1   :  { %v1084_v20 = vmax.f32 %v828_v6, 0.0  ;;  %v1087_v4 = vmax.f32 %v831_v56, 0.0 }
  0xf2   :  { %v1868_v31 = vpop.f32.mrf.mxu0  ;;  %v1136_v15 = vmax.f32 %v880_v7, 0.0  ;;  %v1137_v19 = vmax.f32 %v881_v12, 0.0  ;;  %v4179_v7 = vunpack.c.l.bf16 %v5124_v2 }
  0xf3   :  { %v4450_v34 = vpack.c.bf16 %v1868_v31, %v1866_v10  ;;  %v3000_v35 = vadd.f32 %v2999_v14, %v1868_v31  ;;  %v3262_v36 = vmul.f32 %v1868_v31, %v1868_v31  ;;  %v829_v10 = vadd.f32 %v5380_v9, %v569_v1  ;;  %v5664_v14 = vpop.f32.mrf.mxu1 }
  0xf4   :  { %v1350_v25 = vpack.c.bf16 %v1137_v19, %v1136_v15  ;;  %v672_v12 = vmul.f32 %v5375_v8, %v4179_v7 }
  0xf5   :  { %5189 = vst [vmem:[%s8034_s4 + $0x30] sm:$0xff] %v4450_v34   ;;  %v3517_v40 = vadd.f32 %v3516_v21, %v3262_v36  ;;  %v5123_v21 = vld [vmem:[%s8031_s0 + $0x218] sm:$0xff]   ;;  %v1085_v23 = vmax.f32 %v829_v10, 0.0  ;;  %v4180_v10 = vunpack.c.h.bf16 %v5124_v2 }
  0xf6   :  { %v4175_v26 = vunpack.c.l.bf16 %v5123_v21  ;;  %v4176_v27 = vunpack.c.h.bf16 %v5123_v21 }
  0xf7   :  { %3819 = vmatmul.msk.bf16.gmra.mxu1 %vm1442_vm0, %v1350_v25  ;;  %v1324_v31 = vpack.c.bf16 %v1085_v23, %v1084_v20  ;;  %v673_v15 = vmul.f32 %v5375_v8, %v4180_v10 }
  0xf8   :  { %v670_v28 = vmul.f32 %v5375_v8, %v4175_v26  ;;  %v671_v30 = vmul.f32 %v5375_v8, %v4176_v27 }
  0xf9   :  { %v933_v21 = vadd.f32 %v5380_v9, %v673_v15 }
  0xfa   :  { %v1871_v53 = vpop.f32.mrf.mxu0  ;;  %v930_v34 = vadd.f32 %v5380_v9, %v670_v28  ;;  %v931_v37 = vadd.f32 %v5380_v9, %v671_v30 }
  0xfb   :  { %v3001_v57 = vadd.f32 %v3000_v35, %v1871_v53  ;;  %v3263_v58 = vmul.f32 %v1871_v53, %v1871_v53  ;;  %v5679_v36 = vpop.f32.mrf.mxu1  ;;  %v1189_v28 = vmax.f32 %v933_v21, 0.0 }
  0xfc   :  { %v4590_v41 = vpack.c.bf16 %v5679_v36, %v5664_v14  ;;  %v1186_v43 = vmax.f32 %v930_v34, 0.0  ;;  %v1187_v44 = vmax.f32 %v931_v37, 0.0  ;;  %v5733_v37 = vld [vmem:[%s8032_s1] ss:$0 sm:$0xff] }
  0xfd   :  { %v3518_v0 = vadd.f32 %v3517_v40, %v3263_v58  ;;  %3792 = vmatmul.msk.bf16.gmra.mxu0 %vm1442_vm0, %v1323_v49 }
  0xfe   :  { %5217 = vst [vmem:[%s8034_s4 + $0x110] sm:$0xff] %v4590_v41   ;;  %v1375_v49 = vpack.c.bf16 %v1187_v44, %v1186_v43 }
 0x100   :  { %3844 = vmatmul.msk.bf16.gmra.mxu2 %vm1442_vm0, %v1375_v49 }
 0x102   :  { %v1873_v13 = vpop.f32.mrf.mxu0 }
 0x103   :  { %v4455_v16 = vpack.c.bf16 %v1873_v13, %v1871_v53  ;;  %v3002_v17 = vadd.f32 %v3001_v57, %v1873_v13  ;;  %v3264_v18 = vmul.f32 %v1873_v13, %v1873_v13  ;;  %v830_v53 = vadd.f32 %v5380_v9, %v570_v42  ;;  %v5700_v59 = vpop.f32.mrf.mxu1 }
 0x104   :  { %v883_v57 = vadd.f32 %v5380_v9, %v623_v51  ;;  %v3979_v13 = vunpack.c.l.bf16 %v5074_v5 }
 0x105   :  { %5190 = vst [vmem:[%s8034_s4 + $0x38] sm:$0xff] %v4455_v16   ;;  %v3519_v22 = vadd.f32 %v3518_v0, %v3264_v18  ;;  %v1086_v1 = vmax.f32 %v830_v53, 0.0  ;;  %v932_v18 = vadd.f32 %v5380_v9, %v672_v12 }
 0x106   :  { %v1139_v0 = vmax.f32 %v883_v57, 0.0  ;;  %v572_v26 = vmul.f32 %v5375_v8, %v3979_v13  ;;  %v4183_v57 = vunpack.c.l.bf16 %v5125_v50 }
 0x107   :  { %v1325_v16 = vpack.c.bf16 %v1087_v4, %v1086_v1  ;;  %v1188_v27 = vmax.f32 %v932_v18, 0.0 }
 0x108   :  { %v1351_v6 = vpack.c.bf16 %v1139_v0, %v1138_v60  ;;  %v674_v60 = vmul.f32 %v5733_v37, %v4183_v57  ;;  %v3984_v0 = vunpack.c.h.bf16 %v5075_v55  ;;  %v5102_v57 = vld [vmem:[%s8031_s0 + $0x170] sm:$0xff]  }
 0x109   :  { %v1376_v34 = vpack.c.bf16 %v1189_v28, %v1188_v27 }
 0x10a   :  { %v1876_v35 = vpop.f32.mrf.mxu0  ;;  %3820 = vmatmul.msk.bf16.gmra.mxu1 %vm1442_vm0, %v1351_v6  ;;  %v575_v18 = vmul.f32 %v5733_v37, %v3984_v0 }
 0x10b   :  { %v3003_v39 = vadd.f32 %v3002_v17, %v1876_v35  ;;  %v3265_v40 = vmul.f32 %v1876_v35, %v1876_v35  ;;  %v3980_v17 = vunpack.c.h.bf16 %v5074_v5  ;;  %v5715_v20 = vpop.f32.mrf.mxu1  ;;  %v5101_v5 = vld [vmem:[%s8031_s0 + $0x168] sm:$0xff]  }
 0x10c   :  { %v4595_v25 = vpack.c.bf16 %v5715_v20, %v5700_v59 }
 0x10d   :  { %v3520_v46 = vadd.f32 %v3519_v22, %v3265_v40  ;;  %3793 = vmatmul.msk.bf16.gmra.mxu0 %vm1442_vm0, %v1324_v31  ;;  %v5100_v22 = vld [vmem:[%s8031_s0 + $0x160] sm:$0xff]   ;;  %v573_v31 = vmul.f32 %v5375_v8, %v3980_v17 }
 0x10e   :  { %v4083_v29 = vunpack.c.l.bf16 %v5100_v22  ;;  %5218 = vst [vmem:[%s8034_s4 + $0x118] sm:$0xff] %v4595_v25   ;;  %v4084_v33 = vunpack.c.h.bf16 %v5100_v22  ;;  %v5741_v40 = vld [vmem:[%s8033_s2] ss:$0 sm:$0xff] }
 0x10f   :  { %v934_v1 = vadd.f32 %v5741_v40, %v674_v60 }
 0x110   :  { %v625_v38 = vmul.f32 %v5733_v37, %v4084_v33  ;;  %3845 = vmatmul.msk.bf16.gmra.mxu2 %vm1442_vm0, %v1376_v34 }
 0x111   :  { %v1190_v13 = vmax.f32 %v934_v1, 0.0  ;;  %v4091_v1 = vunpack.c.l.bf16 %v5102_v57 }
 0x112   :  { %v1878_v58 = vpop.f32.mrf.mxu0  ;;  %v885_v42 = vadd.f32 %v5741_v40, %v625_v38 }
 0x113   :  { %v4460_v61 = vpack.c.bf16 %v1878_v58, %v1876_v35  ;;  %v3004_v62 = vadd.f32 %v3003_v39, %v1878_v58  ;;  %v3266_v63 = vmul.f32 %v1878_v58, %v1878_v58  ;;  %v624_v35 = vmul.f32 %v5375_v8, %v4083_v29  ;;  %v5746_v44 = vpop.f32.mrf.mxu1 }
 0x114   :  { %v832_v39 = vadd.f32 %v5380_v9, %v572_v26  ;;  %v833_v8 = vadd.f32 %v5741_v40, %v573_v31  ;;  %v1141_v48 = vmax.f32 %v885_v42, 0.0  ;;  %v4184_v58 = vunpack.c.h.bf16 %v5125_v50  ;;  %v5076_v42 = vld [vmem:[%s8031_s0 + $0xa0] sm:$0xff]  }
 0x115   :  { %5191 = vst [vmem:[%s8034_s4 + $0x40] sm:$0xff] %v4460_v61   ;;  %v3521_v3 = vadd.f32 %v3520_v46, %v3266_v63  ;;  %v884_v41 = vadd.f32 %v5741_v40, %v624_v35  ;;  %v3983_v61 = vunpack.c.l.bf16 %v5075_v55  ;;  %v835_v26 = vadd.f32 %v5741_v40, %v575_v18 }
 0x116   :  { %v1088_v49 = vmax.f32 %v832_v39, 0.0  ;;  %v1089_v53 = vmax.f32 %v833_v8, 0.0  ;;  %v5126_v39 = vld [vmem:[%s8031_s0 + $0x230] sm:$0xff]   ;;  %v3988_v50 = vunpack.c.h.bf16 %v5076_v42 }
 0x117   :  { %v1140_v45 = vmax.f32 %v884_v41, 0.0  ;;  %v574_v12 = vmul.f32 %v5733_v37, %v3983_v61  ;;  %v1091_v8 = vmax.f32 %v835_v26, 0.0  ;;  %v5127_v26 = vld [vmem:[%s8031_s0 + $0x238] sm:$0xff]  }
 0x118   :  { %v1326_v63 = vpack.c.bf16 %v1089_v53, %v1088_v49 }
 0x119   :  { %v1352_v56 = vpack.c.bf16 %v1141_v48, %v1140_v45  ;;  %v4187_v45 = vunpack.c.l.bf16 %v5126_v39 }
 0x11a   :  { %v1881_v19 = vpop.f32.mrf.mxu0 }
 0x11b   :  { %v3005_v23 = vadd.f32 %v3004_v62, %v1881_v19  ;;  %v3267_v24 = vmul.f32 %v1881_v19, %v1881_v19  ;;  %3821 = vmatmul.msk.bf16.gmra.mxu1 %vm1442_vm0, %v1352_v56  ;;  %v675_v62 = vmul.f32 %v5733_v37, %v4184_v58 }
 0x11d   :  { %v3522_v30 = vadd.f32 %v3521_v3, %v3267_v24  ;;  %3794 = vmatmul.msk.bf16.gmra.mxu0 %vm1442_vm0, %v1325_v16  ;;  %v5761_v3 = vpop.f32.mrf.mxu1  ;;  %v935_v4 = vadd.f32 %v5741_v40, %v675_v62  ;;  %v4087_v16 = vunpack.c.l.bf16 %v5101_v5  ;;  %v834_v24 = vadd.f32 %v5741_v40, %v574_v12 }
 0x11e   :  { %v4600_v10 = vpack.c.bf16 %v5761_v3, %v5746_v44 }
 0x11f   :  { %v1191_v15 = vmax.f32 %v935_v4, 0.0  ;;  %v626_v22 = vmul.f32 %v5733_v37, %v4087_v16  ;;  %v1090_v38 = vmax.f32 %v834_v24, 0.0  ;;  %v577_v4 = vmul.f32 %v5733_v37, %v3988_v50 }
 0x120   :  { %5219 = vst [vmem:[%s8034_s4 + $0x120] sm:$0xff] %v4600_v10  }
 0x121   :  { %v1377_v21 = vpack.c.bf16 %v1191_v15, %v1190_v13  ;;  %v886_v25 = vadd.f32 %v5741_v40, %v626_v22  ;;  %v1327_v49 = vpack.c.bf16 %v1091_v8, %v1090_v38  ;;  %v837_v15 = vadd.f32 %v5741_v40, %v577_v4 }
 0x122   :  { %v1883_v43 = vpop.f32.mrf.mxu0 }
 0x123   :  { %v4465_v46 = vpack.c.bf16 %v1883_v43, %v1881_v19  ;;  %v3006_v47 = vadd.f32 %v3005_v23, %v1883_v43  ;;  %v3268_v9 = vmul.f32 %v1883_v43, %v1883_v43  ;;  %v4088_v19 = vunpack.c.h.bf16 %v5101_v5  ;;  %3846 = vmatmul.msk.bf16.gmra.mxu2 %vm1442_vm0, %v1377_v21 }
 0x124   :  { %v4092_v5 = vunpack.c.h.bf16 %v5102_v57 }
 0x125   :  { %5192 = vst [vmem:[%s8034_s4 + $0x48] sm:$0xff] %v4465_v46   ;;  %v3523_v51 = vadd.f32 %v3522_v30, %v3268_v9  ;;  %v627_v23 = vmul.f32 %v5733_v37, %v4088_v19  ;;  %v5782_v29 = vpop.f32.mrf.mxu1  ;;  %v1142_v30 = vmax.f32 %v886_v25, 0.0  ;;  %v4188_v46 = vunpack.c.h.bf16 %v5126_v39 }
 0x126   :  { %v3987_v9 = vunpack.c.l.bf16 %v5076_v42  ;;  %v629_v10 = vmul.f32 %v5733_v37, %v4092_v5 }
 0x127   :  { %v887_v27 = vadd.f32 %v5741_v40, %v627_v23  ;;  %v677_v48 = vmul.f32 %v5733_v37, %v4188_v46 }
 0x128   :  { %v576_v62 = vmul.f32 %v5733_v37, %v3987_v9  ;;  %v889_v16 = vadd.f32 %v5741_v40, %v629_v10 }
 0x129   :  { %v1143_v35 = vmax.f32 %v887_v27, 0.0  ;;  %v937_v56 = vadd.f32 %v5741_v40, %v677_v48 }
 0x12a   :  { %v1886_v2 = vpop.f32.mrf.mxu0  ;;  %v836_v12 = vadd.f32 %v5741_v40, %v576_v62  ;;  %v1145_v24 = vmax.f32 %v889_v16, 0.0 }
 0x12b   :  { %v3007_v6 = vadd.f32 %v3006_v47, %v1886_v2  ;;  %v3269_v7 = vmul.f32 %v1886_v2, %v1886_v2  ;;  %v1353_v43 = vpack.c.bf16 %v1143_v35, %v1142_v30  ;;  %v676_v47 = vmul.f32 %v5733_v37, %v4187_v45  ;;  %v5077_v30 = vld [vmem:[%s8031_s0 + $0xa8] sm:$0xff]  }
 0x12c   :  { %v1193_v0 = vmax.f32 %v937_v56, 0.0  ;;  %v1092_v25 = vmax.f32 %v836_v12, 0.0  ;;  %v3991_v38 = vunpack.c.l.bf16 %v5077_v30  ;;  %v3992_v8 = vunpack.c.h.bf16 %v5077_v30 }
 0x12d   :  { %v3524_v17 = vadd.f32 %v3523_v51, %v3269_v7  ;;  %3795 = vmatmul.msk.bf16.gmra.mxu0 %vm1442_vm0, %v1326_v63  ;;  %3822 = vmatmul.msk.bf16.gmra.mxu1 %vm1442_vm0, %v1353_v43  ;;  %v936_v51 = vadd.f32 %v5741_v40, %v676_v47  ;;  %v5797_v55 = vpop.f32.mrf.mxu1  ;;  %v628_v7 = vmul.f32 %v5733_v37, %v4091_v1  ;;  %v5103_v47 = vld [vmem:[%s8031_s0 + $0x178] sm:$0xff]  }
 0x12e   :  { %v4605_v61 = vpack.c.bf16 %v5797_v55, %v5782_v29  ;;  %v578_v50 = vmul.f32 %v5733_v37, %v3991_v38  ;;  %v4095_v56 = vunpack.c.l.bf16 %v5103_v47 }
 0x12f   :  { %v1192_v63 = vmax.f32 %v936_v51, 0.0  ;;  %v888_v13 = vadd.f32 %v5741_v40, %v628_v7 }
 0x130   :  { %5220 = vst [vmem:[%s8034_s4 + $0x128] sm:$0xff] %v4605_v61   ;;  %v630_v62 = vmul.f32 %v5733_v37, %v4095_v56 }
 0x131   :  { %v1144_v19 = vmax.f32 %v888_v13, 0.0 }
 0x132   :  { %v1888_v28 = vpop.f32.mrf.mxu0  ;;  %v890_v1 = vadd.f32 %v5741_v40, %v630_v62 }
 0x133   :  { %v4470_v31 = vpack.c.bf16 %v1888_v28, %v1886_v2  ;;  %v3008_v33 = vadd.f32 %v3007_v6, %v1888_v28  ;;  %v3270_v34 = vmul.f32 %v1888_v28, %v1888_v28  ;;  %v1378_v6 = vpack.c.bf16 %v1193_v0, %v1192_v63 }
 0x134   :  { %v1093_v28 = vmax.f32 %v837_v15, 0.0  ;;  %v838_v0 = vadd.f32 %v5741_v40, %v578_v50  ;;  %v1146_v7 = vmax.f32 %v890_v1, 0.0 }
 0x135   :  { %5193 = vst [vmem:[%s8034_s4 + $0x50] sm:$0xff] %v4470_v31   ;;  %v3525_v41 = vadd.f32 %v3524_v17, %v3270_v34  ;;  %3847 = vmatmul.msk.bf16.gmra.mxu2 %vm1442_vm0, %v1378_v6  ;;  %v5818_v18 = vpop.f32.mrf.mxu1  ;;  %v1354_v31 = vpack.c.bf16 %v1145_v24, %v1144_v19  ;;  %v4192_v34 = vunpack.c.h.bf16 %v5127_v26  ;;  %v5128_v19 = vld [vmem:[%s8031_s0 + $0x240] sm:$0xff]  }
 0x136   :  { %v1094_v16 = vmax.f32 %v838_v0, 0.0 }
 0x137   :  { %v679_v39 = vmul.f32 %v5733_v37, %v4192_v34 }
 0x139   :  { %v939_v46 = vadd.f32 %v5741_v40, %v679_v39 }
 0x13a   :  { %v1891_v53 = vpop.f32.mrf.mxu0 }
 0x13b   :  { %v3009_v58 = vadd.f32 %v3008_v33, %v1891_v53  ;;  %v3271_v60 = vmul.f32 %v1891_v53, %v1891_v53  ;;  %v4191_v33 = vunpack.c.l.bf16 %v5127_v26  ;;  %v4196_v26 = vunpack.c.h.bf16 %v5128_v19 }
 0x13d   :  { %v3526_v2 = vadd.f32 %v3525_v41, %v3271_v60  ;;  %3796 = vmatmul.msk.bf16.gmra.mxu0 %vm1442_vm0, %v1327_v49  ;;  %3823 = vmatmul.msk.bf16.gmra.mxu1 %vm1442_vm0, %v1354_v31  ;;  %v678_v35 = vmul.f32 %v5733_v37, %v4191_v33  ;;  %v1328_v41 = vpack.c.bf16 %v1093_v28, %v1092_v25  ;;  %v5833_v45 = vpop.f32.mrf.mxu1  ;;  %v4096_v60 = vunpack.c.h.bf16 %v5103_v47  ;;  %v5104_v47 = vld [vmem:[%s8031_s0 + $0x180] sm:$0xff]  }
 0x13e   :  { %v4610_v49 = vpack.c.bf16 %v5833_v45, %v5818_v18  ;;  %v4195_v25 = vunpack.c.l.bf16 %v5128_v19  ;;  %v681_v34 = vmul.f32 %v5733_v37, %v4196_v26  ;;  %v4100_v62 = vunpack.c.h.bf16 %v5104_v47 }
 0x13f   :  { %v938_v42 = vadd.f32 %v5741_v40, %v678_v35  ;;  %v631_v63 = vmul.f32 %v5733_v37, %v4096_v60 }
 0x140   :  { %5221 = vst [vmem:[%s8034_s4 + $0x130] sm:$0xff] %v4610_v49   ;;  %v680_v30 = vmul.f32 %v5733_v37, %v4195_v25  ;;  %v5153_v25 = vld [vmem:[%s8031_s0 + $0x308] sm:$0xff]  }
 0x141   :  { %v1194_v51 = vmax.f32 %v938_v42, 0.0  ;;  %v891_v4 = vadd.f32 %v5741_v40, %v631_v63 }
 0x142   :  { %v1893_v17 = vpop.f32.mrf.mxu0  ;;  %v940_v39 = vadd.f32 %v5741_v40, %v680_v30  ;;  %v5079_v30 = vld [vmem:[%s8031_s0 + $0xb8] sm:$0xff]  }
 0x143   :  { %v4475_v21 = vpack.c.bf16 %v1893_v17, %v1891_v53  ;;  %v3010_v22 = vadd.f32 %v3009_v58, %v1893_v17  ;;  %v3272_v23 = vmul.f32 %v1893_v17, %v1893_v17  ;;  %v1195_v53 = vmax.f32 %v939_v46, 0.0  ;;  %v5078_v17 = vld [vmem:[%s8031_s0 + $0xb0] sm:$0xff]  }
 0x144   :  { %v579_v58 = vmul.f32 %v5733_v37, %v3992_v8  ;;  %v1147_v15 = vmax.f32 %v891_v4, 0.0  ;;  %v3995_v28 = vunpack.c.l.bf16 %v5078_v17  ;;  %v3996_v33 = vunpack.c.h.bf16 %v5078_v17 }
 0x145   :  { %5194 = vst [vmem:[%s8034_s4 + $0x58] sm:$0xff] %v4475_v21   ;;  %v3527_v27 = vadd.f32 %v3526_v2, %v3272_v23  ;;  %v1379_v61 = vpack.c.bf16 %v1195_v53, %v1194_v51  ;;  %v5854_v6 = vpop.f32.mrf.mxu1  ;;  %v5152_v21 = vld [vmem:[%s8031_s0 + $0x300] sm:$0xff]   ;;  %v1196_v53 = vmax.f32 %v940_v39, 0.0  ;;  %v4296_v39 = vunpack.c.h.bf16 %v5153_v25 }
 0x146   :  { %v839_v2 = vadd.f32 %v5741_v40, %v579_v58  ;;  %v1355_v24 = vpack.c.bf16 %v1147_v15, %v1146_v7  ;;  %v4292_v31 = vunpack.c.h.bf16 %v5152_v21  ;;  %v580_v49 = vmul.f32 %v5733_v37, %v3995_v28 }
 0x147   :  { %3848 = vmatmul.msk.bf16.gmra.mxu2 %vm1442_vm0, %v1379_v61  ;;  %v581_v51 = vmul.f32 %v5733_v37, %v3996_v33  ;;  %v4099_v61 = vunpack.c.l.bf16 %v5104_v47 }
 0x148   :  { %v1095_v23 = vmax.f32 %v839_v2, 0.0  ;;  %v633_v2 = vmul.f32 %v5733_v37, %v4100_v62 }
 0x149   :  { %v632_v1 = vmul.f32 %v5733_v37, %v4099_v61  ;;  %v841_v7 = vadd.f32 %v5741_v40, %v581_v51 }
 0x14a   :  { %v1896_v43 = vpop.f32.mrf.mxu0  ;;  %v1329_v38 = vpack.c.bf16 %v1095_v23, %v1094_v16 }
 0x14b   :  { %v3011_v9 = vadd.f32 %v3010_v22, %v1896_v43  ;;  %v3273_v48 = vmul.f32 %v1896_v43, %v1896_v43  ;;  %v1097_v28 = vmax.f32 %v841_v7, 0.0 }
 0x14d   :  { %v3528_v57 = vadd.f32 %v3527_v27, %v3273_v48  ;;  %3797 = vmatmul.msk.bf16.gmra.mxu0 %vm1442_vm0, %v1328_v41  ;;  %v4291_v27 = vunpack.c.l.bf16 %v5152_v21  ;;  %3824 = vmatmul.msk.bf16.gmra.mxu1 %vm1442_vm0, %v1355_v24  ;;  %v729_v41 = vmul.f32 %v5733_v37, %v4292_v31  ;;  %v5874_v42 = vpop.f32.mrf.mxu1  ;;  %v5898_v15 = vpop.f32.mrf.mxu2  ;;  %v5129_v24 = vld [vmem:[%s8031_s0 + $0x248] sm:$0xff]  }
 0x14e   :  { %v4615_v50 = vpack.c.bf16 %v5874_v42, %v5854_v6  ;;  %8190 = vst [vmem:[#allocation2_spill] sm:$0xff] %v5898_v15  ;;  %v4199_v31 = vunpack.c.l.bf16 %v5129_v24 }
 0x14f   :  { %v728_v35 = vmul.f32 %v5733_v37, %v4291_v27 }
 0x150   :  { %5222 = vst [vmem:[%s8034_s4 + $0x138] sm:$0xff] %v4615_v50  }
 0x151   :  { %v988_v46 = vadd.f32 %v5741_v40, %v728_v35  ;;  %v682_v35 = vmul.f32 %v5733_v37, %v4199_v31 }
 0x152   :  { %v1898_v5 = vpop.f32.mrf.mxu0 }
 0x153   :  { %v4480_v10 = vpack.c.bf16 %v1898_v5, %v1896_v43  ;;  %v3012_v12 = vadd.f32 %v3011_v9, %v1898_v5  ;;  %v3274_v13 = vmul.f32 %v1898_v5, %v1898_v5  ;;  %v941_v43 = vadd.f32 %v5741_v40, %v681_v34 }
 0x154   :  { %v1244_v60 = vmax.f32 %v988_v46, 0.0  ;;  %v840_v5 = vadd.f32 %v5741_v40, %v580_v49  ;;  %v4200_v34 = vunpack.c.h.bf16 %v5129_v24  ;;  %v942_v47 = vadd.f32 %v5741_v40, %v682_v35 }
 0x155   :  { %5195 = vst [vmem:[%s8034_s4 + $0x60] sm:$0xff] %v4480_v10   ;;  %v3529_v22 = vadd.f32 %v3528_v57, %v3274_v13  ;;  %v1197_v56 = vmax.f32 %v941_v43, 0.0  ;;  %v989_v57 = vadd.f32 %v5741_v40, %v729_v41  ;;  %v892_v10 = vadd.f32 %v5741_v40, %v632_v1  ;;  %v5900_v21 = vpop.f32.mrf.mxu1  ;;  %v5920_v50 = vpop.f32.mrf.mxu2 }
 0x156   :  { %v1096_v27 = vmax.f32 %v840_v5, 0.0  ;;  %v3999_v41 = vunpack.c.l.bf16 %v5079_v30  ;;  %v683_v43 = vmul.f32 %v5733_v37, %v4200_v34  ;;  %8191 = vst [vmem:[#allocation3_spill] sm:$0xff] %v5920_v50 }
 0x157   :  { %v1380_v63 = vpack.c.bf16 %v1197_v56, %v1196_v53  ;;  %v1245_v0 = vmax.f32 %v989_v57, 0.0 }
 0x158   :  { %v1330_v46 = vpack.c.bf16 %v1097_v28, %v1096_v27  ;;  %v943_v51 = vadd.f32 %v5741_v40, %v683_v43  ;;  %v582_v61 = vmul.f32 %v5733_v37, %v3999_v41  ;;  %v5154_v41 = vld [vmem:[%s8031_s0 + $0x310] sm:$0xff]  }
 0x159   :  { %3849 = vmatmul.msk.bf16.gmra.mxu2 %vm1442_vm0, %v1380_v63  ;;  %v1404_v4 = vpack.c.bf16 %v1245_v0, %v1244_v60  ;;  %v5105_v60 = vld [vmem:[%s8031_s0 + $0x188] sm:$0xff]   ;;  %v1198_v0 = vmax.f32 %v942_v47, 0.0  ;;  %v5080_v47 = vld [vmem:[%s8031_s0 + $0xc0] sm:$0xff]  }
 0x15a   :  { %v1901_v8 = vpop.f32.mrf.mxu0  ;;  %v4103_v7 = vunpack.c.l.bf16 %v5105_v60 }
 0x15b   :  { %v3013_v9 = vadd.f32 %v3012_v12, %v1901_v8  ;;  %v3275_v48 = vmul.f32 %v1901_v8, %v1901_v8  ;;  %v893_v12 = vadd.f32 %v5741_v40, %v633_v2  ;;  %3873 = vmatmul.msk.bf16.vlgmr.msra.gmra.mxu3 %vm1442_vm0, %v1404_v4  ;;  %v1199_v2 = vmax.f32 %v943_v51, 0.0 }
 0x15c   :  { %v4299_v51 = vunpack.c.l.bf16 %v5154_v41 }
 0x15d   :  { %v3530_v58 = vadd.f32 %v3529_v22, %v3275_v48  ;;  %3798 = vmatmul.msk.bf16.gmra.mxu0 %vm1442_vm0, %v1329_v38  ;;  %v1148_v22 = vmax.f32 %v892_v10, 0.0  ;;  %v1149_v23 = vmax.f32 %v893_v12, 0.0  ;;  %v4295_v38 = vunpack.c.l.bf16 %v5153_v25  ;;  %v5923_v57 = vpop.f32.mrf.mxu1 }
 0x15e   :  { %v731_v48 = vmul.f32 %v5733_v37, %v4296_v39  ;;  %v4620_v63 = vpack.c.bf16 %v5923_v57, %v5900_v21  ;;  %v4104_v10 = vunpack.c.h.bf16 %v5105_v60  ;;  %v1381_v12 = vpack.c.bf16 %v1199_v2, %v1198_v0  ;;  %v5130_v39 = vld [vmem:[%s8031_s0 + $0x250] sm:$0xff]  }
 0x15f   :  { %v1356_v33 = vpack.c.bf16 %v1149_v23, %v1148_v22  ;;  %v842_v22 = vadd.f32 %v5741_v40, %v582_v61 }
 0x160   :  { %v991_v5 = vadd.f32 %v5741_v40, %v731_v48  ;;  %5223 = vst [vmem:[%s8034_s4 + $0x140] sm:$0xff] %v4620_v63   ;;  %v4203_v48 = vunpack.c.l.bf16 %v5130_v39  ;;  %v732_v63 = vmul.f32 %v5733_v37, %v4299_v51 }
 0x161   :  { %3825 = vmatmul.msk.bf16.gmra.mxu1 %vm1442_vm0, %v1356_v33  ;;  %v5951_v33 = vpop.f32.mrf.mxu2  ;;  %v1098_v43 = vmax.f32 %v842_v22, 0.0 }
 0x162   :  { %v1903_v13 = vpop.f32.mrf.mxu0  ;;  %8192 = vst [vmem:[#allocation4_spill] sm:$0xff] %v5951_v33 }
 0x163   :  { %v4485_v16 = vpack.c.bf16 %v1903_v13, %v1901_v8  ;;  %v3014_v17 = vadd.f32 %v3013_v9, %v1903_v13  ;;  %v3276_v19 = vmul.f32 %v1903_v13, %v1903_v13  ;;  %v4000_v8 = vunpack.c.h.bf16 %v5079_v30 }
 0x164   :  { %v730_v9 = vmul.f32 %v5733_v37, %v4295_v38 }
 0x165   :  { %5196 = vst [vmem:[%s8034_s4 + $0x68] sm:$0xff] %v4485_v16   ;;  %v3531_v26 = vadd.f32 %v3530_v58, %v3276_v19  ;;  %v4740_v58 = vpack.c.bf16 %v5920_v50, %v5898_v15  ;;  %v583_v62 = vmul.f32 %v5733_v37, %v4000_v8  ;;  %v1247_v16 = vmax.f32 %v991_v5, 0.0  ;;  %v5953_v34 = vpop.f32.mrf.mxu1 }
 0x166   :  { %v990_v4 = vadd.f32 %v5741_v40, %v730_v9  ;;  %v635_v19 = vmul.f32 %v5733_v37, %v4104_v10 }
 0x167   :  { %5247 = vst [vmem:[%s8034_s4 + $0x200] sm:$0xff] %v4740_v58   ;;  %v843_v23 = vadd.f32 %v5741_v40, %v583_v62  ;;  %v684_v58 = vmul.f32 %v5733_v37, %v4203_v48  ;;  %v4004_v62 = vunpack.c.h.bf16 %v5080_v47 }
 0x168   :  { %v1246_v13 = vmax.f32 %v990_v4, 0.0  ;;  %v895_v27 = vadd.f32 %v5741_v40, %v635_v19 }
 0x169   :  { %3850 = vmatmul.msk.bf16.gmra.mxu2 %vm1442_vm0, %v1381_v12  ;;  %v944_v2 = vadd.f32 %v5741_v40, %v684_v58  ;;  %v5974_v10 = vpop.f32.mrf.mxu2  ;;  %v992_v12 = vadd.f32 %v5741_v40, %v732_v63  ;;  %v5155_v63 = vld [vmem:[%s8031_s0 + $0x318] sm:$0xff]  }
 0x16a   :  { %v1906_v49 = vpop.f32.mrf.mxu0  ;;  %v1405_v24 = vpack.c.bf16 %v1247_v16, %v1246_v13  ;;  %v1151_v38 = vmax.f32 %v895_v27, 0.0  ;;  %8193 = vst [vmem:[#allocation5_spill] sm:$0xff] %v5974_v10  ;;  %v5106_v16 = vld [vmem:[%s8031_s0 + $0x190] sm:$0xff]   ;;  %v4745_v22 = vpack.c.bf16 %v5974_v10, %v5951_v33 }
 0x16b   :  { %v3015_v53 = vadd.f32 %v3014_v17, %v1906_v49  ;;  %v3277_v56 = vmul.f32 %v1906_v49, %v1906_v49  ;;  %v634_v17 = vmul.f32 %v5733_v37, %v4103_v7 }
 0x16c   :  { %3874 = vmatmul.msk.bf16.gmra.mxu3 %vm1442_vm0, %v1405_v24  ;;  %5248 = vst [vmem:[%s8034_s4 + $0x208] sm:$0xff] %v4745_v22  }
 0x16d   :  { %v3532_v1 = vadd.f32 %v3531_v26, %v3277_v56  ;;  %3799 = vmatmul.msk.bf16.gmra.mxu0 %vm1442_vm0, %v1330_v46  ;;  %v894_v26 = vadd.f32 %v5741_v40, %v634_v17  ;;  %v1099_v46 = vmax.f32 %v843_v23, 0.0  ;;  %v4003_v56 = vunpack.c.l.bf16 %v5080_v47  ;;  %v5982_v19 = vpop.f32.mrf.mxu1 }
 0x16e   :  { %v1200_v23 = vmax.f32 %v944_v2, 0.0 }
 0x16f   :  { %v1150_v35 = vmax.f32 %v894_v26, 0.0  ;;  %v1331_v61 = vpack.c.bf16 %v1099_v46, %v1098_v43  ;;  %v584_v17 = vmul.f32 %v5733_v37, %v4003_v56  ;;  %v4625_v26 = vpack.c.bf16 %v5982_v19, %v5953_v34 }
 0x171   :  { %v1357_v9 = vpack.c.bf16 %v1151_v38, %v1150_v35  ;;  %v4108_v35 = vunpack.c.h.bf16 %v5106_v16  ;;  %5224 = vst [vmem:[%s8034_s4 + $0x148] sm:$0xff] %v4625_v26   ;;  %v844_v43 = vadd.f32 %v5741_v40, %v584_v17  ;;  %v6004_v56 = vpop.f32.mrf.mxu2 }
 0x172   :  { %v1908_v25 = vpop.f32.mrf.mxu0  ;;  %8194 = vst [vmem:[#allocation6_spill] sm:$0xff] %v6004_v56 }
 0x173   :  { %v4490_v28 = vpack.c.bf16 %v1908_v25, %v1906_v49  ;;  %v3016_v30 = vadd.f32 %v3015_v53, %v1908_v25  ;;  %v3278_v31 = vmul.f32 %v1908_v25, %v1908_v25  ;;  %v4204_v49 = vunpack.c.h.bf16 %v5130_v39  ;;  %3826 = vmatmul.msk.bf16.gmra.mxu1 %vm1442_vm0, %v1357_v9 }
 0x174   :  { %v4300_v53 = vunpack.c.h.bf16 %v5154_v41  ;;  %v585_v25 = vmul.f32 %v5733_v37, %v4004_v62  ;;  %v5131_v62 = vld [vmem:[%s8031_s0 + $0x258] sm:$0xff]  }
 0x175   :  { %5197 = vst [vmem:[%s8034_s4 + $0x70] sm:$0xff] %v4490_v28   ;;  %v3533_v8 = vadd.f32 %v3532_v1, %v3278_v31  ;;  %v685_v60 = vmul.f32 %v5733_v37, %v4204_v49  ;;  %v1248_v28 = vmax.f32 %v992_v12, 0.0  ;;  %v4107_v31 = vunpack.c.l.bf16 %v5106_v16  ;;  %v6006_v58 = vpop.f32.mrf.mxu1 }
 0x176   :  { %v733_v0 = vmul.f32 %v5733_v37, %v4300_v53  ;;  %v845_v46 = vadd.f32 %v5741_v40, %v585_v25  ;;  %v4208_v12 = vunpack.c.h.bf16 %v5131_v62  ;;  %v4304_v16 = vunpack.c.h.bf16 %v5155_v63 }
 0x177   :  { %v945_v4 = vadd.f32 %v5741_v40, %v685_v60  ;;  %v636_v41 = vmul.f32 %v5733_v37, %v4107_v31 }
 0x178   :  { %v993_v13 = vadd.f32 %v5741_v40, %v733_v0  ;;  %v1101_v2 = vmax.f32 %v845_v46, 0.0 }
 0x179   :  { %v1201_v27 = vmax.f32 %v945_v4, 0.0  ;;  %v896_v9 = vadd.f32 %v5741_v40, %v636_v41  ;;  %v5081_v4 = vld [vmem:[%s8031_s0 + $0xc8] sm:$0xff]  }
 0x17a   :  { %v1911_v1 = vpop.f32.mrf.mxu0  ;;  %v4007_v17 = vunpack.c.l.bf16 %v5081_v4 }
 0x17b   :  { %v3017_v5 = vadd.f32 %v3016_v30, %v1911_v1  ;;  %v3279_v7 = vmul.f32 %v1911_v1, %v1911_v1  ;;  %v1249_v30 = vmax.f32 %v993_v13, 0.0  ;;  %v1382_v38 = vpack.c.bf16 %v1201_v27, %v1200_v23 }
 0x17c   :  { %v1152_v60 = vmax.f32 %v896_v9, 0.0  ;;  %v4303_v13 = vunpack.c.l.bf16 %v5155_v63  ;;  %v687_v23 = vmul.f32 %v5733_v37, %v4208_v12  ;;  %v735_v27 = vmul.f32 %v5733_v37, %v4304_v16 }
 0x17d   :  { %v3534_v24 = vadd.f32 %v3533_v8, %v3279_v7  ;;  %3800 = vmatmul.msk.bf16.gmra.mxu0 %vm1442_vm0, %v1331_v61  ;;  %v1406_v39 = vpack.c.bf16 %v1249_v30, %v1248_v28  ;;  %v637_v8 = vmul.f32 %v5733_v37, %v4108_v35  ;;  %3851 = vmatmul.msk.bf16.gmra.mxu2 %vm1442_vm0, %v1382_v38  ;;  %v4207_v7 = vunpack.c.l.bf16 %v5131_v62 }
 0x17e   :  { %v734_v26 = vmul.f32 %v5733_v37, %v4303_v13  ;;  %v947_v31 = vadd.f32 %v5741_v40, %v687_v23  ;;  %v586_v46 = vmul.f32 %v5733_v37, %v4007_v17 }
 0x17f   :  { %v897_v48 = vadd.f32 %v5741_v40, %v637_v8  ;;  %3875 = vmatmul.msk.bf16.gmra.mxu3 %vm1442_vm0, %v1406_v39  ;;  %v686_v22 = vmul.f32 %v5733_v37, %v4207_v7  ;;  %v6027_v39 = vpop.f32.mrf.mxu2  ;;  %v995_v8 = vadd.f32 %v5741_v40, %v735_v27 }
 0x180   :  { %8195 = vst [vmem:[#allocation7_spill] sm:$0xff] %v6027_v39  ;;  %v994_v41 = vadd.f32 %v5741_v40, %v734_v26  ;;  %v4750_v9 = vpack.c.bf16 %v6027_v39, %v6004_v56  ;;  %v846_v7 = vadd.f32 %v5741_v40, %v586_v46 }
 0x181   :  { %v1153_v61 = vmax.f32 %v897_v48, 0.0  ;;  %v946_v30 = vadd.f32 %v5741_v40, %v686_v22  ;;  %v1251_v62 = vmax.f32 %v995_v8, 0.0  ;;  %v5082_v8 = vld [vmem:[%s8031_s0 + $0xd0] sm:$0xff]  }
 0x182   :  { %v1913_v47 = vpop.f32.mrf.mxu0  ;;  %5249 = vst [vmem:[%s8034_s4 + $0x210] sm:$0xff] %v4750_v9  }
 0x183   :  { %v4495_v49 = vpack.c.bf16 %v1913_v47, %v1911_v1  ;;  %v3018_v51 = vadd.f32 %v3017_v5, %v1913_v47  ;;  %v3280_v53 = vmul.f32 %v1913_v47, %v1913_v47  ;;  %v1100_v1 = vmax.f32 %v844_v43, 0.0  ;;  %v5107_v43 = vld [vmem:[%s8031_s0 + $0x198] sm:$0xff]   ;;  %v6035_v47 = vpop.f32.mrf.mxu1 }
 0x184   :  { %v1358_v5 = vpack.c.bf16 %v1153_v61, %v1152_v60  ;;  %v1202_v48 = vmax.f32 %v946_v30, 0.0  ;;  %v1203_v60 = vmax.f32 %v947_v31, 0.0  ;;  %v1250_v61 = vmax.f32 %v994_v41, 0.0  ;;  %v5132_v31 = vld [vmem:[%s8031_s0 + $0x260] sm:$0xff]  }
 0x185   :  { %5198 = vst [vmem:[%s8034_s4 + $0x78] sm:$0xff] %v4495_v49   ;;  %v3535_v0 = vadd.f32 %v3534_v24, %v3280_v53  ;;  %v1332_v25 = vpack.c.bf16 %v1101_v2, %v1100_v1  ;;  %v4008_v24 = vunpack.c.h.bf16 %v5081_v4  ;;  %v4630_v53 = vpack.c.bf16 %v6035_v47, %v6006_v58 }
 0x186   :  { %3827 = vmatmul.msk.bf16.gmra.mxu1 %vm1442_vm0, %v1358_v5  ;;  %v4111_v63 = vunpack.c.l.bf16 %v5107_v43  ;;  %v4112_v1 = vunpack.c.h.bf16 %v5107_v43  ;;  %v1407_v2 = vpack.c.bf16 %v1251_v62, %v1250_v61  ;;  %v4211_v46 = vunpack.c.l.bf16 %v5132_v31 }
 0x187   :  { %5225 = vst [vmem:[%s8034_s4 + $0x150] sm:$0xff] %v4630_v53   ;;  %v4212_v9 = vunpack.c.h.bf16 %v5132_v31  ;;  %v4011_v53 = vunpack.c.l.bf16 %v5082_v8 }
 0x188   :  { %v638_v4 = vmul.f32 %v5733_v37, %v4111_v63  ;;  %v639_v5 = vmul.f32 %v5733_v37, %v4112_v1 }
 0x189   :  { %v689_v61 = vmul.f32 %v5733_v37, %v4212_v9 }
 0x18a   :  { %v1916_v28 = vpop.f32.mrf.mxu0  ;;  %v898_v16 = vadd.f32 %v5741_v40, %v638_v4  ;;  %v899_v17 = vadd.f32 %v5741_v40, %v639_v5 }
 0x18b   :  { %v3019_v35 = vadd.f32 %v3018_v51, %v1916_v28  ;;  %v3281_v38 = vmul.f32 %v1916_v28, %v1916_v28  ;;  %v587_v51 = vmul.f32 %v5733_v37, %v4008_v24  ;;  %v6057_v24 = vpop.f32.mrf.mxu2  ;;  %v6059_v26 = vpop.f32.mrf.mxu1  ;;  %v949_v4 = vadd.f32 %v5741_v40, %v689_v61 }
 0x18c   :  { %8196 = vst [vmem:[#allocation8_spill] sm:$0xff] %v6057_v24  ;;  %v1154_v27 = vmax.f32 %v898_v16, 0.0  ;;  %v1155_v30 = vmax.f32 %v899_v17, 0.0  ;;  %v5108_v17 = vld [vmem:[%s8031_s0 + $0x1a0] sm:$0xff]  }
 0x18d   :  { %v3536_v49 = vadd.f32 %v3535_v0, %v3281_v38  ;;  %3801 = vmatmul.msk.bf16.gmra.mxu0 %vm1442_vm0, %v1332_v25  ;;  %v1383_v0 = vpack.c.bf16 %v1203_v60, %v1202_v48  ;;  %v847_v12 = vadd.f32 %v5741_v40, %v587_v51  ;;  %v5156_v38 = vld [vmem:[%s8031_s0 + $0x320] sm:$0xff]   ;;  %v688_v60 = vmul.f32 %v5733_v37, %v4211_v46 }
 0x18e   :  { %v1359_v43 = vpack.c.bf16 %v1155_v30, %v1154_v27  ;;  %v4307_v48 = vunpack.c.l.bf16 %v5156_v38  ;;  %v4308_v51 = vunpack.c.h.bf16 %v5156_v38  ;;  %v4116_v46 = vunpack.c.h.bf16 %v5108_v17 }
 0x18f   :  { %3852 = vmatmul.msk.bf16.gmra.mxu2 %vm1442_vm0, %v1383_v0  ;;  %3876 = vmatmul.msk.bf16.gmra.mxu3 %vm1442_vm0, %v1407_v2  ;;  %v1103_v41 = vmax.f32 %v847_v12, 0.0  ;;  %v948_v2 = vadd.f32 %v5741_v40, %v688_v60 }
 0x190   :  { %v736_v63 = vmul.f32 %v5733_v37, %v4307_v48  ;;  %v737_v1 = vmul.f32 %v5733_v37, %v4308_v51  ;;  %v641_v51 = vmul.f32 %v5733_v37, %v4116_v46 }
 0x191   :  { %v1204_v30 = vmax.f32 %v948_v2, 0.0 }
 0x192   :  { %v1918_v13 = vpop.f32.mrf.mxu0  ;;  %v997_v16 = vadd.f32 %v5741_v40, %v737_v1 }
 0x193   :  { %v4500_v22 = vpack.c.bf16 %v1918_v13, %v1916_v28  ;;  %v3282_v23 = vmul.f32 %v1918_v13, %v1918_v13  ;;  %v3020_v25 = vadd.f32 %v3019_v35, %v1918_v13  ;;  %v1102_v35 = vmax.f32 %v846_v7, 0.0  ;;  %v6080_v12 = vpop.f32.mrf.mxu2 }
 0x194   :  { %8197 = vst [vmem:[#allocation9_spill] sm:$0xff] %v6080_v12  ;;  %v996_v13 = vadd.f32 %v5741_v40, %v736_v63  ;;  %v4755_v27 = vpack.c.bf16 %v6080_v12, %v6057_v24 }
 0x195   :  { %5199 = vst [vmem:[%s8034_s4 + $0x80] sm:$0xff] %v4500_v22   ;;  %v3537_v28 = vadd.f32 %v3536_v49, %v3282_v23  ;;  %v1333_v62 = vpack.c.bf16 %v1103_v41, %v1102_v35  ;;  %v4012_v49 = vunpack.c.h.bf16 %v5082_v8  ;;  %v588_v22 = vmul.f32 %v5733_v37, %v4011_v53  ;;  %v6088_v23 = vpop.f32.mrf.mxu1 }
 0x196   :  { %3828 = vmatmul.msk.bf16.gmra.mxu1 %vm1442_vm0, %v1359_v43  ;;  %v4635_v38 = vpack.c.bf16 %v6088_v23, %v6059_v26  ;;  %v1205_v35 = vmax.f32 %v949_v4, 0.0  ;;  %5250 = vst [vmem:[%s8034_s4 + $0x218] sm:$0xff] %v4755_v27   ;;  %v1252_v41 = vmax.f32 %v996_v13, 0.0  ;;  %v1253_v8 = vmax.f32 %v997_v16, 0.0 }
 0x197   :  { %v589_v31 = vmul.f32 %v5733_v37, %v4012_v49  ;;  %v4115_v43 = vunpack.c.l.bf16 %v5108_v17  ;;  %v848_v53 = vadd.f32 %v5741_v40, %v588_v22  ;;  %v901_v49 = vadd.f32 %v5741_v40, %v641_v51  ;;  %v5133_v17 = vld [vmem:[%s8031_s0 + $0x268] sm:$0xff]  }
 0x198   :  { %5226 = vst [vmem:[%s8034_s4 + $0x158] sm:$0xff] %v4635_v38   ;;  %v1408_v9 = vpack.c.bf16 %v1253_v8, %v1252_v41  ;;  %v5157_v22 = vld [vmem:[%s8031_s0 + $0x328] sm:$0xff]   ;;  %v4215_v38 = vunpack.c.l.bf16 %v5133_v17 }
 0x199   :  { %v640_v48 = vmul.f32 %v5733_v37, %v4115_v43  ;;  %v849_v60 = vadd.f32 %v5741_v40, %v589_v31  ;;  %v1157_v16 = vmax.f32 %v901_v49, 0.0  ;;  %v4311_v41 = vunpack.c.l.bf16 %v5157_v22 }
 0x19a   :  { %v1921_v0 = vpop.f32.mrf.mxu0  ;;  %v4312_v8 = vunpack.c.h.bf16 %v5157_v22  ;;  %v690_v46 = vmul.f32 %v5733_v37, %v4215_v38 }
 0x19b   :  { %v3021_v5 = vadd.f32 %v3020_v25, %v1921_v0  ;;  %v3283_v7 = vmul.f32 %v1921_v0, %v1921_v0  ;;  %v6110_v4 = vpop.f32.mrf.mxu2  ;;  %v1105_v27 = vmax.f32 %v849_v60, 0.0 }
 0x19c   :  { %8198 = vst [vmem:[#allocation10_spill] sm:$0xff] %v6110_v4  ;;  %v739_v51 = vmul.f32 %v5733_v37, %v4312_v8  ;;  %v950_v60 = vadd.f32 %v5741_v40, %v690_v46 }
 0x19d   :  { %v3538_v25 = vadd.f32 %v3537_v28, %v3283_v7  ;;  %3802 = vmatmul.msk.bf16.gmra.mxu0 %vm1442_vm0, %v1333_v62  ;;  %v1384_v28 = vpack.c.bf16 %v1205_v35, %v1204_v30  ;;  %v900_v62 = vadd.f32 %v5741_v40, %v640_v48  ;;  %v6112_v7 = vpop.f32.mrf.mxu1  ;;  %v5083_v30 = vld [vmem:[%s8031_s0 + $0xd8] sm:$0xff]   ;;  %v4216_v35 = vunpack.c.h.bf16 %v5133_v17 }
 0x19e   :  { %v4015_v43 = vunpack.c.l.bf16 %v5083_v30  ;;  %v738_v48 = vmul.f32 %v5733_v37, %v4311_v41 }
 0x19f   :  { %3853 = vmatmul.msk.bf16.gmra.mxu2 %vm1442_vm0, %v1384_v28  ;;  %3877 = vmatmul.msk.bf16.gmra.mxu3 %vm1442_vm0, %v1408_v9  ;;  %v1156_v13 = vmax.f32 %v900_v62, 0.0  ;;  %v691_v28 = vmul.f32 %v5733_v37, %v4216_v35 }
 0x1a0   :  { %v590_v17 = vmul.f32 %v5733_v37, %v4015_v43 }
 0x1a1   :  { %v1360_v31 = vpack.c.bf16 %v1157_v16, %v1156_v13  ;;  %v999_v13 = vadd.f32 %v5741_v40, %v739_v51  ;;  %v5109_v16 = vld [vmem:[%s8031_s0 + $0x1a8] sm:$0xff]  }
 0x1a2   :  { %v1923_v61 = vpop.f32.mrf.mxu0  ;;  %v4119_v8 = vunpack.c.l.bf16 %v5109_v16  ;;  %v4120_v43 = vunpack.c.h.bf16 %v5109_v16 }
 0x1a3   :  { %v4505_v63 = vpack.c.bf16 %v1923_v61, %v1921_v0  ;;  %v3284_v1 = vmul.f32 %v1923_v61, %v1923_v61  ;;  %v3022_v2 = vadd.f32 %v3021_v5, %v1923_v61  ;;  %v1104_v5 = vmax.f32 %v848_v53, 0.0 }
 0x1a4   :  { %v951_v61 = vadd.f32 %v5741_v40, %v691_v28  ;;  %v1255_v41 = vmax.f32 %v999_v13, 0.0  ;;  %v642_v28 = vmul.f32 %v5733_v37, %v4119_v8 }
 0x1a5   :  { %5200 = vst [vmem:[%s8034_s4 + $0x88] sm:$0xff] %v4505_v63   ;;  %v3539_v0 = vadd.f32 %v3538_v25, %v3284_v1  ;;  %v1334_v9 = vpack.c.bf16 %v1105_v27, %v1104_v5  ;;  %v4016_v25 = vunpack.c.h.bf16 %v5083_v30  ;;  %v6133_v63 = vpop.f32.mrf.mxu2  ;;  %v998_v1 = vadd.f32 %v5741_v40, %v738_v48  ;;  %v6141_v22 = vpop.f32.mrf.mxu1 }
 0x1a6   :  { %3829 = vmatmul.msk.bf16.gmra.mxu1 %vm1442_vm0, %v1360_v31  ;;  %8199 = vst [vmem:[#allocation11_spill] sm:$0xff] %v6133_v63  ;;  %v4760_v5 = vpack.c.bf16 %v6133_v63, %v6110_v4  ;;  %v1206_v27 = vmax.f32 %v950_v60, 0.0  ;;  %v4640_v31 = vpack.c.bf16 %v6141_v22, %v6112_v7  ;;  %v1207_v38 = vmax.f32 %v951_v61, 0.0 }
 0x1a7   :  { %v591_v30 = vmul.f32 %v5733_v37, %v4016_v25  ;;  %v1254_v35 = vmax.f32 %v998_v1, 0.0  ;;  %v850_v25 = vadd.f32 %v5741_v40, %v590_v17  ;;  %v902_v60 = vadd.f32 %v5741_v40, %v642_v28 }
 0x1a8   :  { %5251 = vst [vmem:[%s8034_s4 + $0x220] sm:$0xff] %v4760_v5  }
 0x1a9   :  { %5227 = vst [vmem:[%s8034_s4 + $0x160] sm:$0xff] %v4640_v31   ;;  %v1409_v46 = vpack.c.bf16 %v1255_v41, %v1254_v35  ;;  %v851_v48 = vadd.f32 %v5741_v40, %v591_v30  ;;  %v5158_v30 = vld [vmem:[%s8031_s0 + $0x330] sm:$0xff]   ;;  %v5084_v31 = vld [vmem:[%s8031_s0 + $0xe0] sm:$0xff]  }
 0x1aa   :  { %v1926_v53 = vpop.f32.mrf.mxu0  ;;  %v4315_v8 = vunpack.c.l.bf16 %v5158_v30 }
 0x1ab   :  { %v3023_v62 = vadd.f32 %v3022_v2, %v1926_v53  ;;  %v3285_v49 = vmul.f32 %v1926_v53, %v1926_v53 }
 0x1ad   :  { %v3540_v2 = vadd.f32 %v3539_v0, %v3285_v49  ;;  %3803 = vmatmul.msk.bf16.gmra.mxu0 %vm1442_vm0, %v1334_v9  ;;  %v1385_v0 = vpack.c.bf16 %v1207_v38, %v1206_v27  ;;  %v643_v9 = vmul.f32 %v5733_v37, %v4120_v43  ;;  %v6163_v16 = vpop.f32.mrf.mxu2  ;;  %v6165_v5 = vpop.f32.mrf.mxu1  ;;  %v1158_v37 = vmax.f32 %v902_v60, 0.0  ;;  %v5134_v27 = vld [vmem:[%s8031_s0 + $0x270] sm:$0xff]  }
 0x1ae   :  { %8200 = vst [vmem:[#allocation12_spill] sm:$0xff] %v6163_v16  ;;  %v4219_v35 = vunpack.c.l.bf16 %v5134_v27  ;;  %v4220_v41 = vunpack.c.h.bf16 %v5134_v27  ;;  %v4316_v43 = vunpack.c.h.bf16 %v5158_v30 }
 0x1af   :  { %3854 = vmatmul.msk.bf16.gmra.mxu2 %vm1442_vm0, %v1385_v0  ;;  %v903_v61 = vadd.f32 %v5741_v40, %v643_v9  ;;  %3878 = vmatmul.msk.bf16.gmra.mxu3 %vm1442_vm0, %v1409_v46  ;;  %v4019_v0 = vunpack.c.l.bf16 %v5084_v31  ;;  %v6183_v46 = vld [vmem:[%s8032_s1] ss:$0 sm:$0xff] }
 0x1b0   :  { %v693_v28 = vmul.f32 %v6183_v46, %v4220_v41 }
 0x1b1   :  { %v1159_v17 = vmax.f32 %v903_v61, 0.0  ;;  %v6192_v61 = vld [vmem:[%s8033_s2] ss:$0 sm:$0xff] }
 0x1b2   :  { %v1928_v51 = vpop.f32.mrf.mxu0 }
 0x1b3   :  { %v4510_v49 = vpack.c.bf16 %v1928_v51, %v1926_v53  ;;  %v3286_v1 = vmul.f32 %v1928_v51, %v1928_v51  ;;  %v3024_v13 = vadd.f32 %v3023_v62, %v1928_v51  ;;  %v1106_v53 = vmax.f32 %v850_v25, 0.0 }
 0x1b4   :  { %v1107_v62 = vmax.f32 %v851_v48, 0.0  ;;  %v1361_v38 = vpack.c.bf16 %v1159_v17, %v1158_v37  ;;  %v4020_v25 = vunpack.c.h.bf16 %v5084_v31  ;;  %v740_v48 = vmul.f32 %v6183_v46, %v4315_v8 }
 0x1b5   :  { %5201 = vst [vmem:[%s8034_s4 + $0x90] sm:$0xff] %v4510_v49   ;;  %v3541_v40 = vadd.f32 %v3540_v2, %v3286_v1  ;;  %v692_v2 = vmul.f32 %v6183_v46, %v4219_v35  ;;  %v741_v51 = vmul.f32 %v6183_v46, %v4316_v43  ;;  %v953_v1 = vadd.f32 %v6192_v61, %v693_v28  ;;  %v6196_v27 = vpop.f32.mrf.mxu2 }
 0x1b6   :  { %3830 = vmatmul.msk.bf16.gmra.mxu1 %vm1442_vm0, %v1361_v38  ;;  %v1335_v9 = vpack.c.bf16 %v1107_v62, %v1106_v53  ;;  %8201 = vst [vmem:[#allocation13_spill] sm:$0xff] %v6196_v27  ;;  %v1000_v30 = vadd.f32 %v6192_v61, %v740_v48  ;;  %v5110_v62 = vld [vmem:[%s8031_s0 + $0x1b0] sm:$0xff]   ;;  %v592_v31 = vmul.f32 %v6183_v46, %v4019_v0  ;;  %v6204_v38 = vpop.f32.mrf.mxu1 }
 0x1b7   :  { %v952_v49 = vadd.f32 %v6192_v61, %v692_v2  ;;  %v1001_v53 = vadd.f32 %v6192_v61, %v741_v51  ;;  %v4765_v35 = vpack.c.bf16 %v6196_v27, %v6163_v16  ;;  %v593_v8 = vmul.f32 %v6183_v46, %v4020_v25 }
 0x1b8   :  { %v4645_v43 = vpack.c.bf16 %v6204_v38, %v6165_v5  ;;  %v1209_v2 = vmax.f32 %v953_v1, 0.0  ;;  %v1256_v0 = vmax.f32 %v1000_v30, 0.0  ;;  %v4123_v48 = vunpack.c.l.bf16 %v5110_v62 }
 0x1b9   :  { %v1208_v41 = vmax.f32 %v952_v49, 0.0  ;;  %5252 = vst [vmem:[%s8034_s4 + $0x228] sm:$0xff] %v4765_v35   ;;  %v1257_v28 = vmax.f32 %v1001_v53, 0.0  ;;  %v4124_v51 = vunpack.c.h.bf16 %v5110_v62  ;;  %v852_v1 = vadd.f32 %v6192_v61, %v592_v31 }
 0x1ba   :  { %v1931_v60 = vpop.f32.mrf.mxu0  ;;  %5228 = vst [vmem:[%s8034_s4 + $0x168] sm:$0xff] %v4645_v43   ;;  %v644_v25 = vmul.f32 %v6183_v46, %v4123_v48 }
 0x1bb   :  { %v3025_v37 = vadd.f32 %v3024_v13, %v1931_v60  ;;  %v3287_v17 = vmul.f32 %v1931_v60, %v1931_v60  ;;  %v645_v49 = vmul.f32 %v6183_v46, %v4124_v51  ;;  %v5085_v51 = vld [vmem:[%s8031_s0 + $0xe8] sm:$0xff]  }
 0x1bc   :  { %v904_v53 = vadd.f32 %v6192_v61, %v644_v25 }
 0x1bd   :  { %v3542_v13 = vadd.f32 %v3541_v40, %v3287_v17  ;;  %3804 = vmatmul.msk.bf16.gmra.mxu0 %vm1442_vm0, %v1335_v9  ;;  %v1386_v40 = vpack.c.bf16 %v1209_v2, %v1208_v41  ;;  %v1410_v9 = vpack.c.bf16 %v1257_v28, %v1256_v0  ;;  %v853_v17 = vadd.f32 %v6192_v61, %v593_v8  ;;  %v6226_v41 = vpop.f32.mrf.mxu2  ;;  %v5135_v8 = vld [vmem:[%s8031_s0 + $0x278] sm:$0xff]  }
 0x1be   :  { %v905_v62 = vadd.f32 %v6192_v61, %v645_v49  ;;  %8202 = vst [vmem:[#allocation14_spill] sm:$0xff] %v6226_v41  ;;  %v6228_v2 = vpop.f32.mrf.mxu1  ;;  %v1160_v0 = vmax.f32 %v904_v53, 0.0  ;;  %v5159_v28 = vld [vmem:[%s8031_s0 + $0x338] sm:$0xff]   ;;  %v4224_v25 = vunpack.c.h.bf16 %v5135_v8  ;;  %v4023_v53 = vunpack.c.l.bf16 %v5085_v51 }
 0x1bf   :  { %3855 = vmatmul.msk.bf16.gmra.mxu2 %vm1442_vm0, %v1386_v40  ;;  %3879 = vmatmul.msk.bf16.gmra.mxu3 %vm1442_vm0, %v1410_v9  ;;  %v1109_v48 = vmax.f32 %v853_v17, 0.0  ;;  %v4223_v9 = vunpack.c.l.bf16 %v5135_v8  ;;  %v4319_v49 = vunpack.c.l.bf16 %v5159_v28 }
 0x1c0   :  { %v1161_v31 = vmax.f32 %v905_v62, 0.0  ;;  %v695_v16 = vmul.f32 %v6183_v46, %v4224_v25 }
 0x1c1   :  { %v694_v62 = vmul.f32 %v6183_v46, %v4223_v9 }
 0x1c2   :  { %v1933_v30 = vpop.f32.mrf.mxu0  ;;  %v1362_v40 = vpack.c.bf16 %v1161_v31, %v1160_v0  ;;  %v955_v31 = vadd.f32 %v6192_v61, %v695_v16 }
 0x1c3   :  { %v4515_v35 = vpack.c.bf16 %v1933_v30, %v1931_v60  ;;  %v3288_v27 = vmul.f32 %v1933_v30, %v1933_v30  ;;  %v3026_v43 = vadd.f32 %v3025_v37, %v1933_v30  ;;  %v1108_v37 = vmax.f32 %v852_v1, 0.0 }
 0x1c4   :  { %v4320_v30 = vunpack.c.h.bf16 %v5159_v28  ;;  %v954_v0 = vadd.f32 %v6192_v61, %v694_v62  ;;  %v1211_v62 = vmax.f32 %v955_v31, 0.0 }
 0x1c5   :  { %5202 = vst [vmem:[%s8034_s4 + $0x98] sm:$0xff] %v4515_v35   ;;  %v3543_v60 = vadd.f32 %v3542_v13, %v3288_v27  ;;  %v1336_v35 = vpack.c.bf16 %v1109_v48, %v1108_v37  ;;  %v4024_v27 = vunpack.c.h.bf16 %v5085_v51  ;;  %v742_v13 = vmul.f32 %v6183_v46, %v4319_v49  ;;  %v6249_v63 = vpop.f32.mrf.mxu2  ;;  %v5111_v37 = vld [vmem:[%s8031_s0 + $0x1b8] sm:$0xff]  }
 0x1c6   :  { %3831 = vmatmul.msk.bf16.gmra.mxu1 %vm1442_vm0, %v1362_v40  ;;  %v743_v1 = vmul.f32 %v6183_v46, %v4320_v30  ;;  %8203 = vst [vmem:[#allocation15_spill] sm:$0xff] %v6249_v63  ;;  %v594_v48 = vmul.f32 %v6183_v46, %v4023_v53  ;;  %v6257_v51 = vpop.f32.mrf.mxu1  ;;  %v4770_v25 = vpack.c.bf16 %v6249_v63, %v6226_v41  ;;  %v1210_v16 = vmax.f32 %v954_v0, 0.0 }
 0x1c7   :  { %v1002_v40 = vadd.f32 %v6192_v61, %v742_v13  ;;  %v595_v49 = vmul.f32 %v6183_v46, %v4024_v27  ;;  %v4650_v30 = vpack.c.bf16 %v6257_v51, %v6228_v2  ;;  %v4128_v4 = vunpack.c.h.bf16 %v5111_v37 }
 0x1c8   :  { %v1003_v9 = vadd.f32 %v6192_v61, %v743_v1  ;;  %5253 = vst [vmem:[%s8034_s4 + $0x230] sm:$0xff] %v4770_v25   ;;  %v4127_v1 = vunpack.c.l.bf16 %v5111_v37  ;;  %v854_v31 = vadd.f32 %v6192_v61, %v594_v48 }
 0x1c9   :  { %v1258_v53 = vmax.f32 %v1002_v40, 0.0  ;;  %5229 = vst [vmem:[%s8034_s4 + $0x170] sm:$0xff] %v4650_v30   ;;  %v647_v0 = vmul.f32 %v6183_v46, %v4128_v4 }
 0x1ca   :  { %v1936_v17 = vpop.f32.mrf.mxu0  ;;  %v1259_v13 = vmax.f32 %v1003_v9, 0.0  ;;  %v646_v27 = vmul.f32 %v6183_v46, %v4127_v1  ;;  %v5086_v1 = vld [vmem:[%s8031_s0 + $0xf0] sm:$0xff]  }
 0x1cb   :  { %v3027_v8 = vadd.f32 %v3026_v43, %v1936_v17  ;;  %v3289_v28 = vmul.f32 %v1936_v17, %v1936_v17  ;;  %v907_v37 = vadd.f32 %v6192_v61, %v647_v0 }
 0x1cc   :  { %v906_v9 = vadd.f32 %v6192_v61, %v646_v27 }
 0x1cd   :  { %v3544_v43 = vadd.f32 %v3543_v60, %v3289_v28  ;;  %3805 = vmatmul.msk.bf16.gmra.mxu0 %vm1442_vm0, %v1336_v35  ;;  %v1387_v60 = vpack.c.bf16 %v1211_v62, %v1210_v16  ;;  %v1411_v35 = vpack.c.bf16 %v1259_v13, %v1258_v53  ;;  %v855_v28 = vadd.f32 %v6192_v61, %v595_v49  ;;  %v6279_v16 = vpop.f32.mrf.mxu2  ;;  %v5136_v49 = vld [vmem:[%s8031_s0 + $0x280] sm:$0xff]  }
 0x1ce   :  { %8204 = vst [vmem:[#allocation16_spill] sm:$0xff] %v6279_v16  ;;  %v6281_v62 = vpop.f32.mrf.mxu1  ;;  %v1162_v4 = vmax.f32 %v906_v9, 0.0  ;;  %v1163_v48 = vmax.f32 %v907_v37, 0.0  ;;  %v5160_v53 = vld [vmem:[%s8031_s0 + $0x340] sm:$0xff]   ;;  %v4228_v27 = vunpack.c.h.bf16 %v5136_v49  ;;  %v4027_v9 = vunpack.c.l.bf16 %v5086_v1 }
 0x1cf   :  { %3856 = vmatmul.msk.bf16.gmra.mxu2 %vm1442_vm0, %v1387_v60  ;;  %3880 = vmatmul.msk.bf16.gmra.mxu3 %vm1442_vm0, %v1411_v35  ;;  %v1111_v13 = vmax.f32 %v855_v28, 0.0  ;;  %v4227_v35 = vunpack.c.l.bf16 %v5136_v49  ;;  %v4323_v0 = vunpack.c.l.bf16 %v5160_v53 }
 0x1d0   :  { %v1363_v60 = vpack.c.bf16 %v1163_v48, %v1162_v4  ;;  %v697_v41 = vmul.f32 %v6183_v46, %v4228_v27 }
 0x1d1   :  { %v696_v37 = vmul.f32 %v6183_v46, %v4227_v35 }
 0x1d2   :  { %v1938_v40 = vpop.f32.mrf.mxu0  ;;  %v957_v48 = vadd.f32 %v6192_v61, %v697_v41 }
 0x1d3   :  { %v4520_v25 = vpack.c.bf16 %v1938_v40, %v1936_v17  ;;  %v3028_v63 = vadd.f32 %v3027_v8, %v1938_v40  ;;  %v3290_v30 = vmul.f32 %v1938_v40, %v1938_v40  ;;  %v1110_v8 = vmax.f32 %v854_v31, 0.0 }
 0x1d4   :  { %v4324_v40 = vunpack.c.h.bf16 %v5160_v53  ;;  %v744_v31 = vmul.f32 %v6183_v46, %v4323_v0  ;;  %v956_v4 = vadd.f32 %v6192_v61, %v696_v37  ;;  %v1213_v37 = vmax.f32 %v957_v48, 0.0 }
 0x1d5   :  { %5203 = vst [vmem:[%s8034_s4 + $0xa0] sm:$0xff] %v4520_v25   ;;  %v3545_v17 = vadd.f32 %v3544_v43, %v3290_v30  ;;  %v1337_v25 = vpack.c.bf16 %v1111_v13, %v1110_v8  ;;  %v4028_v43 = vunpack.c.h.bf16 %v5086_v1  ;;  %v6302_v12 = vpop.f32.mrf.mxu2  ;;  %v5112_v8 = vld [vmem:[%s8031_s0 + $0x1c0] sm:$0xff]   ;;  %v596_v13 = vmul.f32 %v6183_v46, %v4027_v9 }
 0x1d6   :  { %3832 = vmatmul.msk.bf16.gmra.mxu1 %vm1442_vm0, %v1363_v60  ;;  %v745_v28 = vmul.f32 %v6183_v46, %v4324_v40  ;;  %8205 = vst [vmem:[#allocation17_spill] sm:$0xff] %v6302_v12  ;;  %v1004_v60 = vadd.f32 %v6192_v61, %v744_v31  ;;  %v6310_v1 = vpop.f32.mrf.mxu1  ;;  %v4775_v27 = vpack.c.bf16 %v6302_v12, %v6279_v16  ;;  %v1212_v41 = vmax.f32 %v956_v4, 0.0 }
 0x1d7   :  { %v597_v0 = vmul.f32 %v6183_v46, %v4028_v43  ;;  %v4655_v40 = vpack.c.bf16 %v6310_v1, %v6281_v62  ;;  %v4132_v24 = vunpack.c.h.bf16 %v5112_v8 }
 0x1d8   :  { %v1005_v35 = vadd.f32 %v6192_v61, %v745_v28  ;;  %5254 = vst [vmem:[%s8034_s4 + $0x238] sm:$0xff] %v4775_v27   ;;  %v1260_v9 = vmax.f32 %v1004_v60, 0.0  ;;  %v4131_v28 = vunpack.c.l.bf16 %v5112_v8 }
 0x1d9   :  { %5230 = vst [vmem:[%s8034_s4 + $0x178] sm:$0xff] %v4655_v40   ;;  %v649_v48 = vmul.f32 %v6183_v46, %v4132_v24 }
 0x1da   :  { %v1941_v30 = vpop.f32.mrf.mxu0  ;;  %v1261_v31 = vmax.f32 %v1005_v35, 0.0  ;;  %v648_v4 = vmul.f32 %v6183_v46, %v4131_v28 }
 0x1db   :  { %v3029_v49 = vadd.f32 %v3028_v63, %v1941_v30  ;;  %v3291_v53 = vmul.f32 %v1941_v30, %v1941_v30  ;;  %v909_v8 = vadd.f32 %v6192_v61, %v649_v48 }
 0x1dc   :  { %v1412_v43 = vpack.c.bf16 %v1261_v31, %v1260_v9  ;;  %v908_v35 = vadd.f32 %v6192_v61, %v648_v4  ;;  %v5137_v9 = vld [vmem:[%s8031_s0 + $0x288] sm:$0xff]  }
 0x1dd   :  { %v3546_v63 = vadd.f32 %v3545_v17, %v3291_v53  ;;  %3806 = vmatmul.msk.bf16.gmra.mxu0 %vm1442_vm0, %v1337_v25  ;;  %v1388_v17 = vpack.c.bf16 %v1213_v37, %v1212_v41  ;;  %v856_v25 = vadd.f32 %v6192_v61, %v596_v13  ;;  %v857_v53 = vadd.f32 %v6192_v61, %v597_v0  ;;  %v5087_v13 = vld [vmem:[%s8031_s0 + $0xf8] sm:$0xff]   ;;  %v6335_v41 = vpop.f32.mrf.mxu2 }
 0x1de   :  { %8206 = vst [vmem:[#allocation18_spill] sm:$0xff] %v6335_v41  ;;  %v1164_v0 = vmax.f32 %v908_v35, 0.0  ;;  %v1165_v37 = vmax.f32 %v909_v8, 0.0  ;;  %v6346_v28 = vpop.f32.mrf.mxu1  ;;  %v4031_v4 = vunpack.c.l.bf16 %v5087_v13  ;;  %v4032_v39 = vunpack.c.h.bf16 %v5087_v13  ;;  %v5113_v13 = vld [vmem:[%s8031_s0 + $0x1c8] sm:$0xff]  }
 0x1df   :  { %3857 = vmatmul.msk.bf16.gmra.mxu2 %vm1442_vm0, %v1388_v17  ;;  %3881 = vmatmul.msk.bf16.gmra.mxu3 %vm1442_vm0, %v1412_v43  ;;  %v1112_v24 = vmax.f32 %v856_v25, 0.0  ;;  %v1113_v31 = vmax.f32 %v857_v53, 0.0  ;;  %v6348_v17 = vpop.f32.mrf.mxu3  ;;  %v4231_v25 = vunpack.c.l.bf16 %v5137_v9  ;;  %v4232_v43 = vunpack.c.h.bf16 %v5137_v9 }
 0x1e0   :  { %8207 = vst [vmem:[#allocation19_spill] sm:$0xff] %v6348_v17  ;;  %v1364_v48 = vpack.c.bf16 %v1165_v37, %v1164_v0  ;;  %v598_v0 = vmul.f32 %v6183_v46, %v4031_v4  ;;  %v4135_v10 = vunpack.c.l.bf16 %v5113_v13  ;;  %v4136_v33 = vunpack.c.h.bf16 %v5113_v13 }
 0x1e1   :  { %v698_v35 = vmul.f32 %v6183_v46, %v4231_v25  ;;  %v699_v8 = vmul.f32 %v6183_v46, %v4232_v43  ;;  %v1338_v53 = vpack.c.bf16 %v1113_v31, %v1112_v24 }
 0x1e2   :  { %v1943_v60 = vpop.f32.mrf.mxu0 }
 0x1e3   :  { %v4525_v27 = vpack.c.bf16 %v1943_v60, %v1941_v30  ;;  %v3030_v12 = vadd.f32 %v3029_v49, %v1943_v60  ;;  %v3292_v40 = vmul.f32 %v1943_v60, %v1943_v60  ;;  %v5161_v30 = vld [vmem:[%s8031_s0 + $0x348] sm:$0xff]  }
 0x1e4   :  { %v4327_v60 = vunpack.c.l.bf16 %v5161_v30  ;;  %v4328_v16 = vunpack.c.h.bf16 %v5161_v30 }
 0x1e5   :  { %5204 = vst [vmem:[%s8034_s4 + $0xa8] sm:$0xff] %v4525_v27   ;;  %v3547_v49 = vadd.f32 %v3546_v63, %v3292_v40  ;;  %v958_v27 = vadd.f32 %v6192_v61, %v698_v35  ;;  %v959_v40 = vadd.f32 %v6192_v61, %v699_v8  ;;  %v6362_v43 = vpop.f32.mrf.mxu2 }
 0x1e6   :  { %3833 = vmatmul.msk.bf16.gmra.mxu1 %vm1442_vm0, %v1364_v48  ;;  %v746_v63 = vmul.f32 %v6183_v46, %v4327_v60  ;;  %v747_v9 = vmul.f32 %v6183_v46, %v4328_v16  ;;  %8208 = vst [vmem:[#allocation20_spill] sm:$0xff] %v6362_v43  ;;  %v599_v48 = vmul.f32 %v6183_v46, %v4032_v39  ;;  %v6369_v8 = vpop.f32.mrf.mxu1 }
 0x1e7   :  { %v1214_v24 = vmax.f32 %v958_v27, 0.0  ;;  %v1215_v31 = vmax.f32 %v959_v40, 0.0  ;;  %v4780_v16 = vpack.c.bf16 %v6362_v43, %v6335_v41  ;;  %8209 = vst [vmem:[#allocation21_spill] sm:$0xff] %v6369_v8  ;;  %v4660_v27 = vpack.c.bf16 %v6369_v8, %v6346_v28 }
 0x1e8   :  { %v1006_v37 = vadd.f32 %v6192_v61, %v746_v63  ;;  %v1007_v60 = vadd.f32 %v6192_v61, %v747_v9  ;;  %v6371_v63 = vpop.f32.mrf.mxu3  ;;  %v651_v40 = vmul.f32 %v6183_v46, %v4136_v33  ;;  %v858_v9 = vadd.f32 %v6192_v61, %v598_v0 }
 0x1e9   :  { %8210 = vst [vmem:[#allocation22_spill] sm:$0xff] %v6371_v63  ;;  %v4900_v39 = vpack.c.bf16 %v6371_v63, %v6348_v17 }
 0x1ea   :  { %v1946_v56 = vpop.f32.mrf.mxu0  ;;  %v1262_v4 = vmax.f32 %v1006_v37, 0.0  ;;  %5255 = vst [vmem:[%s8034_s4 + $0x240] sm:$0xff] %v4780_v16   ;;  %v859_v37 = vadd.f32 %v6192_v61, %v599_v48  ;;  %v1114_v16 = vmax.f32 %v858_v9, 0.0 }
 0x1eb   :  { %v3031_v30 = vadd.f32 %v3030_v12, %v1946_v56  ;;  %v3293_v25 = vmul.f32 %v1946_v56, %v1946_v56  ;;  %v1389_v12 = vpack.c.bf16 %v1215_v31, %v1214_v24  ;;  %5231 = vst [vmem:[%s8034_s4 + $0x180] sm:$0xff] %v4660_v27  }
 0x1ec   :  { %5279 = vst [vmem:[%s8034_s4 + $0x300] sm:$0xff] %v4900_v39  }
 0x1ed   :  { %v3548_v35 = vadd.f32 %v3547_v49, %v3293_v25  ;;  %3807 = vmatmul.msk.bf16.gmra.mxu0 %vm1442_vm0, %v1338_v53  ;;  %v1263_v49 = vmax.f32 %v1007_v60, 0.0  ;;  %v650_v53 = vmul.f32 %v6183_v46, %v4135_v10  ;;  %v911_v10 = vadd.f32 %v6192_v61, %v651_v40  ;;  %v6394_v60 = vpop.f32.mrf.mxu2 }
 0x1ee   :  { %8211 = vst [vmem:[#allocation23_spill] sm:$0xff] %v6394_v60 }
 0x1ef   :  { %3858 = vmatmul.msk.bf16.gmra.mxu2 %vm1442_vm0, %v1389_v12  ;;  %v1413_v13 = vpack.c.bf16 %v1263_v49, %v1262_v4  ;;  %v910_v25 = vadd.f32 %v6192_v61, %v650_v53  ;;  %v1167_v27 = vmax.f32 %v911_v10, 0.0  ;;  %v5138_v12 = vld [vmem:[%s8031_s0 + $0x290] sm:$0xff]  }
 0x1f0   :  { %v5162_v4 = vld [vmem:[%s8031_s0 + $0x350] sm:$0xff]   ;;  %v6405_v39 = vpop.f32.mrf.mxu1  ;;  %v4235_v49 = vunpack.c.l.bf16 %v5138_v12  ;;  %v4236_v53 = vunpack.c.h.bf16 %v5138_v12  ;;  %v6407_v40 = vpop.f32.mrf.mxu3 }
 0x1f1   :  { %3882 = vmatmul.msk.bf16.gmra.mxu3 %vm1442_vm0, %v1413_v13  ;;  %v1166_v48 = vmax.f32 %v910_v25, 0.0  ;;  %8212 = vst [vmem:[#allocation24_spill] sm:$0xff] %v6405_v39  ;;  %v4331_v13 = vunpack.c.l.bf16 %v5162_v4  ;;  %v4332_v25 = vunpack.c.h.bf16 %v5162_v4  ;;  %v5114_v4 = vld [vmem:[%s8031_s0 + $0x1d0] sm:$0xff]  }
 0x1f2   :  { %v1948_v33 = vpop.f32.mrf.mxu0  ;;  %8213 = vst [vmem:[#allocation25_spill] sm:$0xff] %v6407_v40  ;;  %v700_v10 = vmul.f32 %v6183_v46, %v4235_v49 }
 0x1f3   :  { %v4530_v24 = vpack.c.bf16 %v1948_v33, %v1946_v56  ;;  %v3032_v0 = vadd.f32 %v3031_v30, %v1948_v33  ;;  %v3294_v31 = vmul.f32 %v1948_v33, %v1948_v33  ;;  %v1115_v30 = vmax.f32 %v859_v37, 0.0 }
 0x1f4   :  { %v1365_v9 = vpack.c.bf16 %v1167_v27, %v1166_v48  ;;  %v701_v33 = vmul.f32 %v6183_v46, %v4236_v53  ;;  %v748_v63 = vmul.f32 %v6183_v46, %v4331_v13 }
 0x1f5   :  { %5205 = vst [vmem:[%s8034_s4 + $0xb0] sm:$0xff] %v4530_v24   ;;  %v3549_v56 = vadd.f32 %v3548_v35, %v3294_v31  ;;  %v749_v35 = vmul.f32 %v6183_v46, %v4332_v25  ;;  %v1339_v37 = vpack.c.bf16 %v1115_v30, %v1114_v16  ;;  %v960_v24 = vadd.f32 %v6192_v61, %v700_v10  ;;  %v6421_v17 = vpop.f32.mrf.mxu2 }
 0x1f6   :  { %3834 = vmatmul.msk.bf16.gmra.mxu1 %vm1442_vm0, %v1365_v9  ;;  %v961_v31 = vadd.f32 %v6192_v61, %v701_v33  ;;  %v1008_v48 = vadd.f32 %v6192_v61, %v748_v63  ;;  %8214 = vst [vmem:[#allocation26_spill] sm:$0xff] %v6421_v17  ;;  %v4139_v25 = vunpack.c.l.bf16 %v5114_v4  ;;  %v4140_v10 = vunpack.c.h.bf16 %v5114_v4 }
 0x1f7   :  { %v1009_v27 = vadd.f32 %v6192_v61, %v749_v35  ;;  %v1216_v9 = vmax.f32 %v960_v24, 0.0  ;;  %v4785_v35 = vpack.c.bf16 %v6421_v17, %v6394_v60 }
 0x1f8   :  { %v1217_v13 = vmax.f32 %v961_v31, 0.0  ;;  %v1264_v16 = vmax.f32 %v1008_v48, 0.0  ;;  %v6424_v63 = vpop.f32.mrf.mxu1  ;;  %v6430_v24 = vpop.f32.mrf.mxu3  ;;  %v652_v31 = vmul.f32 %v6183_v46, %v4139_v25  ;;  %v653_v48 = vmul.f32 %v6183_v46, %v4140_v10 }
 0x1f9   :  { %v1265_v30 = vmax.f32 %v1009_v27, 0.0  ;;  %8215 = vst [vmem:[#allocation27_spill] sm:$0xff] %v6424_v63 }
 0x1fa   :  { %v1951_v12 = vpop.f32.mrf.mxu0  ;;  %v1390_v43 = vpack.c.bf16 %v1217_v13, %v1216_v9  ;;  %8216 = vst [vmem:[#allocation28_spill] sm:$0xff] %v6430_v24  ;;  %v912_v27 = vadd.f32 %v6192_v61, %v652_v31  ;;  %v913_v4 = vadd.f32 %v6192_v61, %v653_v48 }
 0x1fb   :  { %v3033_v49 = vadd.f32 %v3032_v0, %v1951_v12  ;;  %v3295_v53 = vmul.f32 %v1951_v12, %v1951_v12  ;;  %v4665_v0 = vpack.c.bf16 %v6424_v63, %v6405_v39  ;;  %5256 = vst [vmem:[%s8034_s4 + $0x248] sm:$0xff] %v4785_v35   ;;  %v5139_v35 = vld [vmem:[%s8031_s0 + $0x298] sm:$0xff]  }
 0x1fc   :  { %v1168_v9 = vmax.f32 %v912_v27, 0.0  ;;  %v1169_v25 = vmax.f32 %v913_v4, 0.0  ;;  %v4239_v31 = vunpack.c.l.bf16 %v5139_v35 }
 0x1fd   :  { %v3550_v33 = vadd.f32 %v3549_v56, %v3295_v53  ;;  %3808 = vmatmul.msk.bf16.gmra.mxu0 %vm1442_vm0, %v1339_v37  ;;  %v4905_v56 = vpack.c.bf16 %v6430_v24, %v6407_v40  ;;  %v1414_v37 = vpack.c.bf16 %v1265_v30, %v1264_v16  ;;  %5232 = vst [vmem:[%s8034_s4 + $0x188] sm:$0xff] %v4665_v0  }
 0x1fe   :  { %v1366_v0 = vpack.c.bf16 %v1169_v25, %v1168_v9  ;;  %v702_v4 = vmul.f32 %v6183_v46, %v4239_v31 }
 0x1ff   :  { %5280 = vst [vmem:[%s8034_s4 + $0x308] sm:$0xff] %v4905_v56   ;;  %3859 = vmatmul.msk.bf16.gmra.mxu2 %vm1442_vm0, %v1390_v43  ;;  %v5163_v43 = vld [vmem:[%s8031_s0 + $0x358] sm:$0xff]  }
 0x200   :  { %v6449_v10 = vpop.f32.mrf.mxu2  ;;  %v4335_v48 = vunpack.c.l.bf16 %v5163_v43  ;;  %v4336_v27 = vunpack.c.h.bf16 %v5163_v43  ;;  %v5115_v43 = vld [vmem:[%s8031_s0 + $0x1d8] sm:$0xff]  }
 0x201   :  { %3883 = vmatmul.msk.bf16.gmra.mxu3 %vm1442_vm0, %v1414_v37  ;;  %8217 = vst [vmem:[#allocation29_spill] sm:$0xff] %v6449_v10  ;;  %v4240_v37 = vunpack.c.h.bf16 %v5139_v35  ;;  %v4143_v40 = vunpack.c.l.bf16 %v5115_v43  ;;  %v4144_v60 = vunpack.c.h.bf16 %v5115_v43 }
 0x202   :  { %v1953_v53 = vpop.f32.mrf.mxu0  ;;  %v6462_v56 = vpop.f32.mrf.mxu3  ;;  %v750_v24 = vmul.f32 %v6183_v46, %v4335_v48 }
 0x203   :  { %v4535_v13 = vpack.c.bf16 %v1953_v53, %v1951_v12  ;;  %v3034_v16 = vadd.f32 %v3033_v49, %v1953_v53  ;;  %v3296_v30 = vmul.f32 %v1953_v53, %v1953_v53  ;;  %v6460_v49 = vpop.f32.mrf.mxu1  ;;  %8219 = vst [vmem:[#allocation31_spill] sm:$0xff] %v6462_v56  ;;  %v703_v53 = vmul.f32 %v6183_v46, %v4240_v37 }
 0x204   :  { %8218 = vst [vmem:[#allocation30_spill] sm:$0xff] %v6460_v49  ;;  %v1010_v25 = vadd.f32 %v6192_v61, %v750_v24 }
 0x205   :  { %5206 = vst [vmem:[%s8034_s4 + $0xb8] sm:$0xff] %v4535_v13   ;;  %v3551_v12 = vadd.f32 %v3550_v33, %v3296_v30  ;;  %v751_v13 = vmul.f32 %v6183_v46, %v4336_v27  ;;  %v962_v33 = vadd.f32 %v6192_v61, %v702_v4  ;;  %v963_v9 = vadd.f32 %v6192_v61, %v703_v53 }
 0x206   :  { %3835 = vmatmul.msk.bf16.gmra.mxu1 %vm1442_vm0, %v1366_v0  ;;  %v1266_v17 = vmax.f32 %v1010_v25, 0.0  ;;  %v655_v25 = vmul.f32 %v6183_v46, %v4144_v60 }
 0x207   :  { %v1011_v35 = vadd.f32 %v6192_v61, %v751_v13  ;;  %v1218_v37 = vmax.f32 %v962_v33, 0.0  ;;  %v1219_v27 = vmax.f32 %v963_v9, 0.0  ;;  %v654_v13 = vmul.f32 %v6183_v46, %v4143_v40 }
 0x208   :  { %v6476_v48 = vpop.f32.mrf.mxu2  ;;  %v915_v40 = vadd.f32 %v6192_v61, %v655_v25 }
 0x209   :  { %8220 = vst [vmem:[#allocation32_spill] sm:$0xff] %v6476_v48  ;;  %v1267_v4 = vmax.f32 %v1011_v35, 0.0  ;;  %v4790_v24 = vpack.c.bf16 %v6476_v48, %v6449_v10  ;;  %v1391_v33 = vpack.c.bf16 %v1219_v27, %v1218_v37  ;;  %v914_v35 = vadd.f32 %v6192_v61, %v654_v13  ;;  %v5164_v13 = vld [vmem:[%s8031_s0 + $0x360] sm:$0xff]  }
 0x20a   :  { %v1956_v30 = vpop.f32.mrf.mxu0  ;;  %v6485_v50 = vpop.f32.mrf.mxu3  ;;  %v1171_v60 = vmax.f32 %v915_v40, 0.0  ;;  %v4339_v25 = vunpack.c.l.bf16 %v5164_v13 }
 0x20b   :  { %v3035_v0 = vadd.f32 %v3034_v16, %v1956_v30  ;;  %v3297_v31 = vmul.f32 %v1956_v30, %v1956_v30  ;;  %v6478_v53 = vpop.f32.mrf.mxu1  ;;  %8222 = vst [vmem:[#allocation34_spill] sm:$0xff] %v6485_v50  ;;  %v1415_v9 = vpack.c.bf16 %v1267_v4, %v1266_v17  ;;  %v1170_v43 = vmax.f32 %v914_v35, 0.0 }
 0x20c   :  { %8221 = vst [vmem:[#allocation33_spill] sm:$0xff] %v6478_v53  ;;  %v4670_v16 = vpack.c.bf16 %v6478_v53, %v6460_v49  ;;  %v4340_v35 = vunpack.c.h.bf16 %v5164_v13  ;;  %v5116_v13 = vld [vmem:[%s8031_s0 + $0x1e0] sm:$0xff]  }
 0x20d   :  { %v3552_v41 = vadd.f32 %v3551_v12, %v3297_v31  ;;  %5257 = vst [vmem:[%s8034_s4 + $0x250] sm:$0xff] %v4790_v24   ;;  %v4910_v12 = vpack.c.bf16 %v6485_v50, %v6462_v56  ;;  %v5140_v24 = vld [vmem:[%s8031_s0 + $0x2a0] sm:$0xff]   ;;  %v752_v50 = vmul.f32 %v6183_v46, %v4339_v25  ;;  %v4147_v56 = vunpack.c.l.bf16 %v5116_v13 }
 0x20e   :  { %5233 = vst [vmem:[%s8034_s4 + $0x190] sm:$0xff] %v4670_v16   ;;  %v1367_v16 = vpack.c.bf16 %v1171_v60, %v1170_v43  ;;  %v4148_v10 = vunpack.c.h.bf16 %v5116_v13 }
 0x20f   :  { %5281 = vst [vmem:[%s8034_s4 + $0x310] sm:$0xff] %v4910_v12   ;;  %3860 = vmatmul.msk.bf16.gmra.mxu2 %vm1442_vm0, %v1391_v33  ;;  %v4243_v33 = vunpack.c.l.bf16 %v5140_v24  ;;  %v1012_v60 = vadd.f32 %v6192_v61, %v752_v50 }
 0x211   :  { %3884 = vmatmul.msk.bf16.gmra.mxu3 %vm1442_vm0, %v1415_v9  ;;  %v4244_v9 = vunpack.c.h.bf16 %v5140_v24  ;;  %v704_v40 = vmul.f32 %v6183_v46, %v4243_v33  ;;  %v1268_v48 = vmax.f32 %v1012_v60, 0.0  ;;  %v657_v60 = vmul.f32 %v6183_v46, %v4148_v10 }
 0x212   :  { %v1958_v31 = vpop.f32.mrf.mxu0  ;;  %v6503_v4 = vpop.f32.mrf.mxu2 }
 0x213   :  { %v4540_v37 = vpack.c.bf16 %v1958_v31, %v1956_v30  ;;  %v3036_v17 = vadd.f32 %v3035_v0, %v1958_v31  ;;  %v3298_v27 = vmul.f32 %v1958_v31, %v1958_v31  ;;  %8223 = vst [vmem:[#allocation35_spill] sm:$0xff] %v6503_v4  ;;  %v6514_v0 = vpop.f32.mrf.mxu1  ;;  %v6516_v12 = vpop.f32.mrf.mxu3  ;;  %v705_v31 = vmul.f32 %v6183_v46, %v4244_v9 }
 0x214   :  { %8224 = vst [vmem:[#allocation36_spill] sm:$0xff] %v6514_v0 }
 0x215   :  { %5207 = vst [vmem:[%s8034_s4 + $0xc0] sm:$0xff] %v4540_v37   ;;  %v3553_v30 = vadd.f32 %v3552_v41, %v3298_v27  ;;  %v753_v37 = vmul.f32 %v6183_v46, %v4340_v35  ;;  %v964_v41 = vadd.f32 %v6192_v61, %v704_v40  ;;  %v965_v43 = vadd.f32 %v6192_v61, %v705_v31 }
 0x216   :  { %8225 = vst [vmem:[#allocation37_spill] sm:$0xff] %v6516_v12  ;;  %3836 = vmatmul.msk.bf16.gmra.mxu1 %vm1442_vm0, %v1367_v16 }
 0x217   :  { %v1013_v24 = vadd.f32 %v6192_v61, %v753_v37  ;;  %v1220_v9 = vmax.f32 %v964_v41, 0.0  ;;  %v1221_v35 = vmax.f32 %v965_v43, 0.0  ;;  %v656_v37 = vmul.f32 %v6183_v46, %v4147_v56 }
 0x218   :  { %v917_v56 = vadd.f32 %v6192_v61, %v657_v60 }
 0x219   :  { %v1269_v40 = vmax.f32 %v1013_v24, 0.0  ;;  %v1392_v41 = vpack.c.bf16 %v1221_v35, %v1220_v9  ;;  %v916_v24 = vadd.f32 %v6192_v61, %v656_v37  ;;  %v5165_v37 = vld [vmem:[%s8031_s0 + $0x368] sm:$0xff]  }
 0x21a   :  { %v1961_v27 = vpop.f32.mrf.mxu0  ;;  %v6530_v25 = vpop.f32.mrf.mxu2  ;;  %v1173_v10 = vmax.f32 %v917_v56, 0.0  ;;  %v4343_v60 = vunpack.c.l.bf16 %v5165_v37 }
 0x21b   :  { %v3037_v16 = vadd.f32 %v3036_v17, %v1961_v27  ;;  %v3299_v33 = vmul.f32 %v1961_v27, %v1961_v27  ;;  %8226 = vst [vmem:[#allocation38_spill] sm:$0xff] %v6530_v25  ;;  %v6532_v31 = vpop.f32.mrf.mxu1  ;;  %v4795_v50 = vpack.c.bf16 %v6530_v25, %v6503_v4  ;;  %v6539_v53 = vpop.f32.mrf.mxu3  ;;  %v1416_v43 = vpack.c.bf16 %v1269_v40, %v1268_v48 }
 0x21c   :  { %8227 = vst [vmem:[#allocation39_spill] sm:$0xff] %v6532_v31  ;;  %v4675_v17 = vpack.c.bf16 %v6532_v31, %v6514_v0  ;;  %v1172_v13 = vmax.f32 %v916_v24, 0.0  ;;  %v4344_v24 = vunpack.c.h.bf16 %v5165_v37  ;;  %v5117_v37 = vld [vmem:[%s8031_s0 + $0x1e8] sm:$0xff]  }
 0x21d   :  { %v3554_v15 = vadd.f32 %v3553_v30, %v3299_v33  ;;  %8228 = vst [vmem:[#allocation40_spill] sm:$0xff] %v6539_v53  ;;  %v4915_v30 = vpack.c.bf16 %v6539_v53, %v6516_v12  ;;  %v754_v53 = vmul.f32 %v6183_v46, %v4343_v60  ;;  %v4151_v60 = vunpack.c.l.bf16 %v5117_v37 }
 0x21e   :  { %5258 = vst [vmem:[%s8034_s4 + $0x258] sm:$0xff] %v4795_v50   ;;  %v5141_v50 = vld [vmem:[%s8031_s0 + $0x2a8] sm:$0xff]   ;;  %v4152_v4 = vunpack.c.h.bf16 %v5117_v37 }
 0x21f   :  { %5234 = vst [vmem:[%s8034_s4 + $0x198] sm:$0xff] %v4675_v17   ;;  %3861 = vmatmul.msk.bf16.gmra.mxu2 %vm1442_vm0, %v1392_v41  ;;  %v1368_v17 = vpack.c.bf16 %v1173_v10, %v1172_v13  ;;  %v4247_v41 = vunpack.c.l.bf16 %v5141_v50  ;;  %v1014_v10 = vadd.f32 %v6192_v61, %v754_v53  ;;  %v658_v31 = vmul.f32 %v6183_v46, %v4151_v60  ;;  %v5142_v60 = vld [vmem:[%s8031_s0 + $0x2b0] sm:$0xff]  }
 0x220   :  { %5282 = vst [vmem:[%s8034_s4 + $0x318] sm:$0xff] %v4915_v30  }
 0x221   :  { %3885 = vmatmul.msk.bf16.gmra.mxu3 %vm1442_vm0, %v1416_v43  ;;  %v4248_v43 = vunpack.c.h.bf16 %v5141_v50  ;;  %v706_v56 = vmul.f32 %v6183_v46, %v4247_v41 }
 0x222   :  { %v1963_v33 = vpop.f32.mrf.mxu0  ;;  %v6557_v40 = vpop.f32.mrf.mxu2 }
 0x223   :  { %v4545_v9 = vpack.c.bf16 %v1963_v33, %v1961_v27  ;;  %v3038_v48 = vadd.f32 %v3037_v16, %v1963_v33  ;;  %v3300_v35 = vmul.f32 %v1963_v33, %v1963_v33  ;;  %8229 = vst [vmem:[#allocation41_spill] sm:$0xff] %v6557_v40  ;;  %v6568_v16 = vpop.f32.mrf.mxu1  ;;  %v6570_v30 = vpop.f32.mrf.mxu3  ;;  %v707_v33 = vmul.f32 %v6183_v46, %v4248_v43 }
 0x224   :  { %8230 = vst [vmem:[#allocation42_spill] sm:$0xff] %v6568_v16 }
 0x225   :  { %5208 = vst [vmem:[%s8034_s4 + $0xc8] sm:$0xff] %v4545_v9   ;;  %v3555_v27 = vadd.f32 %v3554_v15, %v3300_v35  ;;  %v755_v9 = vmul.f32 %v6183_v46, %v4344_v24  ;;  %v966_v15 = vadd.f32 %v6192_v61, %v706_v56  ;;  %v967_v13 = vadd.f32 %v6192_v61, %v707_v33 }
 0x226   :  { %8231 = vst [vmem:[#allocation43_spill] sm:$0xff] %v6570_v30  ;;  %3837 = vmatmul.msk.bf16.gmra.mxu1 %vm1442_vm0, %v1368_v17  ;;  %v1270_v56 = vmax.f32 %v1014_v10, 0.0  ;;  %v659_v10 = vmul.f32 %v6183_v46, %v4152_v4 }
 0x227   :  { %v1015_v50 = vadd.f32 %v6192_v61, %v755_v9  ;;  %v1222_v43 = vmax.f32 %v966_v15, 0.0  ;;  %v1223_v24 = vmax.f32 %v967_v13, 0.0 }
 0x228   :  { %v919_v37 = vadd.f32 %v6192_v61, %v659_v10 }
 0x229   :  { %v1271_v25 = vmax.f32 %v1015_v50, 0.0  ;;  %v1393_v0 = vpack.c.bf16 %v1223_v24, %v1222_v43  ;;  %v918_v50 = vadd.f32 %v6192_v61, %v658_v31 }
 0x22a   :  { %v1966_v35 = vpop.f32.mrf.mxu0  ;;  %v6586_v12 = vpop.f32.mrf.mxu2  ;;  %v1175_v4 = vmax.f32 %v919_v37, 0.0 }
 0x22b   :  { %v6584_v17 = vadd.f32 %v3038_v48, %v1966_v35  ;;  %v3301_v41 = vmul.f32 %v1966_v35, %v1966_v35  ;;  %8232 = vst [vmem:[#allocation44_spill] sm:$0xff] %v6586_v12  ;;  %v6590_v53 = vpop.f32.mrf.mxu1  ;;  %v4800_v9 = vpack.c.bf16 %v6586_v12, %v6557_v40  ;;  %v6597_v15 = vpop.f32.mrf.mxu3  ;;  %v1417_v13 = vpack.c.bf16 %v1271_v25, %v1270_v56 }
 0x22c   :  { %8233 = vst [vmem:[#allocation45_spill] sm:$0xff] %v6590_v53  ;;  %v4680_v48 = vpack.c.bf16 %v6590_v53, %v6568_v16  ;;  %v4251_v56 = vunpack.c.l.bf16 %v5142_v60 }
 0x22d   :  { %v6588_v33 = vadd.f32 %v3555_v27, %v3301_v41  ;;  %8234 = vst [vmem:[#allocation46_spill] sm:$0xff] %v6597_v15  ;;  %v4920_v27 = vpack.c.bf16 %v6597_v15, %v6570_v30  ;;  %v1174_v41 = vmax.f32 %v918_v50, 0.0 }
 0x22e   :  { %5259 = vst [vmem:[%s8034_s4 + $0x260] sm:$0xff] %v4800_v9   ;;  %v708_v10 = vmul.f32 %v6183_v46, %v4251_v56 }
 0x22f   :  { %5235 = vst [vmem:[%s8034_s4 + $0x1a0] sm:$0xff] %v4680_v48   ;;  %3862 = vmatmul.msk.bf16.gmra.mxu2 %vm1442_vm0, %v1393_v0  ;;  %v5166_v0 = vld [vmem:[%s8031_s0 + $0x370] sm:$0xff]   ;;  %v4252_v48 = vunpack.c.h.bf16 %v5142_v60 }
 0x230   :  { %5283 = vst [vmem:[%s8034_s4 + $0x320] sm:$0xff] %v4920_v27   ;;  %v4347_v27 = vunpack.c.l.bf16 %v5166_v0 }
 0x231   :  { %3886 = vmatmul.msk.bf16.gmra.mxu3 %vm1442_vm0, %v1417_v13  ;;  %v4348_v13 = vunpack.c.h.bf16 %v5166_v0  ;;  %v709_v50 = vmul.f32 %v6183_v46, %v4252_v48  ;;  %v5118_v0 = vld [vmem:[%s8031_s0 + $0x1f0] sm:$0xff]  }
 0x232   :  { %v6614_v43 = vpop.f32.mrf.mxu0  ;;  %v6618_v31 = vpop.f32.mrf.mxu2  ;;  %v756_v37 = vmul.f32 %v6183_v46, %v4347_v27  ;;  %v4155_v56 = vunpack.c.l.bf16 %v5118_v0 }
 0x233   :  { %v4550_v25 = vpack.c.bf16 %v6614_v43, %v1966_v35  ;;  %8235 = vst [vmem:[#allocation47_spill] sm:$0xff] %v6618_v31  ;;  %v6629_v24 = vpop.f32.mrf.mxu1  ;;  %v1369_v35 = vpack.c.bf16 %v1175_v4, %v1174_v41  ;;  %v6631_v9 = vpop.f32.mrf.mxu3  ;;  %v757_v15 = vmul.f32 %v6183_v46, %v4348_v13  ;;  %v969_v41 = vadd.f32 %v6192_v61, %v709_v50 }
 0x234   :  { %8236 = vst [vmem:[#allocation48_spill] sm:$0xff] %v6629_v24  ;;  %v1016_v4 = vadd.f32 %v6192_v61, %v756_v37  ;;  %v660_v37 = vmul.f32 %v6183_v46, %v4155_v56 }
 0x235   :  { %5209 = vst [vmem:[%s8034_s4 + $0xd0] sm:$0xff] %v4550_v25   ;;  %v968_v25 = vadd.f32 %v6192_v61, %v708_v10  ;;  %v1017_v60 = vadd.f32 %v6192_v61, %v757_v15  ;;  %v1225_v27 = vmax.f32 %v969_v41, 0.0  ;;  %v4156_v10 = vunpack.c.h.bf16 %v5118_v0 }
 0x236   :  { %8237 = vst [vmem:[#allocation49_spill] sm:$0xff] %v6631_v9  ;;  %3838 = vmatmul.msk.bf16.gmra.mxu1 %vm1442_vm0, %v1369_v35  ;;  %v1272_v13 = vmax.f32 %v1016_v4, 0.0  ;;  %v920_v0 = vadd.f32 %v6192_v61, %v660_v37 }
 0x237   :  { %v1224_v35 = vmax.f32 %v968_v25, 0.0  ;;  %v1273_v12 = vmax.f32 %v1017_v60, 0.0  ;;  %v661_v60 = vmul.f32 %v6183_v46, %v4156_v10  ;;  %v5143_v10 = vld [vmem:[%s8031_s0 + $0x2b8] sm:$0xff]  }
 0x238   :  { %v1176_v56 = vmax.f32 %v920_v0, 0.0  ;;  %v6696_v0 = vld [vmem:[%s8032_s1] ss:$0 sm:$0xff] }
 0x239   :  { %v1394_v25 = vpack.c.bf16 %v1225_v27, %v1224_v35  ;;  %v1418_v4 = vpack.c.bf16 %v1273_v12, %v1272_v13  ;;  %v921_v35 = vadd.f32 %v6192_v61, %v661_v60 }
 0x23a   :  { %v6639_v30 = vpop.f32.mrf.mxu0  ;;  %v6647_v48 = vpop.f32.mrf.mxu2 }
 0x23b   :  { %8238 = vst [vmem:[#allocation50_spill] sm:$0xff] %v6647_v48  ;;  %v6649_v40 = vpop.f32.mrf.mxu1  ;;  %v4805_v50 = vpack.c.bf16 %v6647_v48, %v6618_v31  ;;  %v6656_v53 = vpop.f32.mrf.mxu3  ;;  %v1177_v12 = vmax.f32 %v921_v35, 0.0 }
 0x23c   :  { %8239 = vst [vmem:[#allocation51_spill] sm:$0xff] %v6649_v40  ;;  %v4685_v15 = vpack.c.bf16 %v6649_v40, %v6629_v24  ;;  %v4925_v41 = vpack.c.bf16 %v6656_v53, %v6631_v9 }
 0x23d   :  { %8240 = vst [vmem:[#allocation52_spill] sm:$0xff] %v6656_v53  ;;  %v1370_v37 = vpack.c.bf16 %v1177_v12, %v1176_v56  ;;  %v6706_v12 = vld [vmem:[%s8033_s2] ss:$0 sm:$0xff] }
 0x23e   :  { %5260 = vst [vmem:[%s8034_s4 + $0x268] sm:$0xff] %v4805_v50   ;;  %v5167_v50 = vld [vmem:[%s8031_s0 + $0x378] sm:$0xff]  }
 0x23f   :  { %5236 = vst [vmem:[%s8034_s4 + $0x1a8] sm:$0xff] %v4685_v15   ;;  %3863 = vmatmul.msk.bf16.gmra.mxu2 %vm1442_vm0, %v1394_v25  ;;  %v4255_v15 = vunpack.c.l.bf16 %v5143_v10  ;;  %v4352_v60 = vunpack.c.h.bf16 %v5167_v50 }
 0x240   :  { %5284 = vst [vmem:[%s8034_s4 + $0x328] sm:$0xff] %v4925_v41   ;;  %v4256_v41 = vunpack.c.h.bf16 %v5143_v10 }
 0x241   :  { %3887 = vmatmul.msk.bf16.gmra.mxu3 %vm1442_vm0, %v1418_v4  ;;  %v4351_v4 = vunpack.c.l.bf16 %v5167_v50  ;;  %v710_v35 = vmul.f32 %v6696_v0, %v4255_v15  ;;  %v759_v56 = vmul.f32 %v6696_v0, %v4352_v60 }
 0x242   :  { %v6673_v27 = vpop.f32.mrf.mxu0  ;;  %v6678_v13 = vpop.f32.mrf.mxu2 }
 0x243   :  { %v4555_v46 = vpack.c.bf16 %v6673_v27, %v6639_v30  ;;  %8241 = vst [vmem:[#allocation53_spill] sm:$0xff] %v6678_v13  ;;  %v6689_v61 = vpop.f32.mrf.mxu1  ;;  %v6691_v25 = vpop.f32.mrf.mxu3  ;;  %v758_v53 = vmul.f32 %v6696_v0, %v4351_v4  ;;  %v970_v10 = vadd.f32 %v6706_v12, %v710_v35 }
 0x244   :  { %8242 = vst [vmem:[#allocation54_spill] sm:$0xff] %v6689_v61 }
 0x245   :  { %5210 = vst [vmem:[%s8034_s4 + $0xd8] sm:$0xff] %v4555_v46   ;;  %v711_v46 = vmul.f32 %v6696_v0, %v4256_v41  ;;  %v1018_v15 = vadd.f32 %v6706_v12, %v758_v53  ;;  %v5119_v41 = vld [vmem:[%s8031_s0 + $0x1f8] sm:$0xff]   ;;  %v1226_v4 = vmax.f32 %v970_v10, 0.0 }
 0x246   :  { %8243 = vst [vmem:[#allocation55_spill] sm:$0xff] %v6691_v25  ;;  %3839 = vmatmul.msk.bf16.gmra.mxu1 %vm1442_vm0, %v1370_v37  ;;  %v1019_v37 = vadd.f32 %v6706_v12, %v759_v56  ;;  %v4159_v60 = vunpack.c.l.bf16 %v5119_v41  ;;  %v4160_v35 = vunpack.c.h.bf16 %v5119_v41 }
 0x247   :  { %v971_v9 = vadd.f32 %v6706_v12, %v711_v46  ;;  %v1274_v40 = vmax.f32 %v1018_v15, 0.0 }
 0x248   :  { %v1275_v24 = vmax.f32 %v1019_v37, 0.0  ;;  %v662_v53 = vmul.f32 %v6696_v0, %v4159_v60  ;;  %v663_v37 = vmul.f32 %v6696_v0, %v4160_v35 }
 0x249   :  { %v1227_v31 = vmax.f32 %v971_v9, 0.0 }
 0x24a   :  { %v6709_v50 = vpop.f32.mrf.mxu0  ;;  %v6717_v48 = vpop.f32.mrf.mxu2  ;;  %v1419_v15 = vpack.c.bf16 %v1275_v24, %v1274_v40  ;;  %v922_v41 = vadd.f32 %v6706_v12, %v662_v53  ;;  %v5168_v53 = vld [vmem:[%s8031_s0 + $0x380] sm:$0xff]  }
 0x24b   :  { %8244 = vst [vmem:[#allocation56_spill] sm:$0xff] %v6717_v48  ;;  %v6719_v16 = vpop.f32.mrf.mxu1  ;;  %v4810_v46 = vpack.c.bf16 %v6717_v48, %v6678_v13  ;;  %v6726_v49 = vpop.f32.mrf.mxu3  ;;  %v1395_v10 = vpack.c.bf16 %v1227_v31, %v1226_v4  ;;  %v923_v31 = vadd.f32 %v6706_v12, %v663_v37 }
 0x24c   :  { %8245 = vst [vmem:[#allocation57_spill] sm:$0xff] %v6719_v16  ;;  %v4690_v56 = vpack.c.bf16 %v6719_v16, %v6689_v61  ;;  %v4930_v9 = vpack.c.bf16 %v6726_v49, %v6691_v25  ;;  %v1178_v4 = vmax.f32 %v922_v41, 0.0  ;;  %v4355_v41 = vunpack.c.l.bf16 %v5168_v53 }
 0x24d   :  { %8246 = vst [vmem:[#allocation58_spill] sm:$0xff] %v6726_v49  ;;  %v1179_v24 = vmax.f32 %v923_v31, 0.0  ;;  %v4356_v31 = vunpack.c.h.bf16 %v5168_v53 }
 0x24e   :  { %5261 = vst [vmem:[%s8034_s4 + $0x270] sm:$0xff] %v4810_v46   ;;  %v5144_v46 = vld [vmem:[%s8031_s0 + $0x2c0] sm:$0xff]   ;;  %v760_v48 = vmul.f32 %v6696_v0, %v4355_v41 }
 0x24f   :  { %5237 = vst [vmem:[%s8034_s4 + $0x1b0] sm:$0xff] %v4690_v56   ;;  %3864 = vmatmul.msk.bf16.gmra.mxu2 %vm1442_vm0, %v1395_v10  ;;  %v1371_v10 = vpack.c.bf16 %v1179_v24, %v1178_v4  ;;  %v4260_v37 = vunpack.c.h.bf16 %v5144_v46  ;;  %v761_v13 = vmul.f32 %v6696_v0, %v4356_v31 }
 0x250   :  { %5285 = vst [vmem:[%s8034_s4 + $0x330] sm:$0xff] %v4930_v9   ;;  %v4259_v9 = vunpack.c.l.bf16 %v5144_v46  ;;  %v1020_v24 = vadd.f32 %v6706_v12, %v760_v48 }
 0x251   :  { %3888 = vmatmul.msk.bf16.gmra.mxu3 %vm1442_vm0, %v1419_v15  ;;  %v713_v25 = vmul.f32 %v6696_v0, %v4260_v37  ;;  %v1021_v46 = vadd.f32 %v6706_v12, %v761_v13 }
 0x252   :  { %v6743_v60 = vpop.f32.mrf.mxu0  ;;  %v6748_v35 = vpop.f32.mrf.mxu2  ;;  %v712_v49 = vmul.f32 %v6696_v0, %v4259_v9  ;;  %v1276_v61 = vmax.f32 %v1020_v24, 0.0 }
 0x253   :  { %v4560_v40 = vpack.c.bf16 %v6743_v60, %v6709_v50  ;;  %8247 = vst [vmem:[#allocation59_spill] sm:$0xff] %v6748_v35  ;;  %v6759_v56 = vpop.f32.mrf.mxu1  ;;  %v6761_v15 = vpop.f32.mrf.mxu3  ;;  %v973_v4 = vadd.f32 %v6706_v12, %v713_v25  ;;  %v1277_v37 = vmax.f32 %v1021_v46, 0.0  ;;  %v5169_v46 = vld [vmem:[%s8031_s0 + $0x388] sm:$0xff]  }
 0x254   :  { %8248 = vst [vmem:[#allocation60_spill] sm:$0xff] %v6759_v56 }
 0x255   :  { %5211 = vst [vmem:[%s8034_s4 + $0xe0] sm:$0xff] %v4560_v40   ;;  %v972_v40 = vadd.f32 %v6706_v12, %v712_v49  ;;  %v1420_v13 = vpack.c.bf16 %v1277_v37, %v1276_v61  ;;  %v5145_v61 = vld [vmem:[%s8031_s0 + $0x2c8] sm:$0xff]  }
 0x256   :  { %8249 = vst [vmem:[#allocation61_spill] sm:$0xff] %v6761_v15  ;;  %3840 = vmatmul.msk.bf16.gmra.mxu1 %vm1442_vm0, %v1371_v10  ;;  %v1229_v10 = vmax.f32 %v973_v4, 0.0  ;;  %v4264_v37 = vunpack.c.h.bf16 %v5145_v61 }
 0x257   :  { %v1228_v53 = vmax.f32 %v972_v40, 0.0 }
 0x259   :  { %v1396_v25 = vpack.c.bf16 %v1229_v10, %v1228_v53  ;;  %v4263_v10 = vunpack.c.l.bf16 %v5145_v61 }
 0x25a   :  { %v6769_v16 = vpop.f32.mrf.mxu0  ;;  %v6774_v9 = vpop.f32.mrf.mxu2 }
 0x25b   :  { %8250 = vst [vmem:[#allocation62_spill] sm:$0xff] %v6774_v9  ;;  %v6776_v63 = vpop.f32.mrf.mxu1  ;;  %v4815_v41 = vpack.c.bf16 %v6774_v9, %v6748_v35  ;;  %v6782_v31 = vpop.f32.mrf.mxu3 }
 0x25c   :  { %8251 = vst [vmem:[#allocation63_spill] sm:$0xff] %v6776_v63  ;;  %v4695_v49 = vpack.c.bf16 %v6776_v63, %v6759_v56  ;;  %v4935_v48 = vpack.c.bf16 %v6782_v31, %v6761_v15 }
 0x25d   :  { %8252 = vst [vmem:[#allocation64_spill] sm:$0xff] %v6782_v31 }
 0x25e   :  { %5262 = vst [vmem:[%s8034_s4 + $0x278] sm:$0xff] %v4815_v41   ;;  %v4359_v41 = vunpack.c.l.bf16 %v5169_v46 }
 0x25f   :  { %5238 = vst [vmem:[%s8034_s4 + $0x1b8] sm:$0xff] %v4695_v49   ;;  %3865 = vmatmul.msk.bf16.gmra.mxu2 %vm1442_vm0, %v1396_v25  ;;  %v4360_v25 = vunpack.c.h.bf16 %v5169_v46  ;;  %v3302_v46 = vmul.f32 %v6614_v43, %v6614_v43 }
 0x260   :  { %5286 = vst [vmem:[%s8034_s4 + $0x338] sm:$0xff] %v4935_v48   ;;  %v714_v48 = vmul.f32 %v6696_v0, %v4263_v10  ;;  %v762_v31 = vmul.f32 %v6696_v0, %v4359_v41 }
 0x261   :  { %3889 = vmatmul.msk.bf16.gmra.mxu3 %vm1442_vm0, %v1420_v13  ;;  %v715_v13 = vmul.f32 %v6696_v0, %v4264_v37  ;;  %v763_v15 = vmul.f32 %v6696_v0, %v4360_v25 }
 0x262   :  { %v6796_v40 = vpop.f32.mrf.mxu0  ;;  %v6801_v24 = vpop.f32.mrf.mxu2  ;;  %v974_v9 = vadd.f32 %v6706_v12, %v714_v48  ;;  %v1022_v35 = vadd.f32 %v6706_v12, %v762_v31  ;;  %v3303_v31 = vmul.f32 %v6639_v30, %v6639_v30 }
 0x263   :  { %v4565_v4 = vpack.c.bf16 %v6796_v40, %v6769_v16  ;;  %8253 = vst [vmem:[#allocation65_spill] sm:$0xff] %v6801_v24  ;;  %v6812_v53 = vpop.f32.mrf.mxu1  ;;  %v6814_v49 = vpop.f32.mrf.mxu3  ;;  %v1023_v61 = vadd.f32 %v6706_v12, %v763_v15 }
 0x264   :  { %8254 = vst [vmem:[#allocation66_spill] sm:$0xff] %v6814_v49  ;;  %v1230_v37 = vmax.f32 %v974_v9, 0.0  ;;  %v1278_v41 = vmax.f32 %v1022_v35, 0.0  ;;  %v3040_v9 = vadd.f32 %v6584_v17, %v6614_v43  ;;  %v3305_v43 = vmul.f32 %v6709_v50, %v6709_v50 }
 0x265   :  { %5212 = vst [vmem:[%s8034_s4 + $0xe8] sm:$0xff] %v4565_v4   ;;  %v975_v4 = vadd.f32 %v6706_v12, %v715_v13  ;;  %v1279_v48 = vmax.f32 %v1023_v61, 0.0  ;;  %v3557_v61 = vadd.f32 %v6588_v33, %v3302_v46 }
 0x267   :  { %v1231_v56 = vmax.f32 %v975_v4, 0.0  ;;  %v1421_v4 = vpack.c.bf16 %v1279_v48, %v1278_v41  ;;  %v3558_v17 = vadd.f32 %v3557_v61, %v3303_v31  ;;  %v5170_v48 = vld [vmem:[%s8031_s0 + $0x390] sm:$0xff]  }
 0x269   :  { %v1397_v8 = vpack.c.bf16 %v1231_v56, %v1230_v37  ;;  %v3041_v56 = vadd.f32 %v3040_v9, %v6639_v30  ;;  %v3306_v30 = vmul.f32 %v6743_v60, %v6743_v60  ;;  %v4363_v9 = vunpack.c.l.bf16 %v5170_v48 }
 0x26a   :  { %v6823_v63 = vpop.f32.mrf.mxu0  ;;  %v6828_v10 = vpop.f32.mrf.mxu2 }
 0x26b   :  { %8255 = vst [vmem:[#allocation67_spill] sm:$0xff] %v6828_v10  ;;  %v6830_v39 = vpop.f32.mrf.mxu1  ;;  %v4820_v25 = vpack.c.bf16 %v6828_v10, %v6801_v24  ;;  %v6838_v13 = vpop.f32.mrf.mxu3  ;;  %v3304_v10 = vmul.f32 %v6673_v27, %v6673_v27  ;;  %v3042_v46 = vadd.f32 %v3041_v56, %v6673_v27  ;;  %v4364_v56 = vunpack.c.h.bf16 %v5170_v48 }
 0x26c   :  { %8256 = vst [vmem:[#allocation68_spill] sm:$0xff] %v6830_v39  ;;  %v4700_v15 = vpack.c.bf16 %v6830_v39, %v6812_v53  ;;  %v4940_v35 = vpack.c.bf16 %v6838_v13, %v6814_v49 }
 0x26d   :  { %8257 = vst [vmem:[#allocation69_spill] sm:$0xff] %v6838_v13  ;;  %v3559_v41 = vadd.f32 %v3558_v17, %v3304_v10  ;;  %v3043_v27 = vadd.f32 %v3042_v46, %v6709_v50 }
 0x26e   :  { %5263 = vst [vmem:[%s8034_s4 + $0x280] sm:$0xff] %v4820_v25  }
 0x26f   :  { %5239 = vst [vmem:[%s8034_s4 + $0x1c0] sm:$0xff] %v4700_v15   ;;  %3866 = vmatmul.msk.bf16.gmra.mxu2 %vm1442_vm0, %v1397_v8  ;;  %v5146_v8 = vld [vmem:[%s8031_s0 + $0x2d0] sm:$0xff]   ;;  %v3044_v17 = vadd.f32 %v3043_v27, %v6743_v60 }
 0x270   :  { %5287 = vst [vmem:[%s8034_s4 + $0x340] sm:$0xff] %v4940_v35   ;;  %v4267_v31 = vunpack.c.l.bf16 %v5146_v8  ;;  %v4268_v15 = vunpack.c.h.bf16 %v5146_v8  ;;  %v3560_v35 = vadd.f32 %v3559_v41, %v3305_v43  ;;  %v3308_v8 = vmul.f32 %v6796_v40, %v6796_v40 }
 0x271   :  { %3890 = vmatmul.msk.bf16.gmra.mxu3 %vm1442_vm0, %v1421_v4  ;;  %v3307_v4 = vmul.f32 %v6769_v16, %v6769_v16  ;;  %v765_v43 = vmul.f32 %v6696_v0, %v4364_v56  ;;  %v3045_v41 = vadd.f32 %v3044_v17, %v6769_v16 }
 0x272   :  { %v1988_v33 = vpop.f32.mrf.mxu0  ;;  %v6865_v25 = vpop.f32.mrf.mxu2  ;;  %v716_v50 = vmul.f32 %v6696_v0, %v4267_v31  ;;  %v717_v46 = vmul.f32 %v6696_v0, %v4268_v15  ;;  %v3561_v13 = vadd.f32 %v3560_v35, %v3306_v30  ;;  %v3309_v31 = vmul.f32 %v6823_v63, %v6823_v63 }
 0x273   :  { %v4570_v37 = vpack.c.bf16 %v1988_v33, %v6823_v63  ;;  %v6877_v10 = vpop.f32.mrf.mxu1  ;;  %v1025_v30 = vadd.f32 %v6706_v12, %v765_v43 }
 0x274   :  { %v6881_v61 = vpop.f32.mrf.mxu3  ;;  %v976_v49 = vadd.f32 %v6706_v12, %v716_v50  ;;  %v977_v48 = vadd.f32 %v6706_v12, %v717_v46  ;;  %v3562_v27 = vadd.f32 %v3561_v13, %v3307_v4  ;;  %v3310_v46 = vmul.f32 %v1988_v33, %v1988_v33 }
 0x275   :  { %5213 = vst [vmem:[%s8034_s4 + $0xf0] sm:$0xff] %v4570_v37   ;;  %v764_v37 = vmul.f32 %v6696_v0, %v4363_v9  ;;  %v3046_v9 = vadd.f32 %v3045_v41, %v6796_v40  ;;  %v1281_v4 = vmax.f32 %v1025_v30, 0.0 }
 0x276   :  { %v3563_v35 = vadd.f32 %v3562_v27, %v3308_v8  ;;  %v1232_v56 = vmax.f32 %v976_v49, 0.0  ;;  %v1233_v16 = vmax.f32 %v977_v48, 0.0 }
 0x277   :  { %v1024_v60 = vadd.f32 %v6706_v12, %v764_v37  ;;  %v3047_v50 = vadd.f32 %v3046_v9, %v6823_v63 }
 0x278   :  { %v3564_v37 = vadd.f32 %v3563_v35, %v3309_v31  ;;  %v1398_v8 = vpack.c.bf16 %v1233_v16, %v1232_v56  ;;  %v3313_v56 = vmul.f32 %v5592_v52, %v5592_v52 }
 0x279   :  { %v1280_v17 = vmax.f32 %v1024_v60, 0.0  ;;  %v3048_v41 = vadd.f32 %v3047_v50, %v1988_v33  ;;  %v5171_v50 = vld [vmem:[%s8031_s0 + $0x398] sm:$0xff]  }
 0x27a   :  { %v1991_v15 = vpop.f32.mrf.mxu0  ;;  %v6898_v24 = vpop.f32.mrf.mxu2  ;;  %v3565_v60 = vadd.f32 %v3564_v37, %v3310_v46 }
 0x27b   :  { %v6901_v39 = vpop.f32.mrf.mxu1  ;;  %v4825_v13 = vpack.c.bf16 %v6898_v24, %v6865_v25  ;;  %v3311_v49 = vmul.f32 %v1991_v15, %v1991_v15  ;;  %v1422_v48 = vpack.c.bf16 %v1281_v4, %v1280_v17  ;;  %v3049_v27 = vadd.f32 %v3048_v41, %v1991_v15  ;;  %v5147_v17 = vld [vmem:[%s8031_s0 + $0x2d8] sm:$0xff]  }
 0x27c   :  { %v4705_v43 = vpack.c.bf16 %v6901_v39, %v6877_v10  ;;  %v6907_v40 = vpop.f32.mrf.mxu3  ;;  %v4271_v4 = vunpack.c.l.bf16 %v5147_v17  ;;  %v4272_v37 = vunpack.c.h.bf16 %v5147_v17  ;;  %v4367_v41 = vunpack.c.l.bf16 %v5171_v50 }
 0x27d   :  { %5264 = vst [vmem:[%s8034_s4 + $0x288] sm:$0xff] %v4825_v13   ;;  %v4945_v63 = vpack.c.bf16 %v6907_v40, %v6881_v61  ;;  %v3566_v31 = vadd.f32 %v3565_v60, %v3311_v49  ;;  %v4368_v49 = vunpack.c.h.bf16 %v5171_v50  ;;  %v3316_v50 = vmul.f32 %v5643_v54, %v5643_v54 }
 0x27e   :  { %5240 = vst [vmem:[%s8034_s4 + $0x1c8] sm:$0xff] %v4705_v43   ;;  %v3314_v43 = vmul.f32 %v5607_v11, %v5607_v11  ;;  %v718_v60 = vmul.f32 %v6696_v0, %v4271_v4 }
 0x27f   :  { %5288 = vst [vmem:[%s8034_s4 + $0x348] sm:$0xff] %v4945_v63   ;;  %3867 = vmatmul.msk.bf16.gmra.mxu2 %vm1442_vm0, %v1398_v8 }
 0x281   :  { %3891 = vmatmul.msk.bf16.gmra.mxu3 %vm1442_vm0, %v1422_v48 }
 0x282   :  { %v1993_v33 = vpop.f32.mrf.mxu0  ;;  %v6924_v16 = vpop.f32.mrf.mxu2 }
 0x283   :  { %v4575_v30 = vpack.c.bf16 %v1993_v33, %v1991_v15  ;;  %v3050_v9 = vadd.f32 %v3049_v27, %v1993_v33  ;;  %v3312_v35 = vmul.f32 %v1993_v33, %v1993_v33  ;;  %v6936_v13 = vpop.f32.mrf.mxu1  ;;  %v719_v27 = vmul.f32 %v6696_v0, %v4272_v37 }
 0x284   :  { %v6940_v8 = vpop.f32.mrf.mxu3  ;;  %v766_v33 = vmul.f32 %v6696_v0, %v4367_v41 }
 0x285   :  { %5214 = vst [vmem:[%s8034_s4 + $0xf8] sm:$0xff] %v4575_v30   ;;  %v3051_v15 = vadd.f32 %v3050_v9, %v5592_v52  ;;  %v3567_v46 = vadd.f32 %v3566_v31, %v3312_v35  ;;  %v3315_v52 = vmul.f32 %v5628_v32, %v5628_v32  ;;  %v767_v31 = vmul.f32 %v6696_v0, %v4368_v49 }
 0x286   :  { %v978_v35 = vadd.f32 %v6706_v12, %v718_v60  ;;  %v979_v17 = vadd.f32 %v6706_v12, %v719_v27 }
 0x287   :  { %v3052_v63 = vadd.f32 %v3051_v15, %v5607_v11  ;;  %v3568_v48 = vadd.f32 %v3567_v46, %v3313_v56  ;;  %v1026_v11 = vadd.f32 %v6706_v12, %v766_v33  ;;  %v1027_v56 = vadd.f32 %v6706_v12, %v767_v31 }
 0x288   :  { %v1234_v37 = vmax.f32 %v978_v35, 0.0  ;;  %v1235_v41 = vmax.f32 %v979_v17, 0.0  ;;  %v3318_v31 = vmul.f32 %v5679_v36, %v5679_v36  ;;  %v3319_v17 = vmul.f32 %v5700_v59, %v5700_v59 }
 0x289   :  { %v3053_v30 = vadd.f32 %v3052_v63, %v5628_v32  ;;  %v3569_v9 = vadd.f32 %v3568_v48, %v3314_v43  ;;  %v1282_v32 = vmax.f32 %v1026_v11, 0.0  ;;  %v3317_v43 = vmul.f32 %v5664_v14, %v5664_v14 }
 0x28a   :  { %v6957_v4 = vpop.f32.mrf.mxu2  ;;  %v1283_v33 = vmax.f32 %v1027_v56, 0.0 }
 0x28b   :  { %v3054_v15 = vadd.f32 %v3053_v30, %v5643_v54  ;;  %v3570_v46 = vadd.f32 %v3569_v9, %v3315_v52  ;;  %v6962_v48 = vpop.f32.mrf.mxu1  ;;  %v4830_v60 = vpack.c.bf16 %v6957_v4, %v6924_v16  ;;  %v1399_v52 = vpack.c.bf16 %v1235_v41, %v1234_v37  ;;  %v5172_v41 = vld [vmem:[%s8031_s0 + $0x3a0] sm:$0xff]  }
 0x28c   :  { %v4710_v54 = vpack.c.bf16 %v6962_v48, %v6936_v13  ;;  %v6968_v27 = vpop.f32.mrf.mxu3  ;;  %v1423_v35 = vpack.c.bf16 %v1283_v33, %v1282_v32  ;;  %v4372_v33 = vunpack.c.h.bf16 %v5172_v41 }
 0x28d   :  { %v3055_v49 = vadd.f32 %v3054_v15, %v5664_v14  ;;  %v3571_v63 = vadd.f32 %v3570_v46, %v3316_v50  ;;  %5265 = vst [vmem:[%s8034_s4 + $0x290] sm:$0xff] %v4830_v60   ;;  %v4950_v14 = vpack.c.bf16 %v6968_v27, %v6940_v8  ;;  %v3321_v46 = vmul.f32 %v5746_v44, %v5746_v44 }
 0x28e   :  { %5241 = vst [vmem:[%s8034_s4 + $0x1d0] sm:$0xff] %v4710_v54   ;;  %v3322_v60 = vmul.f32 %v5761_v3, %v5761_v3 }
 0x28f   :  { %v3056_v30 = vadd.f32 %v3055_v49, %v5679_v36  ;;  %v3572_v9 = vadd.f32 %v3571_v63, %v3317_v43  ;;  %5289 = vst [vmem:[%s8034_s4 + $0x350] sm:$0xff] %v4950_v14   ;;  %3868 = vmatmul.msk.bf16.gmra.mxu2 %vm1442_vm0, %v1399_v52  ;;  %v3320_v36 = vmul.f32 %v5715_v20, %v5715_v20  ;;  %v4371_v52 = vunpack.c.l.bf16 %v5172_v41 }
 0x291   :  { %v3057_v11 = vadd.f32 %v3056_v30, %v5700_v59  ;;  %v3573_v56 = vadd.f32 %v3572_v9, %v3318_v31  ;;  %3892 = vmatmul.msk.bf16.gmra.mxu3 %vm1442_vm0, %v1423_v35  ;;  %v5148_v59 = vld [vmem:[%s8031_s0 + $0x2e0] sm:$0xff]   ;;  %v768_v35 = vmul.f32 %v6696_v0, %v4371_v52 }
 0x292   :  { %v6994_v37 = vpop.f32.mrf.mxu2  ;;  %v4275_v49 = vunpack.c.l.bf16 %v5148_v59  ;;  %v4276_v63 = vunpack.c.h.bf16 %v5148_v59 }
 0x293   :  { %v3058_v50 = vadd.f32 %v3057_v11, %v5715_v20  ;;  %v3574_v15 = vadd.f32 %v3573_v56, %v3319_v17  ;;  %v7003_v20 = vpop.f32.mrf.mxu1  ;;  %v769_v17 = vmul.f32 %v6696_v0, %v4372_v33 }
 0x294   :  { %v7007_v54 = vpop.f32.mrf.mxu3  ;;  %v720_v9 = vmul.f32 %v6696_v0, %v4275_v49  ;;  %v721_v14 = vmul.f32 %v6696_v0, %v4276_v63  ;;  %v3325_v63 = vmul.f32 %v5818_v18, %v5818_v18 }
 0x295   :  { %v3059_v32 = vadd.f32 %v3058_v50, %v5746_v44  ;;  %v3575_v43 = vadd.f32 %v3574_v15, %v3320_v36  ;;  %v3323_v44 = vmul.f32 %v5782_v29, %v5782_v29  ;;  %v1029_v15 = vadd.f32 %v6706_v12, %v769_v17 }
 0x296   :  { %v980_v36 = vadd.f32 %v6706_v12, %v720_v9  ;;  %v981_v50 = vadd.f32 %v6706_v12, %v721_v14 }
 0x297   :  { %v3060_v31 = vadd.f32 %v3059_v32, %v5761_v3  ;;  %v3576_v30 = vadd.f32 %v3575_v43, %v3321_v46  ;;  %v1028_v3 = vadd.f32 %v6706_v12, %v768_v35  ;;  %v3324_v46 = vmul.f32 %v5797_v55, %v5797_v55 }
 0x298   :  { %v1236_v43 = vmax.f32 %v980_v36, 0.0  ;;  %v1237_v49 = vmax.f32 %v981_v50, 0.0  ;;  %v1285_v14 = vmax.f32 %v1029_v15, 0.0 }
 0x299   :  { %v3061_v11 = vadd.f32 %v3060_v31, %v5782_v29  ;;  %v3577_v56 = vadd.f32 %v3576_v30, %v3322_v60  ;;  %v1284_v29 = vmax.f32 %v1028_v3, 0.0 }
 0x29a   :  { %v7024_v32 = vpop.f32.mrf.mxu2  ;;  %v1400_v9 = vpack.c.bf16 %v1237_v49, %v1236_v43 }
 0x29b   :  { %v3062_v59 = vadd.f32 %v3061_v11, %v5797_v55  ;;  %v3578_v41 = vadd.f32 %v3577_v56, %v3323_v44  ;;  %v7029_v33 = vpop.f32.mrf.mxu1  ;;  %v4835_v31 = vpack.c.bf16 %v7024_v32, %v6994_v37  ;;  %v3326_v44 = vmul.f32 %v5833_v45, %v5833_v45 }
 0x29c   :  { %v4715_v55 = vpack.c.bf16 %v7029_v33, %v7003_v20  ;;  %v7035_v30 = vpop.f32.mrf.mxu3  ;;  %v1424_v11 = vpack.c.bf16 %v1285_v14, %v1284_v29  ;;  %v3327_v56 = vmul.f32 %v5854_v6, %v5854_v6 }
 0x29d   :  { %v3063_v60 = vadd.f32 %v3062_v59, %v5818_v18  ;;  %v3579_v52 = vadd.f32 %v3578_v41, %v3324_v46  ;;  %5266 = vst [vmem:[%s8034_s4 + $0x298] sm:$0xff] %v4835_v31   ;;  %v4955_v18 = vpack.c.bf16 %v7035_v30, %v7007_v54  ;;  %v3329_v46 = vmul.f32 %v5900_v21, %v5900_v21  ;;  %v5173_v41 = vld [vmem:[%s8031_s0 + $0x3a8] sm:$0xff]  }
 0x29e   :  { %5242 = vst [vmem:[%s8034_s4 + $0x1d8] sm:$0xff] %v4715_v55   ;;  %v4375_v31 = vunpack.c.l.bf16 %v5173_v41  ;;  %v4376_v55 = vunpack.c.h.bf16 %v5173_v41 }
 0x29f   :  { %v3064_v35 = vadd.f32 %v3063_v60, %v5833_v45  ;;  %v3580_v17 = vadd.f32 %v3579_v52, %v3325_v63  ;;  %5290 = vst [vmem:[%s8034_s4 + $0x358] sm:$0xff] %v4955_v18   ;;  %3869 = vmatmul.msk.bf16.gmra.mxu2 %vm1442_vm0, %v1400_v9  ;;  %v3328_v45 = vmul.f32 %v5874_v42, %v5874_v42 }
 0x2a0   :  { %v3330_v60 = vmul.f32 %v5923_v57, %v5923_v57  ;;  %v771_v18 = vmul.f32 %v6696_v0, %v4376_v55 }
 0x2a1   :  { %v3065_v36 = vadd.f32 %v3064_v35, %v5854_v6  ;;  %v3581_v50 = vadd.f32 %v3580_v17, %v3326_v44  ;;  %3893 = vmatmul.msk.bf16.gmra.mxu3 %vm1442_vm0, %v1424_v11  ;;  %v5149_v6 = vld [vmem:[%s8031_s0 + $0x2e8] sm:$0xff]   ;;  %v770_v17 = vmul.f32 %v6696_v0, %v4375_v31 }
 0x2a2   :  { %v7061_v59 = vpop.f32.mrf.mxu2  ;;  %v4279_v29 = vunpack.c.l.bf16 %v5149_v6  ;;  %v4280_v63 = vunpack.c.h.bf16 %v5149_v6 }
 0x2a3   :  { %v3066_v3 = vadd.f32 %v3065_v36, %v5874_v42  ;;  %v3582_v15 = vadd.f32 %v3581_v50, %v3327_v56  ;;  %v7070_v42 = vpop.f32.mrf.mxu1 }
 0x2a4   :  { %v7074_v52 = vpop.f32.mrf.mxu3  ;;  %v722_v44 = vmul.f32 %v6696_v0, %v4279_v29  ;;  %v723_v35 = vmul.f32 %v6696_v0, %v4280_v63 }
 0x2a5   :  { %v3067_v43 = vadd.f32 %v3066_v3, %v5900_v21  ;;  %v3583_v49 = vadd.f32 %v3582_v15, %v3328_v45  ;;  %v3331_v21 = vmul.f32 %v5953_v34, %v5953_v34  ;;  %v1031_v45 = vadd.f32 %v6706_v12, %v771_v18 }
 0x2a6   :  { %v982_v36 = vadd.f32 %v6706_v12, %v722_v44  ;;  %v983_v50 = vadd.f32 %v6706_v12, %v723_v35  ;;  %v3332_v3 = vmul.f32 %v5982_v19, %v5982_v19  ;;  %v3334_v44 = vmul.f32 %v6035_v47, %v6035_v47 }
 0x2a7   :  { %v3068_v9 = vadd.f32 %v3067_v43, %v5923_v57  ;;  %v3584_v14 = vadd.f32 %v3583_v49, %v3329_v46  ;;  %v1030_v57 = vadd.f32 %v6706_v12, %v770_v17  ;;  %v3333_v49 = vmul.f32 %v6006_v58, %v6006_v58 }
 0x2a8   :  { %v1238_v41 = vmax.f32 %v982_v36, 0.0  ;;  %v1239_v43 = vmax.f32 %v983_v50, 0.0  ;;  %v3335_v18 = vmul.f32 %v6059_v26, %v6059_v26 }
 0x2a9   :  { %v3069_v11 = vadd.f32 %v3068_v9, %v5953_v34  ;;  %v3585_v56 = vadd.f32 %v3584_v14, %v3330_v60  ;;  %v1286_v34 = vmax.f32 %v1030_v57, 0.0  ;;  %v1287_v14 = vmax.f32 %v1031_v45, 0.0 }
 0x2aa   :  { %v7091_v6 = vpop.f32.mrf.mxu2  ;;  %v1401_v9 = vpack.c.bf16 %v1239_v43, %v1238_v41  ;;  %v3337_v57 = vmul.f32 %v6112_v7, %v6112_v7 }
 0x2ab   :  { %v3070_v15 = vadd.f32 %v3069_v11, %v5982_v19  ;;  %v3586_v46 = vadd.f32 %v3585_v56, %v3331_v21  ;;  %v7096_v60 = vpop.f32.mrf.mxu1  ;;  %v4840_v31 = vpack.c.bf16 %v7091_v6, %v7061_v59  ;;  %v1425_v17 = vpack.c.bf16 %v1287_v14, %v1286_v34 }
 0x2ac   :  { %v4720_v19 = vpack.c.bf16 %v7096_v60, %v7070_v42  ;;  %v7102_v55 = vpop.f32.mrf.mxu3  ;;  %v3338_v34 = vmul.f32 %v6141_v22, %v6141_v22 }
 0x2ad   :  { %v3071_v29 = vadd.f32 %v3070_v15, %v6006_v58  ;;  %v3587_v63 = vadd.f32 %v3586_v46, %v3332_v3  ;;  %5267 = vst [vmem:[%s8034_s4 + $0x2a0] sm:$0xff] %v4840_v31   ;;  %v4960_v58 = vpack.c.bf16 %v7102_v55, %v7074_v52  ;;  %v5174_v3 = vld [vmem:[%s8031_s0 + $0x3b0] sm:$0xff]  }
 0x2ae   :  { %5243 = vst [vmem:[%s8034_s4 + $0x1e0] sm:$0xff] %v4720_v19  }
 0x2af   :  { %v3072_v35 = vadd.f32 %v3071_v29, %v6035_v47  ;;  %v3588_v21 = vadd.f32 %v3587_v63, %v3333_v49  ;;  %5291 = vst [vmem:[%s8034_s4 + $0x360] sm:$0xff] %v4960_v58   ;;  %3870 = vmatmul.msk.bf16.gmra.mxu2 %vm1442_vm0, %v1401_v9  ;;  %v3336_v47 = vmul.f32 %v6088_v23, %v6088_v23  ;;  %v4379_v29 = vunpack.c.l.bf16 %v5174_v3 }
 0x2b0   :  { %v4380_v63 = vunpack.c.h.bf16 %v5174_v3  ;;  %v3341_v3 = vmul.f32 %v6228_v2, %v6228_v2 }
 0x2b1   :  { %v3073_v11 = vadd.f32 %v3072_v35, %v6059_v26  ;;  %v3589_v56 = vadd.f32 %v3588_v21, %v3334_v44  ;;  %3894 = vmatmul.msk.bf16.gmra.mxu3 %vm1442_vm0, %v1425_v17  ;;  %v5150_v26 = vld [vmem:[%s8031_s0 + $0x2f0] sm:$0xff]   ;;  %v772_v44 = vmul.f32 %v6696_v0, %v4379_v29 }
 0x2b2   :  { %v7128_v45 = vpop.f32.mrf.mxu2  ;;  %v4283_v41 = vunpack.c.l.bf16 %v5150_v26  ;;  %v4284_v43 = vunpack.c.h.bf16 %v5150_v26  ;;  %v773_v35 = vmul.f32 %v6696_v0, %v4380_v63 }
 0x2b3   :  { %v3074_v36 = vadd.f32 %v3073_v11, %v6088_v23  ;;  %v3590_v50 = vadd.f32 %v3589_v56, %v3335_v18  ;;  %v7137_v23 = vpop.f32.mrf.mxu1  ;;  %v3340_v56 = vmul.f32 %v6204_v38, %v6204_v38 }
 0x2b4   :  { %v7141_v49 = vpop.f32.mrf.mxu3  ;;  %v724_v9 = vmul.f32 %v6696_v0, %v4283_v41  ;;  %v725_v14 = vmul.f32 %v6696_v0, %v4284_v43  ;;  %v1033_v11 = vadd.f32 %v6706_v12, %v773_v35 }
 0x2b5   :  { %v3591_v15 = vadd.f32 %v3590_v50, %v3336_v47  ;;  %v3075_v46 = vadd.f32 %v3074_v36, %v6112_v7  ;;  %v3339_v7 = vmul.f32 %v6165_v5, %v6165_v5 }
 0x2b6   :  { %v984_v17 = vadd.f32 %v6706_v12, %v724_v9  ;;  %v985_v18 = vadd.f32 %v6706_v12, %v725_v14  ;;  %v1289_v63 = vmax.f32 %v1033_v11, 0.0 }
 0x2b7   :  { %v3076_v31 = vadd.f32 %v3075_v46, %v6141_v22  ;;  %v3592_v19 = vadd.f32 %v3591_v15, %v3337_v57  ;;  %v1032_v22 = vadd.f32 %v6706_v12, %v772_v44 }
 0x2b8   :  { %v1240_v57 = vmax.f32 %v984_v17, 0.0  ;;  %v1241_v26 = vmax.f32 %v985_v18, 0.0  ;;  %v3345_v17 = vmul.f32 %v6346_v28, %v6346_v28 }
 0x2b9   :  { %v3077_v21 = vadd.f32 %v3076_v31, %v6165_v5  ;;  %v3593_v58 = vadd.f32 %v3592_v19, %v3338_v34  ;;  %v1288_v5 = vmax.f32 %v1032_v22, 0.0  ;;  %v3342_v31 = vmul.f32 %v6257_v51, %v6257_v51  ;;  %v5175_v22 = vld [vmem:[%s8031_s0 + $0x3b8] sm:$0xff]  }
 0x2ba   :  { %v7158_v50 = vpop.f32.mrf.mxu2  ;;  %v1402_v29 = vpack.c.bf16 %v1241_v26, %v1240_v57  ;;  %v8258_v57 = vld [vmem:[#allocation21_spill] sm:$0xff] }
 0x2bb   :  { %v3078_v47 = vadd.f32 %v3077_v21, %v6204_v38  ;;  %v3594_v36 = vadd.f32 %v3593_v58, %v3339_v7  ;;  %v7163_v41 = vpop.f32.mrf.mxu1  ;;  %v4845_v43 = vpack.c.bf16 %v7158_v50, %v7128_v45  ;;  %v1426_v14 = vpack.c.bf16 %v1289_v63, %v1288_v5 }
 0x2bc   :  { %v4725_v38 = vpack.c.bf16 %v7163_v41, %v7137_v23  ;;  %v7169_v34 = vpop.f32.mrf.mxu3  ;;  %v3343_v7 = vmul.f32 %v6281_v62, %v6281_v62  ;;  %v3346_v26 = vmul.f32 %v8258_v57, %v8258_v57 }
 0x2bd   :  { %v3079_v15 = vadd.f32 %v3078_v47, %v6228_v2  ;;  %v3595_v46 = vadd.f32 %v3594_v36, %v3340_v56  ;;  %5268 = vst [vmem:[%s8034_s4 + $0x2a8] sm:$0xff] %v4845_v43   ;;  %v4965_v2 = vpack.c.bf16 %v7169_v34, %v7141_v49 }
 0x2be   :  { %5244 = vst [vmem:[%s8034_s4 + $0x1e8] sm:$0xff] %v4725_v38  }
 0x2bf   :  { %v3080_v19 = vadd.f32 %v3079_v15, %v6257_v51  ;;  %v3596_v9 = vadd.f32 %v3595_v46, %v3341_v3  ;;  %5292 = vst [vmem:[%s8034_s4 + $0x368] sm:$0xff] %v4965_v2   ;;  %3871 = vmatmul.msk.bf16.gmra.mxu2 %vm1442_vm0, %v1402_v29  ;;  %v3344_v51 = vmul.f32 %v6310_v1, %v6310_v1  ;;  %v4383_v3 = vunpack.c.l.bf16 %v5175_v22 }
 0x2c0   :  { %v4384_v15 = vunpack.c.h.bf16 %v5175_v22 }
 0x2c1   :  { %v3081_v44 = vadd.f32 %v3080_v19, %v6281_v62  ;;  %v3597_v35 = vadd.f32 %v3596_v9, %v3342_v31  ;;  %3895 = vmatmul.msk.bf16.gmra.mxu3 %vm1442_vm0, %v1426_v14  ;;  %v5151_v62 = vld [vmem:[%s8031_s0 + $0x2f8] sm:$0xff]   ;;  %v774_v31 = vmul.f32 %v6696_v0, %v4383_v3 }
 0x2c2   :  { %v7195_v18 = vpop.f32.mrf.mxu2  ;;  %v4287_v47 = vunpack.c.l.bf16 %v5151_v62  ;;  %v4288_v36 = vunpack.c.h.bf16 %v5151_v62  ;;  %v775_v19 = vmul.f32 %v6696_v0, %v4384_v15 }
 0x2c3   :  { %v3082_v21 = vadd.f32 %v3081_v44, %v6310_v1  ;;  %v3598_v58 = vadd.f32 %v3597_v35, %v3343_v7  ;;  %v7204_v1 = vpop.f32.mrf.mxu1  ;;  %v1034_v44 = vadd.f32 %v6706_v12, %v774_v31 }
 0x2c4   :  { %v7208_v5 = vpop.f32.mrf.mxu3  ;;  %v726_v38 = vmul.f32 %v6696_v0, %v4287_v47  ;;  %v727_v29 = vmul.f32 %v6696_v0, %v4288_v36  ;;  %v1035_v35 = vadd.f32 %v6706_v12, %v775_v19  ;;  %v8261_v47 = vld [vmem:[#allocation30_spill] sm:$0xff] }
 0x2c5   :  { %v3083_v11 = vadd.f32 %v3082_v21, %v6346_v28  ;;  %v3599_v56 = vadd.f32 %v3598_v58, %v3344_v51  ;;  %v8259_v28 = vld [vmem:[#allocation24_spill] sm:$0xff]  ;;  %v8260_v51 = vld [vmem:[#allocation27_spill] sm:$0xff]  ;;  %v3349_v36 = vmul.f32 %v8261_v47, %v8261_v47 }
 0x2c6   :  { %v3347_v63 = vmul.f32 %v8259_v28, %v8259_v28  ;;  %v986_v14 = vadd.f32 %v6706_v12, %v726_v38  ;;  %v987_v7 = vadd.f32 %v6706_v12, %v727_v29  ;;  %v3348_v21 = vmul.f32 %v8260_v51, %v8260_v51 }
 0x2c7   :  { %v3084_v46 = vadd.f32 %v3083_v11, %v8258_v57  ;;  %v3600_v43 = vadd.f32 %v3599_v56, %v3345_v17  ;;  %v1290_v56 = vmax.f32 %v1034_v44, 0.0  ;;  %v1291_v29 = vmax.f32 %v1035_v35, 0.0 }
 0x2c8   :  { %v1242_v22 = vmax.f32 %v986_v14, 0.0  ;;  %v1243_v11 = vmax.f32 %v987_v7, 0.0  ;;  %v8263_v14 = vld [vmem:[#allocation36_spill] sm:$0xff] }
 0x2c9   :  { %v3085_v9 = vadd.f32 %v3084_v46, %v8259_v28  ;;  %v3601_v2 = vadd.f32 %v3600_v43, %v3346_v26  ;;  %v8262_v28 = vld [vmem:[#allocation33_spill] sm:$0xff]  ;;  %v3351_v7 = vmul.f32 %v8263_v14, %v8263_v14 }
 0x2ca   :  { %v7225_v62 = vpop.f32.mrf.mxu2  ;;  %v1403_v38 = vpack.c.bf16 %v1243_v11, %v1242_v22  ;;  %v8265_v22 = vld [vmem:[#allocation42_spill] sm:$0xff] }
 0x2cb   :  { %v3086_v58 = vadd.f32 %v3085_v9, %v8260_v51  ;;  %v3602_v17 = vadd.f32 %v3601_v2, %v3347_v63  ;;  %v7230_v3 = vpop.f32.mrf.mxu1  ;;  %v4850_v15 = vpack.c.bf16 %v7225_v62, %v7195_v18  ;;  %v3350_v63 = vmul.f32 %v8262_v28, %v8262_v28  ;;  %v8264_v51 = vld [vmem:[#allocation39_spill] sm:$0xff] }
 0x2cc   :  { %v4730_v46 = vpack.c.bf16 %v7230_v3, %v7204_v1  ;;  %v7236_v43 = vpop.f32.mrf.mxu3  ;;  %v1427_v2 = vpack.c.bf16 %v1291_v29, %v1290_v56  ;;  %v3353_v11 = vmul.f32 %v8265_v22, %v8265_v22 }
 0x2cd   :  { %v3087_v57 = vadd.f32 %v3086_v58, %v8261_v47  ;;  %v3603_v26 = vadd.f32 %v3602_v17, %v3348_v21  ;;  %5269 = vst [vmem:[%s8034_s4 + $0x2b0] sm:$0xff] %v4850_v15   ;;  %v4970_v9 = vpack.c.bf16 %v7236_v43, %v7208_v5  ;;  %v3352_v21 = vmul.f32 %v8264_v51, %v8264_v51  ;;  %v5176_v47 = vld [vmem:[%s8031_s0 + $0x3c0] sm:$0xff]  }
 0x2ce   :  { %5245 = vst [vmem:[%s8034_s4 + $0x1f0] sm:$0xff] %v4730_v46   ;;  %v4387_v15 = vunpack.c.l.bf16 %v5176_v47  ;;  %v4388_v46 = vunpack.c.h.bf16 %v5176_v47 }
 0x2cf   :  { %v3088_v31 = vadd.f32 %v3087_v57, %v8262_v28  ;;  %v3604_v19 = vadd.f32 %v3603_v26, %v3349_v36  ;;  %5293 = vst [vmem:[%s8034_s4 + $0x370] sm:$0xff] %v4970_v9   ;;  %3872 = vmatmul.msk.bf16.gmra.mxu2 %vm1442_vm0, %v1403_v38  ;;  %v8266_v38 = vld [vmem:[#allocation45_spill] sm:$0xff] }
 0x2d0   :  { %v3354_v29 = vmul.f32 %v8266_v38, %v8266_v38  ;;  %v777_v9 = vmul.f32 %v6696_v0, %v4388_v46 }
 0x2d1   :  { %v3089_v44 = vadd.f32 %v3088_v31, %v8263_v14  ;;  %v3605_v35 = vadd.f32 %v3604_v19, %v3350_v63  ;;  %3896 = vmatmul.msk.bf16.gmra.mxu3 %vm1442_vm0, %v1427_v2  ;;  %v776_v19 = vmul.f32 %v6696_v0, %v4387_v15  ;;  %v8267_v2 = vld [vmem:[#allocation48_spill] sm:$0xff] }
 0x2d2   :  { %v7262_v56 = vpop.f32.mrf.mxu2  ;;  %v3355_v14 = vmul.f32 %v8267_v2, %v8267_v2 }
 0x2d3   :  { %v3090_v58 = vadd.f32 %v3089_v44, %v8264_v51  ;;  %v3606_v17 = vadd.f32 %v3605_v35, %v3351_v7  ;;  %v7268_v26 = vpop.f32.mrf.mxu1  ;;  %v1036_v35 = vadd.f32 %v6706_v12, %v776_v19  ;;  %v1037_v51 = vadd.f32 %v6706_v12, %v777_v9 }
 0x2d4   :  { %v7272_v28 = vpop.f32.mrf.mxu3 }
 0x2d5   :  { %v3091_v36 = vadd.f32 %v3090_v58, %v8265_v22  ;;  %v3607_v57 = vadd.f32 %v3606_v17, %v3352_v21  ;;  %v8268_v21 = vld [vmem:[#allocation51_spill] sm:$0xff]  ;;  %v1292_v47 = vmax.f32 %v1036_v35, 0.0  ;;  %v1293_v0 = vmax.f32 %v1037_v51, 0.0 }
 0x2d6   :  { %v3356_v58 = vmul.f32 %v8268_v21, %v8268_v21 }
 0x2d7   :  { %v3092_v63 = vadd.f32 %v3091_v36, %v8266_v38  ;;  %v3608_v31 = vadd.f32 %v3607_v57, %v3353_v11  ;;  %v8269_v36 = vld [vmem:[#allocation54_spill] sm:$0xff] }
 0x2d8   :  { %v3357_v57 = vmul.f32 %v8269_v36, %v8269_v36 }
 0x2d9   :  { %v3093_v7 = vadd.f32 %v3092_v63, %v8267_v2  ;;  %v3609_v44 = vadd.f32 %v3608_v31, %v3354_v29  ;;  %v8270_v29 = vld [vmem:[#allocation57_spill] sm:$0xff] }
 0x2da   :  { %v7285_v11 = vpop.f32.mrf.mxu2  ;;  %v3358_v63 = vmul.f32 %v8270_v29, %v8270_v29 }
 0x2db   :  { %v3094_v17 = vadd.f32 %v3093_v7, %v8268_v21  ;;  %v3610_v22 = vadd.f32 %v3609_v44, %v3355_v14  ;;  %v7290_v38 = vpop.f32.mrf.mxu1  ;;  %v4855_v12 = vpack.c.bf16 %v7285_v11, %v7262_v56  ;;  %v1428_v7 = vpack.c.bf16 %v1293_v0, %v1292_v47  ;;  %v8271_v44 = vld [vmem:[#allocation60_spill] sm:$0xff] }
 0x2dc   :  { %v4735_v31 = vpack.c.bf16 %v7290_v38, %v7268_v26  ;;  %v7298_v19 = vpop.f32.mrf.mxu3  ;;  %v3359_v35 = vmul.f32 %v8271_v44, %v8271_v44  ;;  %v3361_v0 = vmul.f32 %v6812_v53, %v6812_v53 }
 0x2dd   :  { %v3095_v15 = vadd.f32 %v3094_v17, %v8269_v36  ;;  %v3611_v46 = vadd.f32 %v3610_v22, %v3356_v58  ;;  %5270 = vst [vmem:[%s8034_s4 + $0x2b8] sm:$0xff] %v4855_v12   ;;  %v4975_v14 = vpack.c.bf16 %v7298_v19, %v7272_v28  ;;  %v8272_v58 = vld [vmem:[#allocation63_spill] sm:$0xff] }
 0x2de   :  { %5246 = vst [vmem:[%s8034_s4 + $0x1f8] sm:$0xff] %v4735_v31   ;;  %v3360_v17 = vmul.f32 %v8272_v58, %v8272_v58 }
 0x2df   :  { %v3096_v9 = vadd.f32 %v3095_v15, %v8270_v29  ;;  %v3612_v2 = vadd.f32 %v3611_v46, %v3357_v57  ;;  %5294 = vst [vmem:[%s8034_s4 + $0x378] sm:$0xff] %v4975_v14   ;;  %v5177_v57 = vld [vmem:[%s8031_s0 + $0x3c8] sm:$0xff]  }
 0x2e0   :  { %v4391_v12 = vunpack.c.l.bf16 %v5177_v57  ;;  %v4392_v29 = vunpack.c.h.bf16 %v5177_v57  ;;  %v3364_v57 = vmul.f32 %v6901_v39, %v6901_v39 }
 0x2e1   :  { %v3097_v51 = vadd.f32 %v3096_v9, %v8271_v44  ;;  %v3613_v21 = vadd.f32 %v3612_v2, %v3358_v63  ;;  %3897 = vmatmul.msk.bf16.gmra.mxu3 %vm1442_vm0, %v1428_v7  ;;  %v8273_v63 = vld [vmem:[#allocation68_spill] sm:$0xff]  ;;  %v7335_v7 = vld [vmem:[%s8032_s1] ss:$0 sm:$0xff] }
 0x2e2   :  { %v7321_v36 = vpop.f32.mrf.mxu2  ;;  %v3362_v31 = vmul.f32 %v8273_v63, %v8273_v63  ;;  %v778_v44 = vmul.f32 %v7335_v7, %v4391_v12 }
 0x2e3   :  { %v3098_v22 = vadd.f32 %v3097_v51, %v8272_v58  ;;  %v3614_v47 = vadd.f32 %v3613_v21, %v3359_v35  ;;  %v3363_v35 = vmul.f32 %v6877_v10, %v6877_v10  ;;  %v7345_v58 = vld [vmem:[%s8033_s2] ss:$0 sm:$0xff] }
 0x2e4   :  { %v7329_v9 = vpop.f32.mrf.mxu3 }
 0x2e5   :  { %v3099_v15 = vadd.f32 %v3098_v22, %v6812_v53  ;;  %v3615_v46 = vadd.f32 %v3614_v47, %v3360_v17  ;;  %v779_v53 = vmul.f32 %v7335_v7, %v4392_v29  ;;  %v1038_v17 = vadd.f32 %v7345_v58, %v778_v44 }
 0x2e7   :  { %v3616_v2 = vadd.f32 %v3615_v46, %v3361_v0  ;;  %v3100_v14 = vadd.f32 %v3099_v15, %v8273_v63  ;;  %v1039_v22 = vadd.f32 %v7345_v58, %v779_v53  ;;  %v1294_v46 = vmax.f32 %v1038_v17, 0.0 }
 0x2e8   :  { %v3365_v63 = vmul.f32 %v6936_v13, %v6936_v13 }
 0x2e9   :  { %v3617_v51 = vadd.f32 %v3616_v2, %v3362_v31  ;;  %v3101_v21 = vadd.f32 %v3100_v14, %v6877_v10  ;;  %v1295_v12 = vmax.f32 %v1039_v22, 0.0  ;;  %v3366_v2 = vmul.f32 %v6962_v48, %v6962_v48 }
 0x2ea   :  { %v7352_v15 = vpop.f32.mrf.mxu2  ;;  %v3368_v22 = vmul.f32 %v7029_v33, %v7029_v33 }
 0x2eb   :  { %v3618_v47 = vadd.f32 %v3617_v51, %v3363_v35  ;;  %v3102_v0 = vadd.f32 %v3101_v21, %v6901_v39  ;;  %v4860_v31 = vpack.c.bf16 %v7352_v15, %v7321_v36  ;;  %v1429_v35 = vpack.c.bf16 %v1295_v12, %v1294_v46 }
 0x2ec   :  { %v7361_v14 = vpop.f32.mrf.mxu3  ;;  %v3367_v21 = vmul.f32 %v7003_v20, %v7003_v20 }
 0x2ed   :  { %v3619_v10 = vadd.f32 %v3618_v47, %v3364_v57  ;;  %v3103_v29 = vadd.f32 %v3102_v0, %v6936_v13  ;;  %5271 = vst [vmem:[%s8034_s4 + $0x2c0] sm:$0xff] %v4860_v31   ;;  %v4980_v53 = vpack.c.bf16 %v7361_v14, %v7329_v9  ;;  %v3369_v47 = vmul.f32 %v7070_v42, %v7070_v42 }
 0x2ef   :  { %v3620_v44 = vadd.f32 %v3619_v10, %v3365_v63  ;;  %v3104_v39 = vadd.f32 %v3103_v29, %v6962_v48  ;;  %5295 = vst [vmem:[%s8034_s4 + $0x380] sm:$0xff] %v4980_v53   ;;  %v3370_v29 = vmul.f32 %v7096_v60, %v7096_v60 }
 0x2f1   :  { %v3621_v13 = vadd.f32 %v3620_v44, %v3366_v2  ;;  %v3105_v51 = vadd.f32 %v3104_v39, %v7003_v20  ;;  %3898 = vmatmul.msk.bf16.gmra.mxu3 %vm1442_vm0, %v1429_v35  ;;  %v5178_v20 = vld [vmem:[%s8031_s0 + $0x3d0] sm:$0xff]   ;;  %v3371_v39 = vmul.f32 %v7137_v23, %v7137_v23 }
 0x2f2   :  { %v7381_v0 = vpop.f32.mrf.mxu2  ;;  %v4395_v12 = vunpack.c.l.bf16 %v5178_v20  ;;  %v4396_v10 = vunpack.c.h.bf16 %v5178_v20 }
 0x2f3   :  { %v3622_v17 = vadd.f32 %v3621_v13, %v3367_v21  ;;  %v3106_v48 = vadd.f32 %v3105_v51, %v7029_v33 }
 0x2f4   :  { %v7389_v33 = vpop.f32.mrf.mxu3  ;;  %v780_v2 = vmul.f32 %v7335_v7, %v4395_v12  ;;  %v781_v44 = vmul.f32 %v7335_v7, %v4396_v10 }
 0x2f5   :  { %v3623_v57 = vadd.f32 %v3622_v17, %v3368_v22  ;;  %v3107_v46 = vadd.f32 %v3106_v48, %v7070_v42  ;;  %8274 = vst [vmem:[#allocation21_spill] sm:$0xff] %v7389_v33 }
 0x2f6   :  { %v1040_v35 = vadd.f32 %v7345_v58, %v780_v2  ;;  %v1041_v13 = vadd.f32 %v7345_v58, %v781_v44  ;;  %v3375_v2 = vmul.f32 %v7268_v26, %v7268_v26 }
 0x2f7   :  { %v3624_v63 = vadd.f32 %v3623_v57, %v3369_v47  ;;  %v3108_v31 = vadd.f32 %v3107_v46, %v7096_v60  ;;  %v3372_v60 = vmul.f32 %v7163_v41, %v7163_v41  ;;  %v3374_v46 = vmul.f32 %v7230_v3, %v7230_v3 }
 0x2f8   :  { %v1296_v48 = vmax.f32 %v1040_v35, 0.0  ;;  %v1297_v22 = vmax.f32 %v1041_v13, 0.0 }
 0x2f9   :  { %v3625_v53 = vadd.f32 %v3624_v63, %v3370_v29  ;;  %v3109_v42 = vadd.f32 %v3108_v31, %v7137_v23  ;;  %v3373_v23 = vmul.f32 %v7204_v1, %v7204_v1 }
 0x2fa   :  { %v7402_v17 = vpop.f32.mrf.mxu2  ;;  %v1430_v63 = vpack.c.bf16 %v1297_v22, %v1296_v48  ;;  %v8277_v48 = vld [vmem:[#allocation3_spill] sm:$0xff] }
 0x2fb   :  { %v3626_v51 = vadd.f32 %v3625_v53, %v3371_v39  ;;  %v3110_v21 = vadd.f32 %v3109_v42, %v7163_v41  ;;  %v4865_v57 = vpack.c.bf16 %v7402_v17, %v7381_v0  ;;  %v3376_v39 = vmul.f32 %v7290_v38, %v7290_v38  ;;  %v8276_v53 = vld [vmem:[#allocation2_spill] sm:$0xff] }
 0x2fc   :  { %v7411_v12 = vpop.f32.mrf.mxu3  ;;  %v3377_v42 = vmul.f32 %v8276_v53, %v8276_v53  ;;  %v3378_v22 = vmul.f32 %v8277_v48, %v8277_v48 }
 0x2fd   :  { %v3627_v47 = vadd.f32 %v3626_v51, %v3372_v60  ;;  %v3111_v20 = vadd.f32 %v3110_v21, %v7204_v1  ;;  %8275 = vst [vmem:[#allocation24_spill] sm:$0xff] %v7411_v12  ;;  %v4985_v29 = vpack.c.bf16 %v7411_v12, %v7389_v33 }
 0x2fe   :  { %5272 = vst [vmem:[%s8034_s4 + $0x2c8] sm:$0xff] %v4865_v57  }
 0x2ff   :  { %v3628_v10 = vadd.f32 %v3627_v47, %v3373_v23  ;;  %v3112_v41 = vadd.f32 %v3111_v20, %v7230_v3  ;;  %5296 = vst [vmem:[%s8034_s4 + $0x388] sm:$0xff] %v4985_v29  }
 0x301   :  { %v3629_v1 = vadd.f32 %v3628_v10, %v3374_v46  ;;  %v3113_v31 = vadd.f32 %v3112_v41, %v7268_v26  ;;  %3899 = vmatmul.msk.bf16.gmra.mxu3 %vm1442_vm0, %v1430_v63  ;;  %v5179_v26 = vld [vmem:[%s8031_s0 + $0x3d8] sm:$0xff]   ;;  %v8279_v46 = vld [vmem:[#allocation4_spill] sm:$0xff] }
 0x302   :  { %v7431_v35 = vpop.f32.mrf.mxu2  ;;  %v4399_v21 = vunpack.c.l.bf16 %v5179_v26  ;;  %v4400_v60 = vunpack.c.h.bf16 %v5179_v26  ;;  %v3379_v10 = vmul.f32 %v8279_v46, %v8279_v46  ;;  %v8281_v26 = vld [vmem:[#allocation6_spill] sm:$0xff] }
 0x303   :  { %v3630_v44 = vadd.f32 %v3629_v1, %v3375_v2  ;;  %v3114_v3 = vadd.f32 %v3113_v31, %v7290_v38  ;;  %v8280_v31 = vld [vmem:[#allocation5_spill] sm:$0xff] }
 0x304   :  { %v7439_v38 = vpop.f32.mrf.mxu3  ;;  %v782_v23 = vmul.f32 %v7335_v7, %v4399_v21  ;;  %v783_v57 = vmul.f32 %v7335_v7, %v4400_v60  ;;  %v3380_v2 = vmul.f32 %v8280_v31, %v8280_v31 }
 0x305   :  { %v3115_v13 = vadd.f32 %v3114_v3, %v8276_v53  ;;  %v3631_v51 = vadd.f32 %v3630_v44, %v3376_v39  ;;  %8278 = vst [vmem:[#allocation27_spill] sm:$0xff] %v7439_v38 }
 0x306   :  { %v1042_v63 = vadd.f32 %v7345_v58, %v782_v23  ;;  %v1043_v1 = vadd.f32 %v7345_v58, %v783_v57 }
 0x307   :  { %v3116_v47 = vadd.f32 %v3115_v13, %v8277_v48  ;;  %v3632_v20 = vadd.f32 %v3631_v51, %v3377_v42  ;;  %v3381_v13 = vmul.f32 %v8281_v26, %v8281_v26  ;;  %v8282_v48 = vld [vmem:[#allocation7_spill] sm:$0xff] }
 0x308   :  { %v1298_v53 = vmax.f32 %v1042_v63, 0.0  ;;  %v1299_v42 = vmax.f32 %v1043_v1, 0.0  ;;  %v8285_v1 = vld [vmem:[#allocation9_spill] sm:$0xff] }
 0x309   :  { %v3117_v41 = vadd.f32 %v3116_v47, %v8279_v46  ;;  %v3633_v29 = vadd.f32 %v3632_v20, %v3378_v22  ;;  %v3382_v22 = vmul.f32 %v8282_v48, %v8282_v48 }
 0x30a   :  { %v7452_v39 = vpop.f32.mrf.mxu2  ;;  %v1431_v46 = vpack.c.bf16 %v1299_v42, %v1298_v53 }
 0x30b   :  { %v3118_v44 = vadd.f32 %v3117_v41, %v8280_v31  ;;  %v3634_v3 = vadd.f32 %v3633_v29, %v3379_v10  ;;  %v4870_v60 = vpack.c.bf16 %v7452_v39, %v7431_v35  ;;  %v8284_v10 = vld [vmem:[#allocation8_spill] sm:$0xff]  ;;  %v3384_v31 = vmul.f32 %v8285_v1, %v8285_v1 }
 0x30c   :  { %v7461_v47 = vpop.f32.mrf.mxu3  ;;  %v3383_v41 = vmul.f32 %v8284_v10, %v8284_v10 }
 0x30d   :  { %v3119_v51 = vadd.f32 %v3118_v44, %v8281_v26  ;;  %v3635_v21 = vadd.f32 %v3634_v3, %v3380_v2  ;;  %8283 = vst [vmem:[#allocation30_spill] sm:$0xff] %v7461_v47  ;;  %v4990_v57 = vpack.c.bf16 %v7461_v47, %v7439_v38  ;;  %v8286_v3 = vld [vmem:[#allocation10_spill] sm:$0xff] }
 0x30e   :  { %5273 = vst [vmem:[%s8034_s4 + $0x2d0] sm:$0xff] %v4870_v60   ;;  %v3385_v53 = vmul.f32 %v8286_v3, %v8286_v3  ;;  %v5180_v26 = vld [vmem:[%s8031_s0 + $0x3e0] sm:$0xff]  }
 0x30f   :  { %v3120_v20 = vadd.f32 %v3119_v51, %v8282_v48  ;;  %v3636_v23 = vadd.f32 %v3635_v21, %v3381_v13  ;;  %5297 = vst [vmem:[%s8034_s4 + $0x390] sm:$0xff] %v4990_v57   ;;  %v4403_v21 = vunpack.c.l.bf16 %v5180_v26  ;;  %v4404_v60 = vunpack.c.h.bf16 %v5180_v26  ;;  %v8287_v48 = vld [vmem:[#allocation11_spill] sm:$0xff] }
 0x311   :  { %v3121_v29 = vadd.f32 %v3120_v20, %v8284_v10  ;;  %v3637_v63 = vadd.f32 %v3636_v23, %v3382_v22  ;;  %3900 = vmatmul.msk.bf16.gmra.mxu3 %vm1442_vm0, %v1431_v46  ;;  %v3386_v22 = vmul.f32 %v8287_v48, %v8287_v48  ;;  %v784_v46 = vmul.f32 %v7335_v7, %v4403_v21 }
 0x312   :  { %v7481_v42 = vpop.f32.mrf.mxu2  ;;  %v785_v10 = vmul.f32 %v7335_v7, %v4404_v60  ;;  %v8291_v60 = vld [vmem:[#allocation14_spill] sm:$0xff] }
 0x313   :  { %v3122_v2 = vadd.f32 %v3121_v29, %v8285_v1  ;;  %v3638_v44 = vadd.f32 %v3637_v63, %v3383_v41  ;;  %v8289_v41 = vld [vmem:[#allocation12_spill] sm:$0xff] }
 0x314   :  { %v7489_v20 = vpop.f32.mrf.mxu3  ;;  %v3387_v29 = vmul.f32 %v8289_v41, %v8289_v41 }
 0x315   :  { %v3123_v13 = vadd.f32 %v3122_v2, %v8286_v3  ;;  %v3639_v51 = vadd.f32 %v3638_v44, %v3384_v31  ;;  %8288 = vst [vmem:[#allocation33_spill] sm:$0xff] %v7489_v20  ;;  %v1044_v31 = vadd.f32 %v7345_v58, %v784_v46  ;;  %v1045_v2 = vadd.f32 %v7345_v58, %v785_v10  ;;  %v8290_v44 = vld [vmem:[#allocation13_spill] sm:$0xff]  ;;  %v8292_v46 = vld [vmem:[#allocation15_spill] sm:$0xff] }
 0x316   :  { %v3388_v3 = vmul.f32 %v8290_v44, %v8290_v44  ;;  %v3390_v10 = vmul.f32 %v8292_v46, %v8292_v46 }
 0x317   :  { %v3124_v23 = vadd.f32 %v3123_v13, %v8287_v48  ;;  %v3640_v57 = vadd.f32 %v3639_v51, %v3385_v53  ;;  %v1300_v51 = vmax.f32 %v1044_v31, 0.0  ;;  %v1301_v21 = vmax.f32 %v1045_v2, 0.0  ;;  %v8294_v2 = vld [vmem:[#allocation16_spill] sm:$0xff] }
 0x318   :  { %v3389_v48 = vmul.f32 %v8291_v60, %v8291_v60 }
 0x319   :  { %v3125_v63 = vadd.f32 %v3124_v23, %v8289_v41  ;;  %v3641_v1 = vadd.f32 %v3640_v57, %v3386_v22  ;;  %v1432_v31 = vpack.c.bf16 %v1301_v21, %v1300_v51 }
 0x31a   :  { %v7502_v13 = vpop.f32.mrf.mxu2 }
 0x31b   :  { %v3126_v26 = vadd.f32 %v3125_v63, %v8290_v44  ;;  %v3642_v53 = vadd.f32 %v3641_v1, %v3387_v29  ;;  %v4875_v57 = vpack.c.bf16 %v7502_v13, %v7481_v42  ;;  %v3391_v44 = vmul.f32 %v8294_v2, %v8294_v2 }
 0x31c   :  { %v7511_v41 = vpop.f32.mrf.mxu3 }
 0x31d   :  { %v3127_v23 = vadd.f32 %v3126_v26, %v8291_v60  ;;  %v3643_v22 = vadd.f32 %v3642_v53, %v3388_v3  ;;  %8293 = vst [vmem:[#allocation36_spill] sm:$0xff] %v7511_v41  ;;  %v4995_v1 = vpack.c.bf16 %v7511_v41, %v7489_v20  ;;  %v8295_v53 = vld [vmem:[#allocation17_spill] sm:$0xff]  ;;  %v8299_v41 = vld [vmem:[#allocation23_spill] sm:$0xff] }
 0x31e   :  { %5274 = vst [vmem:[%s8034_s4 + $0x2d8] sm:$0xff] %v4875_v57   ;;  %v3392_v60 = vmul.f32 %v8295_v53, %v8295_v53  ;;  %v5181_v57 = vld [vmem:[%s8031_s0 + $0x3e8] sm:$0xff]   ;;  %v3395_v20 = vmul.f32 %v8299_v41, %v8299_v41 }
 0x31f   :  { %v3128_v29 = vadd.f32 %v3127_v23, %v8292_v46  ;;  %v3644_v63 = vadd.f32 %v3643_v22, %v3389_v48  ;;  %5298 = vst [vmem:[%s8034_s4 + $0x398] sm:$0xff] %v4995_v1   ;;  %v8296_v22 = vld [vmem:[#allocation18_spill] sm:$0xff]  ;;  %v8297_v1 = vld [vmem:[#allocation20_spill] sm:$0xff] }
 0x320   :  { %v3393_v51 = vmul.f32 %v8296_v22, %v8296_v22 }
 0x321   :  { %v3129_v3 = vadd.f32 %v3128_v29, %v8294_v2  ;;  %v3645_v26 = vadd.f32 %v3644_v63, %v3390_v10  ;;  %3901 = vmatmul.msk.bf16.gmra.mxu3 %vm1442_vm0, %v1432_v31  ;;  %v4407_v29 = vunpack.c.l.bf16 %v5181_v57  ;;  %v4408_v63 = vunpack.c.h.bf16 %v5181_v57  ;;  %v8300_v57 = vld [vmem:[#allocation26_spill] sm:$0xff] }
 0x322   :  { %v7531_v21 = vpop.f32.mrf.mxu2  ;;  %v3394_v2 = vmul.f32 %v8297_v1, %v8297_v1  ;;  %v3396_v47 = vmul.f32 %v8300_v57, %v8300_v57 }
 0x323   :  { %v3130_v48 = vadd.f32 %v3129_v3, %v8295_v53  ;;  %v3646_v23 = vadd.f32 %v3645_v26, %v3391_v44  ;;  %v786_v26 = vmul.f32 %v7335_v7, %v4407_v29  ;;  %v787_v53 = vmul.f32 %v7335_v7, %v4408_v63 }
 0x324   :  { %v7539_v44 = vpop.f32.mrf.mxu3 }
 0x325   :  { %v3131_v46 = vadd.f32 %v3130_v48, %v8296_v22  ;;  %v3647_v10 = vadd.f32 %v3646_v23, %v3392_v60  ;;  %8298 = vst [vmem:[#allocation39_spill] sm:$0xff] %v7539_v44  ;;  %v1046_v23 = vadd.f32 %v7345_v58, %v786_v26  ;;  %v1047_v22 = vadd.f32 %v7345_v58, %v787_v53 }
 0x327   :  { %v3132_v31 = vadd.f32 %v3131_v46, %v8297_v1  ;;  %v3648_v3 = vadd.f32 %v3647_v10, %v3393_v51  ;;  %v1302_v29 = vmax.f32 %v1046_v23, 0.0  ;;  %v1303_v63 = vmax.f32 %v1047_v22, 0.0  ;;  %v8301_v1 = vld [vmem:[#allocation29_spill] sm:$0xff] }
 0x328   :  { %v3397_v38 = vmul.f32 %v8301_v1, %v8301_v1 }
 0x329   :  { %v3133_v48 = vadd.f32 %v3132_v31, %v8299_v41  ;;  %v3649_v60 = vadd.f32 %v3648_v3, %v3394_v2  ;;  %v8302_v3 = vld [vmem:[#allocation32_spill] sm:$0xff]  ;;  %v1433_v23 = vpack.c.bf16 %v1303_v63, %v1302_v29 }
 0x32a   :  { %v7552_v10 = vpop.f32.mrf.mxu2  ;;  %v3398_v26 = vmul.f32 %v8302_v3, %v8302_v3 }
 0x32b   :  { %v3134_v46 = vadd.f32 %v3133_v48, %v8300_v57  ;;  %v3650_v51 = vadd.f32 %v3649_v60, %v3395_v20  ;;  %v4880_v31 = vpack.c.bf16 %v7552_v10, %v7531_v21 }
 0x32c   :  { %v7561_v53 = vpop.f32.mrf.mxu3 }
 0x32d   :  { %v3135_v41 = vadd.f32 %v3134_v46, %v8301_v1  ;;  %v3651_v2 = vadd.f32 %v3650_v51, %v3396_v47  ;;  %8303 = vst [vmem:[#allocation42_spill] sm:$0xff] %v7561_v53  ;;  %v5000_v60 = vpack.c.bf16 %v7561_v53, %v7539_v44  ;;  %v8304_v47 = vld [vmem:[#allocation35_spill] sm:$0xff]  ;;  %v8305_v51 = vld [vmem:[#allocation38_spill] sm:$0xff] }
 0x32e   :  { %5275 = vst [vmem:[%s8034_s4 + $0x2e0] sm:$0xff] %v4880_v31   ;;  %v3399_v22 = vmul.f32 %v8304_v47, %v8304_v47  ;;  %v5182_v31 = vld [vmem:[%s8031_s0 + $0x3f0] sm:$0xff]   ;;  %v8308_v53 = vld [vmem:[#allocation47_spill] sm:$0xff] }
 0x32f   :  { %v3136_v20 = vadd.f32 %v3135_v41, %v8302_v3  ;;  %v3652_v48 = vadd.f32 %v3651_v2, %v3397_v38  ;;  %5299 = vst [vmem:[%s8034_s4 + $0x3a0] sm:$0xff] %v5000_v60   ;;  %v3400_v38 = vmul.f32 %v8305_v51, %v8305_v51  ;;  %v8306_v2 = vld [vmem:[#allocation41_spill] sm:$0xff]  ;;  %v8307_v60 = vld [vmem:[#allocation44_spill] sm:$0xff]  ;;  %v3403_v44 = vmul.f32 %v8308_v53, %v8308_v53 }
 0x330   :  { %v3401_v29 = vmul.f32 %v8306_v2, %v8306_v2 }
 0x331   :  { %v3137_v57 = vadd.f32 %v3136_v20, %v8304_v47  ;;  %v3653_v46 = vadd.f32 %v3652_v48, %v3398_v26  ;;  %3902 = vmatmul.msk.bf16.gmra.mxu3 %vm1442_vm0, %v1433_v23  ;;  %v4411_v20 = vunpack.c.l.bf16 %v5182_v31  ;;  %v4412_v48 = vunpack.c.h.bf16 %v5182_v31  ;;  %v8309_v31 = vld [vmem:[#allocation50_spill] sm:$0xff] }
 0x332   :  { %v7581_v63 = vpop.f32.mrf.mxu2  ;;  %v3402_v47 = vmul.f32 %v8307_v60, %v8307_v60  ;;  %v3404_v12 = vmul.f32 %v8309_v31, %v8309_v31 }
 0x333   :  { %v3138_v1 = vadd.f32 %v3137_v57, %v8305_v51  ;;  %v3654_v41 = vadd.f32 %v3653_v46, %v3399_v22  ;;  %v788_v46 = vmul.f32 %v7335_v7, %v4411_v20  ;;  %v789_v51 = vmul.f32 %v7335_v7, %v4412_v48 }
 0x334   :  { %v7589_v22 = vpop.f32.mrf.mxu3 }
 0x335   :  { %v3655_v3 = vadd.f32 %v3654_v41, %v3400_v38  ;;  %v3139_v26 = vadd.f32 %v3138_v1, %v8306_v2  ;;  %v1048_v41 = vadd.f32 %v7345_v58, %v788_v46  ;;  %v1049_v2 = vadd.f32 %v7345_v58, %v789_v51 }
 0x337   :  { %v3140_v23 = vadd.f32 %v3139_v26, %v8307_v60  ;;  %v3656_v57 = vadd.f32 %v3655_v3, %v3401_v29  ;;  %v1304_v20 = vmax.f32 %v1048_v41, 0.0  ;;  %v1305_v48 = vmax.f32 %v1049_v2, 0.0  ;;  %v8310_v60 = vld [vmem:[#allocation53_spill] sm:$0xff] }
 0x338   :  { %v3405_v33 = vmul.f32 %v8310_v60, %v8310_v60 }
 0x339   :  { %v3141_v38 = vadd.f32 %v3140_v23, %v8308_v53  ;;  %v3657_v1 = vadd.f32 %v3656_v57, %v3402_v47  ;;  %v8311_v57 = vld [vmem:[#allocation56_spill] sm:$0xff]  ;;  %v1434_v41 = vpack.c.bf16 %v1305_v48, %v1304_v20 }
 0x33a   :  { %v7602_v3 = vpop.f32.mrf.mxu2  ;;  %v3406_v46 = vmul.f32 %v8311_v57, %v8311_v57 }
 0x33b   :  { %v3142_v26 = vadd.f32 %v3141_v38, %v8309_v31  ;;  %v3658_v29 = vadd.f32 %v3657_v1, %v3403_v44  ;;  %v4885_v23 = vpack.c.bf16 %v7602_v3, %v7581_v63 }
 0x33c   :  { %v7611_v51 = vpop.f32.mrf.mxu3 }
 0x33d   :  { %v3143_v53 = vadd.f32 %v3142_v26, %v8310_v60  ;;  %v3659_v47 = vadd.f32 %v3658_v29, %v3404_v12  ;;  %8312 = vst [vmem:[#allocation45_spill] sm:$0xff] %v7611_v51  ;;  %v5005_v1 = vpack.c.bf16 %v7611_v51, %v7589_v22  ;;  %v8313_v12 = vld [vmem:[#allocation59_spill] sm:$0xff]  ;;  %v8314_v29 = vld [vmem:[#allocation62_spill] sm:$0xff]  ;;  %v3411_v51 = vmul.f32 %v6865_v25, %v6865_v25 }
 0x33e   :  { %5276 = vst [vmem:[%s8034_s4 + $0x2e8] sm:$0xff] %v4885_v23   ;;  %v3407_v2 = vmul.f32 %v8313_v12, %v8313_v12  ;;  %v5183_v23 = vld [vmem:[%s8031_s0 + $0x3f8] sm:$0xff]  }
 0x33f   :  { %v3144_v44 = vadd.f32 %v3143_v53, %v8311_v57  ;;  %v3660_v38 = vadd.f32 %v3659_v47, %v3405_v33  ;;  %5300 = vst [vmem:[%s8034_s4 + $0x3a8] sm:$0xff] %v5005_v1   ;;  %v3408_v33 = vmul.f32 %v8314_v29, %v8314_v29  ;;  %v8315_v47 = vld [vmem:[#allocation65_spill] sm:$0xff]  ;;  %v8316_v1 = vld [vmem:[#allocation67_spill] sm:$0xff] }
 0x340   :  { %v3409_v20 = vmul.f32 %v8315_v47, %v8315_v47 }
 0x341   :  { %v3145_v31 = vadd.f32 %v3144_v44, %v8313_v12  ;;  %v3661_v26 = vadd.f32 %v3660_v38, %v3406_v46  ;;  %3903 = vmatmul.msk.bf16.gmra.mxu3 %vm1442_vm0, %v1434_v41  ;;  %v4415_v44 = vunpack.c.l.bf16 %v5183_v23  ;;  %v4416_v38 = vunpack.c.h.bf16 %v5183_v23 }
 0x342   :  { %v7631_v48 = vpop.f32.mrf.mxu2  ;;  %v3410_v12 = vmul.f32 %v8316_v1, %v8316_v1  ;;  %v3412_v23 = vmul.f32 %v6898_v24, %v6898_v24 }
 0x343   :  { %v3146_v60 = vadd.f32 %v3145_v31, %v8314_v29  ;;  %v3662_v53 = vadd.f32 %v3661_v26, %v3407_v2  ;;  %v790_v26 = vmul.f32 %v7335_v7, %v4415_v44  ;;  %v791_v29 = vmul.f32 %v7335_v7, %v4416_v38 }
 0x344   :  { %v7639_v2 = vpop.f32.mrf.mxu3  ;;  %v3413_v38 = vmul.f32 %v6924_v16, %v6924_v16 }
 0x345   :  { %v3147_v57 = vadd.f32 %v3146_v60, %v8315_v47  ;;  %v3663_v46 = vadd.f32 %v3662_v53, %v3408_v33  ;;  %v1050_v53 = vadd.f32 %v7345_v58, %v790_v26  ;;  %v1051_v47 = vadd.f32 %v7345_v58, %v791_v29 }
 0x346   :  { %v3414_v58 = vmul.f32 %v6957_v4, %v6957_v4  ;;  %v3415_v26 = vmul.f32 %v6994_v37, %v6994_v37 }
 0x347   :  { %v3148_v41 = vadd.f32 %v3147_v57, %v8316_v1  ;;  %v3664_v31 = vadd.f32 %v3663_v46, %v3409_v20  ;;  %v1306_v44 = vmax.f32 %v1050_v53, 0.0  ;;  %v1307_v7 = vmax.f32 %v1051_v47, 0.0 }
 0x349   :  { %v3149_v60 = vadd.f32 %v3148_v41, %v6865_v25  ;;  %v3665_v33 = vadd.f32 %v3664_v31, %v3410_v12 }
 0x34a   :  { %v7652_v46 = vpop.f32.mrf.mxu2 }
 0x34b   :  { %v3150_v57 = vadd.f32 %v3149_v60, %v6898_v24  ;;  %v3666_v20 = vadd.f32 %v3665_v33, %v3411_v51  ;;  %v4890_v12 = vpack.c.bf16 %v7652_v46, %v7631_v48 }
 0x34c   :  { %v7661_v41 = vpop.f32.mrf.mxu3 }
 0x34d   :  { %v3151_v25 = vadd.f32 %v3150_v57, %v6924_v16  ;;  %v3667_v1 = vadd.f32 %v3666_v20, %v3412_v23  ;;  %5277 = vst [vmem:[%s8034_s4 + $0x2f0] sm:$0xff] %v4890_v12   ;;  %v5010_v31 = vpack.c.bf16 %v7661_v41, %v7639_v2  ;;  %v1435_v16 = vpack.c.bf16 %v1307_v7, %v1306_v44 }
 0x34e   :  { %v3417_v23 = vmul.f32 %v7061_v59, %v7061_v59  ;;  %v3418_v44 = vmul.f32 %v7091_v6, %v7091_v6  ;;  %v3420_v12 = vmul.f32 %v7158_v50, %v7158_v50 }
 0x34f   :  { %v3152_v24 = vadd.f32 %v3151_v25, %v6957_v4  ;;  %v3668_v51 = vadd.f32 %v3667_v1, %v3413_v38  ;;  %5301 = vst [vmem:[%s8034_s4 + $0x3b0] sm:$0xff] %v5010_v31   ;;  %v3416_v4 = vmul.f32 %v7024_v32, %v7024_v32 }
 0x351   :  { %v3153_v29 = vadd.f32 %v3152_v24, %v6994_v37  ;;  %v3669_v60 = vadd.f32 %v3668_v51, %v3414_v58  ;;  %3904 = vmatmul.msk.bf16.gmra.mxu3 %vm1442_vm0, %v1435_v16  ;;  %v3421_v51 = vmul.f32 %v7195_v18, %v7195_v18 }
 0x352   :  { %v7679_v47 = vpop.f32.mrf.mxu2 }
 0x353   :  { %v3154_v33 = vadd.f32 %v3153_v29, %v7024_v32  ;;  %v3670_v53 = vadd.f32 %v3669_v60, %v3415_v26  ;;  %v3419_v32 = vmul.f32 %v7128_v45, %v7128_v45 }
 0x354   :  { %v7684_v20 = vpop.f32.mrf.mxu3 }
 0x355   :  { %v3155_v37 = vadd.f32 %v3154_v33, %v7061_v59  ;;  %v3671_v57 = vadd.f32 %v3670_v53, %v3416_v4  ;;  %v3424_v53 = vmul.f32 %v7285_v11, %v7285_v11 }
 0x357   :  { %v3156_v7 = vadd.f32 %v3155_v37, %v7091_v6  ;;  %v3672_v38 = vadd.f32 %v3671_v57, %v3417_v23 }
 0x359   :  { %v3157_v25 = vadd.f32 %v3156_v7, %v7128_v45  ;;  %v3673_v1 = vadd.f32 %v3672_v38, %v3418_v44  ;;  %v3422_v45 = vmul.f32 %v7225_v62, %v7225_v62  ;;  %v3425_v44 = vmul.f32 %v7321_v36, %v7321_v36 }
 0x35a   :  { %v7695_v24 = vpop.f32.mrf.mxu2 }
 0x35b   :  { %v3158_v59 = vadd.f32 %v3157_v25, %v7158_v50  ;;  %v3674_v58 = vadd.f32 %v3673_v1, %v3419_v32  ;;  %v4895_v16 = vpack.c.bf16 %v7695_v24, %v7679_v47  ;;  %v3426_v32 = vmul.f32 %v7352_v15, %v7352_v15 }
 0x35c   :  { %v7702_v26 = vpop.f32.mrf.mxu3 }
 0x35d   :  { %v3159_v6 = vadd.f32 %v3158_v59, %v7195_v18  ;;  %v3675_v31 = vadd.f32 %v3674_v58, %v3420_v12  ;;  %5278 = vst [vmem:[%s8034_s4 + $0x2f8] sm:$0xff] %v4895_v16   ;;  %v5015_v60 = vpack.c.bf16 %v7702_v26, %v7684_v20  ;;  %v3423_v18 = vmul.f32 %v7262_v56, %v7262_v56 }
 0x35f   :  { %v3160_v29 = vadd.f32 %v3159_v6, %v7225_v62  ;;  %v3676_v50 = vadd.f32 %v3675_v31, %v3421_v51  ;;  %5302 = vst [vmem:[%s8034_s4 + $0x3b8] sm:$0xff] %v5015_v60   ;;  %v3429_v6 = vmul.f32 %v7431_v35, %v7431_v35 }
 0x361   :  { %v3161_v4 = vadd.f32 %v3160_v29, %v7262_v56  ;;  %v3677_v33 = vadd.f32 %v3676_v50, %v3422_v45  ;;  %v3431_v50 = vmul.f32 %v7481_v42, %v7481_v42 }
 0x363   :  { %v3162_v62 = vadd.f32 %v3161_v4, %v7285_v11  ;;  %v3678_v23 = vadd.f32 %v3677_v33, %v3423_v18  ;;  %v3427_v11 = vmul.f32 %v7381_v0, %v7381_v0  ;;  %v3432_v18 = vmul.f32 %v7502_v13, %v7502_v13 }
 0x364   :  { %v7724_v7 = vpop.f32.mrf.mxu3  ;;  %v3433_v33 = vmul.f32 %v7531_v21, %v7531_v21 }
 0x365   :  { %v3679_v37 = vadd.f32 %v3678_v23, %v3424_v53  ;;  %v3163_v57 = vadd.f32 %v3162_v62, %v7321_v36  ;;  %v3428_v36 = vmul.f32 %v7402_v17, %v7402_v17  ;;  %v3434_v23 = vmul.f32 %v7552_v10, %v7552_v10 }
 0x367   :  { %v3680_v56 = vadd.f32 %v3679_v37, %v3425_v44  ;;  %v3164_v38 = vadd.f32 %v3163_v57, %v7352_v15 }
 0x369   :  { %v3681_v25 = vadd.f32 %v3680_v56, %v3426_v32  ;;  %v3165_v1 = vadd.f32 %v3164_v38, %v7381_v0  ;;  %v3430_v0 = vmul.f32 %v7452_v39, %v7452_v39 }
 0x36b   :  { %v3682_v12 = vadd.f32 %v3681_v25, %v3427_v11  ;;  %v3166_v59 = vadd.f32 %v3165_v1, %v7402_v17  ;;  %v3437_v25 = vmul.f32 %v7631_v48, %v7631_v48 }
 0x36c   :  { %v7738_v31 = vpop.f32.mrf.mxu3 }
 0x36d   :  { %v3683_v58 = vadd.f32 %v3682_v12, %v3428_v36  ;;  %v3167_v51 = vadd.f32 %v3166_v59, %v7431_v35  ;;  %v5020_v45 = vpack.c.bf16 %v7738_v31, %v7724_v7  ;;  %v3439_v36 = vmul.f32 %v7679_v47, %v7679_v47 }
 0x36f   :  { %v3684_v15 = vadd.f32 %v3683_v58, %v3429_v6  ;;  %v3168_v16 = vadd.f32 %v3167_v51, %v7452_v39  ;;  %5303 = vst [vmem:[%s8034_s4 + $0x3c0] sm:$0xff] %v5020_v45   ;;  %v3440_v51 = vmul.f32 %v7695_v24, %v7695_v24  ;;  %v8318_v45 = vld [vmem:[#allocation22_spill] sm:$0xff] }
 0x371   :  { %v3685_v29 = vadd.f32 %v3684_v15, %v3430_v0  ;;  %v3169_v17 = vadd.f32 %v3168_v16, %v7481_v42 }
 0x373   :  { %v3686_v35 = vadd.f32 %v3685_v29, %v3431_v50  ;;  %v3170_v60 = vadd.f32 %v3169_v17, %v7502_v13  ;;  %v3435_v13 = vmul.f32 %v7581_v63, %v7581_v63  ;;  %v8319_v50 = vld [vmem:[#allocation25_spill] sm:$0xff] }
 0x374   :  { %v7757_v62 = vpop.f32.mrf.mxu3 }
 0x375   :  { %v3687_v39 = vadd.f32 %v3686_v35, %v3432_v18  ;;  %v3171_v4 = vadd.f32 %v3170_v60, %v7531_v21  ;;  %v3436_v21 = vmul.f32 %v7602_v3, %v7602_v3  ;;  %v3443_v35 = vmul.f32 %v8319_v50, %v8319_v50  ;;  %v8320_v18 = vld [vmem:[#allocation28_spill] sm:$0xff] }
 0x377   :  { %v3688_v53 = vadd.f32 %v3687_v39, %v3433_v33  ;;  %v3172_v42 = vadd.f32 %v3171_v4, %v7552_v10  ;;  %v3444_v39 = vmul.f32 %v8320_v18, %v8320_v18 }
 0x379   :  { %v3689_v37 = vadd.f32 %v3688_v53, %v3434_v23  ;;  %v3173_v57 = vadd.f32 %v3172_v42, %v7581_v63  ;;  %v3438_v63 = vmul.f32 %v7652_v46, %v7652_v46  ;;  %v8321_v53 = vld [vmem:[#allocation31_spill] sm:$0xff] }
 0x37a   :  { %v3445_v42 = vmul.f32 %v8321_v53, %v8321_v53 }
 0x37b   :  { %v3690_v44 = vadd.f32 %v3689_v37, %v3435_v13  ;;  %v3174_v56 = vadd.f32 %v3173_v57, %v7602_v3  ;;  %v8322_v13 = vld [vmem:[#allocation34_spill] sm:$0xff] }
 0x37c   :  { %v7771_v1 = vpop.f32.mrf.mxu3 }
 0x37d   :  { %v3691_v38 = vadd.f32 %v3690_v44, %v3436_v21  ;;  %v3175_v32 = vadd.f32 %v3174_v56, %v7631_v48  ;;  %v5025_v12 = vpack.c.bf16 %v7771_v1, %v7757_v62  ;;  %v3446_v44 = vmul.f32 %v8322_v13, %v8322_v13 }
 0x37f   :  { %v3692_v10 = vadd.f32 %v3691_v38, %v3437_v25  ;;  %v3176_v11 = vadd.f32 %v3175_v32, %v7652_v46  ;;  %5304 = vst [vmem:[%s8034_s4 + $0x3c8] sm:$0xff] %v5025_v12   ;;  %v8317_v46 = vld [vmem:[#allocation19_spill] sm:$0xff]  ;;  %v8323_v32 = vld [vmem:[#allocation37_spill] sm:$0xff] }
 0x380   :  { %v3441_v6 = vmul.f32 %v8317_v46, %v8317_v46  ;;  %v3447_v25 = vmul.f32 %v8323_v32, %v8323_v32 }
 0x381   :  { %v3693_v59 = vadd.f32 %v3692_v10, %v3438_v63  ;;  %v3177_v3 = vadd.f32 %v3176_v11, %v7679_v47  ;;  %v3442_v47 = vmul.f32 %v8318_v45, %v8318_v45  ;;  %v8324_v63 = vld [vmem:[#allocation40_spill] sm:$0xff] }
 0x382   :  { %v3448_v12 = vmul.f32 %v8324_v63, %v8324_v63 }
 0x383   :  { %v3694_v48 = vadd.f32 %v3693_v59, %v3439_v36  ;;  %v3178_v58 = vadd.f32 %v3177_v3, %v7695_v24  ;;  %v8325_v36 = vld [vmem:[#allocation43_spill] sm:$0xff] }
 0x384   :  { %v7790_v0 = vpop.f32.mrf.mxu3 }
 0x385   :  { %v3179_v15 = vadd.f32 %v3178_v58, %v8317_v46  ;;  %v3695_v16 = vadd.f32 %v3694_v48, %v3440_v51  ;;  %v3449_v48 = vmul.f32 %v8325_v36, %v8325_v36 }
 0x387   :  { %v3180_v29 = vadd.f32 %v3179_v15, %v8318_v45  ;;  %v3696_v17 = vadd.f32 %v3695_v16, %v3441_v6  ;;  %v8326_v6 = vld [vmem:[#allocation46_spill] sm:$0xff] }
 0x388   :  { %v3450_v15 = vmul.f32 %v8326_v6, %v8326_v6 }
 0x389   :  { %v3181_v60 = vadd.f32 %v3180_v29, %v8319_v50  ;;  %v3697_v24 = vadd.f32 %v3696_v17, %v3442_v47  ;;  %v8327_v47 = vld [vmem:[#allocation49_spill] sm:$0xff] }
 0x38a   :  { %v3451_v29 = vmul.f32 %v8327_v47, %v8327_v47 }
 0x38b   :  { %v3182_v4 = vadd.f32 %v3181_v60, %v8320_v18  ;;  %v3698_v33 = vadd.f32 %v3697_v24, %v3443_v35  ;;  %v8328_v35 = vld [vmem:[#allocation52_spill] sm:$0xff] }
 0x38c   :  { %v7804_v57 = vpop.f32.mrf.mxu3  ;;  %v3452_v60 = vmul.f32 %v8328_v35, %v8328_v35 }
 0x38d   :  { %v3183_v23 = vadd.f32 %v3182_v4, %v8321_v53  ;;  %v3699_v37 = vadd.f32 %v3698_v33, %v3444_v39  ;;  %v5030_v38 = vpack.c.bf16 %v7804_v57, %v7790_v0  ;;  %v8329_v39 = vld [vmem:[#allocation55_spill] sm:$0xff] }
 0x38e   :  { %v3453_v4 = vmul.f32 %v8329_v39, %v8329_v39 }
 0x38f   :  { %v3184_v56 = vadd.f32 %v3183_v23, %v8322_v13  ;;  %v3700_v21 = vadd.f32 %v3699_v37, %v3445_v42  ;;  %5305 = vst [vmem:[%s8034_s4 + $0x3d0] sm:$0xff] %v5030_v38   ;;  %v8330_v23 = vld [vmem:[#allocation58_spill] sm:$0xff] }
 0x390   :  { %v3454_v37 = vmul.f32 %v8330_v23, %v8330_v23 }
 0x391   :  { %v3185_v10 = vadd.f32 %v3184_v56, %v8323_v32  ;;  %v3701_v11 = vadd.f32 %v3700_v21, %v3446_v44  ;;  %v8331_v21 = vld [vmem:[#allocation61_spill] sm:$0xff] }
 0x392   :  { %v3455_v38 = vmul.f32 %v8331_v21, %v8331_v21 }
 0x393   :  { %v3186_v59 = vadd.f32 %v3185_v10, %v8324_v63  ;;  %v3702_v3 = vadd.f32 %v3701_v11, %v3447_v25  ;;  %v8332_v10 = vld [vmem:[#allocation64_spill] sm:$0xff] }
 0x394   :  { %v7823_v46 = vpop.f32.mrf.mxu3  ;;  %v3456_v11 = vmul.f32 %v8332_v10, %v8332_v10 }
 0x395   :  { %v3187_v58 = vadd.f32 %v3186_v59, %v8325_v36  ;;  %v3703_v51 = vadd.f32 %v3702_v3, %v3448_v12  ;;  %v8333_v59 = vld [vmem:[#allocation66_spill] sm:$0xff] }
 0x396   :  { %v3457_v3 = vmul.f32 %v8333_v59, %v8333_v59 }
 0x397   :  { %v3188_v16 = vadd.f32 %v3187_v58, %v8326_v6  ;;  %v3704_v45 = vadd.f32 %v3703_v51, %v3449_v48  ;;  %v8334_v51 = vld [vmem:[#allocation69_spill] sm:$0xff] }
 0x398   :  { %v3458_v6 = vmul.f32 %v8334_v51, %v8334_v51 }
 0x399   :  { %v3189_v17 = vadd.f32 %v3188_v16, %v8327_v47  ;;  %v3705_v50 = vadd.f32 %v3704_v45, %v3450_v15  ;;  %v3459_v45 = vmul.f32 %v6881_v61, %v6881_v61 }
 0x39b   :  { %v3190_v24 = vadd.f32 %v3189_v17, %v8328_v35  ;;  %v3706_v18 = vadd.f32 %v3705_v50, %v3451_v29  ;;  %v3460_v17 = vmul.f32 %v6907_v40, %v6907_v40 }
 0x39c   :  { %v7837_v42 = vpop.f32.mrf.mxu3 }
 0x39d   :  { %v3191_v33 = vadd.f32 %v3190_v24, %v8329_v39  ;;  %v3707_v53 = vadd.f32 %v3706_v18, %v3452_v60  ;;  %v5035_v56 = vpack.c.bf16 %v7837_v42, %v7823_v46  ;;  %v3461_v60 = vmul.f32 %v6940_v8, %v6940_v8 }
 0x39f   :  { %v3192_v13 = vadd.f32 %v3191_v33, %v8330_v23  ;;  %v3708_v44 = vadd.f32 %v3707_v53, %v3453_v4  ;;  %5306 = vst [vmem:[%s8034_s4 + $0x3d8] sm:$0xff] %v5035_v56   ;;  %v3462_v4 = vmul.f32 %v6968_v27, %v6968_v27 }
 0x3a1   :  { %v3193_v32 = vadd.f32 %v3192_v13, %v8331_v21  ;;  %v3709_v25 = vadd.f32 %v3708_v44, %v3454_v37  ;;  %v3465_v44 = vmul.f32 %v7074_v52, %v7074_v52 }
 0x3a3   :  { %v3194_v63 = vadd.f32 %v3193_v32, %v8332_v10  ;;  %v3710_v12 = vadd.f32 %v3709_v25, %v3455_v38  ;;  %v3467_v10 = vmul.f32 %v7141_v49, %v7141_v49 }
 0x3a4   :  { %v7856_v58 = vpop.f32.mrf.mxu3 }
 0x3a5   :  { %v3195_v36 = vadd.f32 %v3194_v63, %v8333_v59  ;;  %v3711_v48 = vadd.f32 %v3710_v12, %v3456_v11  ;;  %v3468_v63 = vmul.f32 %v7169_v34, %v7169_v34  ;;  %v3469_v59 = vmul.f32 %v7208_v5, %v7208_v5 }
 0x3a7   :  { %v3196_v15 = vadd.f32 %v3195_v36, %v8334_v51  ;;  %v3712_v16 = vadd.f32 %v3711_v48, %v3457_v3  ;;  %v3470_v48 = vmul.f32 %v7236_v43, %v7236_v43 }
 0x3a9   :  { %v3197_v47 = vadd.f32 %v3196_v15, %v6881_v61  ;;  %v3713_v29 = vadd.f32 %v3712_v16, %v3458_v6 }
 0x3ab   :  { %v3198_v50 = vadd.f32 %v3197_v47, %v6907_v40  ;;  %v3714_v35 = vadd.f32 %v3713_v29, %v3459_v45  ;;  %v3463_v40 = vmul.f32 %v7007_v54, %v7007_v54  ;;  %v3473_v47 = vmul.f32 %v7329_v9, %v7329_v9 }
 0x3ac   :  { %v7870_v39 = vpop.f32.mrf.mxu3 }
 0x3ad   :  { %v3199_v24 = vadd.f32 %v3198_v50, %v6940_v8  ;;  %v3715_v18 = vadd.f32 %v3714_v35, %v3460_v17  ;;  %v5040_v53 = vpack.c.bf16 %v7870_v39, %v7856_v58  ;;  %v3464_v8 = vmul.f32 %v7035_v30, %v7035_v30 }
 0x3af   :  { %v3200_v61 = vadd.f32 %v3199_v24, %v6968_v27  ;;  %v3716_v33 = vadd.f32 %v3715_v18, %v3461_v60  ;;  %5307 = vst [vmem:[%s8034_s4 + $0x3e0] sm:$0xff] %v5040_v53   ;;  %v8335_v24 = vld [vmem:[#allocation21_spill] sm:$0xff] }
 0x3b0   :  { %v3475_v18 = vmul.f32 %v8335_v24, %v8335_v24 }
 0x3b1   :  { %v3201_v23 = vadd.f32 %v3200_v61, %v7007_v54  ;;  %v3717_v37 = vadd.f32 %v3716_v33, %v3462_v4  ;;  %v3466_v54 = vmul.f32 %v7102_v55, %v7102_v55  ;;  %v8336_v61 = vld [vmem:[#allocation24_spill] sm:$0xff] }
 0x3b2   :  { %v3476_v33 = vmul.f32 %v8336_v61, %v8336_v61 }
 0x3b3   :  { %v3202_v13 = vadd.f32 %v3201_v23, %v7035_v30  ;;  %v3718_v27 = vadd.f32 %v3717_v37, %v3463_v40  ;;  %v8337_v40 = vld [vmem:[#allocation27_spill] sm:$0xff] }
 0x3b4   :  { %v7889_v38 = vpop.f32.mrf.mxu3  ;;  %v3477_v23 = vmul.f32 %v8337_v40, %v8337_v40 }
 0x3b5   :  { %v3719_v56 = vadd.f32 %v3718_v27, %v3464_v8  ;;  %v3203_v21 = vadd.f32 %v3202_v13, %v7074_v52  ;;  %v8338_v13 = vld [vmem:[#allocation30_spill] sm:$0xff] }
 0x3b6   :  { %v3478_v27 = vmul.f32 %v8338_v13, %v8338_v13 }
 0x3b7   :  { %v3204_v32 = vadd.f32 %v3203_v21, %v7102_v55  ;;  %v3720_v25 = vadd.f32 %v3719_v56, %v3465_v44 }
 0x3b9   :  { %v3205_v30 = vadd.f32 %v3204_v32, %v7141_v49  ;;  %v3721_v11 = vadd.f32 %v3720_v25, %v3466_v54  ;;  %v8339_v54 = vld [vmem:[#allocation33_spill] sm:$0xff] }
 0x3ba   :  { %v3479_v32 = vmul.f32 %v8339_v54, %v8339_v54 }
 0x3bb   :  { %v3206_v12 = vadd.f32 %v3205_v30, %v7169_v34  ;;  %v3722_v52 = vadd.f32 %v3721_v11, %v3467_v10  ;;  %v3471_v34 = vmul.f32 %v7272_v28, %v7272_v28  ;;  %v8340_v30 = vld [vmem:[#allocation36_spill] sm:$0xff] }
 0x3bc   :  { %v7903_v55 = vpop.f32.mrf.mxu3  ;;  %v3480_v11 = vmul.f32 %v8340_v30, %v8340_v30 }
 0x3bd   :  { %v3207_v3 = vadd.f32 %v3206_v12, %v7208_v5  ;;  %v3723_v36 = vadd.f32 %v3722_v52, %v3468_v63  ;;  %v5045_v6 = vpack.c.bf16 %v7903_v55, %v7889_v38  ;;  %v3472_v5 = vmul.f32 %v7298_v19, %v7298_v19  ;;  %v8341_v52 = vld [vmem:[#allocation39_spill] sm:$0xff] }
 0x3bf   :  { %v3208_v49 = vadd.f32 %v3207_v3, %v7236_v43  ;;  %v3724_v51 = vadd.f32 %v3723_v36, %v3469_v59  ;;  %5308 = vst [vmem:[%s8034_s4 + $0x3e8] sm:$0xff] %v5045_v6   ;;  %v3481_v59 = vmul.f32 %v8341_v52, %v8341_v52 }
 0x3c1   :  { %v3209_v15 = vadd.f32 %v3208_v49, %v7272_v28  ;;  %v3725_v16 = vadd.f32 %v3724_v51, %v3470_v48  ;;  %v3474_v28 = vmul.f32 %v7361_v14, %v7361_v14  ;;  %v8342_v49 = vld [vmem:[#allocation42_spill] sm:$0xff] }
 0x3c2   :  { %v3482_v51 = vmul.f32 %v8342_v49, %v8342_v49 }
 0x3c3   :  { %v3210_v45 = vadd.f32 %v3209_v15, %v7298_v19  ;;  %v3726_v43 = vadd.f32 %v3725_v16, %v3471_v34  ;;  %v3483_v15 = vmul.f32 %v7589_v22, %v7589_v22 }
 0x3c4   :  { %v7922_v50 = vpop.f32.mrf.mxu3 }
 0x3c5   :  { %v3211_v29 = vadd.f32 %v3210_v45, %v7329_v9  ;;  %v3727_v17 = vadd.f32 %v3726_v43, %v3472_v5  ;;  %v8343_v45 = vld [vmem:[#allocation45_spill] sm:$0xff] }
 0x3c6   :  { %v3484_v43 = vmul.f32 %v8343_v45, %v8343_v45 }
 0x3c7   :  { %v3212_v35 = vadd.f32 %v3211_v29, %v7361_v14  ;;  %v3728_v60 = vadd.f32 %v3727_v17, %v3473_v47  ;;  %v3485_v17 = vmul.f32 %v7639_v2, %v7639_v2 }
 0x3c9   :  { %v3213_v19 = vadd.f32 %v3212_v35, %v8335_v24  ;;  %v3729_v4 = vadd.f32 %v3728_v60, %v3474_v28  ;;  %v3486_v24 = vmul.f32 %v7661_v41, %v7661_v41 }
 0x3cb   :  { %v3214_v9 = vadd.f32 %v3213_v19, %v8336_v61  ;;  %v3730_v53 = vadd.f32 %v3729_v4, %v3475_v18  ;;  %v3487_v4 = vmul.f32 %v7684_v20, %v7684_v20 }
 0x3cc   :  { %v7936_v14 = vpop.f32.mrf.mxu3 }
 0x3cd   :  { %v3215_v37 = vadd.f32 %v3214_v9, %v8337_v40  ;;  %v3731_v8 = vadd.f32 %v3730_v53, %v3476_v33  ;;  %v5050_v21 = vpack.c.bf16 %v7936_v14, %v7922_v50  ;;  %v3488_v9 = vmul.f32 %v7702_v26, %v7702_v26 }
 0x3cf   :  { %v3216_v44 = vadd.f32 %v3215_v37, %v8338_v13  ;;  %v3732_v56 = vadd.f32 %v3731_v8, %v3477_v23  ;;  %5309 = vst [vmem:[%s8034_s4 + $0x3f0] sm:$0xff] %v5050_v21   ;;  %v3489_v23 = vmul.f32 %v7724_v7, %v7724_v7  ;;  %v3490_v8 = vmul.f32 %v7738_v31, %v7738_v31 }
 0x3d0   :  { %v3492_v21 = vmul.f32 %v7771_v1, %v7771_v1 }
 0x3d1   :  { %v3217_v25 = vadd.f32 %v3216_v44, %v8339_v54  ;;  %v3733_v10 = vadd.f32 %v3732_v56, %v3478_v27  ;;  %v3491_v44 = vmul.f32 %v7757_v62, %v7757_v62 }
 0x3d3   :  { %v3218_v63 = vadd.f32 %v3217_v25, %v8340_v30  ;;  %v3734_v12 = vadd.f32 %v3733_v10, %v3479_v32  ;;  %v3493_v32 = vmul.f32 %v7790_v0, %v7790_v0  ;;  %v3494_v10 = vmul.f32 %v7804_v57, %v7804_v57 }
 0x3d4   :  { %v7955_v48 = vpop.f32.mrf.mxu3 }
 0x3d5   :  { %v3219_v3 = vadd.f32 %v3218_v63, %v8341_v52  ;;  %v3735_v36 = vadd.f32 %v3734_v12, %v3480_v11  ;;  %v3495_v11 = vmul.f32 %v7823_v46, %v7823_v46  ;;  %v3496_v12 = vmul.f32 %v7837_v42, %v7837_v42 }
 0x3d7   :  { %v3220_v6 = vadd.f32 %v3219_v3, %v8342_v49  ;;  %v3736_v34 = vadd.f32 %v3735_v36, %v3481_v59  ;;  %v3497_v59 = vmul.f32 %v7856_v58, %v7856_v58  ;;  %v3498_v36 = vmul.f32 %v7870_v39, %v7870_v39 }
 0x3d9   :  { %v3221_v16 = vadd.f32 %v3220_v6, %v7589_v22  ;;  %v3737_v5 = vadd.f32 %v3736_v34, %v3482_v51  ;;  %v3499_v51 = vmul.f32 %v7889_v38, %v7889_v38  ;;  %v3500_v34 = vmul.f32 %v7903_v55, %v7903_v55 }
 0x3db   :  { %v3222_v47 = vadd.f32 %v3221_v16, %v8343_v45  ;;  %v3738_v29 = vadd.f32 %v3737_v5, %v3483_v15  ;;  %v3501_v16 = vmul.f32 %v7922_v50, %v7922_v50  ;;  %v3502_v45 = vmul.f32 %v7936_v14, %v7936_v14 }
 0x3dc   :  { %v2473_v60 = vpop.f32.mrf.mxu3 }
 0x3dd   :  { %v3223_v28 = vadd.f32 %v3222_v47, %v7639_v2  ;;  %v3739_v35 = vadd.f32 %v3738_v29, %v3484_v43  ;;  %v5055_v19 = vpack.c.bf16 %v2473_v60, %v7955_v48  ;;  %v3503_v47 = vmul.f32 %v7955_v48, %v7955_v48 }
 0x3df   :  { %v3224_v18 = vadd.f32 %v3223_v28, %v7661_v41  ;;  %v3740_v22 = vadd.f32 %v3739_v35, %v3485_v17  ;;  %5310 = vst [vmem:[%s8034_s4 + $0x3f8] sm:$0xff] %v5055_v19   ;;  %v3504_v17 = vmul.f32 %v2473_v60, %v2473_v60 }
 0x3e1   :  { %v3225_v61 = vadd.f32 %v3224_v18, %v7684_v20  ;;  %v3741_v33 = vadd.f32 %v3740_v22, %v3486_v24 }
 0x3e3   :  { %v3226_v2 = vadd.f32 %v3225_v61, %v7702_v26  ;;  %v3742_v53 = vadd.f32 %v3741_v33, %v3487_v4 }
 0x3e5   :  { %v3743_v41 = vadd.f32 %v3742_v53, %v3488_v9  ;;  %v3227_v40 = vadd.f32 %v3226_v2, %v7724_v7 }
 0x3e7   :  { %v3744_v37 = vadd.f32 %v3743_v41, %v3489_v23  ;;  %v3228_v20 = vadd.f32 %v3227_v40, %v7738_v31 }
 0x3e9   :  { %v3745_v13 = vadd.f32 %v3744_v37, %v3490_v8  ;;  %v3229_v27 = vadd.f32 %v3228_v20, %v7757_v62 }
 0x3eb   :  { %v3746_v26 = vadd.f32 %v3745_v13, %v3491_v44  ;;  %v3230_v56 = vadd.f32 %v3229_v27, %v7771_v1 }
 0x3ed   :  { %v3747_v54 = vadd.f32 %v3746_v26, %v3492_v21  ;;  %v3231_v7 = vadd.f32 %v3230_v56, %v7790_v0 }
 0x3ef   :  { %v3748_v25 = vadd.f32 %v3747_v54, %v3493_v32  ;;  %v3232_v31 = vadd.f32 %v3231_v7, %v7804_v57 }
 0x3f1   :  { %v3749_v30 = vadd.f32 %v3748_v25, %v3494_v10  ;;  %v3233_v62 = vadd.f32 %v3232_v31, %v7823_v46 }
 0x3f3   :  { %v3750_v63 = vadd.f32 %v3749_v30, %v3495_v11  ;;  %v3234_v1 = vadd.f32 %v3233_v62, %v7837_v42 }
 0x3f5   :  { %v3751_v52 = vadd.f32 %v3750_v63, %v3496_v12  ;;  %v3235_v0 = vadd.f32 %v3234_v1, %v7856_v58 }
 0x3f7   :  { %v3752_v3 = vadd.f32 %v3751_v52, %v3497_v59  ;;  %v3236_v57 = vadd.f32 %v3235_v0, %v7870_v39 }
 0x3f9   :  { %v3753_v49 = vadd.f32 %v3752_v3, %v3498_v36  ;;  %v3237_v46 = vadd.f32 %v3236_v57, %v7889_v38 }
 0x3fb   :  { %v3754_v6 = vadd.f32 %v3753_v49, %v3499_v51  ;;  %v3238_v42 = vadd.f32 %v3237_v46, %v7903_v55 }
 0x3fd   :  { %v3755_v15 = vadd.f32 %v3754_v6, %v3500_v34  ;;  %v3239_v58 = vadd.f32 %v3238_v42, %v7922_v50 }
 0x3ff   :  { %v3756_v5 = vadd.f32 %v3755_v15, %v3501_v16  ;;  %v3240_v39 = vadd.f32 %v3239_v58, %v7936_v14 }
 0x401   :  { %v3757_v43 = vadd.f32 %v3756_v5, %v3502_v45  ;;  %v3241_v38 = vadd.f32 %v3240_v39, %v7955_v48 }
 0x403   :  { %v3758_v29 = vadd.f32 %v3757_v43, %v3503_v47  ;;  %v3242_v55 = vadd.f32 %v3241_v38, %v2473_v60 }
 0x405   :  { %v3243_v28 = vrot.slane %v3242_v55, 4  ;;  %v3759_v35 = vadd.f32 %v3758_v29, %v3504_v17 }
 0x407   :  { %v3244_v24 = vadd.f32 %v3243_v28, %v3242_v55  ;;  %v3760_v18 = vrot.slane %v3759_v35, 4 }
 0x409   :  { %v3245_v50 = vrot.slane %v3244_v24, 2  ;;  %v3761_v22 = vadd.f32 %v3760_v18, %v3759_v35 }
 0x40b   :  { %v3246_v19 = vadd.f32 %v3245_v50, %v3244_v24  ;;  %v3762_v4 = vrot.slane %v3761_v22, 2 }
 0x40d   :  { %v3247_v61 = vrot.slane %v3246_v19, 1  ;;  %v3763_v33 = vadd.f32 %v3762_v4, %v3761_v22 }
 0x40f   :  { %v3764_v14 = vrot.slane %v3763_v33, 1  ;;  %v3248_v2 = vadd.f32 %v3247_v61, %v3246_v19 }
 0x411   :  { %v3765_v9 = vadd.f32 %v3764_v14, %v3763_v33 }
 0x413   :  { %v3767_v53 = vsel %vm3766_vm1, %v3248_v2, %v3765_v9 }
 0x414   :  { %3768 = vst [vmem:[%s8035_s5] sm:$0x3] %v3767_v53 }

</bundles_post_ra>
